<compile_context>
chip_gen: v5e
topology: v5e:2x2
jax: 0.10.0
libtpu: 0.0.40
codegen_flags: <defaults>
</compile_context>

<pallas_src>
import numpy as np
import jax
import jax.numpy as jnp
from jax import lax
from jax.experimental import pallas as pl
from jax.experimental.pallas import tpu as pltpu

H = W = 4
P = H * W          # 16 spatial positions
C1 = 128           # conv1 output channels
C2 = 256           # conv2 output channels
FC1 = 256          # advantage hidden width
NOUT = 4           # advantage outputs


# ---------------------------------------------------------------------------
# Fused kernel: whole Net3 forward for one small batch, resident in VMEM.
# ---------------------------------------------------------------------------
def _net3_fused_kernel(cols1_ref, shift_ref, w1_ref, b1_ref,
                       w2_ref, b2_ref, wfc1_ref, bfc1_ref,
                       selp_ref, wfc2_ref, bfc2_ref, out_ref):
    # conv1 (1 -> 128, 3x3, pad 1) as a single im2col matmul + bias + ReLU.
    h1 = jnp.dot(cols1_ref[...], w1_ref[...],
                 preferred_element_type=jnp.float32)            # (R, 128)
    h1 = jnp.maximum(h1 + b1_ref[...], 0.0)

    # conv2 (128 -> 256, 3x3, pad 1): 9 shifted matmuls accumulated in f32.
    # shift_ref[t] is a constant (R, R) 0/1 matrix implementing the spatial
    # shift (with zero padding) of kernel tap t; w2_ref[t] is its (128, 256)
    # bf16 weight slab.
    acc2 = jnp.zeros((h1.shape[0], C2), jnp.float32)
    for tap in range(9):
        sh = jnp.dot(shift_ref[tap], h1,
                     preferred_element_type=jnp.float32)        # (R, 128)
        acc2 = acc2 + jnp.dot(sh.astype(jnp.bfloat16), w2_ref[tap],
                              preferred_element_type=jnp.float32)
    h2 = jnp.maximum(acc2 + b2_ref[...], 0.0)                   # (R, 256)

    # fc1 (Linear 4096 -> 256): PyTorch's NCHW flatten is folded into the
    # weights -- wfc1_ref[p] is the (256, 256) slab for spatial position p and
    # selp_ref[p] (B, R) picks activation row b*16+p, so no in-kernel
    # transpose / reshape of the activation is needed.
    nb = out_ref.shape[0]
    a1 = jnp.zeros((nb, FC1), jnp.float32)
    for p in range(P):
        rows_p = jnp.dot(selp_ref[p], h2,
                         preferred_element_type=jnp.float32)    # (B, 256)
        a1 = a1 + jnp.dot(rows_p.astype(jnp.bfloat16), wfc1_ref[p],
                          preferred_element_type=jnp.float32)
    # TODO(synk): nn.Dropout(0.5) is treated in eval mode (identity).
    a1 = jnp.maximum(a1 + bfc1_ref[...], 0.0)

    # fc2 (Linear 256 -> 4): the final (B, 4) result is the only HBM store.
    out = jnp.dot(a1, wfc2_ref[...], preferred_element_type=jnp.float32)
    out_ref[...] = (out + bfc2_ref[...]).astype(out_ref.dtype)


# ---------------------------------------------------------------------------
# Host-side constants / glue
# ---------------------------------------------------------------------------
def _shift_matrices(batch):
    """(9, R, R) 0/1 matrices with (SHIFT[t] @ h)[b*16+y*4+x] =
    h[b*16+(y+kh-1)*4+(x+kw-1)] when in range, else 0 (t = kh*3+kw)."""
    r = batch * P
    m = np.zeros((9, r, r), np.float32)
    for kh in range(3):
        for kw in range(3):
            t = kh * 3 + kw
            for b in range(batch):
                for y in range(H):
                    for x in range(W):
                        ys, xs = y + kh - 1, x + kw - 1
                        if 0 <= ys < H and 0 <= xs < W:
                            m[t, b * P + y * W + x, b * P + ys * W + xs] = 1.0
    return jnp.asarray(m)


def _spatial_selectors(batch):
    """(16, B, R) 0/1 matrices with (SELP[p] @ h)[b] = h[b*16 + p]."""
    r = batch * P
    s = np.zeros((P, batch, r), np.float32)
    for p in range(P):
        for b in range(batch):
            s[p, b, b * P + p] = 1.0
    return jnp.asarray(s)


def _im2col_1ch(x_nchw):
    """(B, 1, 4, 4) -> (B*16, 9) im2col for a 3x3/pad=1 conv (tiny, ~1 KB)."""
    b = x_nchw.shape[0]
    xp = jnp.pad(x_nchw, ((0, 0), (0, 0), (1, 1), (1, 1)))
    cols = [xp[:, 0, kh:kh + H, kw:kw + W]
            for kh in range(3) for kw in range(3)]
    return jnp.stack(cols, axis=-1).reshape(b * P, 9)


def _full_block(arr):
    ndim = arr.ndim
    return pl.BlockSpec(arr.shape, lambda: (0,) * ndim)


# ---------------------------------------------------------------------------
# Parameters (PyTorch layouts) and one-time repack into kernel layouts
# ---------------------------------------------------------------------------
def init_params(key):
    ks = jax.random.split(key, 8)

    def uni(k, shape, fan_in):
        bound = 1.0 / float(np.sqrt(fan_in))
        return jax.random.uniform(k, shape, jnp.float32, -bound, bound)

    return {
        "conv1_w": uni(ks[0], (C1, 1, 3, 3), 9),
        "conv1_b": uni(ks[1], (C1,), 9),
        "conv2_w": uni(ks[2], (C2, C1, 3, 3), 9 * C1),
        "conv2_b": uni(ks[3], (C2,), 9 * C1),
        "fc1_w": uni(ks[4], (FC1, C2 * P), C2 * P),
        "fc1_b": uni(ks[5], (FC1,), C2 * P),
        "fc2_w": uni(ks[6], (NOUT, FC1), FC1),
        "fc2_b": uni(ks[7], (NOUT,), FC1),
    }


def convert_params(pt):
    """PyTorch layouts -> layouts consumed by the fused kernel.
    Big weights (conv2, fc1) are stored in bfloat16."""
    w1 = pt["conv1_w"].reshape(C1, 9).T                                  # (9,128) [tap,co]
    w2 = jnp.transpose(pt["conv2_w"], (2, 3, 1, 0)).reshape(9, C1, C2)   # [tap,ci,co]
    # fc1 rows are in NCHW-flatten order (c*16 + p); regroup into per-spatial-
    # position slabs [p, c, j] so the kernel never transposes the activation.
    wfc1 = jnp.transpose(pt["fc1_w"].T.reshape(C2, P, FC1), (1, 0, 2))   # (16,256,256)
    return {
        "w1": w1.astype(jnp.float32),
        "b1": pt["conv1_b"].reshape(1, C1).astype(jnp.float32),
        "w2": w2.astype(jnp.bfloat16),
        "b2": pt["conv2_b"].reshape(1, C2).astype(jnp.float32),
        "wfc1": wfc1.astype(jnp.bfloat16),
        "bfc1": pt["fc1_b"].reshape(1, FC1).astype(jnp.float32),
        "wfc2": pt["fc2_w"].T.astype(jnp.float32),                       # (256, 4)
        "bfc2": pt["fc2_b"].reshape(1, NOUT).astype(jnp.float32),
    }


# ---------------------------------------------------------------------------
# Forward pass (matches Net3.forward; dropout in eval mode)
# ---------------------------------------------------------------------------
def net3_forward(kparams, x):
    x = x.reshape(-1, 1, H, W).astype(jnp.float32)   # PyTorch: x.reshape(-1,1,4,4)
    batch = x.shape[0]

    cols1 = _im2col_1ch(x)                 # (B*16, 9)
    shift = _shift_matrices(batch)         # (9, R, R) constants
    selp = _spatial_selectors(batch)       # (16, B, R) constants

    operands = (cols1, shift,
                kparams["w1"], kparams["b1"],
                kparams["w2"], kparams["b2"],
                kparams["wfc1"], kparams["bfc1"],
                selp, kparams["wfc2"], kparams["bfc2"])

    return pl.pallas_call(
        _net3_fused_kernel,
        out_shape=jax.ShapeDtypeStruct((batch, NOUT), jnp.float32),
        in_specs=[_full_block(op) for op in operands],
        out_specs=pl.BlockSpec((batch, NOUT), lambda: (0, 0)),
        compiler_params=pltpu.CompilerParams(vmem_limit_bytes=16 * 1024 * 1024),
    )(*operands)


# ---------------------------------------------------------------------------
# Independent pure-XLA reference (f32) for a correctness check
# ---------------------------------------------------------------------------
def net3_reference(pt, x):
    x = x.reshape(-1, 1, H, W).astype(jnp.float32)
    batch = x.shape[0]
    dn = ("NCHW", "OIHW", "NCHW")
    hp = lax.Precision.HIGHEST
    h = lax.conv_general_dilated(x, pt["conv1_w"], (1, 1), ((1, 1), (1, 1)),
                                 dimension_numbers=dn, precision=hp)
    h = jnp.maximum(h + pt["conv1_b"].reshape(1, -1, 1, 1), 0.0)
    h = lax.conv_general_dilated(h, pt["conv2_w"], (1, 1), ((1, 1), (1, 1)),
                                 dimension_numbers=dn, precision=hp)
    h = jnp.maximum(h + pt["conv2_b"].reshape(1, -1, 1, 1), 0.0)
    flat = h.reshape(batch, -1)                                   # NCHW flatten
    a = jnp.dot(flat, pt["fc1_w"].T, precision=hp) + pt["fc1_b"]
    a = jnp.maximum(a, 0.0)                                       # Dropout: eval identity
    return jnp.dot(a, pt["fc2_w"].T, precision=hp) + pt["fc2_b"]


if __name__ == "__main__":
    key = jax.random.PRNGKey(0)
    pkey, xkey = jax.random.split(key)

    pt_params = init_params(pkey)
    kparams = convert_params(pt_params)            # one-time weight repack

    # Example input consistent with forward(): reshapeable to (-1, 1, 4, 4).
    x = jax.random.normal(xkey, (2, 1, 4, 4), dtype=jnp.float32)

    out = jax.jit(net3_forward)(kparams, x)
    out = jax.block_until_ready(out)
    assert out.shape == (2, NOUT), out.shape
    assert out.dtype == jnp.float32

    ref = jax.block_until_ready(net3_reference(pt_params, x))
    assert jnp.allclose(out, ref, rtol=2e-2, atol=2e-2), (out, ref)

    print("KERNEL_OK")
</pallas_src>

<mosaic_0001>
module attributes {stable_mosaic.version = 11 : i64} {
  func.func @_net3_fused_kernel(%arg0: memref<32x9xf32, #tpu.memory_space<vmem>>, %arg1: memref<9x32x32xf32, #tpu.memory_space<vmem>>, %arg2: memref<9x128xf32, #tpu.memory_space<vmem>>, %arg3: memref<1x128xf32, #tpu.memory_space<vmem>>, %arg4: memref<9x128x256xbf16, #tpu.memory_space<vmem>>, %arg5: memref<1x256xf32, #tpu.memory_space<vmem>>, %arg6: memref<16x256x256xbf16, #tpu.memory_space<vmem>>, %arg7: memref<1x256xf32, #tpu.memory_space<vmem>>, %arg8: memref<16x2x32xf32, #tpu.memory_space<vmem>>, %arg9: memref<256x4xf32, #tpu.memory_space<vmem>>, %arg10: memref<1x4xf32, #tpu.memory_space<vmem>>, %arg11: memref<2x4xf32, #tpu.memory_space<vmem>>) attributes {dimension_semantics = [], scalar_prefetch = 0 : i64, scratch_operands = 0 : i64, tpu.core_type = #tpu.core_type<tc>} {
    %c0 = arith.constant 0 : index
    %c0_0 = arith.constant 0 : index
    %0 = vector.load %arg0[%c0, %c0_0] : memref<32x9xf32, #tpu.memory_space<vmem>>, vector<32x9xf32>
    %c0_1 = arith.constant 0 : index
    %c0_2 = arith.constant 0 : index
    %1 = vector.load %arg2[%c0_1, %c0_2] : memref<9x128xf32, #tpu.memory_space<vmem>>, vector<9x128xf32>
    %cst = arith.constant dense<0.000000e+00> : vector<32x128xf32>
    %2 = tpu.matmul %0, %1, %cst {dimension_numbers = #tpu.dot_dimension_numbers<[1], [0], [0], [1], [0, 0, 1, 1], [], []>} : vector<32x9xf32>, vector<9x128xf32>, vector<32x128xf32> -> vector<32x128xf32>
    %c0_3 = arith.constant 0 : index
    %c0_4 = arith.constant 0 : index
    %3 = vector.load %arg3[%c0_3, %c0_4] : memref<1x128xf32, #tpu.memory_space<vmem>>, vector<1x128xf32>
    %4 = vector.broadcast %3 : vector<1x128xf32> to vector<32x128xf32>
    %5 = arith.addf %2, %4 : vector<32x128xf32>
    %cst_5 = arith.constant 0.000000e+00 : f32
    %6 = vector.broadcast %cst_5 : f32 to vector<32x128xf32>
    %7 = arith.maximumf %5, %6 : vector<32x128xf32>
    %cst_6 = arith.constant 0.000000e+00 : f32
    %8 = vector.broadcast %cst_6 : f32 to vector<32x256xf32>
    %c0_7 = arith.constant 0 : index
    %c0_8 = arith.constant 0 : index
    %c0_9 = arith.constant 0 : index
    %9 = vector.load %arg1[%c0_7, %c0_8, %c0_9] : memref<9x32x32xf32, #tpu.memory_space<vmem>>, vector<1x32x32xf32>
    %10 = vector.shape_cast %9 : vector<1x32x32xf32> to vector<32x32xf32>
    %cst_10 = arith.constant dense<0.000000e+00> : vector<32x128xf32>
    %11 = tpu.matmul %10, %7, %cst_10 {dimension_numbers = #tpu.dot_dimension_numbers<[1], [0], [0], [1], [0, 0, 1, 1], [], []>} : vector<32x32xf32>, vector<32x128xf32>, vector<32x128xf32> -> vector<32x128xf32>
    %12 = arith.truncf %11 : vector<32x128xf32> to vector<32x128xbf16>
    %c0_11 = arith.constant 0 : index
    %c0_12 = arith.constant 0 : index
    %c0_13 = arith.constant 0 : index
    %13 = vector.load %arg4[%c0_11, %c0_12, %c0_13] : memref<9x128x256xbf16, #tpu.memory_space<vmem>>, vector<1x128x256xbf16>
    %14 = vector.shape_cast %13 : vector<1x128x256xbf16> to vector<128x256xbf16>
    %cst_14 = arith.constant dense<0.000000e+00> : vector<32x256xf32>
    %15 = tpu.matmul %12, %14, %cst_14 {dimension_numbers = #tpu.dot_dimension_numbers<[1], [0], [0], [1], [0, 0, 1, 1], [], []>} : vector<32x128xbf16>, vector<128x256xbf16>, vector<32x256xf32> -> vector<32x256xf32>
    %16 = arith.addf %8, %15 : vector<32x256xf32>
    %c1 = arith.constant 1 : index
    %c0_15 = arith.constant 0 : index
    %c0_16 = arith.constant 0 : index
    %17 = vector.load %arg1[%c1, %c0_15, %c0_16] : memref<9x32x32xf32, #tpu.memory_space<vmem>>, vector<1x32x32xf32>
    %18 = vector.shape_cast %17 : vector<1x32x32xf32> to vector<32x32xf32>
    %cst_17 = arith.constant dense<0.000000e+00> : vector<32x128xf32>
    %19 = tpu.matmul %18, %7, %cst_17 {dimension_numbers = #tpu.dot_dimension_numbers<[1], [0], [0], [1], [0, 0, 1, 1], [], []>} : vector<32x32xf32>, vector<32x128xf32>, vector<32x128xf32> -> vector<32x128xf32>
    %20 = arith.truncf %19 : vector<32x128xf32> to vector<32x128xbf16>
    %c1_18 = arith.constant 1 : index
    %c0_19 = arith.constant 0 : index
    %c0_20 = arith.constant 0 : index
    %21 = vector.load %arg4[%c1_18, %c0_19, %c0_20] : memref<9x128x256xbf16, #tpu.memory_space<vmem>>, vector<1x128x256xbf16>
    %22 = vector.shape_cast %21 : vector<1x128x256xbf16> to vector<128x256xbf16>
    %cst_21 = arith.constant dense<0.000000e+00> : vector<32x256xf32>
    %23 = tpu.matmul %20, %22, %cst_21 {dimension_numbers = #tpu.dot_dimension_numbers<[1], [0], [0], [1], [0, 0, 1, 1], [], []>} : vector<32x128xbf16>, vector<128x256xbf16>, vector<32x256xf32> -> vector<32x256xf32>
    %24 = arith.addf %16, %23 : vector<32x256xf32>
    %c2 = arith.constant 2 : index
    %c0_22 = arith.constant 0 : index
    %c0_23 = arith.constant 0 : index
    %25 = vector.load %arg1[%c2, %c0_22, %c0_23] : memref<9x32x32xf32, #tpu.memory_space<vmem>>, vector<1x32x32xf32>
    %26 = vector.shape_cast %25 : vector<1x32x32xf32> to vector<32x32xf32>
    %cst_24 = arith.constant dense<0.000000e+00> : vector<32x128xf32>
    %27 = tpu.matmul %26, %7, %cst_24 {dimension_numbers = #tpu.dot_dimension_numbers<[1], [0], [0], [1], [0, 0, 1, 1], [], []>} : vector<32x32xf32>, vector<32x128xf32>, vector<32x128xf32> -> vector<32x128xf32>
    %28 = arith.truncf %27 : vector<32x128xf32> to vector<32x128xbf16>
    %c2_25 = arith.constant 2 : index
    %c0_26 = arith.constant 0 : index
    %c0_27 = arith.constant 0 : index
    %29 = vector.load %arg4[%c2_25, %c0_26, %c0_27] : memref<9x128x256xbf16, #tpu.memory_space<vmem>>, vector<1x128x256xbf16>
    %30 = vector.shape_cast %29 : vector<1x128x256xbf16> to vector<128x256xbf16>
    %cst_28 = arith.constant dense<0.000000e+00> : vector<32x256xf32>
    %31 = tpu.matmul %28, %30, %cst_28 {dimension_numbers = #tpu.dot_dimension_numbers<[1], [0], [0], [1], [0, 0, 1, 1], [], []>} : vector<32x128xbf16>, vector<128x256xbf16>, vector<32x256xf32> -> vector<32x256xf32>
    %32 = arith.addf %24, %31 : vector<32x256xf32>
    %c3 = arith.constant 3 : index
    %c0_29 = arith.constant 0 : index
    %c0_30 = arith.constant 0 : index
    %33 = vector.load %arg1[%c3, %c0_29, %c0_30] : memref<9x32x32xf32, #tpu.memory_space<vmem>>, vector<1x32x32xf32>
    %34 = vector.shape_cast %33 : vector<1x32x32xf32> to vector<32x32xf32>
    %cst_31 = arith.constant dense<0.000000e+00> : vector<32x128xf32>
    %35 = tpu.matmul %34, %7, %cst_31 {dimension_numbers = #tpu.dot_dimension_numbers<[1], [0], [0], [1], [0, 0, 1, 1], [], []>} : vector<32x32xf32>, vector<32x128xf32>, vector<32x128xf32> -> vector<32x128xf32>
    %36 = arith.truncf %35 : vector<32x128xf32> to vector<32x128xbf16>
    %c3_32 = arith.constant 3 : index
    %c0_33 = arith.constant 0 : index
    %c0_34 = arith.constant 0 : index
    %37 = vector.load %arg4[%c3_32, %c0_33, %c0_34] : memref<9x128x256xbf16, #tpu.memory_space<vmem>>, vector<1x128x256xbf16>
    %38 = vector.shape_cast %37 : vector<1x128x256xbf16> to vector<128x256xbf16>
    %cst_35 = arith.constant dense<0.000000e+00> : vector<32x256xf32>
    %39 = tpu.matmul %36, %38, %cst_35 {dimension_numbers = #tpu.dot_dimension_numbers<[1], [0], [0], [1], [0, 0, 1, 1], [], []>} : vector<32x128xbf16>, vector<128x256xbf16>, vector<32x256xf32> -> vector<32x256xf32>
    %40 = arith.addf %32, %39 : vector<32x256xf32>
    %c4 = arith.constant 4 : index
    %c0_36 = arith.constant 0 : index
    %c0_37 = arith.constant 0 : index
    %41 = vector.load %arg1[%c4, %c0_36, %c0_37] : memref<9x32x32xf32, #tpu.memory_space<vmem>>, vector<1x32x32xf32>
    %42 = vector.shape_cast %41 : vector<1x32x32xf32> to vector<32x32xf32>
    %cst_38 = arith.constant dense<0.000000e+00> : vector<32x128xf32>
    %43 = tpu.matmul %42, %7, %cst_38 {dimension_numbers = #tpu.dot_dimension_numbers<[1], [0], [0], [1], [0, 0, 1, 1], [], []>} : vector<32x32xf32>, vector<32x128xf32>, vector<32x128xf32> -> vector<32x128xf32>
    %44 = arith.truncf %43 : vector<32x128xf32> to vector<32x128xbf16>
    %c4_39 = arith.constant 4 : index
    %c0_40 = arith.constant 0 : index
    %c0_41 = arith.constant 0 : index
    %45 = vector.load %arg4[%c4_39, %c0_40, %c0_41] : memref<9x128x256xbf16, #tpu.memory_space<vmem>>, vector<1x128x256xbf16>
    %46 = vector.shape_cast %45 : vector<1x128x256xbf16> to vector<128x256xbf16>
    %cst_42 = arith.constant dense<0.000000e+00> : vector<32x256xf32>
    %47 = tpu.matmul %44, %46, %cst_42 {dimension_numbers = #tpu.dot_dimension_numbers<[1], [0], [0], [1], [0, 0, 1, 1], [], []>} : vector<32x128xbf16>, vector<128x256xbf16>, vector<32x256xf32> -> vector<32x256xf32>
    %48 = arith.addf %40, %47 : vector<32x256xf32>
    %c5 = arith.constant 5 : index
    %c0_43 = arith.constant 0 : index
    %c0_44 = arith.constant 0 : index
    %49 = vector.load %arg1[%c5, %c0_43, %c0_44] : memref<9x32x32xf32, #tpu.memory_space<vmem>>, vector<1x32x32xf32>
    %50 = vector.shape_cast %49 : vector<1x32x32xf32> to vector<32x32xf32>
    %cst_45 = arith.constant dense<0.000000e+00> : vector<32x128xf32>
    %51 = tpu.matmul %50, %7, %cst_45 {dimension_numbers = #tpu.dot_dimension_numbers<[1], [0], [0], [1], [0, 0, 1, 1], [], []>} : vector<32x32xf32>, vector<32x128xf32>, vector<32x128xf32> -> vector<32x128xf32>
    %52 = arith.truncf %51 : vector<32x128xf32> to vector<32x128xbf16>
    %c5_46 = arith.constant 5 : index
    %c0_47 = arith.constant 0 : index
    %c0_48 = arith.constant 0 : index
    %53 = vector.load %arg4[%c5_46, %c0_47, %c0_48] : memref<9x128x256xbf16, #tpu.memory_space<vmem>>, vector<1x128x256xbf16>
    %54 = vector.shape_cast %53 : vector<1x128x256xbf16> to vector<128x256xbf16>
    %cst_49 = arith.constant dense<0.000000e+00> : vector<32x256xf32>
    %55 = tpu.matmul %52, %54, %cst_49 {dimension_numbers = #tpu.dot_dimension_numbers<[1], [0], [0], [1], [0, 0, 1, 1], [], []>} : vector<32x128xbf16>, vector<128x256xbf16>, vector<32x256xf32> -> vector<32x256xf32>
    %56 = arith.addf %48, %55 : vector<32x256xf32>
    %c6 = arith.constant 6 : index
    %c0_50 = arith.constant 0 : index
    %c0_51 = arith.constant 0 : index
    %57 = vector.load %arg1[%c6, %c0_50, %c0_51] : memref<9x32x32xf32, #tpu.memory_space<vmem>>, vector<1x32x32xf32>
    %58 = vector.shape_cast %57 : vector<1x32x32xf32> to vector<32x32xf32>
    %cst_52 = arith.constant dense<0.000000e+00> : vector<32x128xf32>
    %59 = tpu.matmul %58, %7, %cst_52 {dimension_numbers = #tpu.dot_dimension_numbers<[1], [0], [0], [1], [0, 0, 1, 1], [], []>} : vector<32x32xf32>, vector<32x128xf32>, vector<32x128xf32> -> vector<32x128xf32>
    %60 = arith.truncf %59 : vector<32x128xf32> to vector<32x128xbf16>
    %c6_53 = arith.constant 6 : index
    %c0_54 = arith.constant 0 : index
    %c0_55 = arith.constant 0 : index
    %61 = vector.load %arg4[%c6_53, %c0_54, %c0_55] : memref<9x128x256xbf16, #tpu.memory_space<vmem>>, vector<1x128x256xbf16>
    %62 = vector.shape_cast %61 : vector<1x128x256xbf16> to vector<128x256xbf16>
    %cst_56 = arith.constant dense<0.000000e+00> : vector<32x256xf32>
    %63 = tpu.matmul %60, %62, %cst_56 {dimension_numbers = #tpu.dot_dimension_numbers<[1], [0], [0], [1], [0, 0, 1, 1], [], []>} : vector<32x128xbf16>, vector<128x256xbf16>, vector<32x256xf32> -> vector<32x256xf32>
    %64 = arith.addf %56, %63 : vector<32x256xf32>
    %c7 = arith.constant 7 : index
    %c0_57 = arith.constant 0 : index
    %c0_58 = arith.constant 0 : index
    %65 = vector.load %arg1[%c7, %c0_57, %c0_58] : memref<9x32x32xf32, #tpu.memory_space<vmem>>, vector<1x32x32xf32>
    %66 = vector.shape_cast %65 : vector<1x32x32xf32> to vector<32x32xf32>
    %cst_59 = arith.constant dense<0.000000e+00> : vector<32x128xf32>
    %67 = tpu.matmul %66, %7, %cst_59 {dimension_numbers = #tpu.dot_dimension_numbers<[1], [0], [0], [1], [0, 0, 1, 1], [], []>} : vector<32x32xf32>, vector<32x128xf32>, vector<32x128xf32> -> vector<32x128xf32>
    %68 = arith.truncf %67 : vector<32x128xf32> to vector<32x128xbf16>
    %c7_60 = arith.constant 7 : index
    %c0_61 = arith.constant 0 : index
    %c0_62 = arith.constant 0 : index
    %69 = vector.load %arg4[%c7_60, %c0_61, %c0_62] : memref<9x128x256xbf16, #tpu.memory_space<vmem>>, vector<1x128x256xbf16>
    %70 = vector.shape_cast %69 : vector<1x128x256xbf16> to vector<128x256xbf16>
    %cst_63 = arith.constant dense<0.000000e+00> : vector<32x256xf32>
    %71 = tpu.matmul %68, %70, %cst_63 {dimension_numbers = #tpu.dot_dimension_numbers<[1], [0], [0], [1], [0, 0, 1, 1], [], []>} : vector<32x128xbf16>, vector<128x256xbf16>, vector<32x256xf32> -> vector<32x256xf32>
    %72 = arith.addf %64, %71 : vector<32x256xf32>
    %c8 = arith.constant 8 : index
    %c0_64 = arith.constant 0 : index
    %c0_65 = arith.constant 0 : index
    %73 = vector.load %arg1[%c8, %c0_64, %c0_65] : memref<9x32x32xf32, #tpu.memory_space<vmem>>, vector<1x32x32xf32>
    %74 = vector.shape_cast %73 : vector<1x32x32xf32> to vector<32x32xf32>
    %cst_66 = arith.constant dense<0.000000e+00> : vector<32x128xf32>
    %75 = tpu.matmul %74, %7, %cst_66 {dimension_numbers = #tpu.dot_dimension_numbers<[1], [0], [0], [1], [0, 0, 1, 1], [], []>} : vector<32x32xf32>, vector<32x128xf32>, vector<32x128xf32> -> vector<32x128xf32>
    %76 = arith.truncf %75 : vector<32x128xf32> to vector<32x128xbf16>
    %c8_67 = arith.constant 8 : index
    %c0_68 = arith.constant 0 : index
    %c0_69 = arith.constant 0 : index
    %77 = vector.load %arg4[%c8_67, %c0_68, %c0_69] : memref<9x128x256xbf16, #tpu.memory_space<vmem>>, vector<1x128x256xbf16>
    %78 = vector.shape_cast %77 : vector<1x128x256xbf16> to vector<128x256xbf16>
    %cst_70 = arith.constant dense<0.000000e+00> : vector<32x256xf32>
    %79 = tpu.matmul %76, %78, %cst_70 {dimension_numbers = #tpu.dot_dimension_numbers<[1], [0], [0], [1], [0, 0, 1, 1], [], []>} : vector<32x128xbf16>, vector<128x256xbf16>, vector<32x256xf32> -> vector<32x256xf32>
    %80 = arith.addf %72, %79 : vector<32x256xf32>
    %c0_71 = arith.constant 0 : index
    %c0_72 = arith.constant 0 : index
    %81 = vector.load %arg5[%c0_71, %c0_72] : memref<1x256xf32, #tpu.memory_space<vmem>>, vector<1x256xf32>
    %82 = vector.broadcast %81 : vector<1x256xf32> to vector<32x256xf32>
    %83 = arith.addf %80, %82 : vector<32x256xf32>
    %cst_73 = arith.constant 0.000000e+00 : f32
    %84 = vector.broadcast %cst_73 : f32 to vector<32x256xf32>
    %85 = arith.maximumf %83, %84 : vector<32x256xf32>
    %cst_74 = arith.constant 0.000000e+00 : f32
    %86 = vector.broadcast %cst_74 : f32 to vector<2x256xf32>
    %c0_75 = arith.constant 0 : index
    %c0_76 = arith.constant 0 : index
    %c0_77 = arith.constant 0 : index
    %87 = vector.load %arg8[%c0_75, %c0_76, %c0_77] : memref<16x2x32xf32, #tpu.memory_space<vmem>>, vector<1x2x32xf32>
    %88 = vector.shape_cast %87 : vector<1x2x32xf32> to vector<2x32xf32>
    %cst_78 = arith.constant dense<0.000000e+00> : vector<2x256xf32>
    %89 = tpu.matmul %88, %85, %cst_78 {dimension_numbers = #tpu.dot_dimension_numbers<[1], [0], [0], [1], [0, 0, 1, 1], [], []>} : vector<2x32xf32>, vector<32x256xf32>, vector<2x256xf32> -> vector<2x256xf32>
    %90 = arith.truncf %89 : vector<2x256xf32> to vector<2x256xbf16>
    %c0_79 = arith.constant 0 : index
    %c0_80 = arith.constant 0 : index
    %c0_81 = arith.constant 0 : index
    %91 = vector.load %arg6[%c0_79, %c0_80, %c0_81] : memref<16x256x256xbf16, #tpu.memory_space<vmem>>, vector<1x256x256xbf16>
    %92 = vector.shape_cast %91 : vector<1x256x256xbf16> to vector<256x256xbf16>
    %cst_82 = arith.constant dense<0.000000e+00> : vector<2x256xf32>
    %93 = tpu.matmul %90, %92, %cst_82 {dimension_numbers = #tpu.dot_dimension_numbers<[1], [0], [0], [1], [0, 0, 1, 1], [], []>} : vector<2x256xbf16>, vector<256x256xbf16>, vector<2x256xf32> -> vector<2x256xf32>
    %94 = arith.addf %86, %93 : vector<2x256xf32>
    %c1_83 = arith.constant 1 : index
    %c0_84 = arith.constant 0 : index
    %c0_85 = arith.constant 0 : index
    %95 = vector.load %arg8[%c1_83, %c0_84, %c0_85] : memref<16x2x32xf32, #tpu.memory_space<vmem>>, vector<1x2x32xf32>
    %96 = vector.shape_cast %95 : vector<1x2x32xf32> to vector<2x32xf32>
    %cst_86 = arith.constant dense<0.000000e+00> : vector<2x256xf32>
    %97 = tpu.matmul %96, %85, %cst_86 {dimension_numbers = #tpu.dot_dimension_numbers<[1], [0], [0], [1], [0, 0, 1, 1], [], []>} : vector<2x32xf32>, vector<32x256xf32>, vector<2x256xf32> -> vector<2x256xf32>
    %98 = arith.truncf %97 : vector<2x256xf32> to vector<2x256xbf16>
    %c1_87 = arith.constant 1 : index
    %c0_88 = arith.constant 0 : index
    %c0_89 = arith.constant 0 : index
    %99 = vector.load %arg6[%c1_87, %c0_88, %c0_89] : memref<16x256x256xbf16, #tpu.memory_space<vmem>>, vector<1x256x256xbf16>
    %100 = vector.shape_cast %99 : vector<1x256x256xbf16> to vector<256x256xbf16>
    %cst_90 = arith.constant dense<0.000000e+00> : vector<2x256xf32>
    %101 = tpu.matmul %98, %100, %cst_90 {dimension_numbers = #tpu.dot_dimension_numbers<[1], [0], [0], [1], [0, 0, 1, 1], [], []>} : vector<2x256xbf16>, vector<256x256xbf16>, vector<2x256xf32> -> vector<2x256xf32>
    %102 = arith.addf %94, %101 : vector<2x256xf32>
    %c2_91 = arith.constant 2 : index
    %c0_92 = arith.constant 0 : index
    %c0_93 = arith.constant 0 : index
    %103 = vector.load %arg8[%c2_91, %c0_92, %c0_93] : memref<16x2x32xf32, #tpu.memory_space<vmem>>, vector<1x2x32xf32>
    %104 = vector.shape_cast %103 : vector<1x2x32xf32> to vector<2x32xf32>
    %cst_94 = arith.constant dense<0.000000e+00> : vector<2x256xf32>
    %105 = tpu.matmul %104, %85, %cst_94 {dimension_numbers = #tpu.dot_dimension_numbers<[1], [0], [0], [1], [0, 0, 1, 1], [], []>} : vector<2x32xf32>, vector<32x256xf32>, vector<2x256xf32> -> vector<2x256xf32>
    %106 = arith.truncf %105 : vector<2x256xf32> to vector<2x256xbf16>
    %c2_95 = arith.constant 2 : index
    %c0_96 = arith.constant 0 : index
    %c0_97 = arith.constant 0 : index
    %107 = vector.load %arg6[%c2_95, %c0_96, %c0_97] : memref<16x256x256xbf16, #tpu.memory_space<vmem>>, vector<1x256x256xbf16>
    %108 = vector.shape_cast %107 : vector<1x256x256xbf16> to vector<256x256xbf16>
    %cst_98 = arith.constant dense<0.000000e+00> : vector<2x256xf32>
    %109 = tpu.matmul %106, %108, %cst_98 {dimension_numbers = #tpu.dot_dimension_numbers<[1], [0], [0], [1], [0, 0, 1, 1], [], []>} : vector<2x256xbf16>, vector<256x256xbf16>, vector<2x256xf32> -> vector<2x256xf32>
    %110 = arith.addf %102, %109 : vector<2x256xf32>
    %c3_99 = arith.constant 3 : index
    %c0_100 = arith.constant 0 : index
    %c0_101 = arith.constant 0 : index
    %111 = vector.load %arg8[%c3_99, %c0_100, %c0_101] : memref<16x2x32xf32, #tpu.memory_space<vmem>>, vector<1x2x32xf32>
    %112 = vector.shape_cast %111 : vector<1x2x32xf32> to vector<2x32xf32>
    %cst_102 = arith.constant dense<0.000000e+00> : vector<2x256xf32>
    %113 = tpu.matmul %112, %85, %cst_102 {dimension_numbers = #tpu.dot_dimension_numbers<[1], [0], [0], [1], [0, 0, 1, 1], [], []>} : vector<2x32xf32>, vector<32x256xf32>, vector<2x256xf32> -> vector<2x256xf32>
    %114 = arith.truncf %113 : vector<2x256xf32> to vector<2x256xbf16>
    %c3_103 = arith.constant 3 : index
    %c0_104 = arith.constant 0 : index
    %c0_105 = arith.constant 0 : index
    %115 = vector.load %arg6[%c3_103, %c0_104, %c0_105] : memref<16x256x256xbf16, #tpu.memory_space<vmem>>, vector<1x256x256xbf16>
    %116 = vector.shape_cast %115 : vector<1x256x256xbf16> to vector<256x256xbf16>
    %cst_106 = arith.constant dense<0.000000e+00> : vector<2x256xf32>
    %117 = tpu.matmul %114, %116, %cst_106 {dimension_numbers = #tpu.dot_dimension_numbers<[1], [0], [0], [1], [0, 0, 1, 1], [], []>} : vector<2x256xbf16>, vector<256x256xbf16>, vector<2x256xf32> -> vector<2x256xf32>
    %118 = arith.addf %110, %117 : vector<2x256xf32>
    %c4_107 = arith.constant 4 : index
    %c0_108 = arith.constant 0 : index
    %c0_109 = arith.constant 0 : index
    %119 = vector.load %arg8[%c4_107, %c0_108, %c0_109] : memref<16x2x32xf32, #tpu.memory_space<vmem>>, vector<1x2x32xf32>
    %120 = vector.shape_cast %119 : vector<1x2x32xf32> to vector<2x32xf32>
    %cst_110 = arith.constant dense<0.000000e+00> : vector<2x256xf32>
    %121 = tpu.matmul %120, %85, %cst_110 {dimension_numbers = #tpu.dot_dimension_numbers<[1], [0], [0], [1], [0, 0, 1, 1], [], []>} : vector<2x32xf32>, vector<32x256xf32>, vector<2x256xf32> -> vector<2x256xf32>
    %122 = arith.truncf %121 : vector<2x256xf32> to vector<2x256xbf16>
    %c4_111 = arith.constant 4 : index
    %c0_112 = arith.constant 0 : index
    %c0_113 = arith.constant 0 : index
    %123 = vector.load %arg6[%c4_111, %c0_112, %c0_113] : memref<16x256x256xbf16, #tpu.memory_space<vmem>>, vector<1x256x256xbf16>
    %124 = vector.shape_cast %123 : vector<1x256x256xbf16> to vector<256x256xbf16>
    %cst_114 = arith.constant dense<0.000000e+00> : vector<2x256xf32>
    %125 = tpu.matmul %122, %124, %cst_114 {dimension_numbers = #tpu.dot_dimension_numbers<[1], [0], [0], [1], [0, 0, 1, 1], [], []>} : vector<2x256xbf16>, vector<256x256xbf16>, vector<2x256xf32> -> vector<2x256xf32>
    %126 = arith.addf %118, %125 : vector<2x256xf32>
    %c5_115 = arith.constant 5 : index
    %c0_116 = arith.constant 0 : index
    %c0_117 = arith.constant 0 : index
    %127 = vector.load %arg8[%c5_115, %c0_116, %c0_117] : memref<16x2x32xf32, #tpu.memory_space<vmem>>, vector<1x2x32xf32>
    %128 = vector.shape_cast %127 : vector<1x2x32xf32> to vector<2x32xf32>
    %cst_118 = arith.constant dense<0.000000e+00> : vector<2x256xf32>
    %129 = tpu.matmul %128, %85, %cst_118 {dimension_numbers = #tpu.dot_dimension_numbers<[1], [0], [0], [1], [0, 0, 1, 1], [], []>} : vector<2x32xf32>, vector<32x256xf32>, vector<2x256xf32> -> vector<2x256xf32>
    %130 = arith.truncf %129 : vector<2x256xf32> to vector<2x256xbf16>
    %c5_119 = arith.constant 5 : index
    %c0_120 = arith.constant 0 : index
    %c0_121 = arith.constant 0 : index
    %131 = vector.load %arg6[%c5_119, %c0_120, %c0_121] : memref<16x256x256xbf16, #tpu.memory_space<vmem>>, vector<1x256x256xbf16>
    %132 = vector.shape_cast %131 : vector<1x256x256xbf16> to vector<256x256xbf16>
    %cst_122 = arith.constant dense<0.000000e+00> : vector<2x256xf32>
    %133 = tpu.matmul %130, %132, %cst_122 {dimension_numbers = #tpu.dot_dimension_numbers<[1], [0], [0], [1], [0, 0, 1, 1], [], []>} : vector<2x256xbf16>, vector<256x256xbf16>, vector<2x256xf32> -> vector<2x256xf32>
    %134 = arith.addf %126, %133 : vector<2x256xf32>
    %c6_123 = arith.constant 6 : index
    %c0_124 = arith.constant 0 : index
    %c0_125 = arith.constant 0 : index
    %135 = vector.load %arg8[%c6_123, %c0_124, %c0_125] : memref<16x2x32xf32, #tpu.memory_space<vmem>>, vector<1x2x32xf32>
    %136 = vector.shape_cast %135 : vector<1x2x32xf32> to vector<2x32xf32>
    %cst_126 = arith.constant dense<0.000000e+00> : vector<2x256xf32>
    %137 = tpu.matmul %136, %85, %cst_126 {dimension_numbers = #tpu.dot_dimension_numbers<[1], [0], [0], [1], [0, 0, 1, 1], [], []>} : vector<2x32xf32>, vector<32x256xf32>, vector<2x256xf32> -> vector<2x256xf32>
    %138 = arith.truncf %137 : vector<2x256xf32> to vector<2x256xbf16>
    %c6_127 = arith.constant 6 : index
    %c0_128 = arith.constant 0 : index
    %c0_129 = arith.constant 0 : index
    %139 = vector.load %arg6[%c6_127, %c0_128, %c0_129] : memref<16x256x256xbf16, #tpu.memory_space<vmem>>, vector<1x256x256xbf16>
    %140 = vector.shape_cast %139 : vector<1x256x256xbf16> to vector<256x256xbf16>
    %cst_130 = arith.constant dense<0.000000e+00> : vector<2x256xf32>
    %141 = tpu.matmul %138, %140, %cst_130 {dimension_numbers = #tpu.dot_dimension_numbers<[1], [0], [0], [1], [0, 0, 1, 1], [], []>} : vector<2x256xbf16>, vector<256x256xbf16>, vector<2x256xf32> -> vector<2x256xf32>
    %142 = arith.addf %134, %141 : vector<2x256xf32>
    %c7_131 = arith.constant 7 : index
    %c0_132 = arith.constant 0 : index
    %c0_133 = arith.constant 0 : index
    %143 = vector.load %arg8[%c7_131, %c0_132, %c0_133] : memref<16x2x32xf32, #tpu.memory_space<vmem>>, vector<1x2x32xf32>
    %144 = vector.shape_cast %143 : vector<1x2x32xf32> to vector<2x32xf32>
    %cst_134 = arith.constant dense<0.000000e+00> : vector<2x256xf32>
    %145 = tpu.matmul %144, %85, %cst_134 {dimension_numbers = #tpu.dot_dimension_numbers<[1], [0], [0], [1], [0, 0, 1, 1], [], []>} : vector<2x32xf32>, vector<32x256xf32>, vector<2x256xf32> -> vector<2x256xf32>
    %146 = arith.truncf %145 : vector<2x256xf32> to vector<2x256xbf16>
    %c7_135 = arith.constant 7 : index
    %c0_136 = arith.constant 0 : index
    %c0_137 = arith.constant 0 : index
    %147 = vector.load %arg6[%c7_135, %c0_136, %c0_137] : memref<16x256x256xbf16, #tpu.memory_space<vmem>>, vector<1x256x256xbf16>
    %148 = vector.shape_cast %147 : vector<1x256x256xbf16> to vector<256x256xbf16>
    %cst_138 = arith.constant dense<0.000000e+00> : vector<2x256xf32>
    %149 = tpu.matmul %146, %148, %cst_138 {dimension_numbers = #tpu.dot_dimension_numbers<[1], [0], [0], [1], [0, 0, 1, 1], [], []>} : vector<2x256xbf16>, vector<256x256xbf16>, vector<2x256xf32> -> vector<2x256xf32>
    %150 = arith.addf %142, %149 : vector<2x256xf32>
    %c8_139 = arith.constant 8 : index
    %c0_140 = arith.constant 0 : index
    %c0_141 = arith.constant 0 : index
    %151 = vector.load %arg8[%c8_139, %c0_140, %c0_141] : memref<16x2x32xf32, #tpu.memory_space<vmem>>, vector<1x2x32xf32>
    %152 = vector.shape_cast %151 : vector<1x2x32xf32> to vector<2x32xf32>
    %cst_142 = arith.constant dense<0.000000e+00> : vector<2x256xf32>
    %153 = tpu.matmul %152, %85, %cst_142 {dimension_numbers = #tpu.dot_dimension_numbers<[1], [0], [0], [1], [0, 0, 1, 1], [], []>} : vector<2x32xf32>, vector<32x256xf32>, vector<2x256xf32> -> vector<2x256xf32>
    %154 = arith.truncf %153 : vector<2x256xf32> to vector<2x256xbf16>
    %c8_143 = arith.constant 8 : index
    %c0_144 = arith.constant 0 : index
    %c0_145 = arith.constant 0 : index
    %155 = vector.load %arg6[%c8_143, %c0_144, %c0_145] : memref<16x256x256xbf16, #tpu.memory_space<vmem>>, vector<1x256x256xbf16>
    %156 = vector.shape_cast %155 : vector<1x256x256xbf16> to vector<256x256xbf16>
    %cst_146 = arith.constant dense<0.000000e+00> : vector<2x256xf32>
    %157 = tpu.matmul %154, %156, %cst_146 {dimension_numbers = #tpu.dot_dimension_numbers<[1], [0], [0], [1], [0, 0, 1, 1], [], []>} : vector<2x256xbf16>, vector<256x256xbf16>, vector<2x256xf32> -> vector<2x256xf32>
    %158 = arith.addf %150, %157 : vector<2x256xf32>
    %c9 = arith.constant 9 : index
    %c0_147 = arith.constant 0 : index
    %c0_148 = arith.constant 0 : index
    %159 = vector.load %arg8[%c9, %c0_147, %c0_148] : memref<16x2x32xf32, #tpu.memory_space<vmem>>, vector<1x2x32xf32>
    %160 = vector.shape_cast %159 : vector<1x2x32xf32> to vector<2x32xf32>
    %cst_149 = arith.constant dense<0.000000e+00> : vector<2x256xf32>
    %161 = tpu.matmul %160, %85, %cst_149 {dimension_numbers = #tpu.dot_dimension_numbers<[1], [0], [0], [1], [0, 0, 1, 1], [], []>} : vector<2x32xf32>, vector<32x256xf32>, vector<2x256xf32> -> vector<2x256xf32>
    %162 = arith.truncf %161 : vector<2x256xf32> to vector<2x256xbf16>
    %c9_150 = arith.constant 9 : index
    %c0_151 = arith.constant 0 : index
    %c0_152 = arith.constant 0 : index
    %163 = vector.load %arg6[%c9_150, %c0_151, %c0_152] : memref<16x256x256xbf16, #tpu.memory_space<vmem>>, vector<1x256x256xbf16>
    %164 = vector.shape_cast %163 : vector<1x256x256xbf16> to vector<256x256xbf16>
    %cst_153 = arith.constant dense<0.000000e+00> : vector<2x256xf32>
    %165 = tpu.matmul %162, %164, %cst_153 {dimension_numbers = #tpu.dot_dimension_numbers<[1], [0], [0], [1], [0, 0, 1, 1], [], []>} : vector<2x256xbf16>, vector<256x256xbf16>, vector<2x256xf32> -> vector<2x256xf32>
    %166 = arith.addf %158, %165 : vector<2x256xf32>
    %c10 = arith.constant 10 : index
    %c0_154 = arith.constant 0 : index
    %c0_155 = arith.constant 0 : index
    %167 = vector.load %arg8[%c10, %c0_154, %c0_155] : memref<16x2x32xf32, #tpu.memory_space<vmem>>, vector<1x2x32xf32>
    %168 = vector.shape_cast %167 : vector<1x2x32xf32> to vector<2x32xf32>
    %cst_156 = arith.constant dense<0.000000e+00> : vector<2x256xf32>
    %169 = tpu.matmul %168, %85, %cst_156 {dimension_numbers = #tpu.dot_dimension_numbers<[1], [0], [0], [1], [0, 0, 1, 1], [], []>} : vector<2x32xf32>, vector<32x256xf32>, vector<2x256xf32> -> vector<2x256xf32>
    %170 = arith.truncf %169 : vector<2x256xf32> to vector<2x256xbf16>
    %c10_157 = arith.constant 10 : index
    %c0_158 = arith.constant 0 : index
    %c0_159 = arith.constant 0 : index
    %171 = vector.load %arg6[%c10_157, %c0_158, %c0_159] : memref<16x256x256xbf16, #tpu.memory_space<vmem>>, vector<1x256x256xbf16>
    %172 = vector.shape_cast %171 : vector<1x256x256xbf16> to vector<256x256xbf16>
    %cst_160 = arith.constant dense<0.000000e+00> : vector<2x256xf32>
    %173 = tpu.matmul %170, %172, %cst_160 {dimension_numbers = #tpu.dot_dimension_numbers<[1], [0], [0], [1], [0, 0, 1, 1], [], []>} : vector<2x256xbf16>, vector<256x256xbf16>, vector<2x256xf32> -> vector<2x256xf32>
    %174 = arith.addf %166, %173 : vector<2x256xf32>
    %c11 = arith.constant 11 : index
    %c0_161 = arith.constant 0 : index
    %c0_162 = arith.constant 0 : index
    %175 = vector.load %arg8[%c11, %c0_161, %c0_162] : memref<16x2x32xf32, #tpu.memory_space<vmem>>, vector<1x2x32xf32>
    %176 = vector.shape_cast %175 : vector<1x2x32xf32> to vector<2x32xf32>
    %cst_163 = arith.constant dense<0.000000e+00> : vector<2x256xf32>
    %177 = tpu.matmul %176, %85, %cst_163 {dimension_numbers = #tpu.dot_dimension_numbers<[1], [0], [0], [1], [0, 0, 1, 1], [], []>} : vector<2x32xf32>, vector<32x256xf32>, vector<2x256xf32> -> vector<2x256xf32>
    %178 = arith.truncf %177 : vector<2x256xf32> to vector<2x256xbf16>
    %c11_164 = arith.constant 11 : index
    %c0_165 = arith.constant 0 : index
    %c0_166 = arith.constant 0 : index
    %179 = vector.load %arg6[%c11_164, %c0_165, %c0_166] : memref<16x256x256xbf16, #tpu.memory_space<vmem>>, vector<1x256x256xbf16>
    %180 = vector.shape_cast %179 : vector<1x256x256xbf16> to vector<256x256xbf16>
    %cst_167 = arith.constant dense<0.000000e+00> : vector<2x256xf32>
    %181 = tpu.matmul %178, %180, %cst_167 {dimension_numbers = #tpu.dot_dimension_numbers<[1], [0], [0], [1], [0, 0, 1, 1], [], []>} : vector<2x256xbf16>, vector<256x256xbf16>, vector<2x256xf32> -> vector<2x256xf32>
    %182 = arith.addf %174, %181 : vector<2x256xf32>
    %c12 = arith.constant 12 : index
    %c0_168 = arith.constant 0 : index
    %c0_169 = arith.constant 0 : index
    %183 = vector.load %arg8[%c12, %c0_168, %c0_169] : memref<16x2x32xf32, #tpu.memory_space<vmem>>, vector<1x2x32xf32>
    %184 = vector.shape_cast %183 : vector<1x2x32xf32> to vector<2x32xf32>
    %cst_170 = arith.constant dense<0.000000e+00> : vector<2x256xf32>
    %185 = tpu.matmul %184, %85, %cst_170 {dimension_numbers = #tpu.dot_dimension_numbers<[1], [0], [0], [1], [0, 0, 1, 1], [], []>} : vector<2x32xf32>, vector<32x256xf32>, vector<2x256xf32> -> vector<2x256xf32>
    %186 = arith.truncf %185 : vector<2x256xf32> to vector<2x256xbf16>
    %c12_171 = arith.constant 12 : index
    %c0_172 = arith.constant 0 : index
    %c0_173 = arith.constant 0 : index
    %187 = vector.load %arg6[%c12_171, %c0_172, %c0_173] : memref<16x256x256xbf16, #tpu.memory_space<vmem>>, vector<1x256x256xbf16>
    %188 = vector.shape_cast %187 : vector<1x256x256xbf16> to vector<256x256xbf16>
    %cst_174 = arith.constant dense<0.000000e+00> : vector<2x256xf32>
    %189 = tpu.matmul %186, %188, %cst_174 {dimension_numbers = #tpu.dot_dimension_numbers<[1], [0], [0], [1], [0, 0, 1, 1], [], []>} : vector<2x256xbf16>, vector<256x256xbf16>, vector<2x256xf32> -> vector<2x256xf32>
    %190 = arith.addf %182, %189 : vector<2x256xf32>
    %c13 = arith.constant 13 : index
    %c0_175 = arith.constant 0 : index
    %c0_176 = arith.constant 0 : index
    %191 = vector.load %arg8[%c13, %c0_175, %c0_176] : memref<16x2x32xf32, #tpu.memory_space<vmem>>, vector<1x2x32xf32>
    %192 = vector.shape_cast %191 : vector<1x2x32xf32> to vector<2x32xf32>
    %cst_177 = arith.constant dense<0.000000e+00> : vector<2x256xf32>
    %193 = tpu.matmul %192, %85, %cst_177 {dimension_numbers = #tpu.dot_dimension_numbers<[1], [0], [0], [1], [0, 0, 1, 1], [], []>} : vector<2x32xf32>, vector<32x256xf32>, vector<2x256xf32> -> vector<2x256xf32>
    %194 = arith.truncf %193 : vector<2x256xf32> to vector<2x256xbf16>
    %c13_178 = arith.constant 13 : index
    %c0_179 = arith.constant 0 : index
    %c0_180 = arith.constant 0 : index
    %195 = vector.load %arg6[%c13_178, %c0_179, %c0_180] : memref<16x256x256xbf16, #tpu.memory_space<vmem>>, vector<1x256x256xbf16>
    %196 = vector.shape_cast %195 : vector<1x256x256xbf16> to vector<256x256xbf16>
    %cst_181 = arith.constant dense<0.000000e+00> : vector<2x256xf32>
    %197 = tpu.matmul %194, %196, %cst_181 {dimension_numbers = #tpu.dot_dimension_numbers<[1], [0], [0], [1], [0, 0, 1, 1], [], []>} : vector<2x256xbf16>, vector<256x256xbf16>, vector<2x256xf32> -> vector<2x256xf32>
    %198 = arith.addf %190, %197 : vector<2x256xf32>
    %c14 = arith.constant 14 : index
    %c0_182 = arith.constant 0 : index
    %c0_183 = arith.constant 0 : index
    %199 = vector.load %arg8[%c14, %c0_182, %c0_183] : memref<16x2x32xf32, #tpu.memory_space<vmem>>, vector<1x2x32xf32>
    %200 = vector.shape_cast %199 : vector<1x2x32xf32> to vector<2x32xf32>
    %cst_184 = arith.constant dense<0.000000e+00> : vector<2x256xf32>
    %201 = tpu.matmul %200, %85, %cst_184 {dimension_numbers = #tpu.dot_dimension_numbers<[1], [0], [0], [1], [0, 0, 1, 1], [], []>} : vector<2x32xf32>, vector<32x256xf32>, vector<2x256xf32> -> vector<2x256xf32>
    %202 = arith.truncf %201 : vector<2x256xf32> to vector<2x256xbf16>
    %c14_185 = arith.constant 14 : index
    %c0_186 = arith.constant 0 : index
    %c0_187 = arith.constant 0 : index
    %203 = vector.load %arg6[%c14_185, %c0_186, %c0_187] : memref<16x256x256xbf16, #tpu.memory_space<vmem>>, vector<1x256x256xbf16>
    %204 = vector.shape_cast %203 : vector<1x256x256xbf16> to vector<256x256xbf16>
    %cst_188 = arith.constant dense<0.000000e+00> : vector<2x256xf32>
    %205 = tpu.matmul %202, %204, %cst_188 {dimension_numbers = #tpu.dot_dimension_numbers<[1], [0], [0], [1], [0, 0, 1, 1], [], []>} : vector<2x256xbf16>, vector<256x256xbf16>, vector<2x256xf32> -> vector<2x256xf32>
    %206 = arith.addf %198, %205 : vector<2x256xf32>
    %c15 = arith.constant 15 : index
    %c0_189 = arith.constant 0 : index
    %c0_190 = arith.constant 0 : index
    %207 = vector.load %arg8[%c15, %c0_189, %c0_190] : memref<16x2x32xf32, #tpu.memory_space<vmem>>, vector<1x2x32xf32>
    %208 = vector.shape_cast %207 : vector<1x2x32xf32> to vector<2x32xf32>
    %cst_191 = arith.constant dense<0.000000e+00> : vector<2x256xf32>
    %209 = tpu.matmul %208, %85, %cst_191 {dimension_numbers = #tpu.dot_dimension_numbers<[1], [0], [0], [1], [0, 0, 1, 1], [], []>} : vector<2x32xf32>, vector<32x256xf32>, vector<2x256xf32> -> vector<2x256xf32>
    %210 = arith.truncf %209 : vector<2x256xf32> to vector<2x256xbf16>
    %c15_192 = arith.constant 15 : index
    %c0_193 = arith.constant 0 : index
    %c0_194 = arith.constant 0 : index
    %211 = vector.load %arg6[%c15_192, %c0_193, %c0_194] : memref<16x256x256xbf16, #tpu.memory_space<vmem>>, vector<1x256x256xbf16>
    %212 = vector.shape_cast %211 : vector<1x256x256xbf16> to vector<256x256xbf16>
    %cst_195 = arith.constant dense<0.000000e+00> : vector<2x256xf32>
    %213 = tpu.matmul %210, %212, %cst_195 {dimension_numbers = #tpu.dot_dimension_numbers<[1], [0], [0], [1], [0, 0, 1, 1], [], []>} : vector<2x256xbf16>, vector<256x256xbf16>, vector<2x256xf32> -> vector<2x256xf32>
    %214 = arith.addf %206, %213 : vector<2x256xf32>
    %c0_196 = arith.constant 0 : index
    %c0_197 = arith.constant 0 : index
    %215 = vector.load %arg7[%c0_196, %c0_197] : memref<1x256xf32, #tpu.memory_space<vmem>>, vector<1x256xf32>
    %216 = vector.broadcast %215 : vector<1x256xf32> to vector<2x256xf32>
    %217 = arith.addf %214, %216 : vector<2x256xf32>
    %cst_198 = arith.constant 0.000000e+00 : f32
    %218 = vector.broadcast %cst_198 : f32 to vector<2x256xf32>
    %219 = arith.maximumf %217, %218 : vector<2x256xf32>
    %c0_199 = arith.constant 0 : index
    %c0_200 = arith.constant 0 : index
    %220 = vector.load %arg9[%c0_199, %c0_200] : memref<256x4xf32, #tpu.memory_space<vmem>>, vector<256x4xf32>
    %cst_201 = arith.constant dense<0.000000e+00> : vector<2x4xf32>
    %221 = tpu.matmul %219, %220, %cst_201 {dimension_numbers = #tpu.dot_dimension_numbers<[1], [0], [0], [1], [0, 0, 1, 1], [], []>} : vector<2x256xf32>, vector<256x4xf32>, vector<2x4xf32> -> vector<2x4xf32>
    %c0_202 = arith.constant 0 : index
    %c0_203 = arith.constant 0 : index
    %222 = vector.load %arg10[%c0_202, %c0_203] : memref<1x4xf32, #tpu.memory_space<vmem>>, vector<1x4xf32>
    %223 = vector.broadcast %222 : vector<1x4xf32> to vector<2x4xf32>
    %224 = arith.addf %221, %223 : vector<2x4xf32>
    %c0_204 = arith.constant 0 : index
    %c0_205 = arith.constant 0 : index
    %225 = vector.load %arg11[%c0_204, %c0_205] : memref<2x4xf32, #tpu.memory_space<vmem>>, vector<2x4xf32>
    tpu.vector_store %arg11[%c0_204, %c0_205], %224 {strides = array<i32>} : memref<2x4xf32, #tpu.memory_space<vmem>>, vector<2x4xf32>,
    return
  }
}

</mosaic_0001>

<bundles_post_ra>
// kernel: net3_forward.1
= control target key start
LH: loop header
LB: loop body
LE: loop exit
PB: predicated region body
PF: predicated region fallthrough
CT: control target
= control target key end

     0   :  { %16 = vsyncpa [#allocation3], 0  ;;  %s11128_s0 = inlined_call_operand.vmem [shape: f32[32,9], index: 0, kind: input, shape index: {}]   ;;  %s11129_s1 = inlined_call_operand.hbm [shape: f32[9,32,32], index: 1, kind: input, shape index: {}]   ;;  %s11130_s2 = inlined_call_operand.hbm [shape: f32[9,128], index: 2, kind: input, shape index: {}]   ;;  %s11131_s3 = inlined_call_operand.hbm [shape: f32[1,128], index: 3, kind: input, shape index: {}]   ;;  %s11132_s4 = inlined_call_operand.hbm [shape: bf16[9,128,256], index: 4, kind: input, shape index: {}]   ;;  %s11133_s5 = inlined_call_operand.hbm [shape: f32[1,256], index: 5, kind: input, shape index: {}]   ;;  %s11134_s6 = inlined_call_operand.hbm [shape: bf16[16,256,256], index: 6, kind: input, shape index: {}]   ;;  %s11135_s7 = inlined_call_operand.hbm [shape: f32[1,256], index: 7, kind: input, shape index: {}]   ;;  %s11136_s8 = inlined_call_operand.hbm [shape: f32[16,2,32], index: 8, kind: input, shape index: {}]   ;;  %s11137_s9 = inlined_call_operand.vmem [shape: f32[256,4], index: 9, kind: input, shape index: {}]   ;;  %s11138_s10 = inlined_call_operand.hbm [shape: f32[1,4], index: 10, kind: input, shape index: {}]   ;;  %s11139_s11 = inlined_call_operand.hbm [shape: f32[2,4], index: 11, kind: output, shape index: {}]  }
   0x1   :  { %17 = vsyncpa [#allocation6], 0 }
   0x2   :  { %18 = vsyncpa [#allocation9], 0 }
   0x3   :  { %19 = vsyncpa [#allocation12], 0 }
   0x4   :  { %20 = vsyncpa [#allocation15], 0 }
   0x5   :  { %21 = vsyncpa [#allocation4], 0  ;;  %s41_s19 = sshll.u32 %s11130_s2, 4  ;;  %s10383_s20 = smov [#allocation5]   ;;  %s42_s19 = int_to_ptr.hbm [resolvable:$true] %s41_s19 }
   0x6   :  { %s43_s21 = sshll.u32 %s10383_s20, 4  ;;  %s65_s24 = sshll.u32 %s11132_s4, 4  ;;  %s44_s21 = int_to_ptr.vmem [resolvable:$true] %s43_s21  ;;  %s66_s24 = int_to_ptr.hbm [resolvable:$true] %s65_s24 }
   0x7   :  { %s10384_s25 = smov 128   ;;  %s10385_s26 = smov 8  }
   0x8   :  { %49 = dma.hbm_to_vmem [thread:$0]  %s42_s19, 256, %s44_s21, [#allocation6], %s10384_s25, %s10384_s25, %s10385_s26  }
   0x9   :  { %s10386_s27 = smov [#allocation8]   ;;  %s89_s2 = sshll.u32 %s11134_s6, 4  ;;  %s90_s2 = int_to_ptr.hbm [resolvable:$true] %s89_s2 }
   0xa   :  { %s67_s28 = sshll.u32 %s10386_s27, 4  ;;  %s113_s13 = sshll.u32 %s11136_s8, 4  ;;  %s68_s28 = int_to_ptr.vmem [resolvable:$true] %s67_s28  ;;  %s114_s13 = int_to_ptr.hbm [resolvable:$true] %s113_s13 }
   0xb   :  { %73 = dma.hbm_to_vmem [thread:$0]  %s66_s24, 18432, %s68_s28, [#allocation9], %s10384_s25, %s10384_s25, %s10385_s26  }
   0xc   :  { %s10387_s14 = smov [#allocation11]   ;;  %s10388_s16 = smov [#allocation14]  }
   0xd   :  { %s91_s15 = sshll.u32 %s10387_s14, 4  ;;  %s115_s6 = sshll.u32 %s10388_s16, 4  ;;  %s92_s15 = int_to_ptr.vmem [resolvable:$true] %s91_s15  ;;  %s116_s6 = int_to_ptr.vmem [resolvable:$true] %s115_s6 }
   0xe   :  { %97 = dma.hbm_to_vmem [thread:$0]  %s90_s2, 65536, %s92_s15, [#allocation12], %s10384_s25, %s10384_s25, %s10385_s26  }
   0xf   :  { %s10389_s17 = smov 32   ;;  %s10390_s18 = smov 2  }
  0x10   :  { %121 = dma.hbm_to_vmem [thread:$0]  %s114_s13, 512, %s116_s6, [#allocation15], %s10389_s17, %s10389_s17, %s10390_s18  }
  0x11   :  { %s28_s21 = sshll.u32 %s11129_s1, 4  ;;  %s10391_s8 = smov [#allocation2]   ;;  %s29_s21 = int_to_ptr.hbm [resolvable:$true] %s28_s21 }
  0x12   :  { %s30_s22 = sshll.u32 %s10391_s8, 4  ;;  %s55_s27 = sshll.u32 %s11131_s3, 4  ;;  %s31_s22 = int_to_ptr.vmem [resolvable:$true] %s30_s22  ;;  %s56_s27 = int_to_ptr.hbm [resolvable:$true] %s55_s27 }
  0x13   :  { %36 = dma.hbm_to_vmem [thread:$0]  %s29_s21, 4608, %s31_s22, [#allocation3], %s10384_s25, %s10384_s25, %s10385_s26  }
  0x14   :  { %s10392_s28 = smov [#allocation7]   ;;  %s79_s4 = sshll.u32 %s11133_s5, 4  ;;  %s80_s4 = int_to_ptr.hbm [resolvable:$true] %s79_s4 }
  0x15   :  { %s57_s29 = sshll.u32 %s10392_s28, 4  ;;  %s103_s13 = sshll.u32 %s11135_s7, 4  ;;  %s58_s29 = int_to_ptr.vmem [resolvable:$true] %s57_s29  ;;  %s104_s13 = int_to_ptr.hbm [resolvable:$true] %s103_s13 }
  0x16   :  { %60 = dma.hbm_to_vmem [thread:$0]  %s56_s27, 16, %s58_s29, [#allocation6]  }
  0x17   :  { %s10393_s14 = smov [#allocation10]   ;;  %s10394_s25 = smov [#allocation13]  }
  0x18   :  { %s81_s3 = sshll.u32 %s10393_s14, 4  ;;  %s105_s26 = sshll.u32 %s10394_s25, 4  ;;  %s82_s3 = int_to_ptr.vmem [resolvable:$true] %s81_s3  ;;  %s106_s26 = int_to_ptr.vmem [resolvable:$true] %s105_s26 }
  0x19   :  { %84 = dma.hbm_to_vmem [thread:$0]  %s80_s4, 32, %s82_s3, [#allocation9]  }
  0x1a   :  { %s129_s6 = sshll.u32 %s11138_s10, 4  ;;  %s10395_s5 = smov [#allocation16]   ;;  %s130_s6 = int_to_ptr.hbm [resolvable:$true] %s129_s6 }
  0x1b   :  { %108 = dma.hbm_to_vmem [thread:$0]  %s104_s13, 32, %s106_s26, [#allocation12]  }
  0x1c   :  { %s131_s17 = sshll.u32 %s10395_s5, 4  ;;  %s132_s17 = int_to_ptr.vmem [resolvable:$true] %s131_s17 }
  0x1d   :  { %134 = dma.hbm_to_vmem [thread:$0]  %s130_s6, 16, %s132_s17, [#allocation15]  }
  0x1e   :  { %10371 = dma.done.wait [#allocation3], 4608  }
  0x1f   :  { %10372 = vsyncadd [#allocation3], 4294962688 }
  0x20   :  { %10373 = dma.done.wait [#allocation6], 272  }
  0x21   :  { %10374 = vsyncadd [#allocation6], 4294967024 }
  0x22   :  { %10375 = dma.done.wait [#allocation9], 18464  }
  0x23   :  { %10376 = vsyncadd [#allocation9], 4294948832 }
  0x24   :  { %10377 = dma.done.wait [#allocation12], 65568  }
  0x25   :  { %10378 = vsyncadd [#allocation12], 4294901728 }
  0x26   :  { %10379 = dma.done.wait [#allocation15], 528  }
  0x27   :  { %10380 = vsyncadd [#allocation15], 4294966768  ;;  %vm194_vm0 = vcmask 1040384   ;;  %v176_v0 = vld [vmem:[#allocation5 + $0x8] sm:$0x1]  ;;  %v175_v1 = vld [vmem:[#allocation5] sm:$0xff] }
  0x28   :  { %6762 = vmatpush.msk.msra.mxu0 %vm194_vm0, %v176_v0  ;;  %v171_v2 = vld [vmem:[%s11128_s0] sm:$0xff]  ;;  %vm181_vm1 = vcmask 72704   ;;  %v172_v3 = vld [vmem:[%s11128_s0 + $0x8] sm:$0xff]  ;;  %v173_v4 = vld [vmem:[%s11128_s0 + $0x10] sm:$0xff]  ;;  %vm235_vm2 = vcmask 261120   ;;  %s6748_s1 = sshll.u32 %s11139_s11, 4  ;;  %s6749_s1 = int_to_ptr.hbm [resolvable:$true] %s6748_s1 }
  0x29   :  { %v174_v5 = vld [vmem:[%s11128_s0 + $0x18] sm:$0xff]  ;;  %v6833_v6 = vld [vmem:[#allocation8 + $0xf0] sm:$0xf]  ;;  %v9490_v7 = vld [vmem:[#allocation8 + $0xf4] sm:$0xf0]  ;;  %vm6739_vm3 = vcmask 25600  }
  0x2a   :  { %213 = vmatpush.msra.mxu0 %v175_v1  ;;  %v6834_v8 = vor.u32 %v9490_v7, %v6833_v6  ;;  %v6825_v9 = vld [vmem:[#allocation8 + $0xe0] sm:$0xf]  ;;  %v9488_v10 = vld [vmem:[#allocation8 + $0xe4] sm:$0xf0]  ;;  %v6817_v12 = vld [vmem:[#allocation8 + $0xd0] sm:$0xf] }
  0x2b   :  { %6763 = vmatmul.msk.f32.vlgmr.msra.gmra.mxu0 %vm181_vm1, %v171_v2  ;;  %v6826_v11 = vor.u32 %v9488_v10, %v6825_v9  ;;  %v9486_v13 = vld [vmem:[#allocation8 + $0xd4] sm:$0xf0]  ;;  %v6809_v15 = vld [vmem:[#allocation8 + $0xc0] sm:$0xf]  ;;  %v9484_v16 = vld [vmem:[#allocation8 + $0xc4] sm:$0xf0] }
  0x2c   :  { %440 = vmatpush.bf16.msra.mxu3 %v6834_v8  ;;  %v6818_v14 = vor.u32 %v9486_v13, %v6817_v12  ;;  %v6810_v17 = vor.u32 %v9484_v16, %v6809_v15  ;;  %v6801_v18 = vld [vmem:[#allocation8 + $0xb0] sm:$0xf]  ;;  %v9482_v19 = vld [vmem:[#allocation8 + $0xb4] sm:$0xf0]  ;;  %v6793_v21 = vld [vmem:[#allocation8 + $0xa0] sm:$0xf] }
  0x2d   :  { %v6802_v20 = vor.u32 %v9482_v19, %v6801_v18  ;;  %v9480_v22 = vld [vmem:[#allocation8 + $0xa4] sm:$0xf0]  ;;  %v6785_v24 = vld [vmem:[#allocation8 + $0x90] sm:$0xf]  ;;  %v9478_v25 = vld [vmem:[#allocation8 + $0x94] sm:$0xf0] }
  0x2e   :  { %v6794_v23 = vor.u32 %v9480_v22, %v6793_v21  ;;  %v6786_v26 = vor.u32 %v9478_v25, %v6785_v24  ;;  %v6777_v27 = vld [vmem:[#allocation8 + $0x80] sm:$0xf]  ;;  %v9476_v28 = vld [vmem:[#allocation8 + $0x84] sm:$0xf0]  ;;  %v10129_v33 = vld [vmem:[#allocation7] ss:$0 sm:$0xff] }
  0x2f   :  { %v6778_v29 = vor.u32 %v9476_v28, %v6777_v27  ;;  %v9473_v42 = vld [vmem:[#allocation8 + $0x74] sm:$0xf]  ;;  %v6899_v43 = vld [vmem:[#allocation8 + $0x78] sm:$0xf0]  ;;  %v9471_v48 = vld [vmem:[#allocation8 + $0x64] sm:$0xf] }
  0x30   :  { %441 = vmatpush.bf16.msra.mxu3 %v6826_v11  ;;  %v231_v45 = vld [vmem:[#allocation2] sm:$0xff]  ;;  %v6902_v47 = vor.u32 %v9473_v42, %v6899_v43  ;;  %v6883_v52 = vld [vmem:[#allocation8 + $0x58] sm:$0xf0]  ;;  %v9474_v55 = vld [vmem:[#allocation8 + $0x74] sm:$0xf0] }
  0x31   :  { %v296_v46 = vld [vmem:[#allocation2 + $0x20] sm:$0xff]  ;;  %v232_v53 = vld [vmem:[#allocation2 + $0x8] sm:$0xff]  ;;  %v6889_v59 = vld [vmem:[#allocation8 + $0x60] sm:$0xf] }
  0x32   :  { %v6891_v49 = vld [vmem:[#allocation8 + $0x68] sm:$0xf0]  ;;  %v9469_v51 = vld [vmem:[#allocation8 + $0x54] sm:$0xf]  ;;  %v6897_v54 = vld [vmem:[#allocation8 + $0x70] sm:$0xf] }
  0x33   :  { %6764 = vmatmul.msk.f32.gmra.mxu0 %vm181_vm1, %v172_v3  ;;  %v6894_v50 = vor.u32 %v9471_v48, %v6891_v49  ;;  %v297_v56 = vld [vmem:[#allocation2 + $0x28] sm:$0xff]  ;;  %v6886_v57 = vor.u32 %v9469_v51, %v6883_v52  ;;  %v6898_v58 = vor.u32 %v9474_v55, %v6897_v54  ;;  %v9472_v60 = vld [vmem:[#allocation8 + $0x64] sm:$0xf0]  ;;  %v9467_v61 = vld [vmem:[#allocation8 + $0x44] sm:$0xf] }
  0x34   :  { %442 = vmatpush.bf16.msra.mxu3 %v6818_v14  ;;  %v6875_v62 = vld [vmem:[#allocation8 + $0x48] sm:$0xf0]  ;;  %v6890_v63 = vor.u32 %v9472_v60, %v6889_v59  ;;  %v9465_v1 = vld [vmem:[#allocation8 + $0x34] sm:$0xf]  ;;  %v6881_v2 = vld [vmem:[#allocation8 + $0x50] sm:$0xf] }
  0x35   :  { %v6878_v0 = vor.u32 %v9467_v61, %v6875_v62  ;;  %v9470_v3 = vld [vmem:[#allocation8 + $0x54] sm:$0xf0]  ;;  %v6835_v6 = vld [vmem:[#allocation8 + $0xf8] sm:$0xf0]  ;;  %v9487_v8 = vld [vmem:[#allocation8 + $0xe4] sm:$0xf] }
  0x36   :  { %v6827_v9 = vld [vmem:[#allocation8 + $0xe8] sm:$0xf0]  ;;  %v233_v10 = vld [vmem:[#allocation2 + $0x10] sm:$0xff]  ;;  %v6882_v12 = vor.u32 %v9470_v3, %v6881_v2  ;;  %v9468_v16 = vld [vmem:[#allocation8 + $0x44] sm:$0xf0] }
  0x37   :  { %v298_v11 = vld [vmem:[#allocation2 + $0x30] sm:$0xff]  ;;  %v6859_v18 = vld [vmem:[#allocation8 + $0x28] sm:$0xf0]  ;;  %v9485_v19 = vld [vmem:[#allocation8 + $0xd4] sm:$0xf] }
  0x38   :  { %443 = vmatpush.bf16.msra.mxu3 %v6810_v17  ;;  %v9463_v14 = vld [vmem:[#allocation8 + $0x24] sm:$0xf]  ;;  %v6873_v15 = vld [vmem:[#allocation8 + $0x40] sm:$0xf]  ;;  %v6830_v17 = vor.u32 %v9487_v8, %v6827_v9  ;;  %v6865_v24 = vld [vmem:[#allocation8 + $0x30] sm:$0xf] }
  0x39   :  { %v6874_v21 = vor.u32 %v9468_v16, %v6873_v15  ;;  %v6862_v22 = vor.u32 %v9463_v14, %v6859_v18  ;;  %v9466_v25 = vld [vmem:[#allocation8 + $0x34] sm:$0xf0]  ;;  %v6851_v27 = vld [vmem:[#allocation8 + $0x18] sm:$0xf0]  ;;  %v9483_v28 = vld [vmem:[#allocation8 + $0xc4] sm:$0xf] }
  0x3a   :  { %v6841_v48 = vld [vmem:[#allocation8] sm:$0xf]  ;;  %v9460_v49 = vld [vmem:[#allocation8 + $0x4] sm:$0xf0]  ;;  %v6967_v51 = vld [vmem:[#allocation8 + $0x178] sm:$0xf0] }
  0x3b   :  { %6765 = vmatmul.msk.f32.gmra.mxu0 %vm181_vm1, %v173_v4  ;;  %v6867_v4 = vld [vmem:[#allocation8 + $0x38] sm:$0xf0]  ;;  %v6842_v52 = vor.u32 %v9460_v49, %v6841_v48  ;;  %v9503_v54 = vld [vmem:[#allocation8 + $0x164] sm:$0xf]  ;;  %v6959_v55 = vld [vmem:[#allocation8 + $0x168] sm:$0xf0] }
  0x3c   :  { %444 = vmatpush.bf16.msra.mxu3 %v6802_v20  ;;  %v6870_v13 = vor.u32 %v9465_v1, %v6867_v4  ;;  %v6819_v20 = vld [vmem:[#allocation8 + $0xd8] sm:$0xf0]  ;;  %v9499_v60 = vld [vmem:[#allocation8 + $0x144] sm:$0xf]  ;;  %v6943_v61 = vld [vmem:[#allocation8 + $0x148] sm:$0xf0] }
  0x3d   :  { %v6946_v62 = vor.u32 %v9499_v60, %v6943_v61  ;;  %v9481_v2 = vld [vmem:[#allocation8 + $0xb4] sm:$0xf]  ;;  %v6803_v3 = vld [vmem:[#allocation8 + $0xb8] sm:$0xf0]  ;;  %v9495_v4 = vld [vmem:[#allocation8 + $0x124] sm:$0xf] }
  0x3e   :  { %v9479_v8 = vld [vmem:[#allocation8 + $0xa4] sm:$0xf]  ;;  %v6795_v9 = vld [vmem:[#allocation8 + $0xa8] sm:$0xf0]  ;;  %v9477_v14 = vld [vmem:[#allocation8 + $0x94] sm:$0xf] }
  0x3f   :  { %v6787_v15 = vld [vmem:[#allocation8 + $0x98] sm:$0xf0]  ;;  %v9491_v16 = vld [vmem:[#allocation8 + $0x104] sm:$0xf]  ;;  %v6911_v18 = vld [vmem:[#allocation8 + $0x108] sm:$0xf0] }
  0x40   :  { %445 = vmatpush.bf16.msra.mxu3 %v6794_v23  ;;  %v9461_v23 = vld [vmem:[#allocation8 + $0x14] sm:$0xf]  ;;  %v6957_v48 = vld [vmem:[#allocation8 + $0x160] sm:$0xf]  ;;  %v9516_v60 = vld [vmem:[#allocation8 + $0x1c4] sm:$0xf0] }
  0x43   :  { %6766 = vmatmul.msk.f32.gmra.mxu0 %vm181_vm1, %v174_v5  ;;  %v9489_v5 = vld [vmem:[#allocation8 + $0xf4] sm:$0xf] }
  0x44   :  { %446 = vmatpush.bf16.msra.mxu3 %v6786_v26  ;;  %v6838_v7 = vor.u32 %v9489_v5, %v6835_v6  ;;  %v6822_v26 = vor.u32 %v9485_v19, %v6819_v20  ;;  %v6806_v5 = vor.u32 %v9481_v2, %v6803_v3  ;;  %v6927_v6 = vld [vmem:[#allocation8 + $0x128] sm:$0xf0]  ;;  %v6914_v19 = vor.u32 %v9491_v16, %v6911_v18  ;;  %v9475_v20 = vld [vmem:[#allocation8 + $0x84] sm:$0xf]  ;;  %v6985_v16 = vld [vmem:[#allocation8 + $0x190] sm:$0xf] }
  0x45   :  { %v791_v2 = vld [vmem:[#allocation2 + $0x78] sm:$0xff] }
  0x46   :  { %459 = vmatpush.bf16.msrb.mxu0 %v6838_v7  ;;  %v6930_v7 = vor.u32 %v9495_v4, %v6927_v6  ;;  %v600_v3 = vld [vmem:[#allocation2 + $0x58] sm:$0xff]  ;;  %v7001_v4 = vld [vmem:[#allocation8 + $0x1b0] sm:$0xf] }
  0x48   :  { %447 = vmatpush.bf16.msra.mxu3 %v6778_v29  ;;  %v6811_v29 = vld [vmem:[#allocation8 + $0xc8] sm:$0xf0] }
  0x4a   :  { %460 = vmatpush.bf16.msrb.mxu0 %v6830_v17  ;;  %v6790_v17 = vor.u32 %v9477_v14, %v6787_v15  ;;  %v9498_v14 = vld [vmem:[#allocation8 + $0x134] sm:$0xf0] }
  0x4e   :  { %461 = vmatpush.bf16.msrb.mxu0 %v6822_v26 }
  0xa8   :  { %v215_v30 = vpop.f32.mrf.mxu0 }
  0xa9   :  { %v216_v39 = vadd.f32 %v10129_v33, %v215_v30  ;;  %v234_v30 = vld [vmem:[#allocation2 + $0x18] sm:$0xff] }
  0xab   :  { %v10520_v44 = vmax.f32 %v216_v39, 0.0  ;;  %v6843_v39 = vld [vmem:[#allocation8 + $0x8] sm:$0xf0] }
  0xb0   :  { %v218_v31 = vpop.f32.mrf.mxu0 }
  0xb1   :  { %v219_v37 = vadd.f32 %v10129_v33, %v218_v31  ;;  %v6866_v31 = vor.u32 %v9466_v25, %v6865_v24 }
  0xb3   :  { %v10515_v41 = vmax.f32 %v219_v37, 0.0  ;;  %v9459_v37 = vld [vmem:[#allocation8 + $0x4] sm:$0xf] }
  0xb4   :  { %v6846_v43 = vor.u32 %v9459_v37, %v6843_v39  ;;  %v9522_v37 = vld [vmem:[#allocation8 + $0x1f4] sm:$0xf0]  ;;  %v7025_v39 = vld [vmem:[#allocation8 + $0x1e0] sm:$0xf] }
  0xb8   :  { %v221_v32 = vpop.f32.mrf.mxu0 }
  0xb9   :  { %v222_v35 = vadd.f32 %v10129_v33, %v221_v32  ;;  %v299_v32 = vld [vmem:[#allocation2 + $0x38] sm:$0xff] }
  0xbb   :  { %v10510_v40 = vmax.f32 %v222_v35, 0.0  ;;  %v9464_v35 = vld [vmem:[#allocation8 + $0x24] sm:$0xf0] }
  0xc0   :  { %v224_v34 = vpop.f32.mrf.mxu0 }
  0xc1   :  { %v225_v36 = vadd.f32 %v10129_v33, %v224_v34  ;;  %v6854_v33 = vor.u32 %v9461_v23, %v6851_v27  ;;  %v6857_v34 = vld [vmem:[#allocation8 + $0x20] sm:$0xf] }
  0xc2   :  { %v6858_v42 = vor.u32 %v9464_v35, %v6857_v34  ;;  %v788_v35 = vld [vmem:[#allocation2 + $0x60] sm:$0xff] }
  0xc3   :  { %v10508_v38 = vmax.f32 %v225_v36, 0.0  ;;  %v6814_v36 = vor.u32 %v9483_v28, %v6811_v29 }
  0xc5   :  { %260 = vmatpush.msra.mxu1 %v10508_v38  ;;  %324 = vmatpush.msra.mxu2 %v10508_v38 }
  0xc6   :  { %625 = vmatpush.msrb.mxu3 %v10508_v38  ;;  %462 = vmatpush.bf16.msrb.mxu0 %v6814_v36  ;;  %v7033_v36 = vld [vmem:[#allocation8 + $0x1f0] sm:$0xf] }
  0xc7   :  { %261 = vmatpush.msra.mxu1 %v10510_v40  ;;  %325 = vmatpush.msra.mxu2 %v10510_v40 }
  0xc8   :  { %626 = vmatpush.msrb.mxu3 %v10510_v40 }
  0xc9   :  { %262 = vmatpush.msra.mxu1 %v10515_v41  ;;  %326 = vmatpush.msra.mxu2 %v10515_v41 }
  0xca   :  { %627 = vmatpush.msrb.mxu3 %v10515_v41  ;;  %463 = vmatpush.bf16.msrb.mxu0 %v6806_v5  ;;  %v9514_v5 = vld [vmem:[#allocation8 + $0x1b4] sm:$0xf0] }
  0xcb   :  { %263 = vmatpush.msra.mxu1 %v10520_v44  ;;  %327 = vmatpush.msra.mxu2 %v10520_v44  ;;  %v7002_v6 = vor.u32 %v9514_v5, %v7001_v4  ;;  %v7003_v5 = vld [vmem:[#allocation8 + $0x1b8] sm:$0xf0] }
  0xcc   :  { %628 = vmatpush.msrb.mxu3 %v10520_v44  ;;  %6767 = vmatmul.msk.f32.vlgmr.msra.gmra.mxu1 %vm235_vm2, %v231_v45  ;;  %v6849_v45 = vld [vmem:[#allocation8 + $0x10] sm:$0xf] }
  0xcd   :  { %6771 = vmatmul.msk.f32.vlgmr.msra.gmra.mxu2 %vm235_vm2, %v296_v46  ;;  %558 = vmatpush.bf16.msrb.mxu1 %v6898_v58  ;;  %v9462_v46 = vld [vmem:[#allocation8 + $0x14] sm:$0xf0]  ;;  %v6951_v58 = vld [vmem:[#allocation8 + $0x158] sm:$0xf0] }
  0xce   :  { %577 = vmatpush.bf16.msrb.mxu2 %v6902_v47  ;;  %v6850_v47 = vor.u32 %v9462_v46, %v6849_v45  ;;  %v6965_v45 = vld [vmem:[#allocation8 + $0x170] sm:$0xf]  ;;  %v9506_v46 = vld [vmem:[#allocation8 + $0x174] sm:$0xf0] }
  0xd1   :  { %559 = vmatpush.bf16.msrb.mxu1 %v6890_v63  ;;  %v9497_v63 = vld [vmem:[#allocation8 + $0x134] sm:$0xf] }
  0xd2   :  { %578 = vmatpush.bf16.msrb.mxu2 %v6894_v50  ;;  %v9505_v50 = vld [vmem:[#allocation8 + $0x174] sm:$0xf] }
  0xd4   :  { %6768 = vmatmul.msk.f32.gmra.mxu1 %vm235_vm2, %v232_v53  ;;  %v6970_v53 = vor.u32 %v9505_v50, %v6967_v51  ;;  %v9504_v50 = vld [vmem:[#allocation8 + $0x164] sm:$0xf0]  ;;  %v7017_v51 = vld [vmem:[#allocation8 + $0x1d0] sm:$0xf] }
  0xd5   :  { %6772 = vmatmul.msk.f32.gmra.mxu2 %vm235_vm2, %v297_v56  ;;  %560 = vmatpush.bf16.msrb.mxu1 %v6882_v12  ;;  %v6962_v56 = vor.u32 %v9503_v54, %v6959_v55  ;;  %v6919_v12 = vld [vmem:[#allocation8 + $0x118] sm:$0xf0]  ;;  %v597_v54 = vld [vmem:[#allocation2 + $0x40] sm:$0xff] }
  0xd6   :  { %579 = vmatpush.bf16.msrb.mxu2 %v6886_v57  ;;  %v9501_v57 = vld [vmem:[#allocation8 + $0x154] sm:$0xf]  ;;  %v6949_v55 = vld [vmem:[#allocation8 + $0x150] sm:$0xf] }
  0xd7   :  { %v6954_v59 = vor.u32 %v9501_v57, %v6951_v58  ;;  %v789_v57 = vld [vmem:[#allocation2 + $0x68] sm:$0xff] }
  0xd9   :  { %561 = vmatpush.bf16.msrb.mxu1 %v6874_v21  ;;  %v6779_v21 = vld [vmem:[#allocation8 + $0x88] sm:$0xf0] }
  0xda   :  { %580 = vmatpush.bf16.msrb.mxu2 %v6878_v0  ;;  %v6935_v0 = vld [vmem:[#allocation8 + $0x138] sm:$0xf0] }
  0xdb   :  { %v6938_v1 = vor.u32 %v9497_v63, %v6935_v0  ;;  %v598_v63 = vld [vmem:[#allocation2 + $0x48] sm:$0xff]  ;;  %v790_v0 = vld [vmem:[#allocation2 + $0x70] sm:$0xff] }
  0xdc   :  { %6769 = vmatmul.msk.f32.gmra.mxu1 %vm235_vm2, %v233_v10  ;;  %v9493_v10 = vld [vmem:[#allocation8 + $0x114] sm:$0xf] }
  0xdd   :  { %6773 = vmatmul.msk.f32.gmra.mxu2 %vm235_vm2, %v298_v11  ;;  %562 = vmatpush.bf16.msrb.mxu1 %v6866_v31  ;;  %v6798_v11 = vor.u32 %v9479_v8, %v6795_v9  ;;  %v9500_v8 = vld [vmem:[#allocation8 + $0x144] sm:$0xf0]  ;;  %v6993_v9 = vld [vmem:[#allocation8 + $0x1a0] sm:$0xf] }
  0xde   :  { %581 = vmatpush.bf16.msrb.mxu2 %v6870_v13  ;;  %v6922_v13 = vor.u32 %v9493_v10, %v6919_v12 }
  0xdf   :  { %464 = vmatpush.bf16.msrb.mxu0 %v6798_v11  ;;  %v9512_v11 = vld [vmem:[#allocation8 + $0x1a4] sm:$0xf0] }
  0xe0   :  { %v6994_v12 = vor.u32 %v9512_v11, %v6993_v9  ;;  %v9511_v11 = vld [vmem:[#allocation8 + $0x1a4] sm:$0xf] }
  0xe1   :  { %563 = vmatpush.bf16.msrb.mxu1 %v6858_v42  ;;  %v7034_v42 = vor.u32 %v9522_v37, %v7033_v36  ;;  %v9521_v36 = vld [vmem:[#allocation8 + $0x1f4] sm:$0xf] }
  0xe2   :  { %582 = vmatpush.bf16.msrb.mxu2 %v6862_v22  ;;  %v6782_v22 = vor.u32 %v9475_v20, %v6779_v21  ;;  %v9496_v20 = vld [vmem:[#allocation8 + $0x124] sm:$0xf0]  ;;  %v6977_v21 = vld [vmem:[#allocation8 + $0x180] sm:$0xf] }
  0xe3   :  { %465 = vmatpush.bf16.msrb.mxu0 %v6790_v17  ;;  %v9510_v17 = vld [vmem:[#allocation8 + $0x194] sm:$0xf0] }
  0xe4   :  { %6770 = vmatmul.msk.f32.gmra.mxu1 %vm235_vm2, %v234_v30  ;;  %v6986_v18 = vor.u32 %v9510_v17, %v6985_v16  ;;  %v9523_v17 = vld [vmem:[#allocation8 + $0x204] sm:$0xf] }
  0xe5   :  { %6774 = vmatmul.msk.f32.gmra.mxu2 %vm235_vm2, %v299_v32  ;;  %564 = vmatpush.bf16.msrb.mxu1 %v6850_v47  ;;  %v6966_v47 = vor.u32 %v9506_v46, %v6965_v45  ;;  %v7087_v45 = vld [vmem:[#allocation8 + $0x258] sm:$0xf0] }
  0xe6   :  { %583 = vmatpush.bf16.msrb.mxu2 %v6854_v33 }
  0xe7   :  { %466 = vmatpush.bf16.msrb.mxu0 %v6782_v22 }
  0xe9   :  { %565 = vmatpush.bf16.msrb.mxu1 %v6842_v52  ;;  %v9518_v52 = vld [vmem:[#allocation8 + $0x1d4] sm:$0xf0] }
  0xea   :  { %584 = vmatpush.bf16.msrb.mxu2 %v6846_v43  ;;  %v9520_v43 = vld [vmem:[#allocation8 + $0x1e4] sm:$0xf0]  ;;  %v7018_v58 = vor.u32 %v9518_v52, %v7017_v51  ;;  %v7079_v51 = vld [vmem:[#allocation8 + $0x248] sm:$0xf0] }
  0xeb   :  { %v7026_v49 = vor.u32 %v9520_v43, %v7025_v39  ;;  %741 = vmatpush.bf16.msra.mxu0 %v6966_v47  ;;  %v7035_v39 = vld [vmem:[#allocation8 + $0x1f8] sm:$0xf0]  ;;  %v9533_v43 = vld [vmem:[#allocation8 + $0x254] sm:$0xf]  ;;  %v9519_v47 = vld [vmem:[#allocation8 + $0x1e4] sm:$0xf] }
  0xec   :  { %v7090_v46 = vor.u32 %v9533_v43, %v7087_v45 }
  0xed   :  { %760 = vmatpush.bf16.msra.mxu1 %v6970_v53  ;;  %v6958_v53 = vor.u32 %v9504_v50, %v6957_v48  ;;  %v7027_v48 = vld [vmem:[#allocation8 + $0x1e8] sm:$0xf0]  ;;  %v9531_v50 = vld [vmem:[#allocation8 + $0x244] sm:$0xf] }
  0xee   :  { %816 = vmatpush.msra.mxu2 %v10508_v38  ;;  %v7082_v52 = vor.u32 %v9531_v50, %v7079_v51 }
  0xef   :  { %742 = vmatpush.bf16.msra.mxu0 %v6958_v53  ;;  %v9517_v53 = vld [vmem:[#allocation8 + $0x1d4] sm:$0xf] }
  0xf0   :  { %817 = vmatpush.msra.mxu2 %v10510_v40 }
  0xf1   :  { %761 = vmatpush.bf16.msra.mxu1 %v6962_v56  ;;  %v9502_v56 = vld [vmem:[#allocation8 + $0x154] sm:$0xf0] }
  0xf2   :  { %818 = vmatpush.msra.mxu2 %v10515_v41  ;;  %v6950_v61 = vor.u32 %v9502_v56, %v6949_v55  ;;  %v9529_v56 = vld [vmem:[#allocation8 + $0x234] sm:$0xf] }
  0xf4   :  { %819 = vmatpush.msra.mxu2 %v10520_v44  ;;  %743 = vmatpush.bf16.msra.mxu0 %v6950_v61 }
  0xf5   :  { %762 = vmatpush.bf16.msra.mxu1 %v6954_v59  ;;  %v7009_v59 = vld [vmem:[#allocation8 + $0x1c0] sm:$0xf] }
  0xf9   :  { %763 = vmatpush.bf16.msra.mxu1 %v6946_v62  ;;  %v7010_v62 = vor.u32 %v9516_v60, %v7009_v59  ;;  %v9515_v59 = vld [vmem:[#allocation8 + $0x1c4] sm:$0xf]  ;;  %v7011_v60 = vld [vmem:[#allocation8 + $0x1c8] sm:$0xf0] }
  0xfd   :  { %764 = vmatpush.bf16.msra.mxu1 %v6938_v1  ;;  %v599_v1 = vld [vmem:[#allocation2 + $0x50] sm:$0xff] }
 0x101   :  { %765 = vmatpush.bf16.msra.mxu1 %v6930_v7  ;;  %v6941_v7 = vld [vmem:[#allocation8 + $0x140] sm:$0xf] }
 0x102   :  { %v6942_v10 = vor.u32 %v9500_v8, %v6941_v7  ;;  %v9525_v7 = vld [vmem:[#allocation8 + $0x214] sm:$0xf]  ;;  %v7055_v8 = vld [vmem:[#allocation8 + $0x218] sm:$0xf0] }
 0x103   :  { %v7058_v9 = vor.u32 %v9525_v7, %v7055_v8  ;;  %v1171_v7 = vld [vmem:[#allocation2 + $0xa8] sm:$0xff]  ;;  %v1172_v8 = vld [vmem:[#allocation2 + $0xb0] sm:$0xff] }
 0x104   :  { %744 = vmatpush.bf16.msra.mxu0 %v6942_v10 }
 0x105   :  { %766 = vmatpush.bf16.msra.mxu1 %v6922_v13  ;;  %v6933_v13 = vld [vmem:[#allocation8 + $0x130] sm:$0xf] }
 0x106   :  { %v6934_v15 = vor.u32 %v9498_v14, %v6933_v13 }
 0x108   :  { %745 = vmatpush.bf16.msra.mxu0 %v6934_v15 }
 0x109   :  { %767 = vmatpush.bf16.msra.mxu1 %v6914_v19  ;;  %v6925_v19 = vld [vmem:[#allocation8 + $0x120] sm:$0xf] }
 0x10a   :  { %v6926_v22 = vor.u32 %v9496_v20, %v6925_v19 }
 0x10c   :  { %746 = vmatpush.bf16.msra.mxu0 %v6926_v22  ;;  %v6987_v22 = vld [vmem:[#allocation8 + $0x198] sm:$0xf0] }
 0x149   :  { %v265_v23 = vpop.f32.mrf.mxu1 }
 0x150   :  { %v329_v24 = vpop.f32.mrf.mxu2 }
 0x151   :  { %v268_v25 = vpop.f32.mrf.mxu1 }
 0x152   :  { %v277_v26 = vpack.c.bf16 %v268_v25, %v265_v23  ;;  %v9508_v23 = vld [vmem:[#allocation8 + $0x184] sm:$0xf0]  ;;  %v9537_v25 = vld [vmem:[#allocation8 + $0x274] sm:$0xf] }
 0x154   :  { %566 = vmatmul.bf16.vlgmr.msrb.gmra.mxu1 %v277_v26  ;;  %585 = vmatmul.bf16.vlgmr.msrb.gmra.mxu2 %v277_v26  ;;  %v7103_v26 = vld [vmem:[#allocation8 + $0x278] sm:$0xf0] }
 0x155   :  { %1007 = vmatpush.msrb.mxu1 %v10508_v38 }
 0x157   :  { %1008 = vmatpush.msrb.mxu1 %v10510_v40 }
 0x158   :  { %v332_v27 = vpop.f32.mrf.mxu2 }
 0x159   :  { %1009 = vmatpush.msrb.mxu1 %v10515_v41  ;;  %v271_v28 = vpop.f32.mrf.mxu1  ;;  %v341_v29 = vpack.c.bf16 %v332_v27, %v329_v24  ;;  %v6978_v24 = vor.u32 %v9508_v23, %v6977_v21  ;;  %v7106_v27 = vor.u32 %v9537_v25, %v7103_v26  ;;  %v9509_v21 = vld [vmem:[#allocation8 + $0x194] sm:$0xf]  ;;  %v9507_v25 = vld [vmem:[#allocation8 + $0x184] sm:$0xf]  ;;  %v6979_v26 = vld [vmem:[#allocation8 + $0x188] sm:$0xf0] }
 0x15a   :  { %v6990_v23 = vor.u32 %v9509_v21, %v6987_v22  ;;  %v9526_v21 = vld [vmem:[#allocation8 + $0x214] sm:$0xf0] }
 0x15b   :  { %448 = vmatmul.bf16.vlgmr.msra.gmra.mxu3 %v341_v29  ;;  %467 = vmatmul.bf16.vlgmr.msrb.gmra.mxu0 %v341_v29  ;;  %v9494_v29 = vld [vmem:[#allocation8 + $0x114] sm:$0xf0] }
 0x15c   :  { %1010 = vmatpush.msrb.mxu1 %v10520_v44  ;;  %932 = vmatpush.bf16.msra.mxu3 %v7034_v42  ;;  %v7038_v42 = vor.u32 %v9521_v36, %v7035_v39 }
 0x160   :  { %v335_v30 = vpop.f32.mrf.mxu2  ;;  %933 = vmatpush.bf16.msra.mxu3 %v7026_v49  ;;  %v7030_v49 = vor.u32 %v9519_v47, %v7027_v48 }
 0x161   :  { %v274_v31 = vpop.f32.mrf.mxu1 }
 0x162   :  { %v278_v32 = vpack.c.bf16 %v274_v31, %v271_v28  ;;  %v6917_v28 = vld [vmem:[#allocation8 + $0x110] sm:$0xf]  ;;  %v9535_v31 = vld [vmem:[#allocation8 + $0x264] sm:$0xf] }
 0x164   :  { %590 = vmatmul.bf16.gmra.mxu2 %v278_v32  ;;  %571 = vmatmul.bf16.gmra.mxu1 %v278_v32  ;;  %v7095_v32 = vld [vmem:[#allocation8 + $0x268] sm:$0xf0] }
 0x165   :  { %934 = vmatpush.bf16.msra.mxu3 %v7018_v58 }
 0x168   :  { %v338_v33 = vpop.f32.mrf.mxu2 }
 0x169   :  { %v342_v34 = vpack.c.bf16 %v338_v33, %v335_v30  ;;  %935 = vmatpush.bf16.msra.mxu3 %v7010_v62  ;;  %v6918_v30 = vor.u32 %v9494_v29, %v6917_v28  ;;  %v7098_v33 = vor.u32 %v9535_v31, %v7095_v32  ;;  %v7014_v62 = vor.u32 %v9515_v59, %v7011_v60  ;;  %v9536_v60 = vld [vmem:[#allocation8 + $0x264] sm:$0xf0] }
 0x16a   :  { %v6982_v28 = vor.u32 %v9507_v25, %v6979_v26  ;;  %v9524_v25 = vld [vmem:[#allocation8 + $0x204] sm:$0xf0]  ;;  %v9553_v26 = vld [vmem:[#allocation8 + $0x2f4] sm:$0xf] }
 0x16b   :  { %453 = vmatmul.bf16.gmra.mxu3 %v342_v34  ;;  %472 = vmatmul.bf16.gmra.mxu0 %v342_v34  ;;  %v6909_v34 = vld [vmem:[#allocation8 + $0x100] sm:$0xf] }
 0x16c   :  { %747 = vmatpush.bf16.msra.mxu0 %v6918_v30 }
 0x16d   :  { %936 = vmatpush.bf16.msra.mxu3 %v7002_v6 }
 0x171   :  { %937 = vmatpush.bf16.msra.mxu3 %v6994_v12  ;;  %v6995_v12 = vld [vmem:[#allocation8 + $0x1a8] sm:$0xf0] }
 0x172   :  { %v6998_v15 = vor.u32 %v9511_v11, %v6995_v12  ;;  %v9530_v11 = vld [vmem:[#allocation8 + $0x234] sm:$0xf0] }
 0x174   :  { %6971 = vmatmul.msk.f32.vlgmr.msra.gmra.mxu2 %vm235_vm2, %v788_v35  ;;  %v9492_v35 = vld [vmem:[#allocation8 + $0x104] sm:$0xf0] }
 0x175   :  { %938 = vmatpush.bf16.msra.mxu3 %v6986_v18  ;;  %v6910_v37 = vor.u32 %v9492_v35, %v6909_v34  ;;  %v7047_v18 = vld [vmem:[#allocation8 + $0x208] sm:$0xf0] }
 0x176   :  { %v7050_v19 = vor.u32 %v9523_v17, %v7047_v18  ;;  %v9528_v17 = vld [vmem:[#allocation8 + $0x224] sm:$0xf0] }
 0x177   :  { %748 = vmatpush.bf16.msra.mxu0 %v6910_v37 }
 0x179   :  { %939 = vmatpush.bf16.msra.mxu3 %v6978_v24 }
 0x17b   :  { %6903 = vmatmul.msk.f32.vlgmr.msrb.gmra.mxu3 %vm235_vm2, %v597_v54  ;;  %951 = vmatpush.bf16.msrb.mxu0 %v7038_v42  ;;  %v7019_v54 = vld [vmem:[#allocation8 + $0x1d8] sm:$0xf0] }
 0x17c   :  { %6972 = vmatmul.msk.f32.gmra.mxu2 %vm235_vm2, %v789_v57  ;;  %v7022_v55 = vor.u32 %v9517_v53, %v7019_v54  ;;  %v7071_v57 = vld [vmem:[#allocation8 + $0x238] sm:$0xf0] }
 0x17d   :  { %1142 = vmatpush.bf16.msrb.mxu3 %v7106_v27  ;;  %v7074_v58 = vor.u32 %v9529_v56, %v7071_v57  ;;  %v980_v53 = vld [vmem:[#allocation2 + $0x88] sm:$0xff]  ;;  %v981_v54 = vld [vmem:[#allocation2 + $0x90] sm:$0xff]  ;;  %v7101_v56 = vld [vmem:[#allocation8 + $0x270] sm:$0xf] }
 0x17e   :  { %v9538_v57 = vld [vmem:[#allocation8 + $0x274] sm:$0xf0] }
 0x17f   :  { %952 = vmatpush.bf16.msrb.mxu0 %v7030_v49  ;;  %v7102_v59 = vor.u32 %v9538_v57, %v7101_v56  ;;  %v7147_v56 = vld [vmem:[#allocation8 + $0x2c8] sm:$0xf0] }
 0x181   :  { %1143 = vmatpush.bf16.msrb.mxu3 %v7098_v33  ;;  %1123 = vmatpush.bf16.msrb.mxu2 %v7102_v59  ;;  %v9548_v59 = vld [vmem:[#allocation8 + $0x2c4] sm:$0xf0] }
 0x183   :  { %6904 = vmatmul.msk.f32.gmra.mxu3 %vm235_vm2, %v598_v63  ;;  %953 = vmatpush.bf16.msrb.mxu0 %v7022_v55  ;;  %v9527_v63 = vld [vmem:[#allocation8 + $0x224] sm:$0xf] }
 0x184   :  { %6973 = vmatmul.msk.f32.gmra.mxu2 %vm235_vm2, %v790_v0  ;;  %v7063_v0 = vld [vmem:[#allocation8 + $0x228] sm:$0xf0] }
 0x185   :  { %1144 = vmatpush.bf16.msrb.mxu3 %v7090_v46  ;;  %v7066_v4 = vor.u32 %v9527_v63, %v7063_v0  ;;  %v982_v55 = vld [vmem:[#allocation2 + $0x98] sm:$0xff]  ;;  %v7085_v63 = vld [vmem:[#allocation8 + $0x250] sm:$0xf]  ;;  %v9534_v0 = vld [vmem:[#allocation8 + $0x254] sm:$0xf0] }
 0x187   :  { %954 = vmatpush.bf16.msrb.mxu0 %v7014_v62 }
 0x189   :  { %1145 = vmatpush.bf16.msrb.mxu3 %v7082_v52  ;;  %v979_v52 = vld [vmem:[#allocation2 + $0x80] sm:$0xff] }
 0x18b   :  { %6905 = vmatmul.msk.f32.gmra.mxu3 %vm235_vm2, %v599_v1  ;;  %v9513_v1 = vld [vmem:[#allocation8 + $0x1b4] sm:$0xf] }
 0x18c   :  { %6974 = vmatmul.msk.f32.gmra.mxu2 %vm235_vm2, %v791_v2  ;;  %v7006_v6 = vor.u32 %v9513_v1, %v7003_v5  ;;  %v1170_v1 = vld [vmem:[#allocation2 + $0xa0] sm:$0xff]  ;;  %v9532_v5 = vld [vmem:[#allocation8 + $0x244] sm:$0xf0] }
 0x18d   :  { %1146 = vmatpush.bf16.msrb.mxu3 %v7074_v58  ;;  %v7093_v58 = vld [vmem:[#allocation8 + $0x260] sm:$0xf] }
 0x18e   :  { %955 = vmatpush.bf16.msrb.mxu0 %v7006_v6  ;;  %v7094_v62 = vor.u32 %v9536_v60, %v7093_v58  ;;  %v7145_v58 = vld [vmem:[#allocation8 + $0x2c0] sm:$0xf]  ;;  %v9545_v60 = vld [vmem:[#allocation8 + $0x2b4] sm:$0xf] }
 0x190   :  { %1124 = vmatpush.bf16.msrb.mxu2 %v7094_v62  ;;  %v7146_v62 = vor.u32 %v9548_v59, %v7145_v58 }
 0x191   :  { %1147 = vmatpush.bf16.msrb.mxu3 %v7066_v4  ;;  %v7077_v4 = vld [vmem:[#allocation8 + $0x240] sm:$0xf] }
 0x192   :  { %956 = vmatpush.bf16.msrb.mxu0 %v6998_v15  ;;  %v7078_v6 = vor.u32 %v9532_v5, %v7077_v4  ;;  %v7061_v15 = vld [vmem:[#allocation8 + $0x220] sm:$0xf]  ;;  %v9546_v4 = vld [vmem:[#allocation8 + $0x2b4] sm:$0xf0] }
 0x193   :  { %6906 = vmatmul.msk.f32.gmra.mxu3 %vm235_vm2, %v600_v3  ;;  %v7062_v18 = vor.u32 %v9528_v17, %v7061_v15  ;;  %v9544_v15 = vld [vmem:[#allocation8 + $0x2a4] sm:$0xf0]  ;;  %v9541_v17 = vld [vmem:[#allocation8 + $0x294] sm:$0xf] }
 0x195   :  { %1148 = vmatpush.bf16.msrb.mxu3 %v7058_v9  ;;  %v1173_v9 = vld [vmem:[#allocation2 + $0xb8] sm:$0xff] }
 0x196   :  { %957 = vmatpush.bf16.msrb.mxu0 %v6990_v23  ;;  %v7045_v23 = vld [vmem:[#allocation8 + $0x200] sm:$0xf] }
 0x199   :  { %1149 = vmatpush.bf16.msrb.mxu3 %v7050_v19  ;;  %v7053_v19 = vld [vmem:[#allocation8 + $0x210] sm:$0xf] }
 0x19a   :  { %958 = vmatpush.bf16.msrb.mxu0 %v6982_v28  ;;  %v7054_v22 = vor.u32 %v9526_v21, %v7053_v19  ;;  %v7171_v28 = vld [vmem:[#allocation8 + $0x2f8] sm:$0xf0] }
 0x19b   :  { %v7123_v19 = vld [vmem:[#allocation8 + $0x298] sm:$0xf0] }
 0x1d1   :  { %v567_v3 = vpop.f32.mrf.mxu1 }
 0x1d7   :  { %v10552_v61 = vpop.f32.mrf.mxu2 }
 0x1d8   :  { %v10554_v2 = vpop.f32.mrf.mxu0 }
 0x1d9   :  { %v10562_v20 = vpop.f32.mrf.mxu1 }
 0x1de   :  { %v449_v10 = vpop.f32.mrf.mxu3 }
 0x1df   :  { %v10556_v13 = vadd.f32 %v567_v3, %v449_v10  ;;  %v10558_v14 = vpop.f32.mrf.mxu2  ;;  %v7086_v3 = vor.u32 %v9534_v0, %v7085_v63  ;;  %v7069_v10 = vld [vmem:[#allocation8 + $0x230] sm:$0xf]  ;;  %v7139_v63 = vld [vmem:[#allocation8 + $0x2b8] sm:$0xf0] }
 0x1e0   :  { %v10560_v16 = vpop.f32.mrf.mxu0  ;;  %v7070_v12 = vor.u32 %v9530_v11, %v7069_v10  ;;  %v7142_v0 = vor.u32 %v9545_v60, %v7139_v63  ;;  %v9563_v63 = vld [vmem:[#allocation8 + $0x344] sm:$0xf] }
 0x1e1   :  { %v572_v31 = vpop.f32.mrf.mxu1  ;;  %1125 = vmatpush.bf16.msrb.mxu2 %v7086_v3  ;;  %v7137_v3 = vld [vmem:[#allocation8 + $0x2b0] sm:$0xf] }
 0x1e5   :  { %1126 = vmatpush.bf16.msrb.mxu2 %v7078_v6 }
 0x1e6   :  { %v10564_v24 = vpop.f32.mrf.mxu3 }
 0x1e7   :  { %v591_v27 = vpop.f32.mrf.mxu2 }
 0x1e8   :  { %v473_v29 = vpop.f32.mrf.mxu0 }
 0x1e9   :  { %v10566_v30 = vadd.f32 %v591_v27, %v473_v29  ;;  %1127 = vmatpush.bf16.msrb.mxu2 %v7070_v12  ;;  %v7046_v27 = vor.u32 %v9524_v25, %v7045_v23  ;;  %v7174_v29 = vor.u32 %v9553_v26, %v7171_v28  ;;  %v7129_v12 = vld [vmem:[#allocation8 + $0x2a0] sm:$0xf]  ;;  %v7121_v25 = vld [vmem:[#allocation8 + $0x290] sm:$0xf]  ;;  %v9542_v26 = vld [vmem:[#allocation8 + $0x294] sm:$0xf0] }
 0x1ea   :  { %v7122_v28 = vor.u32 %v9542_v26, %v7121_v25 }
 0x1ed   :  { %1128 = vmatpush.bf16.msrb.mxu2 %v7062_v18  ;;  %v7130_v18 = vor.u32 %v9544_v15, %v7129_v12 }
 0x1ee   :  { %v454_v32 = vpop.f32.mrf.mxu3 }
 0x1ef   :  { %v10568_v33 = vadd.f32 %v572_v31, %v454_v32  ;;  %v10570_v34 = vpop.f32.mrf.mxu2  ;;  %v7169_v31 = vld [vmem:[#allocation8 + $0x2f0] sm:$0xf]  ;;  %v9554_v32 = vld [vmem:[#allocation8 + $0x2f4] sm:$0xf0] }
 0x1f1   :  { %1129 = vmatpush.bf16.msrb.mxu2 %v7054_v22  ;;  %v7126_v22 = vor.u32 %v9541_v17, %v7123_v19  ;;  %v7183_v19 = vld [vmem:[#allocation8 + $0x308] sm:$0xf0] }
 0x1f5   :  { %1130 = vmatpush.bf16.msrb.mxu2 %v7046_v27 }
 0x1f6   :  { %v10572_v35 = vpop.f32.mrf.mxu3 }
 0x1f7   :  { %v821_v36 = vpop.f32.mrf.mxu2 }
 0x1f9   :  { %1333 = vmatpush.bf16.msra.mxu2 %v7174_v29  ;;  %v9539_v29 = vld [vmem:[#allocation8 + $0x284] sm:$0xf] }
 0x1fe   :  { %v630_v37 = vpop.f32.mrf.mxu3 }
 0x1ff   :  { %v824_v39 = vpop.f32.mrf.mxu2 }
 0x200   :  { %v833_v42 = vpack.c.bf16 %v824_v39, %v821_v36  ;;  %v7170_v36 = vor.u32 %v9554_v32, %v7169_v31  ;;  %v7163_v39 = vld [vmem:[#allocation8 + $0x2e8] sm:$0xf0] }
 0x201   :  { %v7115_v31 = vld [vmem:[#allocation8 + $0x288] sm:$0xf0] }
 0x202   :  { %940 = vmatmul.bf16.vlgmr.msra.gmra.mxu3 %v833_v42  ;;  %v7118_v32 = vor.u32 %v9539_v29, %v7115_v31 }
 0x203   :  { %1389 = vmatpush.msra.mxu3 %v10508_v38 }
 0x205   :  { %1390 = vmatpush.msra.mxu3 %v10510_v40 }
 0x206   :  { %v633_v43 = vpop.f32.mrf.mxu3 }
 0x207   :  { %v642_v45 = vpack.c.bf16 %v633_v43, %v630_v37  ;;  %1391 = vmatpush.msra.mxu3 %v10515_v41  ;;  %v827_v46 = vpop.f32.mrf.mxu2  ;;  %v9551_v37 = vld [vmem:[#allocation8 + $0x2e4] sm:$0xf]  ;;  %v7161_v43 = vld [vmem:[#allocation8 + $0x2e0] sm:$0xf] }
 0x209   :  { %749 = vmatmul.bf16.vlgmr.msra.gmra.mxu0 %v642_v45  ;;  %768 = vmatmul.bf16.vlgmr.msra.gmra.mxu1 %v642_v45  ;;  %v9552_v45 = vld [vmem:[#allocation8 + $0x2e4] sm:$0xf0] }
 0x20a   :  { %1198 = vmatpush.msra.mxu0 %v10508_v38  ;;  %1392 = vmatpush.msra.mxu3 %v10520_v44 }
 0x20b   :  { %1314 = vmatpush.bf16.msra.mxu1 %v7170_v36  ;;  %v7113_v36 = vld [vmem:[#allocation8 + $0x280] sm:$0xf] }
 0x20c   :  { %1199 = vmatpush.msra.mxu0 %v10510_v40 }
 0x20e   :  { %1200 = vmatpush.msra.mxu0 %v10515_v41  ;;  %v636_v47 = vpop.f32.mrf.mxu3 }
 0x20f   :  { %v830_v48 = vpop.f32.mrf.mxu2 }
 0x210   :  { %1201 = vmatpush.msra.mxu0 %v10520_v44  ;;  %v834_v49 = vpack.c.bf16 %v830_v48, %v827_v46  ;;  %v9549_v46 = vld [vmem:[#allocation8 + $0x2d4] sm:$0xf]  ;;  %v7155_v48 = vld [vmem:[#allocation8 + $0x2d8] sm:$0xf0] }
 0x212   :  { %945 = vmatmul.bf16.gmra.mxu3 %v834_v49 }
 0x216   :  { %v639_v50 = vpop.f32.mrf.mxu3 }
 0x217   :  { %v643_v51 = vpack.c.bf16 %v639_v50, %v636_v47  ;;  %v7162_v47 = vor.u32 %v9552_v45, %v7161_v43  ;;  %v7153_v50 = vld [vmem:[#allocation8 + $0x2d0] sm:$0xf]  ;;  %v7239_v43 = vld [vmem:[#allocation8 + $0x378] sm:$0xf0] }
 0x219   :  { %754 = vmatmul.bf16.gmra.mxu0 %v643_v51  ;;  %773 = vmatmul.bf16.gmra.mxu1 %v643_v51  ;;  %v9550_v51 = vld [vmem:[#allocation8 + $0x2d4] sm:$0xf0] }
 0x21a   :  { %1315 = vmatpush.bf16.msra.mxu1 %v7162_v47 }
 0x229   :  { %959 = vmatmul.bf16.vlgmr.msrb.gmra.mxu0 %v833_v42  ;;  %7039 = vmatmul.msk.f32.vlgmr.msrb.gmra.mxu1 %vm235_vm2, %v979_v52  ;;  %v7166_v42 = vor.u32 %v9551_v37, %v7163_v39  ;;  %v10590_v52 = vpop.f32.mrf.mxu0  ;;  %v9540_v37 = vld [vmem:[#allocation8 + $0x284] sm:$0xf0] }
 0x22a   :  { %v7114_v39 = vor.u32 %v9540_v37, %v7113_v36 }
 0x22b   :  { %1334 = vmatpush.bf16.msra.mxu2 %v7166_v42  ;;  %v9569_v42 = vld [vmem:[#allocation8 + $0x374] sm:$0xf] }
 0x22c   :  { %v7242_v45 = vor.u32 %v9569_v42, %v7239_v43  ;;  %v1361_v42 = vld [vmem:[#allocation2 + $0xc0] sm:$0xff] }
 0x231   :  { %7040 = vmatmul.msk.f32.gmra.mxu1 %vm235_vm2, %v980_v53  ;;  %v10592_v53 = vpop.f32.mrf.mxu1 }
 0x239   :  { %964 = vmatmul.bf16.gmra.mxu0 %v834_v49  ;;  %7041 = vmatmul.msk.f32.gmra.mxu1 %vm235_vm2, %v981_v54  ;;  %v7158_v49 = vor.u32 %v9549_v46, %v7155_v48  ;;  %v7154_v54 = vor.u32 %v9550_v51, %v7153_v50  ;;  %v7231_v50 = vld [vmem:[#allocation8 + $0x368] sm:$0xf0] }
 0x23b   :  { %1335 = vmatpush.bf16.msra.mxu2 %v7158_v49  ;;  %1316 = vmatpush.bf16.msra.mxu1 %v7154_v54  ;;  %v9567_v49 = vld [vmem:[#allocation8 + $0x364] sm:$0xf] }
 0x23f   :  { %1317 = vmatpush.bf16.msra.mxu1 %v7146_v62 }
 0x241   :  { %7042 = vmatmul.msk.f32.gmra.mxu1 %vm235_vm2, %v982_v55  ;;  %v9547_v55 = vld [vmem:[#allocation8 + $0x2c4] sm:$0xf] }
 0x242   :  { %v7150_v57 = vor.u32 %v9547_v55, %v7147_v56  ;;  %v7234_v55 = vor.u32 %v9567_v49, %v7231_v50  ;;  %v9565_v56 = vld [vmem:[#allocation8 + $0x354] sm:$0xf]  ;;  %v1364_v49 = vld [vmem:[#allocation2 + $0xd8] sm:$0xff]  ;;  %v7237_v50 = vld [vmem:[#allocation8 + $0x370] sm:$0xf] }
 0x244   :  { %1336 = vmatpush.bf16.msra.mxu2 %v7150_v57  ;;  %v7223_v57 = vld [vmem:[#allocation8 + $0x358] sm:$0xf0] }
 0x245   :  { %v7226_v59 = vor.u32 %v9565_v56, %v7223_v57  ;;  %v7229_v56 = vld [vmem:[#allocation8 + $0x360] sm:$0xf]  ;;  %v9568_v57 = vld [vmem:[#allocation8 + $0x364] sm:$0xf0] }
 0x248   :  { %1337 = vmatpush.bf16.msra.mxu2 %v7142_v0  ;;  %v7215_v0 = vld [vmem:[#allocation8 + $0x348] sm:$0xf0] }
 0x249   :  { %7107 = vmatmul.msk.f32.vlgmr.msra.gmra.mxu0 %vm235_vm2, %v1170_v1 }
 0x251   :  { %7108 = vmatmul.msk.f32.gmra.mxu0 %vm235_vm2, %v1171_v7  ;;  %v7138_v7 = vor.u32 %v9546_v4, %v7137_v3  ;;  %v7207_v3 = vld [vmem:[#allocation8 + $0x338] sm:$0xf0] }
 0x253   :  { %1318 = vmatpush.bf16.msra.mxu1 %v7138_v7  ;;  %v9559_v7 = vld [vmem:[#allocation8 + $0x324] sm:$0xf] }
 0x257   :  { %1319 = vmatpush.bf16.msra.mxu1 %v7130_v18  ;;  %v9555_v18 = vld [vmem:[#allocation8 + $0x304] sm:$0xf] }
 0x258   :  { %v7186_v25 = vor.u32 %v9555_v18, %v7183_v19  ;;  %v7189_v19 = vld [vmem:[#allocation8 + $0x310] sm:$0xf] }
 0x259   :  { %7109 = vmatmul.msk.f32.gmra.mxu0 %vm235_vm2, %v1172_v8  ;;  %v9543_v8 = vld [vmem:[#allocation8 + $0x2a4] sm:$0xf] }
 0x25b   :  { %1320 = vmatpush.bf16.msra.mxu1 %v7122_v28 }
 0x25f   :  { %1321 = vmatpush.bf16.msra.mxu1 %v7114_v39 }
 0x261   :  { %7110 = vmatmul.msk.f32.gmra.mxu0 %vm235_vm2, %v1173_v9  ;;  %v7131_v9 = vld [vmem:[#allocation8 + $0x2a8] sm:$0xf0] }
 0x262   :  { %v7134_v11 = vor.u32 %v9543_v8, %v7131_v9  ;;  %v7199_v8 = vld [vmem:[#allocation8 + $0x328] sm:$0xf0]  ;;  %v9557_v9 = vld [vmem:[#allocation8 + $0x314] sm:$0xf] }
 0x263   :  { %1524 = vmatpush.bf16.msrb.mxu1 %v7242_v45  ;;  %v1362_v45 = vld [vmem:[#allocation2 + $0xc8] sm:$0xff] }
 0x264   :  { %1338 = vmatpush.bf16.msra.mxu2 %v7134_v11  ;;  %v7191_v11 = vld [vmem:[#allocation8 + $0x318] sm:$0xf0] }
 0x265   :  { %v7194_v12 = vor.u32 %v9557_v9, %v7191_v11  ;;  %v9560_v11 = vld [vmem:[#allocation8 + $0x324] sm:$0xf0] }
 0x267   :  { %1525 = vmatpush.bf16.msrb.mxu1 %v7234_v55 }
 0x268   :  { %1339 = vmatpush.bf16.msra.mxu2 %v7126_v22 }
 0x26b   :  { %1526 = vmatpush.bf16.msrb.mxu1 %v7226_v59  ;;  %v7230_v59 = vor.u32 %v9568_v57, %v7229_v56  ;;  %v9582_v56 = vld [vmem:[#allocation8 + $0x3d4] sm:$0xf0]  ;;  %v9581_v57 = vld [vmem:[#allocation8 + $0x3d4] sm:$0xf] }
 0x26c   :  { %1340 = vmatpush.bf16.msra.mxu2 %v7118_v32 }
 0x285   :  { %v941_v1 = vpop.f32.mrf.mxu3 }
 0x286   :  { %v750_v5 = vpop.f32.mrf.mxu0  ;;  %v10594_v6 = vpop.f32.mrf.mxu1 }
 0x287   :  { %v779_v10 = vadd.f32 %v750_v5, %v10556_v13 }
 0x289   :  { %v10597_v21 = vadd.f32 %v941_v1, %v779_v10  ;;  %v7218_v1 = vor.u32 %v9563_v63, %v7215_v0  ;;  %v7202_v10 = vor.u32 %v9559_v7, %v7199_v8  ;;  %v7221_v63 = vld [vmem:[#allocation8 + $0x350] sm:$0xf]  ;;  %v9566_v0 = vld [vmem:[#allocation8 + $0x354] sm:$0xf0] }
 0x28a   :  { %v7205_v7 = vld [vmem:[#allocation8 + $0x330] sm:$0xf]  ;;  %v9562_v8 = vld [vmem:[#allocation8 + $0x334] sm:$0xf0] }
 0x28b   :  { %1527 = vmatpush.bf16.msrb.mxu1 %v7218_v1  ;;  %v7222_v1 = vor.u32 %v9566_v0, %v7221_v63  ;;  %v7206_v9 = vor.u32 %v9562_v8, %v7205_v7  ;;  %v7291_v0 = vld [vmem:[#allocation8 + $0x3d8] sm:$0xf0]  ;;  %v9579_v7 = vld [vmem:[#allocation8 + $0x3c4] sm:$0xf] }
 0x28d   :  { %v10599_v23 = vpop.f32.mrf.mxu3 }
 0x28e   :  { %v10601_v27 = vpop.f32.mrf.mxu0  ;;  %v10603_v13 = vpop.f32.mrf.mxu1 }
 0x295   :  { %v946_v46 = vpop.f32.mrf.mxu3 }
 0x296   :  { %v755_v47 = vpop.f32.mrf.mxu0  ;;  %v774_v48 = vpop.f32.mrf.mxu1 }
 0x297   :  { %v783_v51 = vadd.f32 %v755_v47, %v10568_v33  ;;  %v10607_v54 = vadd.f32 %v774_v48, %v10566_v30  ;;  %v9561_v33 = vld [vmem:[#allocation8 + $0x334] sm:$0xf]  ;;  %v1363_v48 = vld [vmem:[#allocation2 + $0xd0] sm:$0xff] }
 0x298   :  { %v7210_v30 = vor.u32 %v9561_v33, %v7207_v3  ;;  %v7213_v33 = vld [vmem:[#allocation8 + $0x340] sm:$0xf]  ;;  %v9564_v3 = vld [vmem:[#allocation8 + $0x344] sm:$0xf0] }
 0x299   :  { %v10609_v58 = vadd.f32 %v946_v46, %v783_v51  ;;  %v9570_v51 = vld [vmem:[#allocation8 + $0x374] sm:$0xf0] }
 0x29a   :  { %1528 = vmatpush.bf16.msrb.mxu1 %v7210_v30  ;;  %v7238_v55 = vor.u32 %v9570_v51, %v7237_v50  ;;  %v7214_v30 = vor.u32 %v9564_v3, %v7213_v33  ;;  %v7281_v3 = vld [vmem:[#allocation8 + $0x3c0] sm:$0xf] }
 0x29c   :  { %1505 = vmatpush.bf16.msrb.mxu0 %v7238_v55  ;;  %v7289_v55 = vld [vmem:[#allocation8 + $0x3d0] sm:$0xf] }
 0x29d   :  { %v7290_v63 = vor.u32 %v9582_v56, %v7289_v55  ;;  %v9572_v55 = vld [vmem:[#allocation8 + $0x384] sm:$0xf0]  ;;  %v9571_v56 = vld [vmem:[#allocation8 + $0x384] sm:$0xf] }
 0x29e   :  { %v10611_v60 = vpop.f32.mrf.mxu0  ;;  %v10613_v62 = vpop.f32.mrf.mxu1  ;;  %1529 = vmatpush.bf16.msrb.mxu1 %v7202_v10  ;;  %v7197_v10 = vld [vmem:[#allocation8 + $0x320] sm:$0xf] }
 0x2a0   :  { %1506 = vmatpush.bf16.msrb.mxu0 %v7230_v59  ;;  %v594_v59 = vadd.f32 %v10570_v34, %v10590_v52  ;;  %v570_v34 = vadd.f32 %v10562_v20, %v10564_v24 }
 0x2a2   :  { %1530 = vmatpush.bf16.msrb.mxu1 %v7194_v12  ;;  %v7198_v12 = vor.u32 %v9560_v11, %v7197_v10  ;;  %v786_v33 = vadd.f32 %v10613_v62, %v594_v59  ;;  %v7283_v10 = vld [vmem:[#allocation8 + $0x3c8] sm:$0xf0] }
 0x2a3   :  { %v7251_v59 = vld [vmem:[#allocation8 + $0x388] sm:$0xf0] }
 0x2a4   :  { %1507 = vmatpush.bf16.msrb.mxu0 %v7222_v1  ;;  %v7294_v1 = vor.u32 %v9581_v57, %v7291_v0  ;;  %v7254_v0 = vor.u32 %v9571_v56, %v7251_v59  ;;  %v9596_v56 = vld [vmem:[#allocation8 + $0x444] sm:$0xf0] }
 0x2a6   :  { %v10615_v4 = vpop.f32.mrf.mxu0  ;;  %v1012_v5 = vpop.f32.mrf.mxu1  ;;  %1531 = vmatpush.bf16.msrb.mxu1 %v7186_v25  ;;  %v589_v25 = vadd.f32 %v10558_v14, %v10560_v16  ;;  %v7307_v14 = vld [vmem:[#allocation8 + $0x3f8] sm:$0xf0] }
 0x2a8   :  { %1508 = vmatpush.bf16.msrb.mxu0 %v7214_v30  ;;  %v9580_v30 = vld [vmem:[#allocation8 + $0x3c4] sm:$0xf0] }
 0x2ac   :  { %1509 = vmatpush.bf16.msrb.mxu0 %v7206_v9  ;;  %v7282_v9 = vor.u32 %v9580_v30, %v7281_v3 }
 0x2ae   :  { %v10617_v15 = vpop.f32.mrf.mxu0  ;;  %v1015_v17 = vpop.f32.mrf.mxu1 }
 0x2af   :  { %v1024_v22 = vpack.c.bf16 %v1015_v17, %v1012_v5  ;;  %v10639_v5 = vpop.f32.mrf.mxu3 }
 0x2b0   :  { %1510 = vmatpush.bf16.msrb.mxu0 %v7198_v12 }
 0x2b1   :  { %1131 = vmatmul.bf16.vlgmr.msrb.gmra.mxu2 %v1024_v22  ;;  %1150 = vmatmul.bf16.vlgmr.msrb.gmra.mxu3 %v1024_v22  ;;  %v9558_v22 = vld [vmem:[#allocation8 + $0x314] sm:$0xf0] }
 0x2b2   :  { %1580 = vmatpush.msrb.mxu2 %v10508_v38 }
 0x2b4   :  { %1581 = vmatpush.msrb.mxu2 %v10510_v40 }
 0x2b6   :  { %1582 = vmatpush.msrb.mxu2 %v10515_v41  ;;  %v10622_v26 = vpop.f32.mrf.mxu0  ;;  %v1018_v28 = vpop.f32.mrf.mxu1 }
 0x2b8   :  { %1583 = vmatpush.msrb.mxu2 %v10520_v44 }
 0x2be   :  { %v10625_v29 = vpop.f32.mrf.mxu0  ;;  %v1021_v31 = vpop.f32.mrf.mxu1 }
 0x2bf   :  { %v1025_v32 = vpack.c.bf16 %v1021_v31, %v1018_v28  ;;  %v7190_v28 = vor.u32 %v9558_v22, %v7189_v19  ;;  %v782_v31 = vadd.f32 %v10603_v13, %v589_v25  ;;  %v7297_v13 = vld [vmem:[#allocation8 + $0x3e0] sm:$0xf]  ;;  %v977_v8 = vadd.f32 %v10625_v29, %v786_v33  ;;  %v7273_v22 = vld [vmem:[#allocation8 + $0x3b0] sm:$0xf]  ;;  %v9578_v25 = vld [vmem:[#allocation8 + $0x3b4] sm:$0xf0] }
 0x2c0   :  { %v7286_v19 = vor.u32 %v9579_v7, %v7283_v10  ;;  %v781_v29 = vadd.f32 %v10601_v27, %v570_v34  ;;  %v975_v33 = vadd.f32 %v10622_v26, %v10607_v54  ;;  %v1744_v26 = vld [vmem:[#allocation2 + $0x108] sm:$0xff] }
 0x2c1   :  { %1136 = vmatmul.bf16.gmra.mxu2 %v1025_v32  ;;  %1155 = vmatmul.bf16.gmra.mxu3 %v1025_v32  ;;  %v7181_v32 = vld [vmem:[#allocation8 + $0x300] sm:$0xf] }
 0x2c2   :  { %1511 = vmatpush.bf16.msrb.mxu0 %v7190_v28  ;;  %v9577_v28 = vld [vmem:[#allocation8 + $0x3b4] sm:$0xf]  ;;  %v972_v20 = vadd.f32 %v10599_v23, %v781_v29  ;;  %v7249_v23 = vld [vmem:[#allocation8 + $0x380] sm:$0xf] }
 0x2c3   :  { %v7250_v57 = vor.u32 %v9572_v55, %v7249_v23  ;;  %v1745_v29 = vld [vmem:[#allocation2 + $0x110] sm:$0xff] }
 0x2c4   :  { %v7349_v55 = vld [vmem:[#allocation8 + $0x440] sm:$0xf] }
 0x2c5   :  { %v7350_v59 = vor.u32 %v9596_v56, %v7349_v55 }
 0x2c6   :  { %v1203_v36 = vpop.f32.mrf.mxu0 }
 0x2ce   :  { %v1206_v37 = vpop.f32.mrf.mxu0 }
 0x2cf   :  { %v1215_v39 = vpack.c.bf16 %v1206_v37, %v1203_v36  ;;  %v9556_v36 = vld [vmem:[#allocation8 + $0x304] sm:$0xf0]  ;;  %v973_v37 = vadd.f32 %v10617_v15, %v782_v31  ;;  %v7299_v15 = vld [vmem:[#allocation8 + $0x3e8] sm:$0xf0]  ;;  %v7274_v31 = vor.u32 %v9578_v25, %v7273_v22 }
 0x2d0   :  { %v1743_v25 = vld [vmem:[#allocation2 + $0x100] sm:$0xff] }
 0x2d1   :  { %1322 = vmatmul.bf16.vlgmr.msra.gmra.mxu1 %v1215_v39  ;;  %1341 = vmatmul.bf16.vlgmr.msra.gmra.mxu2 %v1215_v39  ;;  %v7182_v39 = vor.u32 %v9556_v36, %v7181_v32  ;;  %v7275_v32 = vld [vmem:[#allocation8 + $0x3b8] sm:$0xf0] }
 0x2d2   :  { %7175 = vmatmul.msk.f32.vlgmr.msra.gmra.mxu3 %vm235_vm2, %v1361_v42  ;;  %1771 = vmatpush.msra.mxu1 %v10508_v38  ;;  %v1552_v38 = vld [vmem:[#allocation2 + $0xe0] sm:$0xff]  ;;  %v7278_v36 = vor.u32 %v9577_v28, %v7275_v32 }
 0x2d3   :  { %1512 = vmatpush.bf16.msrb.mxu0 %v7182_v39  ;;  %v9576_v39 = vld [vmem:[#allocation8 + $0x3a4] sm:$0xf0]  ;;  %v7373_v32 = vld [vmem:[#allocation8 + $0x470] sm:$0xf] }
 0x2d4   :  { %1772 = vmatpush.msra.mxu1 %v10510_v40  ;;  %v1553_v40 = vld [vmem:[#allocation2 + $0xe8] sm:$0xff] }
 0x2d6   :  { %1773 = vmatpush.msra.mxu1 %v10515_v41  ;;  %v1209_v43 = vpop.f32.mrf.mxu0  ;;  %v1554_v41 = vld [vmem:[#allocation2 + $0xf0] sm:$0xff] }
 0x2d8   :  { %1774 = vmatpush.msra.mxu1 %v10520_v44  ;;  %v1555_v44 = vld [vmem:[#allocation2 + $0xf8] sm:$0xff] }
 0x2da   :  { %7176 = vmatmul.msk.f32.gmra.mxu3 %vm235_vm2, %v1362_v45 }
 0x2de   :  { %v1212_v46 = vpop.f32.mrf.mxu0 }
 0x2df   :  { %v1216_v47 = vpack.c.bf16 %v1212_v46, %v1209_v43  ;;  %v7305_v46 = vld [vmem:[#allocation8 + $0x3f0] sm:$0xf] }
 0x2e1   :  { %1327 = vmatmul.bf16.gmra.mxu1 %v1216_v47  ;;  %1346 = vmatmul.bf16.gmra.mxu2 %v1216_v47  ;;  %v9586_v47 = vld [vmem:[#allocation8 + $0x3f4] sm:$0xf0] }
 0x2e2   :  { %7177 = vmatmul.msk.f32.gmra.mxu3 %vm235_vm2, %v1363_v48  ;;  %v9585_v48 = vld [vmem:[#allocation8 + $0x3f4] sm:$0xf] }
 0x2e3   :  { %v7310_v16 = vor.u32 %v9585_v48, %v7307_v14  ;;  %v9574_v14 = vld [vmem:[#allocation8 + $0x394] sm:$0xf0] }
 0x2e5   :  { %1715 = vmatpush.bf16.msra.mxu0 %v7310_v16  ;;  %v9573_v16 = vld [vmem:[#allocation8 + $0x394] sm:$0xf] }
 0x2ea   :  { %7178 = vmatmul.msk.f32.gmra.mxu3 %vm235_vm2, %v1364_v49  ;;  %v7306_v49 = vor.u32 %v9586_v47, %v7305_v46  ;;  %v7267_v46 = vld [vmem:[#allocation8 + $0x3a8] sm:$0xf0] }
 0x2ec   :  { %1696 = vmatpush.bf16.msrb.mxu3 %v7306_v49  ;;  %v7257_v49 = vld [vmem:[#allocation8 + $0x390] sm:$0xf] }
 0x2f1   :  { %7243 = vmatmul.msk.f32.vlgmr.msrb.gmra.mxu2 %vm235_vm2, %v1552_v38  ;;  %v9584_v38 = vld [vmem:[#allocation8 + $0x3e4] sm:$0xf0] }
 0x2f9   :  { %7244 = vmatmul.msk.f32.gmra.mxu2 %vm235_vm2, %v1553_v40  ;;  %v9583_v40 = vld [vmem:[#allocation8 + $0x3e4] sm:$0xf] }
 0x2fa   :  { %v7302_v51 = vor.u32 %v9583_v40, %v7299_v15  ;;  %v7259_v40 = vld [vmem:[#allocation8 + $0x398] sm:$0xf0] }
 0x2fb   :  { %v7262_v15 = vor.u32 %v9573_v16, %v7259_v40  ;;  %v7367_v16 = vld [vmem:[#allocation8 + $0x468] sm:$0xf0]  ;;  %v9597_v40 = vld [vmem:[#allocation8 + $0x454] sm:$0xf] }
 0x2fc   :  { %1716 = vmatpush.bf16.msra.mxu0 %v7302_v51 }
 0x300   :  { %1717 = vmatpush.bf16.msra.mxu0 %v7294_v1 }
 0x301   :  { %7245 = vmatmul.msk.f32.gmra.mxu2 %vm235_vm2, %v1554_v41  ;;  %v7298_v41 = vor.u32 %v9584_v38, %v7297_v13  ;;  %v7258_v38 = vor.u32 %v9574_v14, %v7257_v49 }
 0x303   :  { %1697 = vmatpush.bf16.msrb.mxu3 %v7298_v41 }
 0x304   :  { %1718 = vmatpush.bf16.msra.mxu0 %v7286_v19 }
 0x307   :  { %1698 = vmatpush.bf16.msrb.mxu3 %v7290_v63 }
 0x308   :  { %1719 = vmatpush.bf16.msra.mxu0 %v7278_v36  ;;  %v9602_v36 = vld [vmem:[#allocation8 + $0x474] sm:$0xf0] }
 0x309   :  { %7246 = vmatmul.msk.f32.gmra.mxu2 %vm235_vm2, %v1555_v44 }
 0x30b   :  { %1699 = vmatpush.bf16.msrb.mxu3 %v7282_v9 }
 0x30f   :  { %1700 = vmatpush.bf16.msrb.mxu3 %v7274_v31  ;;  %v1746_v31 = vld [vmem:[#allocation2 + $0x118] sm:$0xff] }
 0x334   :  { %v10641_v17 = vpop.f32.mrf.mxu2  ;;  %v10643_v18 = vpop.f32.mrf.mxu3 }
 0x33c   :  { %v10649_v42 = vpop.f32.mrf.mxu2  ;;  %v1153_v43 = vpop.f32.mrf.mxu3 }
 0x33d   :  { %v10651_v45 = vadd.f32 %v1153_v43, %v973_v37  ;;  %v7265_v37 = vld [vmem:[#allocation8 + $0x3a0] sm:$0xf]  ;;  %v9575_v43 = vld [vmem:[#allocation8 + $0x3a4] sm:$0xf]  ;;  %v1163_v27 = vadd.f32 %v10649_v42, %v972_v20 }
 0x33e   :  { %v7266_v24 = vor.u32 %v9576_v39, %v7265_v37  ;;  %v7270_v48 = vor.u32 %v9575_v43, %v7267_v46  ;;  %v9601_v37 = vld [vmem:[#allocation8 + $0x474] sm:$0xf]  ;;  %v7374_v39 = vor.u32 %v9602_v36, %v7373_v32  ;;  %v7375_v43 = vld [vmem:[#allocation8 + $0x478] sm:$0xf0]  ;;  %v9600_v46 = vld [vmem:[#allocation8 + $0x464] sm:$0xf0] }
 0x33f   :  { %v7378_v20 = vor.u32 %v9601_v37, %v7375_v43  ;;  %v7327_v36 = vld [vmem:[#allocation8 + $0x418] sm:$0xf0]  ;;  %v9588_v43 = vld [vmem:[#allocation8 + $0x404] sm:$0xf0] }
 0x340   :  { %1701 = vmatpush.bf16.msrb.mxu3 %v7266_v24  ;;  %1720 = vmatpush.bf16.msra.mxu0 %v7270_v48  ;;  %v7365_v24 = vld [vmem:[#allocation8 + $0x460] sm:$0xf]  ;;  %v9599_v48 = vld [vmem:[#allocation8 + $0x464] sm:$0xf] }
 0x341   :  { %1887 = vmatpush.bf16.msra.mxu2 %v7374_v39  ;;  %v7366_v14 = vor.u32 %v9600_v46, %v7365_v24  ;;  %v7317_v39 = vld [vmem:[#allocation8 + $0x400] sm:$0xf]  ;;  %v7319_v46 = vld [vmem:[#allocation8 + $0x408] sm:$0xf0] }
 0x342   :  { %v7318_v24 = vor.u32 %v9588_v43, %v7317_v39  ;;  %v9664_v39 = vld [vmem:[#allocation11 + $0x1e4] sm:$0xf0] }
 0x344   :  { %v10653_v44 = vpop.f32.mrf.mxu2  ;;  %v10655_v50 = vpop.f32.mrf.mxu3  ;;  %1702 = vmatpush.bf16.msrb.mxu3 %v7258_v38  ;;  %1721 = vmatpush.bf16.msra.mxu0 %v7262_v15  ;;  %v9598_v38 = vld [vmem:[#allocation8 + $0x454] sm:$0xf0]  ;;  %v7359_v15 = vld [vmem:[#allocation8 + $0x458] sm:$0xf0] }
 0x345   :  { %v1166_v3 = vadd.f32 %v10655_v50, %v975_v33  ;;  %1888 = vmatpush.bf16.msra.mxu2 %v7366_v14  ;;  %v7362_v23 = vor.u32 %v9597_v40, %v7359_v15  ;;  %v7341_v33 = vld [vmem:[#allocation8 + $0x430] sm:$0xf] }
 0x348   :  { %1703 = vmatpush.bf16.msrb.mxu3 %v7250_v57  ;;  %1722 = vmatpush.bf16.msra.mxu0 %v7254_v0  ;;  %v9595_v57 = vld [vmem:[#allocation8 + $0x444] sm:$0xf]  ;;  %v7351_v0 = vld [vmem:[#allocation8 + $0x448] sm:$0xf0] }
 0x34c   :  { %v10661_v11 = vpop.f32.mrf.mxu2  ;;  %v1158_v12 = vpop.f32.mrf.mxu3  ;;  %1906 = vmatpush.bf16.msra.mxu3 %v7378_v20  ;;  %v9587_v20 = vld [vmem:[#allocation8 + $0x404] sm:$0xf] }
 0x34d   :  { %v10665_v52 = vadd.f32 %v1158_v12, %v977_v8 }
 0x34e   :  { %v10667_v62 = vpop.f32.mrf.mxu1 }
 0x354   :  { %v10671_v47 = vpop.f32.mrf.mxu2 }
 0x355   :  { %v1394_v13 = vpop.f32.mrf.mxu3 }
 0x356   :  { %v1325_v41 = vpop.f32.mrf.mxu1 }
 0x357   :  { %v10674_v51 = vadd.f32 %v1325_v41, %v1163_v27  ;;  %v7370_v27 = vor.u32 %v9599_v48, %v7367_v16  ;;  %v7322_v48 = vor.u32 %v9587_v20, %v7319_v46  ;;  %v7489_v46 = vld [vmem:[#allocation11 + $0x1d0] sm:$0xf] }
 0x359   :  { %1907 = vmatpush.bf16.msra.mxu3 %v7370_v27 }
 0x35c   :  { %v10676_v63 = vpop.f32.mrf.mxu2 }
 0x35d   :  { %v1397_v42 = vpop.f32.mrf.mxu3  ;;  %1908 = vmatpush.bf16.msra.mxu3 %v7362_v23 }
 0x35e   :  { %v1406_v1 = vpack.c.bf16 %v1397_v42, %v1394_v13  ;;  %v10689_v49 = vpop.f32.mrf.mxu1  ;;  %v7357_v13 = vld [vmem:[#allocation8 + $0x450] sm:$0xf]  ;;  %v7354_v42 = vor.u32 %v9595_v57, %v7351_v0 }
 0x35f   :  { %v7358_v41 = vor.u32 %v9598_v38, %v7357_v13 }
 0x360   :  { %1513 = vmatmul.bf16.vlgmr.msrb.gmra.mxu0 %v1406_v1  ;;  %1532 = vmatmul.bf16.vlgmr.msrb.gmra.mxu1 %v1406_v1 }
 0x361   :  { %1889 = vmatpush.bf16.msra.mxu2 %v7358_v41  ;;  %1909 = vmatpush.bf16.msra.mxu3 %v7354_v42 }
 0x364   :  { %v1347_v30 = vpop.f32.mrf.mxu2 }
 0x365   :  { %v10681_v7 = vadd.f32 %v1347_v30, %v1166_v3  ;;  %v1400_v8 = vpop.f32.mrf.mxu3  ;;  %1890 = vmatpush.bf16.msra.mxu2 %v7350_v59  ;;  %v9594_v3 = vld [vmem:[#allocation8 + $0x434] sm:$0xf0]  ;;  %v9593_v30 = vld [vmem:[#allocation8 + $0x434] sm:$0xf] }
 0x366   :  { %v10691_v1 = vpop.f32.mrf.mxu1 }
 0x36c   :  { %v10683_v9 = vpop.f32.mrf.mxu2 }
 0x36d   :  { %v1403_v10 = vpop.f32.mrf.mxu3 }
 0x36e   :  { %v1407_v12 = vpack.c.bf16 %v1403_v10, %v1400_v8  ;;  %v7342_v8 = vor.u32 %v9594_v3, %v7341_v33  ;;  %v7343_v10 = vld [vmem:[#allocation8 + $0x438] sm:$0xf0] }
 0x370   :  { %1518 = vmatmul.bf16.gmra.mxu0 %v1407_v12  ;;  %1537 = vmatmul.bf16.gmra.mxu1 %v1407_v12  ;;  %v7346_v12 = vor.u32 %v9593_v30, %v7343_v10 }
 0x371   :  { %1891 = vmatpush.bf16.msra.mxu2 %v7342_v8 }
 0x372   :  { %1910 = vmatpush.bf16.msra.mxu3 %v7346_v12 }
 0x374   :  { %v1585_v19 = vpop.f32.mrf.mxu2 }
 0x37c   :  { %v1588_v34 = vpop.f32.mrf.mxu2 }
 0x37d   :  { %v1597_v22 = vpack.c.bf16 %v1588_v34, %v1585_v19  ;;  %v7333_v19 = vld [vmem:[#allocation8 + $0x420] sm:$0xf]  ;;  %v9592_v34 = vld [vmem:[#allocation8 + $0x424] sm:$0xf0] }
 0x37f   :  { %1704 = vmatmul.bf16.vlgmr.msrb.gmra.mxu3 %v1597_v22 }
 0x380   :  { %1723 = vmatmul.bf16.vlgmr.msra.gmra.mxu0 %v1597_v22  ;;  %7311 = vmatmul.msk.f32.vlgmr.msra.gmra.mxu1 %vm235_vm2, %v1743_v25  ;;  %v9591_v22 = vld [vmem:[#allocation8 + $0x424] sm:$0xf]  ;;  %v7334_v25 = vor.u32 %v9592_v34, %v7333_v19  ;;  %v575_v19 = vadd.f32 %v10592_v53, %v10572_v35 }
 0x381   :  { %v7497_v53 = vld [vmem:[#allocation11 + $0x1e0] sm:$0xf] }
 0x382   :  { %1892 = vmatpush.bf16.msra.mxu2 %v7334_v25  ;;  %v587_v25 = vadd.f32 %v10552_v61, %v10554_v2 }
 0x384   :  { %v1591_v54 = vpop.f32.mrf.mxu2 }
 0x388   :  { %7312 = vmatmul.msk.f32.gmra.mxu1 %vm235_vm2, %v1744_v26 }
 0x38c   :  { %v1594_v50 = vpop.f32.mrf.mxu2 }
 0x38d   :  { %v1598_v28 = vpack.c.bf16 %v1594_v50, %v1591_v54  ;;  %v7335_v54 = vld [vmem:[#allocation8 + $0x428] sm:$0xf0] }
 0x38e   :  { %v7338_v26 = vor.u32 %v9591_v22, %v7335_v54  ;;  %v785_v54 = vadd.f32 %v10611_v60, %v575_v19 }
 0x38f   :  { %1709 = vmatmul.bf16.gmra.mxu3 %v1598_v28 }
 0x390   :  { %1728 = vmatmul.bf16.gmra.mxu0 %v1598_v28  ;;  %7313 = vmatmul.msk.f32.gmra.mxu1 %vm235_vm2, %v1745_v29  ;;  %v7325_v28 = vld [vmem:[#allocation8 + $0x410] sm:$0xf]  ;;  %v9590_v29 = vld [vmem:[#allocation8 + $0x414] sm:$0xf0] }
 0x391   :  { %1911 = vmatpush.bf16.msra.mxu3 %v7338_v26  ;;  %v7326_v32 = vor.u32 %v9590_v29, %v7325_v28  ;;  %v780_v28 = vadd.f32 %v10594_v6, %v587_v25  ;;  %v976_v29 = vadd.f32 %v10639_v5, %v785_v54  ;;  %v1161_v6 = vadd.f32 %v10641_v17, %v10597_v21 }
 0x393   :  { %1893 = vmatpush.bf16.msra.mxu2 %v7326_v32  ;;  %v7505_v32 = vld [vmem:[#allocation11 + $0x1f0] sm:$0xf]  ;;  %v1167_v61 = vadd.f32 %v10661_v11, %v976_v29  ;;  %v1359_v11 = vadd.f32 %v10683_v9, %v10665_v52  ;;  %v9658_v29 = vld [vmem:[#allocation11 + $0x1b4] sm:$0xf0] }
 0x397   :  { %1894 = vmatpush.bf16.msra.mxu2 %v7318_v24 }
 0x398   :  { %7314 = vmatmul.msk.f32.gmra.mxu1 %vm235_vm2, %v1746_v31  ;;  %v9589_v31 = vld [vmem:[#allocation8 + $0x414] sm:$0xf] }
 0x399   :  { %v7330_v37 = vor.u32 %v9589_v31, %v7327_v36  ;;  %v971_v31 = vadd.f32 %v10615_v4, %v780_v28  ;;  %v9666_v36 = vld [vmem:[#allocation11 + $0x1f4] sm:$0xf0]  ;;  %v7498_v4 = vor.u32 %v9664_v39, %v7497_v53 }
 0x39a   :  { %v7506_v35 = vor.u32 %v9666_v36, %v7505_v32  ;;  %v9650_v39 = vld [vmem:[#allocation11 + $0x174] sm:$0xf0] }
 0x39b   :  { %1912 = vmatpush.bf16.msra.mxu3 %v7330_v37  ;;  %v1165_v37 = vadd.f32 %v10653_v44, %v10609_v58  ;;  %v1162_v43 = vadd.f32 %v10643_v18, %v971_v31  ;;  %v1355_v58 = vadd.f32 %v10676_v63, %v10651_v45  ;;  %v1358_v44 = vadd.f32 %v10691_v1, %v1167_v61  ;;  %v1933_v63 = vld [vmem:[#allocation10] sm:$0x3] }
 0x39c   :  { %2286 = vmatpush.bf16.msrb.mxu1 %v7506_v35  ;;  %v1352_v18 = vadd.f32 %v10667_v62, %v1161_v6  ;;  %v9656_v6 = vld [vmem:[#allocation11 + $0x1a4] sm:$0xf0] }
 0x39d   :  { %v1356_v5 = vadd.f32 %v10689_v49, %v1165_v37  ;;  %v1353_v20 = vadd.f32 %v10671_v47, %v1162_v43  ;;  %v9662_v47 = vld [vmem:[#allocation11 + $0x1d4] sm:$0xf0] }
 0x39e   :  { %v7490_v1 = vor.u32 %v9662_v47, %v7489_v46  ;;  %v9654_v46 = vld [vmem:[#allocation11 + $0x194] sm:$0xf0] }
 0x39f   :  { %1913 = vmatpush.bf16.msra.mxu3 %v7322_v48 }
 0x3a0   :  { %2287 = vmatpush.bf16.msrb.mxu1 %v7498_v4 }
 0x3a4   :  { %2288 = vmatpush.bf16.msrb.mxu1 %v7490_v1  ;;  %v2034_v1 = vld [vmem:[#allocation14 + $0x2] sm:$0x3] }
 0x3dd   :  { %v10693_v50 = vpop.f32.mrf.mxu1  ;;  %v1514_v56 = vpop.f32.mrf.mxu0 }
 0x3de   :  { %v1544_v21 = vadd.f32 %v10693_v50, %v1353_v20  ;;  %v1543_v62 = vadd.f32 %v1514_v56, %v1352_v18  ;;  %v1955_v20 = vld [vmem:[#allocation14] sm:$0x3]  ;;  %v9648_v18 = vld [vmem:[#allocation11 + $0x164] sm:$0xf0] }
 0x3e5   :  { %v1535_v14 = vpop.f32.mrf.mxu1  ;;  %v1516_v57 = vpop.f32.mrf.mxu0 }
 0x3e6   :  { %v1545_v17 = vadd.f32 %v1516_v57, %v10674_v51  ;;  %v1546_v49 = vadd.f32 %v1535_v14, %v1355_v58  ;;  %v1935_v14 = vperm.slane %v1933_v63, 0  ;;  %v1936_v57 = vperm.slane %v1933_v63, 1  ;;  %v7433_v58 = vld [vmem:[#allocation11 + $0x160] sm:$0xf]  ;;  %v9652_v63 = vld [vmem:[#allocation11 + $0x184] sm:$0xf0] }
 0x3ed   :  { %v1538_v16 = vpop.f32.mrf.mxu1  ;;  %v1519_v0 = vpop.f32.mrf.mxu0 }
 0x3ee   :  { %v1548_v27 = vadd.f32 %v1538_v16, %v10681_v7  ;;  %v1547_v24 = vadd.f32 %v1519_v0, %v1356_v5  ;;  %v7481_v0 = vld [vmem:[#allocation11 + $0x1c0] sm:$0xf] }
 0x3f5   :  { %v1540_v13 = vpop.f32.mrf.mxu1  ;;  %v1521_v33 = vpop.f32.mrf.mxu0 }
 0x3f6   :  { %v1549_v48 = vadd.f32 %v1521_v33, %v1358_v44 }
 0x3fd   :  { %v1776_v38 = vpop.f32.mrf.mxu1  ;;  %v1724_v30 = vpop.f32.mrf.mxu0 }
 0x402   :  { %v1705_v59 = vpop.f32.mrf.mxu3 }
 0x403   :  { %v1734_v51 = vadd.f32 %v1705_v59, %v1543_v62  ;;  %v7473_v59 = vld [vmem:[#allocation11 + $0x1b0] sm:$0xf] }
 0x405   :  { %v1779_v40 = vpop.f32.mrf.mxu1  ;;  %v1726_v8 = vpop.f32.mrf.mxu0 }
 0x406   :  { %v1788_v41 = vpack.c.bf16 %v1779_v40, %v1776_v38  ;;  %v1550_v38 = vadd.f32 %v1540_v13, %v1359_v11  ;;  %v7434_v11 = vor.u32 %v9648_v18, %v7433_v58  ;;  %v7475_v18 = vld [vmem:[#allocation11 + $0x1b8] sm:$0xf0] }
 0x408   :  { %1895 = vmatmul.bf16.vlgmr.msra.gmra.mxu2 %v1788_v41  ;;  %1914 = vmatmul.bf16.vlgmr.msra.gmra.mxu3 %v1788_v41  ;;  %v1735_v41 = vadd.f32 %v1724_v30, %v1544_v21  ;;  %v9665_v21 = vld [vmem:[#allocation11 + $0x1f4] sm:$0xf] }
 0x40a   :  { %v1707_v42 = vpop.f32.mrf.mxu3 }
 0x40b   :  { %v1736_v52 = vadd.f32 %v1707_v42, %v1545_v17  ;;  %v7507_v17 = vld [vmem:[#allocation11 + $0x1f8] sm:$0xf0] }
 0x40c   :  { %v7510_v62 = vor.u32 %v9665_v21, %v7507_v17  ;;  %v7393_v21 = vld [vmem:[#allocation11 + $0x110] sm:$0xf] }
 0x40d   :  { %v1782_v15 = vpop.f32.mrf.mxu1  ;;  %v1729_v26 = vpop.f32.mrf.mxu0 }
 0x40e   :  { %v1739_v40 = vadd.f32 %v1729_v26, %v1548_v27  ;;  %v9660_v27 = vld [vmem:[#allocation11 + $0x1c4] sm:$0xf0] }
 0x40f   :  { %v7482_v56 = vor.u32 %v9660_v27, %v7481_v0 }
 0x411   :  { %2289 = vmatpush.bf16.msrb.mxu1 %v7482_v56  ;;  %v9645_v56 = vld [vmem:[#allocation11 + $0x154] sm:$0xf] }
 0x412   :  { %v1710_v3 = vpop.f32.mrf.mxu3 }
 0x413   :  { %v1738_v45 = vadd.f32 %v1710_v3, %v1547_v24  ;;  %v7457_v24 = vld [vmem:[#allocation11 + $0x190] sm:$0xf] }
 0x414   :  { %v7458_v47 = vor.u32 %v9654_v46, %v7457_v24  ;;  %v9641_v24 = vld [vmem:[#allocation11 + $0x134] sm:$0xf]  ;;  %v7411_v46 = vld [vmem:[#allocation11 + $0x138] sm:$0xf0] }
 0x415   :  { %v1785_v23 = vpop.f32.mrf.mxu1  ;;  %v1731_v16 = vpop.f32.mrf.mxu0 }
 0x416   :  { %v1789_v55 = vpack.c.bf16 %v1785_v23, %v1782_v15  ;;  %v1737_v15 = vadd.f32 %v1726_v8, %v1546_v49  ;;  %v1741_v9 = vadd.f32 %v1731_v16, %v1550_v38  ;;  %v7425_v49 = vld [vmem:[#allocation11 + $0x150] sm:$0xf]  ;;  %v7443_v16 = vld [vmem:[#allocation11 + $0x178] sm:$0xf0]  ;;  %v9646_v38 = vld [vmem:[#allocation11 + $0x154] sm:$0xf0] }
 0x418   :  { %1900 = vmatmul.bf16.gmra.mxu2 %v1789_v55  ;;  %1919 = vmatmul.bf16.gmra.mxu3 %v1789_v55 }
 0x41a   :  { %v1712_v7 = vpop.f32.mrf.mxu3 }
 0x41b   :  { %v1740_v23 = vadd.f32 %v1712_v7, %v1549_v48  ;;  %v9649_v48 = vld [vmem:[#allocation11 + $0x174] sm:$0xf] }
 0x48b   :  { %v10696_v10 = vpop.f32.mrf.mxu2  ;;  %v10698_v12 = vpop.f32.mrf.mxu3 }
 0x48c   :  { %v1925_v30 = vadd.f32 %v10696_v10, %v1734_v51  ;;  %v1926_v42 = vadd.f32 %v10698_v12, %v1735_v41  ;;  %v7441_v12 = vld [vmem:[#allocation11 + $0x170] sm:$0xf]  ;;  %v9663_v41 = vld [vmem:[#allocation11 + $0x1e4] sm:$0xf] }
 0x48e   :  { %v1939_v37 = vadd.f32 %v1935_v14, %v1925_v30  ;;  %v1940_v35 = vadd.f32 %v1936_v57, %v1926_v42  ;;  %v7427_v30 = vld [vmem:[#allocation11 + $0x158] sm:$0xf0] }
 0x490   :  { %v10742_v5 = vmax.f32 %v1939_v37, 0.0  ;;  %v10744_v4 = vmax.f32 %v1940_v35, 0.0  ;;  %v9643_v37 = vld [vmem:[#allocation11 + $0x144] sm:$0xf]  ;;  %v7419_v35 = vld [vmem:[#allocation11 + $0x148] sm:$0xf0] }
 0x493   :  { %v1898_v34 = vpop.f32.mrf.mxu2  ;;  %v1917_v22 = vpop.f32.mrf.mxu3 }
 0x494   :  { %v1927_v33 = vadd.f32 %v1898_v34, %v1736_v52  ;;  %v1928_v3 = vadd.f32 %v1917_v22, %v1737_v15  ;;  %v7474_v22 = vor.u32 %v9658_v29, %v7473_v59  ;;  %v7446_v15 = vor.u32 %v9649_v48, %v7443_v16  ;;  %v7633_v52 = vld [vmem:[#allocation11 + $0xf0] sm:$0xf]  ;;  %v9630_v59 = vld [vmem:[#allocation11 + $0xd4] sm:$0xf0] }
 0x495   :  { %v7601_v16 = vld [vmem:[#allocation11 + $0xb0] sm:$0xf] }
 0x496   :  { %v1941_v31 = vadd.f32 %v1935_v14, %v1927_v33  ;;  %v1942_v34 = vadd.f32 %v1936_v57, %v1928_v3  ;;  %2290 = vmatpush.bf16.msrb.mxu1 %v7474_v22  ;;  %v9661_v3 = vld [vmem:[#allocation11 + $0x1d4] sm:$0xf]  ;;  %v7430_v22 = vor.u32 %v9645_v56, %v7427_v30 }
 0x498   :  { %v10736_v43 = vmax.f32 %v1941_v31, 0.0  ;;  %v10738_v61 = vmax.f32 %v1942_v34, 0.0  ;;  %v9659_v31 = vld [vmem:[#allocation11 + $0x1c4] sm:$0xf]  ;;  %v7483_v34 = vld [vmem:[#allocation11 + $0x1c8] sm:$0xf0] }
 0x499   :  { %v7486_v58 = vor.u32 %v9659_v31, %v7483_v34  ;;  %v7619_v34 = vld [vmem:[#allocation11 + $0xd8] sm:$0xf0] }
 0x49b   :  { %v1901_v2 = vpop.f32.mrf.mxu2  ;;  %v1920_v60 = vpop.f32.mrf.mxu3 }
 0x49c   :  { %v1929_v55 = vadd.f32 %v1901_v2, %v1738_v45  ;;  %v1930_v50 = vadd.f32 %v1920_v60, %v1739_v40  ;;  %v7442_v2 = vor.u32 %v9650_v39, %v7441_v12  ;;  %v7465_v60 = vld [vmem:[#allocation11 + $0x1a0] sm:$0xf]  ;;  %v7426_v40 = vor.u32 %v9646_v38, %v7425_v49  ;;  %v9638_v49 = vld [vmem:[#allocation11 + $0x114] sm:$0xf0] }
 0x49d   :  { %v7466_v44 = vor.u32 %v9656_v6, %v7465_v60  ;;  %v7449_v45 = vld [vmem:[#allocation11 + $0x180] sm:$0xf]  ;;  %v7394_v48 = vor.u32 %v9638_v49, %v7393_v21  ;;  %v9618_v49 = vld [vmem:[#allocation11 + $0x74] sm:$0xf0] }
 0x49e   :  { %v1943_v7 = vadd.f32 %v1935_v14, %v1929_v55  ;;  %v1944_v8 = vadd.f32 %v1936_v57, %v1930_v50  ;;  %2273 = vmatpush.bf16.msrb.mxu3 %v7442_v2  ;;  %v9647_v55 = vld [vmem:[#allocation11 + $0x164] sm:$0xf]  ;;  %v7435_v50 = vld [vmem:[#allocation11 + $0x168] sm:$0xf0]  ;;  %v7450_v0 = vor.u32 %v9652_v63, %v7449_v45  ;;  %v7401_v12 = vld [vmem:[#allocation11 + $0x120] sm:$0xf]  ;;  %v7414_v45 = vor.u32 %v9641_v24, %v7411_v46 }
 0x49f   :  { %2291 = vmatpush.bf16.msrb.mxu1 %v7466_v44  ;;  %v9640_v2 = vld [vmem:[#allocation11 + $0x124] sm:$0xf0]  ;;  %v7609_v6 = vld [vmem:[#allocation11 + $0xc0] sm:$0xf]  ;;  %v9657_v44 = vld [vmem:[#allocation11 + $0x1b4] sm:$0xf] }
 0x4a0   :  { %v10730_v53 = vmax.f32 %v1943_v7, 0.0  ;;  %v10732_v10 = vmax.f32 %v1944_v8, 0.0  ;;  %v7409_v7 = vld [vmem:[#allocation11 + $0x130] sm:$0xf]  ;;  %v9642_v8 = vld [vmem:[#allocation11 + $0x134] sm:$0xf0]  ;;  %v7402_v60 = vor.u32 %v9640_v2, %v7401_v12  ;;  %v7478_v38 = vor.u32 %v9657_v44, %v7475_v18 }
 0x4a1   :  { %v7467_v63 = vld [vmem:[#allocation11 + $0x1a8] sm:$0xf0]  ;;  %v9611_v44 = vld [vmem:[#allocation11 + $0x44] sm:$0xf]  ;;  %v7385_v24 = vld [vmem:[#allocation11 + $0x100] sm:$0xf] }
 0x4a2   :  { %2274 = vmatpush.bf16.msrb.mxu3 %v7434_v11  ;;  %v7422_v11 = vor.u32 %v9643_v37, %v7419_v35  ;;  %v7555_v37 = vld [vmem:[#allocation11 + $0x58] sm:$0xf0]  ;;  %v7611_v2 = vld [vmem:[#allocation11 + $0xc8] sm:$0xf0]  ;;  %v9636_v46 = vld [vmem:[#allocation11 + $0x104] sm:$0xf0] }
 0x4a3   :  { %v1903_v19 = vpop.f32.mrf.mxu2  ;;  %v1922_v13 = vpop.f32.mrf.mxu3  ;;  %2292 = vmatpush.bf16.msrb.mxu1 %v7458_v47  ;;  %v9626_v47 = vld [vmem:[#allocation11 + $0xb4] sm:$0xf0]  ;;  %v7547_v18 = vld [vmem:[#allocation11 + $0x48] sm:$0xf0]  ;;  %v7386_v21 = vor.u32 %v9636_v46, %v7385_v24 }
 0x4a4   :  { %v1931_v25 = vadd.f32 %v1903_v19, %v1740_v23  ;;  %v1932_v54 = vadd.f32 %v1922_v13, %v1741_v9  ;;  %v9634_v9 = vld [vmem:[#allocation11 + $0xf4] sm:$0xf0]  ;;  %v7499_v23 = vld [vmem:[#allocation11 + $0x1e8] sm:$0xf0]  ;;  %v7625_v19 = vld [vmem:[#allocation11 + $0xe0] sm:$0xf] }
 0x4a5   :  { %v7634_v51 = vor.u32 %v9634_v9, %v7633_v52  ;;  %v9632_v13 = vld [vmem:[#allocation11 + $0xe4] sm:$0xf0]  ;;  %v7502_v27 = vor.u32 %v9663_v41, %v7499_v23  ;;  %v7602_v41 = vor.u32 %v9626_v47, %v7601_v16  ;;  %v9653_v52 = vld [vmem:[#allocation11 + $0x194] sm:$0xf]  ;;  %v7459_v23 = vld [vmem:[#allocation11 + $0x198] sm:$0xf0] }
 0x4a6   :  { %v1945_v26 = vadd.f32 %v1935_v14, %v1931_v25  ;;  %v1946_v28 = vadd.f32 %v1936_v57, %v1932_v54  ;;  %2275 = vmatpush.bf16.msrb.mxu3 %v7426_v40  ;;  %v7417_v14 = vld [vmem:[#allocation11 + $0x140] sm:$0xf]  ;;  %v9644_v57 = vld [vmem:[#allocation11 + $0x144] sm:$0xf0]  ;;  %v7438_v25 = vor.u32 %v9647_v55, %v7435_v50  ;;  %v7491_v54 = vld [vmem:[#allocation11 + $0x1d8] sm:$0xf0]  ;;  %v7626_v42 = vor.u32 %v9632_v13, %v7625_v19 }
 0x4a7   :  { %v7418_v33 = vor.u32 %v9644_v57, %v7417_v14  ;;  %2293 = vmatpush.bf16.msrb.mxu1 %v7450_v0  ;;  %v7494_v29 = vor.u32 %v9661_v3, %v7491_v54  ;;  %v9655_v40 = vld [vmem:[#allocation11 + $0x1a4] sm:$0xf]  ;;  %v9637_v55 = vld [vmem:[#allocation11 + $0x114] sm:$0xf]  ;;  %v7395_v50 = vld [vmem:[#allocation11 + $0x118] sm:$0xf0]  ;;  %v7462_v0 = vor.u32 %v9653_v52, %v7459_v23 }
 0x4a8   :  { %v10726_v32 = vmax.f32 %v1945_v26, 0.0  ;;  %v10728_v36 = vmax.f32 %v1946_v28, 0.0  ;;  %v7410_v26 = vor.u32 %v9642_v8, %v7409_v7  ;;  %v7617_v28 = vld [vmem:[#allocation11 + $0xd0] sm:$0xf]  ;;  %v7451_v14 = vld [vmem:[#allocation11 + $0x188] sm:$0xf0]  ;;  %v7398_v57 = vor.u32 %v9637_v55, %v7395_v50 }
 0x4a9   :  { %v7618_v39 = vor.u32 %v9630_v59, %v7617_v28  ;;  %v9635_v19 = vld [vmem:[#allocation11 + $0x104] sm:$0xf]  ;;  %v7387_v13 = vld [vmem:[#allocation11 + $0x108] sm:$0xf0]  ;;  %v9617_v3 = vld [vmem:[#allocation11 + $0x74] sm:$0xf] }
 0x4aa   :  { %1971 = vmatpush.msrb.mxu0 %v10726_v32  ;;  %1991 = vmatpush.msrb.mxu2 %v10728_v36  ;;  %v7390_v56 = vor.u32 %v9635_v19, %v7387_v13  ;;  %v7627_v8 = vld [vmem:[#allocation11 + $0xe8] sm:$0xf0]  ;;  %v9624_v47 = vld [vmem:[#allocation11 + $0xa4] sm:$0xf0]  ;;  %v9622_v55 = vld [vmem:[#allocation11 + $0x94] sm:$0xf0] }
 0x4ab   :  { %2276 = vmatpush.bf16.msrb.mxu3 %v7418_v33  ;;  %2498 = vmatpush.bf16.msra.mxu1 %v7634_v51  ;;  %v9651_v51 = vld [vmem:[#allocation11 + $0x184] sm:$0xf]  ;;  %v9633_v33 = vld [vmem:[#allocation11 + $0xf4] sm:$0xf]  ;;  %v7563_v28 = vld [vmem:[#allocation11 + $0x68] sm:$0xf0] }
 0x4ac   :  { %1972 = vmatpush.msrb.mxu0 %v10730_v53  ;;  %1992 = vmatpush.msrb.mxu2 %v10732_v10  ;;  %v7454_v54 = vor.u32 %v9651_v51, %v7451_v14  ;;  %v9616_v52 = vld [vmem:[#allocation11 + $0x64] sm:$0xf0]  ;;  %v9621_v50 = vld [vmem:[#allocation11 + $0x94] sm:$0xf]  ;;  %v7553_v13 = vld [vmem:[#allocation11 + $0x50] sm:$0xf] }
 0x4ae   :  { %1973 = vmatpush.msrb.mxu0 %v10736_v43  ;;  %1993 = vmatpush.msrb.mxu2 %v10738_v61 }
 0x4af   :  { %2277 = vmatpush.bf16.msrb.mxu3 %v7410_v26  ;;  %2499 = vmatpush.bf16.msra.mxu1 %v7626_v42  ;;  %v9631_v42 = vld [vmem:[#allocation11 + $0xe4] sm:$0xf] }
 0x4b0   :  { %1974 = vmatpush.msrb.mxu0 %v10742_v5  ;;  %1994 = vmatpush.msrb.mxu2 %v10744_v4  ;;  %v9615_v26 = vld [vmem:[#allocation11 + $0x64] sm:$0xf]  ;;  %v7630_v59 = vor.u32 %v9631_v42, %v7627_v8  ;;  %v9605_v8 = vld [vmem:[#allocation11 + $0x14] sm:$0xf] }
 0x4b1   :  { %7379 = vmatmul.msk.f32.vlgmr.msrb.gmra.mxu0 %vm235_vm2, %v1955_v20  ;;  %7380 = vmatmul.msk.f32.vlgmr.msrb.gmra.mxu2 %vm235_vm2, %v1955_v20  ;;  %v9628_v20 = vld [vmem:[#allocation11 + $0xc4] sm:$0xf0]  ;;  %v7566_v31 = vor.u32 %v9615_v26, %v7563_v28  ;;  %v7523_v26 = vld [vmem:[#allocation11 + $0x18] sm:$0xf0] }
 0x4b2   :  { %2050 = vmatpush.msra.mxu2 %v10726_v32  ;;  %2070 = vmatpush.msra.mxu0 %v10728_v36  ;;  %v7610_v17 = vor.u32 %v9628_v20, %v7609_v6  ;;  %v9625_v6 = vld [vmem:[#allocation11 + $0xb4] sm:$0xf]  ;;  %v7603_v20 = vld [vmem:[#allocation11 + $0xb8] sm:$0xf0]  ;;  %v7526_v28 = vor.u32 %v9605_v8, %v7523_v26  ;;  %v7675_v8 = vld [vmem:[#allocation11 + $0x240] sm:$0xf] }
 0x4b3   :  { %2278 = vmatpush.bf16.msrb.mxu3 %v7402_v60  ;;  %2500 = vmatpush.bf16.msra.mxu1 %v7618_v39  ;;  %v9627_v39 = vld [vmem:[#allocation11 + $0xc4] sm:$0xf]  ;;  %v9676_v26 = vld [vmem:[#allocation11 + $0x244] sm:$0xf0] }
 0x4b4   :  { %2051 = vmatpush.msra.mxu2 %v10730_v53  ;;  %2071 = vmatpush.msra.mxu0 %v10732_v10  ;;  %v7614_v60 = vor.u32 %v9627_v39, %v7611_v2  ;;  %v7529_v2 = vld [vmem:[#allocation11 + $0x20] sm:$0xf] }
 0x4b6   :  { %2052 = vmatpush.msra.mxu2 %v10736_v43  ;;  %2072 = vmatpush.msra.mxu0 %v10738_v61 }
 0x4b7   :  { %2279 = vmatpush.bf16.msrb.mxu3 %v7394_v48  ;;  %2501 = vmatpush.bf16.msra.mxu1 %v7610_v17  ;;  %v7569_v17 = vld [vmem:[#allocation11 + $0x70] sm:$0xf]  ;;  %v7593_v48 = vld [vmem:[#allocation11 + $0xa0] sm:$0xf] }
 0x4b8   :  { %2053 = vmatpush.msra.mxu2 %v10742_v5  ;;  %2073 = vmatpush.msra.mxu0 %v10744_v4  ;;  %v7570_v16 = vor.u32 %v9618_v49, %v7569_v17  ;;  %v9698_v17 = vld [vmem:[#allocation11 + $0x2f4] sm:$0xf0] }
 0x4b9   :  { %7381 = vmatmul.msk.f32.vlgmr.msra.gmra.mxu2 %vm235_vm2, %v2034_v1  ;;  %7382 = vmatmul.msk.f32.vlgmr.msra.gmra.mxu0 %vm235_vm2, %v2034_v1  ;;  %v9639_v1 = vld [vmem:[#allocation11 + $0x124] sm:$0xf] }
 0x4ba   :  { %2312 = vmatpush.bf16.msrb.mxu0 %v7510_v62  ;;  %2299 = vmatpush.bf16.msrb.mxu2 %v7446_v15  ;;  %v7403_v62 = vld [vmem:[#allocation11 + $0x128] sm:$0xf0]  ;;  %v7470_v15 = vor.u32 %v9655_v40, %v7467_v63 }
 0x4bb   :  { %v7406_v9 = vor.u32 %v9639_v1, %v7403_v62  ;;  %2502 = vmatpush.bf16.msra.mxu1 %v7602_v41  ;;  %v7595_v40 = vld [vmem:[#allocation11 + $0xa8] sm:$0xf0]  ;;  %2280 = vmatpush.bf16.msrb.mxu3 %v7386_v21  ;;  %v9609_v1 = vld [vmem:[#allocation11 + $0x34] sm:$0xf]  ;;  %v7539_v62 = vld [vmem:[#allocation11 + $0x38] sm:$0xf0] }
 0x4bc   :  { %v7542_v41 = vor.u32 %v9609_v1, %v7539_v62  ;;  %v7763_v21 = vld [vmem:[#allocation11 + $0x2f0] sm:$0xf] }
 0x4bd   :  { %v7747_v62 = vld [vmem:[#allocation11 + $0x2d0] sm:$0xf] }
 0x4be   :  { %2313 = vmatpush.bf16.msrb.mxu0 %v7502_v27  ;;  %2300 = vmatpush.bf16.msrb.mxu2 %v7438_v25  ;;  %v7635_v27 = vld [vmem:[#allocation11 + $0xf8] sm:$0xf0] }
 0x4bf   :  { %v7571_v25 = vld [vmem:[#allocation11 + $0x78] sm:$0xf0]  ;;  %v7638_v30 = vor.u32 %v9633_v33, %v7635_v27  ;;  %2485 = vmatpush.bf16.msra.mxu3 %v7570_v16  ;;  %v7531_v33 = vld [vmem:[#allocation11 + $0x28] sm:$0xf0]  ;;  %v9614_v27 = vld [vmem:[#allocation11 + $0x54] sm:$0xf0]  ;;  %v7764_v16 = vor.u32 %v9698_v17, %v7763_v21 }
 0x4c0   :  { %v7574_v7 = vor.u32 %v9617_v3, %v7571_v25  ;;  %v7577_v3 = vld [vmem:[#allocation11 + $0x80] sm:$0xf]  ;;  %v7554_v25 = vor.u32 %v9614_v27, %v7553_v13  ;;  %v7731_v13 = vld [vmem:[#allocation11 + $0x2b0] sm:$0xf]  ;;  %v9690_v27 = vld [vmem:[#allocation11 + $0x2b4] sm:$0xf0] }
 0x4c1   :  { %v7677_v21 = vld [vmem:[#allocation11 + $0x248] sm:$0xf0]  ;;  %v7707_v17 = vld [vmem:[#allocation11 + $0x280] sm:$0xf] }
 0x4c2   :  { %2314 = vmatpush.bf16.msrb.mxu0 %v7494_v29  ;;  %2301 = vmatpush.bf16.msrb.mxu2 %v7430_v22  ;;  %v9629_v29 = vld [vmem:[#allocation11 + $0xd4] sm:$0xf] }
 0x4c3   :  { %v9613_v22 = vld [vmem:[#allocation11 + $0x54] sm:$0xf]  ;;  %v7622_v35 = vor.u32 %v9629_v29, %v7619_v34  ;;  %v9612_v29 = vld [vmem:[#allocation11 + $0x44] sm:$0xf0]  ;;  %v9603_v34 = vld [vmem:[#allocation11 + $0x4] sm:$0xf] }
 0x4c4   :  { %v7558_v12 = vor.u32 %v9613_v22, %v7555_v37  ;;  %v7515_v22 = vld [vmem:[#allocation11 + $0x8] sm:$0xf0] }
 0x4c5   :  { %v7518_v37 = vor.u32 %v9603_v34, %v7515_v22  ;;  %v7676_v34 = vor.u32 %v9676_v26, %v7675_v8  ;;  %v7667_v22 = vld [vmem:[#allocation11 + $0x230] sm:$0xf]  ;;  %v7733_v8 = vld [vmem:[#allocation11 + $0x2b8] sm:$0xf0]  ;;  %v9667_v26 = vld [vmem:[#allocation11 + $0x204] sm:$0xf] }
 0x4c6   :  { %2315 = vmatpush.bf16.msrb.mxu0 %v7486_v58  ;;  %2302 = vmatpush.bf16.msrb.mxu2 %v7422_v11  ;;  %v7606_v58 = vor.u32 %v9625_v6, %v7603_v20  ;;  %v7550_v11 = vor.u32 %v9611_v44, %v7547_v18  ;;  %v7521_v20 = vld [vmem:[#allocation11 + $0x10] sm:$0xf]  ;;  %v7513_v18 = vld [vmem:[#allocation11] sm:$0xf] }
 0x4ca   :  { %2316 = vmatpush.bf16.msrb.mxu0 %v7478_v38  ;;  %2303 = vmatpush.bf16.msrb.mxu2 %v7414_v45  ;;  %v9623_v38 = vld [vmem:[#allocation11 + $0xa4] sm:$0xf]  ;;  %v7594_v45 = vor.u32 %v9624_v47, %v7593_v48 }
 0x4cb   :  { %v7598_v63 = vor.u32 %v9623_v38, %v7595_v40  ;;  %v7755_v38 = vld [vmem:[#allocation11 + $0x2e0] sm:$0xf]  ;;  %v9696_v40 = vld [vmem:[#allocation11 + $0x2e4] sm:$0xf0] }
 0x4cc   :  { %2503 = vmatpush.bf16.msra.mxu1 %v7594_v45  ;;  %v7699_v45 = vld [vmem:[#allocation11 + $0x270] sm:$0xf]  ;;  %v7756_v1 = vor.u32 %v9696_v40, %v7755_v38  ;;  %v9697_v40 = vld [vmem:[#allocation11 + $0x2f4] sm:$0xf] }
 0x4ce   :  { %2317 = vmatpush.bf16.msrb.mxu0 %v7470_v15  ;;  %2304 = vmatpush.bf16.msrb.mxu2 %v7406_v9  ;;  %v7561_v15 = vld [vmem:[#allocation11 + $0x60] sm:$0xf]  ;;  %v7585_v9 = vld [vmem:[#allocation11 + $0x90] sm:$0xf] }
 0x4cf   :  { %v7562_v23 = vor.u32 %v9616_v52, %v7561_v15  ;;  %v7586_v51 = vor.u32 %v9622_v55, %v7585_v9  ;;  %v9680_v55 = vld [vmem:[#allocation11 + $0x264] sm:$0xf0] }
 0x4d1   :  { %2486 = vmatpush.bf16.msra.mxu3 %v7562_v23  ;;  %2504 = vmatpush.bf16.msra.mxu1 %v7586_v51  ;;  %v7691_v23 = vld [vmem:[#allocation11 + $0x260] sm:$0xf]  ;;  %v9692_v51 = vld [vmem:[#allocation11 + $0x2c4] sm:$0xf0] }
 0x4d2   :  { %2318 = vmatpush.bf16.msrb.mxu0 %v7462_v0  ;;  %2305 = vmatpush.bf16.msrb.mxu2 %v7398_v57  ;;  %v7587_v0 = vld [vmem:[#allocation11 + $0x98] sm:$0xf0]  ;;  %v9607_v57 = vld [vmem:[#allocation11 + $0x24] sm:$0xf] }
 0x4d3   :  { %v7590_v14 = vor.u32 %v9621_v50, %v7587_v0  ;;  %v7534_v19 = vor.u32 %v9607_v57, %v7531_v33  ;;  %v7739_v0 = vld [vmem:[#allocation11 + $0x2c0] sm:$0xf]  ;;  %v7683_v57 = vld [vmem:[#allocation11 + $0x250] sm:$0xf]  ;;  %v9678_v33 = vld [vmem:[#allocation11 + $0x254] sm:$0xf0] }
 0x4d5   :  { %2487 = vmatpush.bf16.msra.mxu3 %v7554_v25  ;;  %v7701_v25 = vld [vmem:[#allocation11 + $0x278] sm:$0xf0] }
 0x4d6   :  { %2319 = vmatpush.bf16.msrb.mxu0 %v7454_v54  ;;  %2306 = vmatpush.bf16.msrb.mxu2 %v7390_v56  ;;  %v9620_v54 = vld [vmem:[#allocation11 + $0x84] sm:$0xf0]  ;;  %v9619_v56 = vld [vmem:[#allocation11 + $0x84] sm:$0xf] }
 0x4d7   :  { %v7578_v42 = vor.u32 %v9620_v54, %v7577_v3  ;;  %v9681_v3 = vld [vmem:[#allocation11 + $0x274] sm:$0xf]  ;;  %v7684_v54 = vor.u32 %v9678_v33, %v7683_v57 }
 0x4d9   :  { %2505 = vmatpush.bf16.msra.mxu1 %v7578_v42  ;;  %v7693_v42 = vld [vmem:[#allocation11 + $0x268] sm:$0xf0] }
 0x4da   :  { %2524 = vmatpush.bf16.msra.mxu0 %v7638_v30  ;;  %2511 = vmatpush.bf16.msra.mxu2 %v7574_v7  ;;  %v7579_v30 = vld [vmem:[#allocation11 + $0x88] sm:$0xf0] }
 0x4db   :  { %v7582_v7 = vor.u32 %v9619_v56, %v7579_v30  ;;  %v7704_v56 = vor.u32 %v9681_v3, %v7701_v25  ;;  %v9679_v30 = vld [vmem:[#allocation11 + $0x264] sm:$0xf]  ;;  %v7741_v25 = vld [vmem:[#allocation11 + $0x2c8] sm:$0xf0] }
 0x4dc   :  { %v9691_v3 = vld [vmem:[#allocation11 + $0x2c4] sm:$0xf] }
 0x4de   :  { %2525 = vmatpush.bf16.msra.mxu0 %v7630_v59  ;;  %2512 = vmatpush.bf16.msra.mxu2 %v7566_v31  ;;  %v7545_v59 = vld [vmem:[#allocation11 + $0x40] sm:$0xf] }
 0x4df   :  { %v7546_v31 = vor.u32 %v9612_v29, %v7545_v59  ;;  %v7723_v59 = vld [vmem:[#allocation11 + $0x2a0] sm:$0xf]  ;;  %v9688_v29 = vld [vmem:[#allocation11 + $0x2a4] sm:$0xf0] }
 0x4e1   :  { %2488 = vmatpush.bf16.msra.mxu3 %v7546_v31  ;;  %v7696_v31 = vor.u32 %v9679_v30, %v7693_v42  ;;  %v7653_v30 = vld [vmem:[#allocation11 + $0x218] sm:$0xf0]  ;;  %v9689_v42 = vld [vmem:[#allocation11 + $0x2b4] sm:$0xf] }
 0x4e2   :  { %2526 = vmatpush.bf16.msra.mxu0 %v7622_v35  ;;  %2513 = vmatpush.bf16.msra.mxu2 %v7558_v12  ;;  %v7537_v35 = vld [vmem:[#allocation11 + $0x30] sm:$0xf]  ;;  %v9610_v12 = vld [vmem:[#allocation11 + $0x34] sm:$0xf0] }
 0x4e3   :  { %v7538_v39 = vor.u32 %v9610_v12, %v7537_v35  ;;  %v7724_v35 = vor.u32 %v9688_v29, %v7723_v59  ;;  %v9677_v12 = vld [vmem:[#allocation11 + $0x254] sm:$0xf]  ;;  %v7736_v59 = vor.u32 %v9689_v42, %v7733_v8  ;;  %v9687_v29 = vld [vmem:[#allocation11 + $0x2a4] sm:$0xf]  ;;  %v7853_v42 = vld [vmem:[#allocation11 + $0x3a0] sm:$0xf] }
 0x4e4   :  { %v9720_v8 = vld [vmem:[#allocation11 + $0x3a4] sm:$0xf0] }
 0x4e5   :  { %2489 = vmatpush.bf16.msra.mxu3 %v7538_v39  ;;  %v7685_v39 = vld [vmem:[#allocation11 + $0x258] sm:$0xf0] }
 0x4e6   :  { %2527 = vmatpush.bf16.msra.mxu0 %v7614_v60  ;;  %2514 = vmatpush.bf16.msra.mxu2 %v7550_v11  ;;  %v9608_v60 = vld [vmem:[#allocation11 + $0x24] sm:$0xf0] }
 0x4e7   :  { %v7530_v6 = vor.u32 %v9608_v60, %v7529_v2  ;;  %v9604_v11 = vld [vmem:[#allocation11 + $0x4] sm:$0xf0]  ;;  %v7715_v2 = vld [vmem:[#allocation11 + $0x290] sm:$0xf]  ;;  %v9686_v60 = vld [vmem:[#allocation11 + $0x294] sm:$0xf0] }
 0x4e8   :  { %v7514_v24 = vor.u32 %v9604_v11, %v7513_v18  ;;  %v7688_v18 = vor.u32 %v9677_v12, %v7685_v39  ;;  %v7716_v11 = vor.u32 %v9686_v60, %v7715_v2  ;;  %v9685_v39 = vld [vmem:[#allocation11 + $0x294] sm:$0xf]  ;;  %v7717_v2 = vld [vmem:[#allocation11 + $0x298] sm:$0xf0] }
 0x4e9   :  { %2490 = vmatpush.bf16.msra.mxu3 %v7530_v6  ;;  %v7720_v60 = vor.u32 %v9685_v39, %v7717_v2 }
 0x4ea   :  { %2528 = vmatpush.bf16.msra.mxu0 %v7606_v58  ;;  %2515 = vmatpush.bf16.msra.mxu2 %v7542_v41  ;;  %v9606_v58 = vld [vmem:[#allocation11 + $0x14] sm:$0xf0] }
 0x4eb   :  { %v7522_v44 = vor.u32 %v9606_v58, %v7521_v20  ;;  %v9694_v41 = vld [vmem:[#allocation11 + $0x2d4] sm:$0xf0]  ;;  %v7659_v58 = vld [vmem:[#allocation11 + $0x220] sm:$0xf] }
 0x4ec   :  { %v7748_v50 = vor.u32 %v9694_v41, %v7747_v62  ;;  %v7643_v41 = vld [vmem:[#allocation11 + $0x200] sm:$0xf] }
 0x4ed   :  { %2491 = vmatpush.bf16.msra.mxu3 %v7522_v44  ;;  %v9672_v44 = vld [vmem:[#allocation11 + $0x224] sm:$0xf0] }
 0x4ee   :  { %2529 = vmatpush.bf16.msra.mxu0 %v7598_v63  ;;  %2516 = vmatpush.bf16.msra.mxu2 %v7534_v19  ;;  %v9682_v63 = vld [vmem:[#allocation11 + $0x274] sm:$0xf0]  ;;  %v7740_v19 = vor.u32 %v9692_v51, %v7739_v0  ;;  %v9671_v0 = vld [vmem:[#allocation11 + $0x224] sm:$0xf]  ;;  %v7661_v51 = vld [vmem:[#allocation11 + $0x228] sm:$0xf0] }
 0x4ef   :  { %v7700_v52 = vor.u32 %v9682_v63, %v7699_v45  ;;  %v7765_v45 = vld [vmem:[#allocation11 + $0x2f8] sm:$0xf0]  ;;  %v9673_v63 = vld [vmem:[#allocation11 + $0x234] sm:$0xf]  ;;  %v7664_v33 = vor.u32 %v9671_v0, %v7661_v51  ;;  %v9724_v51 = vld [vmem:[#allocation11 + $0x3c4] sm:$0xf0] }
 0x4f1   :  { %2492 = vmatpush.bf16.msra.mxu3 %v7514_v24  ;;  %v9675_v24 = vld [vmem:[#allocation11 + $0x244] sm:$0xf] }
 0x4f2   :  { %2530 = vmatpush.bf16.msra.mxu0 %v7590_v14  ;;  %2517 = vmatpush.bf16.msra.mxu2 %v7526_v28  ;;  %v7692_v14 = vor.u32 %v9680_v55, %v7691_v23  ;;  %v7732_v28 = vor.u32 %v9690_v27, %v7731_v13  ;;  %v9695_v23 = vld [vmem:[#allocation11 + $0x2e4] sm:$0xf]  ;;  %v7749_v13 = vld [vmem:[#allocation11 + $0x2d8] sm:$0xf0] }
 0x4f6   :  { %2531 = vmatpush.bf16.msra.mxu0 %v7582_v7  ;;  %2518 = vmatpush.bf16.msra.mxu2 %v7518_v37  ;;  %v9674_v37 = vld [vmem:[#allocation11 + $0x234] sm:$0xf0] }
 0x4f7   :  { %v7668_v6 = vor.u32 %v9674_v37, %v7667_v22  ;;  %v9714_v37 = vld [vmem:[#allocation11 + $0x374] sm:$0xf0] }
 0x52e   :  { %v10762_v46 = vpop.f32.mrf.mxu0 }
 0x52f   :  { %v1999_v20 = vpack.c.bf16 %v10762_v46, %v10762_v46  ;;  %v7680_v46 = vor.u32 %v9675_v24, %v7677_v21  ;;  %v7813_v24 = vld [vmem:[#allocation11 + $0x350] sm:$0xf]  ;;  %v9710_v21 = vld [vmem:[#allocation11 + $0x354] sm:$0xf0] }
 0x534   :  { %v1996_v49 = vpop.f32.mrf.mxu2 }
 0x535   :  { %v2000_v7 = vpack.c.bf16 %v1996_v49, %v1996_v49  ;;  %v9684_v49 = vld [vmem:[#allocation11 + $0x284] sm:$0xf0] }
 0x536   :  { %v2075_v48 = vpop.f32.mrf.mxu0  ;;  %v7708_v38 = vor.u32 %v9684_v49, %v7707_v17  ;;  %v7893_v17 = vld [vmem:[#allocation11 + $0x3f0] sm:$0xf]  ;;  %v7814_v49 = vor.u32 %v9710_v21, %v7813_v24 }
 0x537   :  { %v2079_v47 = vpack.c.bf16 %v2075_v48, %v2075_v48  ;;  %v7660_v48 = vor.u32 %v9672_v44, %v7659_v58  ;;  %v9683_v44 = vld [vmem:[#allocation11 + $0x284] sm:$0xf] }
 0x539   :  { %2294 = vmatmul.bf16.vlgmr.msrb.gmra.mxu1 %v2079_v47  ;;  %2320 = vmatmul.bf16.vlgmr.msrb.gmra.mxu0 %v2079_v47  ;;  %v9670_v47 = vld [vmem:[#allocation11 + $0x214] sm:$0xf0] }
 0x53a   :  { %2554 = vmatpush.msrb.mxu1 %v10726_v32  ;;  %2790 = vmatpush.bf16.msrb.mxu0 %v7764_v16  ;;  %v7651_v16 = vld [vmem:[#allocation11 + $0x210] sm:$0xf] }
 0x53b   :  { %v7652_v62 = vor.u32 %v9670_v47, %v7651_v16  ;;  %v7805_v47 = vld [vmem:[#allocation11 + $0x340] sm:$0xf] }
 0x53c   :  { %2555 = vmatpush.msrb.mxu1 %v10730_v53  ;;  %v2055_v15 = vpop.f32.mrf.mxu2 }
 0x53d   :  { %v2078_v9 = vpack.c.bf16 %v2055_v15, %v2055_v15  ;;  %v9668_v15 = vld [vmem:[#allocation11 + $0x204] sm:$0xf0] }
 0x53e   :  { %2556 = vmatpush.msrb.mxu1 %v10736_v43  ;;  %2791 = vmatpush.bf16.msrb.mxu0 %v7756_v1  ;;  %v7669_v1 = vld [vmem:[#allocation11 + $0x238] sm:$0xf0] }
 0x53f   :  { %2281 = vmatmul.bf16.vlgmr.msrb.gmra.mxu3 %v2078_v9  ;;  %2307 = vmatmul.bf16.vlgmr.msrb.gmra.mxu2 %v2078_v9  ;;  %v7768_v9 = vor.u32 %v9697_v40, %v7765_v45  ;;  %v7672_v55 = vor.u32 %v9673_v63, %v7669_v1  ;;  %v9728_v45 = vld [vmem:[#allocation11 + $0x3e4] sm:$0xf0]  ;;  %v7797_v1 = vld [vmem:[#allocation11 + $0x330] sm:$0xf] }
 0x540   :  { %2557 = vmatpush.msrb.mxu1 %v10742_v5  ;;  %2777 = vmatpush.bf16.msrb.mxu2 %v7700_v52  ;;  %v2538_v52 = vld [vmem:[#allocation14 + $0x4] sm:$0x3] }
 0x541   :  { %2803 = vmatpush.bf16.msrb.mxu3 %v7704_v56  ;;  %v9669_v56 = vld [vmem:[#allocation11 + $0x214] sm:$0xf] }
 0x542   :  { %2792 = vmatpush.bf16.msrb.mxu0 %v7748_v50  ;;  %v7757_v50 = vld [vmem:[#allocation11 + $0x2e8] sm:$0xf0] }
 0x543   :  { %v7760_v57 = vor.u32 %v9695_v23, %v7757_v50  ;;  %v7789_v23 = vld [vmem:[#allocation11 + $0x320] sm:$0xf] }
 0x544   :  { %2778 = vmatpush.bf16.msrb.mxu2 %v7692_v14  ;;  %v7644_v14 = vor.u32 %v9668_v15, %v7643_v41  ;;  %v7877_v41 = vld [vmem:[#allocation11 + $0x3d0] sm:$0xf]  ;;  %v7869_v50 = vld [vmem:[#allocation11 + $0x3c0] sm:$0xf] }
 0x545   :  { %2804 = vmatpush.bf16.msrb.mxu3 %v7696_v31  ;;  %v7725_v31 = vld [vmem:[#allocation11 + $0x2a8] sm:$0xf0] }
 0x546   :  { %2793 = vmatpush.bf16.msrb.mxu0 %v7740_v19  ;;  %v9693_v19 = vld [vmem:[#allocation11 + $0x2d4] sm:$0xf] }
 0x547   :  { %v7752_v27 = vor.u32 %v9693_v19, %v7749_v13  ;;  %v7861_v19 = vld [vmem:[#allocation11 + $0x3b0] sm:$0xf] }
 0x548   :  { %2779 = vmatpush.bf16.msrb.mxu2 %v7684_v54  ;;  %v7744_v54 = vor.u32 %v9691_v3, %v7741_v25 }
 0x549   :  { %2506 = vmatmul.bf16.vlgmr.msra.gmra.mxu1 %v2000_v7  ;;  %2532 = vmatmul.bf16.vlgmr.msra.gmra.mxu0 %v2000_v7  ;;  %v7656_v7 = vor.u32 %v9669_v56, %v7653_v30  ;;  %v7773_v56 = vld [vmem:[#allocation11 + $0x300] sm:$0xf]  ;;  %v9700_v30 = vld [vmem:[#allocation11 + $0x304] sm:$0xf0] }
 0x54a   :  { %2574 = vmatpush.msra.mxu1 %v10728_v36  ;;  %2794 = vmatpush.bf16.msrb.mxu0 %v7732_v28  ;;  %v7645_v28 = vld [vmem:[#allocation11 + $0x208] sm:$0xf0] }
 0x54b   :  { %2805 = vmatpush.bf16.msrb.mxu3 %v7688_v18  ;;  %v7648_v22 = vor.u32 %v9667_v26, %v7645_v28  ;;  %v7709_v18 = vld [vmem:[#allocation11 + $0x288] sm:$0xf0]  ;;  %v7854_v26 = vor.u32 %v9720_v8, %v7853_v42  ;;  %v7845_v28 = vld [vmem:[#allocation11 + $0x390] sm:$0xf]  ;;  %v9723_v42 = vld [vmem:[#allocation11 + $0x3c4] sm:$0xf] }
 0x54c   :  { %2575 = vmatpush.msra.mxu1 %v10732_v10  ;;  %2780 = vmatpush.bf16.msrb.mxu2 %v7676_v34  ;;  %v7829_v34 = vld [vmem:[#allocation11 + $0x370] sm:$0xf] }
 0x54d   :  { %v7830_v12 = vor.u32 %v9714_v37, %v7829_v34  ;;  %v9716_v37 = vld [vmem:[#allocation11 + $0x384] sm:$0xf0] }
 0x54e   :  { %2576 = vmatpush.msra.mxu1 %v10738_v61  ;;  %2795 = vmatpush.bf16.msrb.mxu0 %v7724_v35  ;;  %v7728_v35 = vor.u32 %v9687_v29, %v7725_v31 }
 0x54f   :  { %2493 = vmatmul.bf16.vlgmr.msra.gmra.mxu3 %v1999_v20  ;;  %2519 = vmatmul.bf16.vlgmr.msra.gmra.mxu2 %v1999_v20  ;;  %v9712_v20 = vld [vmem:[#allocation11 + $0x364] sm:$0xf0] }
 0x550   :  { %2577 = vmatpush.msra.mxu1 %v10744_v4  ;;  %2781 = vmatpush.bf16.msrb.mxu2 %v7668_v6  ;;  %v7821_v6 = vld [vmem:[#allocation11 + $0x360] sm:$0xf] }
 0x551   :  { %2806 = vmatpush.bf16.msrb.mxu3 %v7680_v46  ;;  %v7822_v58 = vor.u32 %v9712_v20, %v7821_v6  ;;  %v9708_v46 = vld [vmem:[#allocation11 + $0x344] sm:$0xf0] }
 0x552   :  { %2796 = vmatpush.bf16.msrb.mxu0 %v7716_v11  ;;  %v7712_v11 = vor.u32 %v9683_v44, %v7709_v18  ;;  %v7806_v40 = vor.u32 %v9708_v46, %v7805_v47 }
 0x554   :  { %2782 = vmatpush.bf16.msrb.mxu2 %v7660_v48  ;;  %v9730_v48 = vld [vmem:[#allocation11 + $0x3f4] sm:$0xf0] }
 0x555   :  { %2807 = vmatpush.bf16.msrb.mxu3 %v7672_v55  ;;  %v7894_v16 = vor.u32 %v9730_v48, %v7893_v17  ;;  %v9704_v55 = vld [vmem:[#allocation11 + $0x324] sm:$0xf0]  ;;  %v7831_v48 = vld [vmem:[#allocation11 + $0x378] sm:$0xf0] }
 0x556   :  { %2797 = vmatpush.bf16.msrb.mxu0 %v7708_v38  ;;  %v7885_v38 = vld [vmem:[#allocation11 + $0x3e0] sm:$0xf]  ;;  %v7790_v0 = vor.u32 %v9704_v55, %v7789_v23 }
 0x557   :  { %v7886_v63 = vor.u32 %v9728_v45, %v7885_v38  ;;  %v7823_v45 = vld [vmem:[#allocation11 + $0x368] sm:$0xf0] }
 0x558   :  { %2783 = vmatpush.bf16.msrb.mxu2 %v7652_v62  ;;  %v9706_v62 = vld [vmem:[#allocation11 + $0x334] sm:$0xf0] }
 0x559   :  { %7639 = vmatmul.msk.f32.vlgmr.msrb.gmra.mxu1 %vm235_vm2, %v2538_v52  ;;  %2808 = vmatpush.bf16.msrb.mxu3 %v7664_v33  ;;  %v7798_v15 = vor.u32 %v9706_v62, %v7797_v1  ;;  %v9702_v33 = vld [vmem:[#allocation11 + $0x314] sm:$0xf0] }
 0x55a   :  { %2868 = vmatpush.msra.mxu0 %v10728_v36  ;;  %2816 = vmatpush.bf16.msrb.mxu1 %v7768_v9 }
 0x55c   :  { %2869 = vmatpush.msra.mxu0 %v10732_v10  ;;  %2784 = vmatpush.bf16.msrb.mxu2 %v7644_v14  ;;  %v7870_v14 = vor.u32 %v9724_v51, %v7869_v50  ;;  %v7887_v51 = vld [vmem:[#allocation11 + $0x3e8] sm:$0xf0] }
 0x55d   :  { %2809 = vmatpush.bf16.msrb.mxu3 %v7656_v7  ;;  %v7774_v7 = vor.u32 %v9700_v30, %v7773_v56  ;;  %v2832_v56 = vld [vmem:[#allocation14 + $0x6] sm:$0x3] }
 0x55e   :  { %2870 = vmatpush.msra.mxu0 %v10738_v61  ;;  %2817 = vmatpush.bf16.msrb.mxu1 %v7760_v57  ;;  %v7781_v57 = vld [vmem:[#allocation11 + $0x310] sm:$0xf] }
 0x55f   :  { %v7782_v13 = vor.u32 %v9702_v33, %v7781_v57  ;;  %v9707_v57 = vld [vmem:[#allocation11 + $0x344] sm:$0xf]  ;;  %v7807_v33 = vld [vmem:[#allocation11 + $0x348] sm:$0xf0] }
 0x560   :  { %2848 = vmatpush.msra.mxu2 %v10726_v32  ;;  %2871 = vmatpush.msra.mxu0 %v10744_v4 }
 0x561   :  { %7640 = vmatmul.msk.f32.vlgmr.msra.gmra.mxu1 %vm235_vm2, %v2538_v52  ;;  %2810 = vmatpush.bf16.msrb.mxu3 %v7648_v22  ;;  %v9726_v52 = vld [vmem:[#allocation11 + $0x3d4] sm:$0xf0]  ;;  %v7837_v22 = vld [vmem:[#allocation11 + $0x380] sm:$0xf] }
 0x562   :  { %2849 = vmatpush.msra.mxu2 %v10730_v53  ;;  %2818 = vmatpush.bf16.msrb.mxu1 %v7752_v27  ;;  %v7878_v9 = vor.u32 %v9726_v52, %v7877_v41  ;;  %v9722_v27 = vld [vmem:[#allocation11 + $0x3b4] sm:$0xf0]  ;;  %v9729_v41 = vld [vmem:[#allocation11 + $0x3f4] sm:$0xf] }
 0x563   :  { %v7862_v3 = vor.u32 %v9722_v27, %v7861_v19  ;;  %v9709_v52 = vld [vmem:[#allocation11 + $0x354] sm:$0xf]  ;;  %v7879_v27 = vld [vmem:[#allocation11 + $0x3d8] sm:$0xf0] }
 0x564   :  { %2850 = vmatpush.msra.mxu2 %v10736_v43 }
 0x565   :  { %3071 = vmatpush.bf16.msra.mxu3 %v7830_v12 }
 0x566   :  { %2851 = vmatpush.msra.mxu2 %v10742_v5  ;;  %2819 = vmatpush.bf16.msrb.mxu1 %v7744_v54 }
 0x569   :  { %3072 = vmatpush.bf16.msra.mxu3 %v7822_v58 }
 0x56a   :  { %2820 = vmatpush.bf16.msrb.mxu1 %v7736_v59  ;;  %v9718_v59 = vld [vmem:[#allocation11 + $0x394] sm:$0xf0] }
 0x56b   :  { %v7846_v29 = vor.u32 %v9718_v59, %v7845_v28  ;;  %v7791_v28 = vld [vmem:[#allocation11 + $0x328] sm:$0xf0] }
 0x56d   :  { %3073 = vmatpush.bf16.msra.mxu3 %v7814_v49  ;;  %v9713_v49 = vld [vmem:[#allocation11 + $0x374] sm:$0xf] }
 0x56e   :  { %2821 = vmatpush.bf16.msrb.mxu1 %v7728_v35  ;;  %v7838_v35 = vor.u32 %v9716_v37, %v7837_v22  ;;  %v7834_v46 = vor.u32 %v9713_v49, %v7831_v48  ;;  %v9701_v22 = vld [vmem:[#allocation11 + $0x314] sm:$0xf]  ;;  %v7783_v37 = vld [vmem:[#allocation11 + $0x318] sm:$0xf0] }
 0x571   :  { %3074 = vmatpush.bf16.msra.mxu3 %v7806_v40  ;;  %v9711_v40 = vld [vmem:[#allocation11 + $0x364] sm:$0xf] }
 0x572   :  { %2822 = vmatpush.bf16.msrb.mxu1 %v7720_v60  ;;  %v7826_v62 = vor.u32 %v9711_v40, %v7823_v45  ;;  %v9715_v40 = vld [vmem:[#allocation11 + $0x384] sm:$0xf]  ;;  %v7839_v45 = vld [vmem:[#allocation11 + $0x388] sm:$0xf0] }
 0x575   :  { %3075 = vmatpush.bf16.msra.mxu3 %v7798_v15  ;;  %v7895_v15 = vld [vmem:[#allocation11 + $0x3f8] sm:$0xf0] }
 0x576   :  { %2823 = vmatpush.bf16.msrb.mxu1 %v7712_v11  ;;  %v7898_v55 = vor.u32 %v9729_v41, %v7895_v15  ;;  %v7943_v41 = vld [vmem:[#allocation11 + $0x450] sm:$0xf]  ;;  %v9742_v15 = vld [vmem:[#allocation11 + $0x454] sm:$0xf0] }
 0x579   :  { %3076 = vmatpush.bf16.msra.mxu3 %v7790_v0  ;;  %v9727_v0 = vld [vmem:[#allocation11 + $0x3e4] sm:$0xf] }
 0x57a   :  { %3084 = vmatpush.bf16.msra.mxu1 %v7894_v16  ;;  %v7890_v19 = vor.u32 %v9727_v0, %v7887_v51  ;;  %v8007_v51 = vld [vmem:[#allocation11 + $0x4d0] sm:$0xf] }
 0x57d   :  { %3077 = vmatpush.bf16.msra.mxu3 %v7782_v13  ;;  %v9725_v13 = vld [vmem:[#allocation11 + $0x3d4] sm:$0xf] }
 0x57e   :  { %3085 = vmatpush.bf16.msra.mxu1 %v7886_v63  ;;  %v7882_v30 = vor.u32 %v9725_v13, %v7879_v27  ;;  %v7999_v27 = vld [vmem:[#allocation11 + $0x4c0] sm:$0xf] }
 0x581   :  { %3078 = vmatpush.bf16.msra.mxu3 %v7774_v7  ;;  %v7871_v7 = vld [vmem:[#allocation11 + $0x3c8] sm:$0xf0] }
 0x582   :  { %3086 = vmatpush.bf16.msra.mxu1 %v7878_v9  ;;  %v7815_v9 = vld [vmem:[#allocation11 + $0x358] sm:$0xf0]  ;;  %v7874_v59 = vor.u32 %v9723_v42, %v7871_v7  ;;  %v7991_v42 = vld [vmem:[#allocation11 + $0x4b0] sm:$0xf]  ;;  %v9754_v7 = vld [vmem:[#allocation11 + $0x4b4] sm:$0xf0] }
 0x586   :  { %3087 = vmatpush.bf16.msra.mxu1 %v7870_v14  ;;  %v7818_v14 = vor.u32 %v9709_v52, %v7815_v9  ;;  %v7842_v52 = vor.u32 %v9715_v40, %v7839_v45 }
 0x58a   :  { %3088 = vmatpush.bf16.msra.mxu1 %v7862_v3  ;;  %v7810_v3 = vor.u32 %v9707_v57, %v7807_v33  ;;  %v7935_v33 = vld [vmem:[#allocation11 + $0x440] sm:$0xf] }
 0x58e   :  { %3089 = vmatpush.bf16.msra.mxu1 %v7854_v26  ;;  %v9703_v26 = vld [vmem:[#allocation11 + $0x324] sm:$0xf] }
 0x592   :  { %3090 = vmatpush.bf16.msra.mxu1 %v7846_v29  ;;  %v9721_v29 = vld [vmem:[#allocation11 + $0x3b4] sm:$0xf] }
 0x596   :  { %3091 = vmatpush.bf16.msra.mxu1 %v7838_v35 }
 0x5b6   :  { %v2295_v25 = vpop.f32.mrf.mxu1  ;;  %v2321_v54 = vpop.f32.mrf.mxu0 }
 0x5be   :  { %v2297_v31 = vpop.f32.mrf.mxu1  ;;  %v2323_v34 = vpop.f32.mrf.mxu0 }
 0x5bf   :  { %v7863_v31 = vld [vmem:[#allocation11 + $0x3b8] sm:$0xf0]  ;;  %v7794_v34 = vor.u32 %v9703_v26, %v7791_v28  ;;  %v7919_v26 = vld [vmem:[#allocation11 + $0x420] sm:$0xf]  ;;  %v9736_v28 = vld [vmem:[#allocation11 + $0x424] sm:$0xf0] }
 0x5c0   :  { %v7866_v35 = vor.u32 %v9721_v29, %v7863_v31  ;;  %v7983_v29 = vld [vmem:[#allocation11 + $0x4a0] sm:$0xf]  ;;  %v9752_v31 = vld [vmem:[#allocation11 + $0x4a4] sm:$0xf0] }
 0x5c2   :  { %v2282_v12 = vpop.f32.mrf.mxu3  ;;  %v2308_v39 = vpop.f32.mrf.mxu2 }
 0x5c3   :  { %v10784_v2 = vadd.f32 %v2321_v54, %v2308_v39  ;;  %v2296_v11 = vadd.f32 %v2295_v25, %v2282_v12  ;;  %v9705_v25 = vld [vmem:[#allocation11 + $0x334] sm:$0xf]  ;;  %v7799_v54 = vld [vmem:[#allocation11 + $0x338] sm:$0xf0]  ;;  %v9719_v12 = vld [vmem:[#allocation11 + $0x3a4] sm:$0xf] }
 0x5c4   :  { %v7802_v8 = vor.u32 %v9705_v25, %v7799_v54  ;;  %v7855_v39 = vld [vmem:[#allocation11 + $0x3a8] sm:$0xf0]  ;;  %v7927_v54 = vld [vmem:[#allocation11 + $0x430] sm:$0xf] }
 0x5c6   :  { %v2507_v60 = vpop.f32.mrf.mxu1  ;;  %v10786_v6 = vpop.f32.mrf.mxu0 }
 0x5ca   :  { %v2284_v20 = vpop.f32.mrf.mxu3  ;;  %v2310_v58 = vpop.f32.mrf.mxu2 }
 0x5cb   :  { %v9699_v20 = vld [vmem:[#allocation11 + $0x304] sm:$0xf]  ;;  %v7775_v58 = vld [vmem:[#allocation11 + $0x308] sm:$0xf0] }
 0x5cc   :  { %v7778_v49 = vor.u32 %v9699_v20, %v7775_v58  ;;  %v7903_v20 = vld [vmem:[#allocation11 + $0x400] sm:$0xf]  ;;  %v9732_v58 = vld [vmem:[#allocation11 + $0x404] sm:$0xf0] }
 0x5ce   :  { %v2509_v44 = vpop.f32.mrf.mxu1  ;;  %v2535_v18 = vpop.f32.mrf.mxu0 }
 0x5cf   :  { %v7959_v44 = vld [vmem:[#allocation11 + $0x470] sm:$0xf]  ;;  %v9746_v18 = vld [vmem:[#allocation11 + $0x474] sm:$0xf0] }
 0x5d0   :  { %v7960_v48 = vor.u32 %v9746_v18, %v7959_v44  ;;  %v7904_v44 = vor.u32 %v9732_v58, %v7903_v20  ;;  %v7967_v18 = vld [vmem:[#allocation11 + $0x480] sm:$0xf]  ;;  %v7985_v20 = vld [vmem:[#allocation11 + $0x4a8] sm:$0xf0] }
 0x5d2   :  { %v2494_v24 = vpop.f32.mrf.mxu3  ;;  %v10788_v21 = vpop.f32.mrf.mxu2 }
 0x5d3   :  { %v2495_v17 = vadd.f32 %v2494_v24, %v2296_v11  ;;  %v7858_v11 = vor.u32 %v9719_v12, %v7855_v39  ;;  %v9717_v24 = vld [vmem:[#allocation11 + $0x394] sm:$0xf]  ;;  %v7975_v12 = vld [vmem:[#allocation11 + $0x490] sm:$0xf]  ;;  %v9750_v39 = vld [vmem:[#allocation11 + $0x494] sm:$0xf0] }
 0x5d5   :  { %v10790_v16 = vadd.f32 %v2507_v60, %v2495_v17  ;;  %v7786_v60 = vor.u32 %v9701_v22, %v7783_v37  ;;  %v7847_v17 = vld [vmem:[#allocation11 + $0x398] sm:$0xf0]  ;;  %v7984_v22 = vor.u32 %v9752_v31, %v7983_v29  ;;  %v9734_v37 = vld [vmem:[#allocation11 + $0x414] sm:$0xf0]  ;;  %v3126_v31 = vld [vmem:[#allocation14 + $0x8] sm:$0x3] }
 0x5d6   :  { %v2559_v47 = vpop.f32.mrf.mxu1 }
 0x5d7   :  { %v2582_v38 = vpack.c.bf16 %v2559_v47, %v2559_v47  ;;  %v7951_v47 = vld [vmem:[#allocation11 + $0x460] sm:$0xf] }
 0x5d9   :  { %2785 = vmatmul.bf16.vlgmr.msrb.gmra.mxu2 %v2582_v38  ;;  %2811 = vmatmul.bf16.vlgmr.msrb.gmra.mxu3 %v2582_v38  ;;  %v7850_v38 = vor.u32 %v9717_v24, %v7847_v17 }
 0x5da   :  { %3142 = vmatpush.msrb.mxu3 %v10726_v32  ;;  %v2496_v63 = vpop.f32.mrf.mxu3  ;;  %v2522_v1 = vpop.f32.mrf.mxu2  ;;  %3097 = vmatpush.bf16.msrb.mxu2 %v7834_v46  ;;  %v9744_v46 = vld [vmem:[#allocation11 + $0x464] sm:$0xf0] }
 0x5db   :  { %v8023_v63 = vld [vmem:[#allocation11 + $0x4f0] sm:$0xf]  ;;  %v9762_v1 = vld [vmem:[#allocation11 + $0x4f4] sm:$0xf0] }
 0x5dc   :  { %3143 = vmatpush.msrb.mxu3 %v10730_v53  ;;  %v8024_v9 = vor.u32 %v9762_v1, %v8023_v63  ;;  %v9745_v63 = vld [vmem:[#allocation11 + $0x474] sm:$0xf]  ;;  %v7961_v1 = vld [vmem:[#allocation11 + $0x478] sm:$0xf0] }
 0x5de   :  { %3144 = vmatpush.msrb.mxu3 %v10736_v43  ;;  %v2579_v23 = vpop.f32.mrf.mxu1  ;;  %3098 = vmatpush.bf16.msrb.mxu2 %v7826_v62  ;;  %v7952_v62 = vor.u32 %v9744_v46, %v7951_v47 }
 0x5df   :  { %v2583_v50 = vpack.c.bf16 %v2579_v23, %v2579_v23  ;;  %v8015_v23 = vld [vmem:[#allocation11 + $0x4e0] sm:$0xf] }
 0x5e0   :  { %3145 = vmatpush.msrb.mxu3 %v10742_v5 }
 0x5e1   :  { %2798 = vmatmul.bf16.vlgmr.msrb.gmra.mxu0 %v2583_v50  ;;  %2824 = vmatmul.bf16.vlgmr.msrb.gmra.mxu1 %v2583_v50  ;;  %v7944_v50 = vor.u32 %v9742_v15, %v7943_v41  ;;  %v9761_v41 = vld [vmem:[#allocation11 + $0x4f4] sm:$0xf]  ;;  %v8025_v15 = vld [vmem:[#allocation11 + $0x4f8] sm:$0xf0] }
 0x5e2   :  { %3162 = vmatpush.msrb.mxu1 %v10728_v36  ;;  %3110 = vmatpush.bf16.msrb.mxu0 %v7898_v55  ;;  %v9760_v55 = vld [vmem:[#allocation11 + $0x4e4] sm:$0xf0] }
 0x5e3   :  { %3099 = vmatpush.bf16.msrb.mxu2 %v7818_v14  ;;  %v8016_v0 = vor.u32 %v9760_v55, %v8015_v23  ;;  %v9758_v14 = vld [vmem:[#allocation11 + $0x4d4] sm:$0xf0]  ;;  %v9743_v55 = vld [vmem:[#allocation11 + $0x464] sm:$0xf] }
 0x5e4   :  { %3163 = vmatpush.msrb.mxu1 %v10732_v10  ;;  %v8008_v57 = vor.u32 %v9758_v14, %v8007_v51  ;;  %v8028_v51 = vor.u32 %v9761_v41, %v8025_v15  ;;  %v9759_v14 = vld [vmem:[#allocation11 + $0x4e4] sm:$0xf]  ;;  %v7969_v15 = vld [vmem:[#allocation11 + $0x488] sm:$0xf0] }
 0x5e5   :  { %v9747_v41 = vld [vmem:[#allocation11 + $0x484] sm:$0xf] }
 0x5e6   :  { %3164 = vmatpush.msrb.mxu1 %v10738_v61  ;;  %3111 = vmatpush.bf16.msrb.mxu0 %v7890_v19  ;;  %v9740_v19 = vld [vmem:[#allocation11 + $0x444] sm:$0xf0] }
 0x5e7   :  { %3100 = vmatpush.bf16.msrb.mxu2 %v7810_v3  ;;  %v7936_v13 = vor.u32 %v9740_v19, %v7935_v33  ;;  %v9756_v3 = vld [vmem:[#allocation11 + $0x4c4] sm:$0xf0]  ;;  %v9741_v19 = vld [vmem:[#allocation11 + $0x454] sm:$0xf] }
 0x5e8   :  { %3165 = vmatpush.msrb.mxu1 %v10744_v4  ;;  %v8000_v25 = vor.u32 %v9756_v3, %v7999_v27  ;;  %v9757_v3 = vld [vmem:[#allocation11 + $0x4d4] sm:$0xf] }
 0x5e9   :  { %7769 = vmatmul.msk.f32.vlgmr.msra.gmra.mxu2 %vm235_vm2, %v2832_v56 }
 0x5ea   :  { %3112 = vmatpush.bf16.msrb.mxu0 %v7882_v30 }
 0x5eb   :  { %3101 = vmatpush.bf16.msrb.mxu2 %v7802_v8  ;;  %v7992_v8 = vor.u32 %v9754_v7, %v7991_v42  ;;  %v9755_v7 = vld [vmem:[#allocation11 + $0x4c4] sm:$0xf] }
 0x5ee   :  { %3113 = vmatpush.bf16.msrb.mxu0 %v7874_v59  ;;  %v7920_v59 = vor.u32 %v9736_v28, %v7919_v26  ;;  %v9737_v28 = vld [vmem:[#allocation11 + $0x434] sm:$0xf] }
 0x5ef   :  { %3102 = vmatpush.bf16.msrb.mxu2 %v7794_v34  ;;  %v7911_v34 = vld [vmem:[#allocation11 + $0x410] sm:$0xf] }
 0x5f1   :  { %7770 = vmatmul.msk.f32.vlgmr.msra.gmra.mxu0 %vm235_vm2, %v2832_v56  ;;  %v9738_v56 = vld [vmem:[#allocation11 + $0x434] sm:$0xf0] }
 0x5f2   :  { %3114 = vmatpush.bf16.msrb.mxu0 %v7866_v35  ;;  %v7928_v30 = vor.u32 %v9738_v56, %v7927_v54  ;;  %v7912_v35 = vor.u32 %v9734_v37, %v7911_v34  ;;  %v9739_v56 = vld [vmem:[#allocation11 + $0x444] sm:$0xf]  ;;  %v9753_v34 = vld [vmem:[#allocation11 + $0x4b4] sm:$0xf] }
 0x5f3   :  { %3103 = vmatpush.bf16.msrb.mxu2 %v7786_v60  ;;  %v7976_v60 = vor.u32 %v9750_v39, %v7975_v12  ;;  %v7921_v12 = vld [vmem:[#allocation11 + $0x428] sm:$0xf0] }
 0x5f6   :  { %3115 = vmatpush.bf16.msrb.mxu0 %v7858_v11  ;;  %v9748_v11 = vld [vmem:[#allocation11 + $0x484] sm:$0xf0] }
 0x5f7   :  { %3104 = vmatpush.bf16.msrb.mxu2 %v7778_v49  ;;  %v7968_v24 = vor.u32 %v9748_v11, %v7967_v18  ;;  %v7913_v18 = vld [vmem:[#allocation11 + $0x418] sm:$0xf0] }
 0x5fa   :  { %3116 = vmatpush.bf16.msrb.mxu0 %v7850_v38 }
 0x5fb   :  { %3365 = vmatpush.bf16.msra.mxu2 %v7960_v48 }
 0x5fe   :  { %3117 = vmatpush.bf16.msrb.mxu0 %v7842_v52  ;;  %v7964_v52 = vor.u32 %v9745_v63, %v7961_v1  ;;  %v8089_v1 = vld [vmem:[#allocation11 + $0x570] sm:$0xf] }
 0x5ff   :  { %3366 = vmatpush.bf16.msra.mxu2 %v7952_v62 }
 0x602   :  { %3378 = vmatpush.bf16.msra.mxu0 %v8024_v9 }
 0x603   :  { %3367 = vmatpush.bf16.msra.mxu2 %v7944_v50  ;;  %v7953_v50 = vld [vmem:[#allocation11 + $0x468] sm:$0xf0] }
 0x604   :  { %v7956_v33 = vor.u32 %v9743_v55, %v7953_v50  ;;  %v7972_v50 = vor.u32 %v9747_v41, %v7969_v15  ;;  %v9764_v41 = vld [vmem:[#allocation11 + $0x504] sm:$0xf0] }
 0x606   :  { %3379 = vmatpush.bf16.msra.mxu0 %v8016_v0 }
 0x607   :  { %3368 = vmatpush.bf16.msra.mxu2 %v7936_v13  ;;  %v7945_v13 = vld [vmem:[#allocation11 + $0x458] sm:$0xf0] }
 0x608   :  { %v7948_v54 = vor.u32 %v9741_v19, %v7945_v13 }
 0x60a   :  { %3380 = vmatpush.bf16.msra.mxu0 %v8008_v57  ;;  %v8017_v57 = vld [vmem:[#allocation11 + $0x4e8] sm:$0xf0] }
 0x60b   :  { %3369 = vmatpush.bf16.msra.mxu2 %v7928_v30  ;;  %v8020_v27 = vor.u32 %v9759_v14, %v8017_v57  ;;  %v7937_v30 = vld [vmem:[#allocation11 + $0x448] sm:$0xf0]  ;;  %v8145_v57 = vld [vmem:[#allocation11 + $0x5e0] sm:$0xf] }
 0x60c   :  { %v7940_v26 = vor.u32 %v9739_v56, %v7937_v30  ;;  %v9774_v56 = vld [vmem:[#allocation11 + $0x554] sm:$0xf0]  ;;  %v8129_v30 = vld [vmem:[#allocation11 + $0x5c0] sm:$0xf] }
 0x60e   :  { %3381 = vmatpush.bf16.msra.mxu0 %v8000_v25  ;;  %v8009_v25 = vld [vmem:[#allocation11 + $0x4d8] sm:$0xf0] }
 0x60f   :  { %3370 = vmatpush.bf16.msra.mxu2 %v7920_v59  ;;  %v8012_v42 = vor.u32 %v9757_v3, %v8009_v25  ;;  %v7929_v59 = vld [vmem:[#allocation11 + $0x438] sm:$0xf0]  ;;  %v9790_v3 = vld [vmem:[#allocation11 + $0x5d4] sm:$0xf0] }
 0x610   :  { %v7932_v37 = vor.u32 %v9737_v28, %v7929_v59  ;;  %v9772_v28 = vld [vmem:[#allocation11 + $0x544] sm:$0xf0]  ;;  %v8121_v59 = vld [vmem:[#allocation11 + $0x5b0] sm:$0xf] }
 0x612   :  { %3382 = vmatpush.bf16.msra.mxu0 %v7992_v8  ;;  %v8001_v8 = vld [vmem:[#allocation11 + $0x4c8] sm:$0xf0] }
 0x613   :  { %3371 = vmatpush.bf16.msra.mxu2 %v7912_v35  ;;  %v8004_v29 = vor.u32 %v9755_v7, %v8001_v8  ;;  %v9735_v35 = vld [vmem:[#allocation11 + $0x424] sm:$0xf]  ;;  %v9788_v7 = vld [vmem:[#allocation11 + $0x5c4] sm:$0xf0] }
 0x614   :  { %v7924_v58 = vor.u32 %v9735_v35, %v7921_v12  ;;  %v8130_v8 = vor.u32 %v9788_v7, %v8129_v30  ;;  %v8113_v35 = vld [vmem:[#allocation11 + $0x5a0] sm:$0xf] }
 0x616   :  { %3383 = vmatpush.bf16.msra.mxu0 %v7984_v22  ;;  %v7993_v22 = vld [vmem:[#allocation11 + $0x4b8] sm:$0xf0] }
 0x617   :  { %3372 = vmatpush.bf16.msra.mxu2 %v7904_v44  ;;  %v7996_v39 = vor.u32 %v9753_v34, %v7993_v22  ;;  %v9733_v44 = vld [vmem:[#allocation11 + $0x414] sm:$0xf]  ;;  %v8057_v22 = vld [vmem:[#allocation11 + $0x530] sm:$0xf] }
 0x61a   :  { %3384 = vmatpush.bf16.msra.mxu0 %v7976_v60  ;;  %v9751_v60 = vld [vmem:[#allocation11 + $0x4a4] sm:$0xf] }
 0x61b   :  { %v7988_v11 = vor.u32 %v9751_v60, %v7985_v20  ;;  %v8049_v20 = vld [vmem:[#allocation11 + $0x520] sm:$0xf] }
 0x61e   :  { %3385 = vmatpush.bf16.msra.mxu0 %v7968_v24  ;;  %v9749_v24 = vld [vmem:[#allocation11 + $0x494] sm:$0xf] }
 0x65c   :  { %v10802_v17 = vpop.f32.mrf.mxu2  ;;  %v10804_v49 = vpop.f32.mrf.mxu3 }
 0x65e   :  { %v10806_v48 = vpop.f32.mrf.mxu0  ;;  %v10808_v47 = vpop.f32.mrf.mxu1 }
 0x664   :  { %v2788_v46 = vpop.f32.mrf.mxu2  ;;  %v2814_v38 = vpop.f32.mrf.mxu3 }
 0x665   :  { %v7977_v46 = vld [vmem:[#allocation11 + $0x498] sm:$0xf0]  ;;  %v7916_v38 = vor.u32 %v9733_v44, %v7913_v18  ;;  %v8105_v44 = vld [vmem:[#allocation11 + $0x590] sm:$0xf] }
 0x666   :  { %v2801_v40 = vpop.f32.mrf.mxu0  ;;  %v2827_v45 = vpop.f32.mrf.mxu1  ;;  %v7980_v63 = vor.u32 %v9749_v24, %v7977_v46  ;;  %v8041_v46 = vld [vmem:[#allocation11 + $0x510] sm:$0xf] }
 0x667   :  { %v9731_v40 = vld [vmem:[#allocation11 + $0x404] sm:$0xf]  ;;  %v7905_v45 = vld [vmem:[#allocation11 + $0x408] sm:$0xf0] }
 0x66c   :  { %v2853_v62 = vpop.f32.mrf.mxu2 }
 0x66d   :  { %v2876_v9 = vpack.c.bf16 %v2853_v62, %v2853_v62  ;;  %v9778_v62 = vld [vmem:[#allocation11 + $0x574] sm:$0xf0] }
 0x66e   :  { %v2873_v23 = vpop.f32.mrf.mxu0  ;;  %v8090_v55 = vor.u32 %v9778_v62, %v8089_v1  ;;  %v8033_v62 = vld [vmem:[#allocation11 + $0x500] sm:$0xf] }
 0x66f   :  { %v2877_v0 = vpack.c.bf16 %v2873_v23, %v2873_v23  ;;  %3079 = vmatmul.bf16.vlgmr.msra.gmra.mxu3 %v2876_v9  ;;  %3105 = vmatmul.bf16.vlgmr.msrb.gmra.mxu2 %v2876_v9  ;;  %v9794_v9 = vld [vmem:[#allocation11 + $0x5f4] sm:$0xf0]  ;;  %v7908_v23 = vor.u32 %v9731_v40, %v7905_v45  ;;  %v8097_v40 = vld [vmem:[#allocation11 + $0x580] sm:$0xf]  ;;  %v8034_v15 = vor.u32 %v9764_v41, %v8033_v62  ;;  %v9781_v62 = vld [vmem:[#allocation11 + $0x594] sm:$0xf] }
 0x670   :  { %3436 = vmatpush.msrb.mxu2 %v10726_v32  ;;  %3391 = vmatpush.bf16.msra.mxu3 %v7964_v52  ;;  %v8153_v52 = vld [vmem:[#allocation11 + $0x5f0] sm:$0xf] }
 0x671   :  { %3092 = vmatmul.bf16.vlgmr.msra.gmra.mxu1 %v2877_v0  ;;  %3118 = vmatmul.bf16.vlgmr.msrb.gmra.mxu0 %v2877_v0  ;;  %v8081_v0 = vld [vmem:[#allocation11 + $0x560] sm:$0xf]  ;;  %v8154_v14 = vor.u32 %v9794_v9, %v8153_v52 }
 0x672   :  { %3437 = vmatpush.msrb.mxu2 %v10730_v53  ;;  %3456 = vmatpush.msrb.mxu0 %v10728_v36 }
 0x673   :  { %3404 = vmatpush.bf16.msra.mxu1 %v8028_v51  ;;  %v9776_v51 = vld [vmem:[#allocation11 + $0x564] sm:$0xf0] }
 0x674   :  { %3438 = vmatpush.msrb.mxu2 %v10736_v43  ;;  %3457 = vmatpush.msrb.mxu0 %v10732_v10  ;;  %v8082_v19 = vor.u32 %v9776_v51, %v8081_v0 }
 0x675   :  { %3392 = vmatpush.bf16.msra.mxu3 %v7956_v33  ;;  %v9792_v33 = vld [vmem:[#allocation11 + $0x5e4] sm:$0xf0] }
 0x676   :  { %3439 = vmatpush.msrb.mxu2 %v10742_v5  ;;  %3458 = vmatpush.msrb.mxu0 %v10738_v61  ;;  %v8146_v13 = vor.u32 %v9792_v33, %v8145_v57  ;;  %v9793_v57 = vld [vmem:[#allocation11 + $0x5f4] sm:$0xf]  ;;  %v8155_v33 = vld [vmem:[#allocation11 + $0x5f8] sm:$0xf0] }
 0x677   :  { %3405 = vmatpush.bf16.msra.mxu1 %v8020_v27  ;;  %v8137_v27 = vld [vmem:[#allocation11 + $0x5d0] sm:$0xf] }
 0x678   :  { %3459 = vmatpush.msrb.mxu0 %v10744_v4  ;;  %v8138_v25 = vor.u32 %v9790_v3, %v8137_v27  ;;  %v9791_v3 = vld [vmem:[#allocation11 + $0x5e4] sm:$0xf] }
 0x679   :  { %3393 = vmatpush.bf16.msra.mxu3 %v7948_v54  ;;  %v8073_v54 = vld [vmem:[#allocation11 + $0x550] sm:$0xf] }
 0x67b   :  { %3406 = vmatpush.bf16.msra.mxu1 %v8012_v42  ;;  %v8074_v42 = vor.u32 %v9774_v56, %v8073_v54  ;;  %v9777_v54 = vld [vmem:[#allocation11 + $0x574] sm:$0xf]  ;;  %v8091_v56 = vld [vmem:[#allocation11 + $0x578] sm:$0xf0] }
 0x67d   :  { %3394 = vmatpush.bf16.msra.mxu3 %v7940_v26  ;;  %v8065_v26 = vld [vmem:[#allocation11 + $0x540] sm:$0xf] }
 0x67f   :  { %7899 = vmatmul.msk.f32.vlgmr.msrb.gmra.mxu3 %vm235_vm2, %v3126_v31  ;;  %3407 = vmatpush.bf16.msra.mxu1 %v8004_v29  ;;  %v8066_v29 = vor.u32 %v9772_v28, %v8065_v26  ;;  %v8094_v26 = vor.u32 %v9777_v54, %v8091_v56  ;;  %v8139_v28 = vld [vmem:[#allocation11 + $0x5d8] sm:$0xf0] }
 0x681   :  { %7900 = vmatmul.msk.f32.vlgmr.msrb.gmra.mxu1 %vm235_vm2, %v3126_v31  ;;  %3395 = vmatpush.bf16.msra.mxu3 %v7932_v37  ;;  %v9786_v31 = vld [vmem:[#allocation11 + $0x5b4] sm:$0xf0] }
 0x682   :  { %v8122_v34 = vor.u32 %v9786_v31, %v8121_v59  ;;  %v9770_v37 = vld [vmem:[#allocation11 + $0x534] sm:$0xf0]  ;;  %v9775_v59 = vld [vmem:[#allocation11 + $0x564] sm:$0xf] }
 0x683   :  { %3408 = vmatpush.bf16.msra.mxu1 %v7996_v39  ;;  %v8058_v12 = vor.u32 %v9770_v37, %v8057_v22  ;;  %v9784_v39 = vld [vmem:[#allocation11 + $0x5a4] sm:$0xf0]  ;;  %v8131_v37 = vld [vmem:[#allocation11 + $0x5c8] sm:$0xf0] }
 0x684   :  { %v8114_v60 = vor.u32 %v9784_v39, %v8113_v35  ;;  %v9773_v35 = vld [vmem:[#allocation11 + $0x554] sm:$0xf] }
 0x685   :  { %3396 = vmatpush.bf16.msra.mxu3 %v7924_v58  ;;  %v9768_v58 = vld [vmem:[#allocation11 + $0x524] sm:$0xf0] }
 0x686   :  { %v8050_v18 = vor.u32 %v9768_v58, %v8049_v20  ;;  %v8123_v58 = vld [vmem:[#allocation11 + $0x5b8] sm:$0xf0] }
 0x687   :  { %3409 = vmatpush.bf16.msra.mxu1 %v7988_v11  ;;  %v9782_v11 = vld [vmem:[#allocation11 + $0x594] sm:$0xf0] }
 0x688   :  { %v8106_v24 = vor.u32 %v9782_v11, %v8105_v44  ;;  %v9771_v44 = vld [vmem:[#allocation11 + $0x544] sm:$0xf]  ;;  %v3420_v11 = vld [vmem:[#allocation14 + $0xa] sm:$0x3] }
 0x689   :  { %3397 = vmatpush.bf16.msra.mxu3 %v7916_v38  ;;  %v9766_v38 = vld [vmem:[#allocation11 + $0x514] sm:$0xf0] }
 0x68a   :  { %v8042_v45 = vor.u32 %v9766_v38, %v8041_v46  ;;  %v9783_v46 = vld [vmem:[#allocation11 + $0x5a4] sm:$0xf] }
 0x68b   :  { %3410 = vmatpush.bf16.msra.mxu1 %v7980_v63  ;;  %v9780_v63 = vld [vmem:[#allocation11 + $0x584] sm:$0xf0] }
 0x68c   :  { %v8098_v1 = vor.u32 %v9780_v63, %v8097_v40  ;;  %v8115_v40 = vld [vmem:[#allocation11 + $0x5a8] sm:$0xf0]  ;;  %v8059_v63 = vld [vmem:[#allocation11 + $0x538] sm:$0xf0] }
 0x68d   :  { %3398 = vmatpush.bf16.msra.mxu3 %v7908_v23 }
 0x68f   :  { %3411 = vmatpush.bf16.msra.mxu1 %v7972_v50 }
 0x691   :  { %3659 = vmatpush.bf16.msrb.mxu3 %v8090_v55 }
 0x693   :  { %3672 = vmatpush.bf16.msrb.mxu1 %v8154_v14 }
 0x695   :  { %3660 = vmatpush.bf16.msrb.mxu3 %v8082_v19 }
 0x697   :  { %3673 = vmatpush.bf16.msrb.mxu1 %v8146_v13  ;;  %v8158_v13 = vor.u32 %v9793_v57, %v8155_v33  ;;  %v8099_v33 = vld [vmem:[#allocation11 + $0x588] sm:$0xf0] }
 0x699   :  { %3661 = vmatpush.bf16.msrb.mxu3 %v8074_v42 }
 0x69b   :  { %3674 = vmatpush.bf16.msrb.mxu1 %v8138_v25  ;;  %v8147_v25 = vld [vmem:[#allocation11 + $0x5e8] sm:$0xf0] }
 0x69c   :  { %v8150_v7 = vor.u32 %v9791_v3, %v8147_v25  ;;  %v9826_v3 = vld [vmem:[#allocation11 + $0x6f4] sm:$0xf0] }
 0x69d   :  { %3662 = vmatpush.bf16.msrb.mxu3 %v8066_v29  ;;  %v8083_v29 = vld [vmem:[#allocation11 + $0x568] sm:$0xf0] }
 0x69e   :  { %v8086_v22 = vor.u32 %v9775_v59, %v8083_v29  ;;  %v8267_v59 = vld [vmem:[#allocation11 + $0x6d0] sm:$0xf]  ;;  %v9822_v29 = vld [vmem:[#allocation11 + $0x6d4] sm:$0xf0] }
 0x69f   :  { %3675 = vmatpush.bf16.msrb.mxu1 %v8130_v8  ;;  %v9789_v8 = vld [vmem:[#allocation11 + $0x5d4] sm:$0xf] }
 0x6a0   :  { %v8142_v31 = vor.u32 %v9789_v8, %v8139_v28  ;;  %v9824_v8 = vld [vmem:[#allocation11 + $0x6e4] sm:$0xf0] }
 0x6a1   :  { %3663 = vmatpush.bf16.msrb.mxu3 %v8058_v12  ;;  %v8075_v12 = vld [vmem:[#allocation11 + $0x558] sm:$0xf0] }
 0x6a2   :  { %v8078_v20 = vor.u32 %v9773_v35, %v8075_v12  ;;  %v8259_v35 = vld [vmem:[#allocation11 + $0x6c0] sm:$0xf]  ;;  %v9820_v12 = vld [vmem:[#allocation11 + $0x6c4] sm:$0xf0] }
 0x6a3   :  { %3676 = vmatpush.bf16.msrb.mxu1 %v8122_v34  ;;  %v9787_v34 = vld [vmem:[#allocation11 + $0x5c4] sm:$0xf] }
 0x6a4   :  { %v8134_v39 = vor.u32 %v9787_v34, %v8131_v37  ;;  %v8219_v34 = vld [vmem:[#allocation11 + $0x670] sm:$0xf] }
 0x6a5   :  { %3664 = vmatpush.bf16.msrb.mxu3 %v8050_v18  ;;  %v8067_v18 = vld [vmem:[#allocation11 + $0x548] sm:$0xf0] }
 0x6a6   :  { %v8070_v38 = vor.u32 %v9771_v44, %v8067_v18  ;;  %v9818_v44 = vld [vmem:[#allocation11 + $0x6b4] sm:$0xf0] }
 0x6a7   :  { %3677 = vmatpush.bf16.msrb.mxu1 %v8114_v60  ;;  %v9785_v60 = vld [vmem:[#allocation11 + $0x5b4] sm:$0xf] }
 0x6a9   :  { %3665 = vmatpush.bf16.msrb.mxu3 %v8042_v45  ;;  %v9769_v45 = vld [vmem:[#allocation11 + $0x534] sm:$0xf] }
 0x6aa   :  { %v8062_v41 = vor.u32 %v9769_v45, %v8059_v63  ;;  %v9816_v45 = vld [vmem:[#allocation11 + $0x6a4] sm:$0xf0] }
 0x6ab   :  { %3678 = vmatpush.bf16.msrb.mxu1 %v8106_v24  ;;  %v8126_v24 = vor.u32 %v9785_v60, %v8123_v58  ;;  %v8260_v60 = vor.u32 %v9820_v12, %v8259_v35  ;;  %v8251_v58 = vld [vmem:[#allocation11 + $0x6b0] sm:$0xf] }
 0x6ad   :  { %3666 = vmatpush.bf16.msrb.mxu3 %v8034_v15  ;;  %v8107_v15 = vld [vmem:[#allocation11 + $0x598] sm:$0xf0] }
 0x6af   :  { %3679 = vmatpush.bf16.msrb.mxu1 %v8098_v1  ;;  %v8118_v1 = vor.u32 %v9783_v46, %v8115_v40  ;;  %v9806_v46 = vld [vmem:[#allocation11 + $0x654] sm:$0xf0]  ;;  %v8243_v40 = vld [vmem:[#allocation11 + $0x6a0] sm:$0xf] }
 0x6b0   :  { %v8244_v63 = vor.u32 %v9816_v45, %v8243_v40  ;;  %v9819_v45 = vld [vmem:[#allocation11 + $0x6c4] sm:$0xf] }
 0x6ee   :  { %v10820_v52 = vpop.f32.mrf.mxu1  ;;  %v10822_v9 = vpop.f32.mrf.mxu0 }
 0x6f2   :  { %v10824_v23 = vpop.f32.mrf.mxu3  ;;  %v10826_v55 = vpop.f32.mrf.mxu2 }
 0x6f6   :  { %v3095_v50 = vpop.f32.mrf.mxu1  ;;  %v3121_v0 = vpop.f32.mrf.mxu0 }
 0x6f7   :  { %v9767_v50 = vld [vmem:[#allocation11 + $0x524] sm:$0xf]  ;;  %v8051_v0 = vld [vmem:[#allocation11 + $0x528] sm:$0xf0] }
 0x6f8   :  { %v8054_v57 = vor.u32 %v9767_v50, %v8051_v0  ;;  %v9814_v50 = vld [vmem:[#allocation11 + $0x694] sm:$0xf0] }
 0x6fa   :  { %v3082_v51 = vpop.f32.mrf.mxu3  ;;  %v3108_v14 = vpop.f32.mrf.mxu2 }
 0x6fb   :  { %v8110_v51 = vor.u32 %v9781_v62, %v8107_v15  ;;  %v9779_v14 = vld [vmem:[#allocation11 + $0x584] sm:$0xf]  ;;  %v9804_v62 = vld [vmem:[#allocation11 + $0x644] sm:$0xf0]  ;;  %v8235_v15 = vld [vmem:[#allocation11 + $0x690] sm:$0xf] }
 0x6fc   :  { %v8102_v25 = vor.u32 %v9779_v14, %v8099_v33  ;;  %v8236_v0 = vor.u32 %v9814_v50, %v8235_v15  ;;  %v9802_v14 = vld [vmem:[#allocation11 + $0x634] sm:$0xf0]  ;;  %v8227_v33 = vld [vmem:[#allocation11 + $0x680] sm:$0xf]  ;;  %v9807_v15 = vld [vmem:[#allocation11 + $0x664] sm:$0xf] }
 0x6fd   :  { %v8213_v50 = vld [vmem:[#allocation11 + $0x668] sm:$0xf0] }
 0x6fe   :  { %v3167_v19 = vpop.f32.mrf.mxu1 }
 0x6ff   :  { %v3171_v27 = vpack.c.bf16 %v3167_v19, %v3167_v19  ;;  %v9765_v19 = vld [vmem:[#allocation11 + $0x514] sm:$0xf] }
 0x701   :  { %3386 = vmatmul.bf16.vlgmr.msra.gmra.mxu0 %v3171_v27  ;;  %3412 = vmatmul.bf16.vlgmr.msra.gmra.mxu1 %v3171_v27  ;;  %v8283_v27 = vld [vmem:[#allocation11 + $0x6f0] sm:$0xf] }
 0x702   :  { %3750 = vmatpush.msra.mxu1 %v10728_v36  ;;  %v3147_v30 = vpop.f32.mrf.mxu3  ;;  %3698 = vmatpush.bf16.msra.mxu0 %v8158_v13  ;;  %v8043_v13 = vld [vmem:[#allocation11 + $0x518] sm:$0xf0]  ;;  %v8284_v56 = vor.u32 %v9826_v3, %v8283_v27  ;;  %v8179_v27 = vld [vmem:[#allocation11 + $0x620] sm:$0xf]  ;;  %v9800_v3 = vld [vmem:[#allocation11 + $0x624] sm:$0xf0] }
 0x703   :  { %v3170_v42 = vpack.c.bf16 %v3147_v30, %v3147_v30  ;;  %v8046_v54 = vor.u32 %v9765_v19, %v8043_v13  ;;  %v9763_v30 = vld [vmem:[#allocation11 + $0x504] sm:$0xf]  ;;  %v9812_v19 = vld [vmem:[#allocation11 + $0x684] sm:$0xf0] }
 0x704   :  { %3751 = vmatpush.msra.mxu1 %v10732_v10  ;;  %v8228_v13 = vor.u32 %v9812_v19, %v8227_v33  ;;  %v9805_v33 = vld [vmem:[#allocation11 + $0x654] sm:$0xf]  ;;  %v8205_v19 = vld [vmem:[#allocation11 + $0x658] sm:$0xf0] }
 0x705   :  { %3373 = vmatmul.bf16.vlgmr.msra.gmra.mxu2 %v3170_v42  ;;  %3399 = vmatmul.bf16.vlgmr.msra.gmra.mxu3 %v3170_v42  ;;  %v8035_v42 = vld [vmem:[#allocation11 + $0x508] sm:$0xf0] }
 0x706   :  { %3730 = vmatpush.msra.mxu3 %v10726_v32  ;;  %3752 = vmatpush.msra.mxu1 %v10738_v61 }
 0x707   :  { %3699 = vmatpush.bf16.msra.mxu0 %v8150_v7  ;;  %3685 = vmatpush.bf16.msra.mxu2 %v8094_v26  ;;  %v8275_v7 = vld [vmem:[#allocation11 + $0x6e0] sm:$0xf]  ;;  %v8038_v26 = vor.u32 %v9763_v30, %v8035_v42 }
 0x708   :  { %3731 = vmatpush.msra.mxu3 %v10730_v53  ;;  %3753 = vmatpush.msra.mxu1 %v10744_v4  ;;  %v8276_v28 = vor.u32 %v9824_v8, %v8275_v7  ;;  %v8163_v42 = vld [vmem:[#allocation11 + $0x600] sm:$0xf]  ;;  %v9796_v7 = vld [vmem:[#allocation11 + $0x604] sm:$0xf0] }
 0x709   :  { %v8164_v8 = vor.u32 %v9796_v7, %v8163_v42  ;;  %v9813_v7 = vld [vmem:[#allocation11 + $0x694] sm:$0xf] }
 0x70a   :  { %3732 = vmatpush.msra.mxu3 %v10736_v43 }
 0x70b   :  { %3700 = vmatpush.bf16.msra.mxu0 %v8142_v31  ;;  %3686 = vmatpush.bf16.msra.mxu2 %v8086_v22  ;;  %v8268_v31 = vor.u32 %v9822_v29, %v8267_v59  ;;  %v9810_v22 = vld [vmem:[#allocation11 + $0x674] sm:$0xf0] }
 0x70c   :  { %3733 = vmatpush.msra.mxu3 %v10742_v5  ;;  %v8220_v37 = vor.u32 %v9810_v22, %v8219_v34  ;;  %v9825_v22 = vld [vmem:[#allocation11 + $0x6f4] sm:$0xf] }
 0x70f   :  { %3701 = vmatpush.bf16.msra.mxu0 %v8134_v39  ;;  %3687 = vmatpush.bf16.msra.mxu2 %v8078_v20  ;;  %v8211_v39 = vld [vmem:[#allocation11 + $0x660] sm:$0xf]  ;;  %v9808_v20 = vld [vmem:[#allocation11 + $0x664] sm:$0xf0] }
 0x710   :  { %v8212_v18 = vor.u32 %v9808_v20, %v8211_v39  ;;  %v8277_v20 = vld [vmem:[#allocation11 + $0x6e8] sm:$0xf0] }
 0x711   :  { %8030 = vmatmul.msk.f32.vlgmr.msrb.gmra.mxu0 %vm235_vm2, %v3420_v11 }
 0x713   :  { %3702 = vmatpush.bf16.msra.mxu0 %v8126_v24  ;;  %3688 = vmatpush.bf16.msra.mxu2 %v8070_v38  ;;  %v8203_v24 = vld [vmem:[#allocation11 + $0x650] sm:$0xf] }
 0x714   :  { %v8204_v38 = vor.u32 %v9806_v46, %v8203_v24  ;;  %v8269_v24 = vld [vmem:[#allocation11 + $0x6d8] sm:$0xf0]  ;;  %v9809_v46 = vld [vmem:[#allocation11 + $0x674] sm:$0xf] }
 0x715   :  { %8029 = vmatmul.msk.f32.vlgmr.msrb.gmra.mxu2 %vm235_vm2, %v3420_v11  ;;  %v8252_v11 = vor.u32 %v9818_v44, %v8251_v58 }
 0x717   :  { %3703 = vmatpush.bf16.msra.mxu0 %v8118_v1  ;;  %3689 = vmatpush.bf16.msra.mxu2 %v8062_v41  ;;  %v8195_v1 = vld [vmem:[#allocation11 + $0x640] sm:$0xf] }
 0x718   :  { %v8196_v41 = vor.u32 %v9804_v62, %v8195_v1 }
 0x71b   :  { %3704 = vmatpush.bf16.msra.mxu0 %v8110_v51  ;;  %3690 = vmatpush.bf16.msra.mxu2 %v8054_v57  ;;  %v8187_v51 = vld [vmem:[#allocation11 + $0x630] sm:$0xf] }
 0x71c   :  { %v8188_v57 = vor.u32 %v9802_v14, %v8187_v51  ;;  %v9817_v51 = vld [vmem:[#allocation11 + $0x6b4] sm:$0xf]  ;;  %v8253_v14 = vld [vmem:[#allocation11 + $0x6b8] sm:$0xf0] }
 0x71f   :  { %3705 = vmatpush.bf16.msra.mxu0 %v8102_v25  ;;  %3691 = vmatpush.bf16.msra.mxu2 %v8046_v54  ;;  %v8180_v25 = vor.u32 %v9800_v3, %v8179_v27  ;;  %v8171_v54 = vld [vmem:[#allocation11 + $0x610] sm:$0xf]  ;;  %v8256_v27 = vor.u32 %v9817_v51, %v8253_v14  ;;  %v9815_v3 = vld [vmem:[#allocation11 + $0x6a4] sm:$0xf] }
 0x720   :  { %v9795_v51 = vld [vmem:[#allocation11 + $0x604] sm:$0xf] }
 0x723   :  { %3966 = vmatpush.bf16.msrb.mxu0 %v8284_v56  ;;  %3692 = vmatpush.bf16.msra.mxu2 %v8038_v26  ;;  %v9798_v56 = vld [vmem:[#allocation11 + $0x614] sm:$0xf0] }
 0x724   :  { %v8172_v30 = vor.u32 %v9798_v56, %v8171_v54  ;;  %v8208_v54 = vor.u32 %v9805_v33, %v8205_v19  ;;  %v9803_v56 = vld [vmem:[#allocation11 + $0x644] sm:$0xf]  ;;  %v8349_v33 = vld [vmem:[#allocation11 + $0x770] sm:$0xf]  ;;  %v9842_v19 = vld [vmem:[#allocation11 + $0x774] sm:$0xf0] }
 0x727   :  { %3967 = vmatpush.bf16.msrb.mxu0 %v8276_v28  ;;  %3953 = vmatpush.bf16.msrb.mxu2 %v8220_v37  ;;  %v8285_v37 = vld [vmem:[#allocation11 + $0x6f8] sm:$0xf0] }
 0x728   :  { %v8288_v12 = vor.u32 %v9825_v22, %v8285_v37  ;;  %v8189_v22 = vld [vmem:[#allocation11 + $0x638] sm:$0xf0] }
 0x72b   :  { %3968 = vmatpush.bf16.msrb.mxu0 %v8268_v31  ;;  %3954 = vmatpush.bf16.msrb.mxu2 %v8212_v18 }
 0x72f   :  { %3969 = vmatpush.bf16.msrb.mxu0 %v8260_v60  ;;  %3955 = vmatpush.bf16.msrb.mxu2 %v8204_v38  ;;  %v9823_v60 = vld [vmem:[#allocation11 + $0x6e4] sm:$0xf]  ;;  %v8221_v38 = vld [vmem:[#allocation11 + $0x678] sm:$0xf0] }
 0x730   :  { %v8280_v18 = vor.u32 %v9823_v60, %v8277_v20  ;;  %v8224_v62 = vor.u32 %v9809_v46, %v8221_v38  ;;  %v9858_v60 = vld [vmem:[#allocation11 + $0x7f4] sm:$0xf0]  ;;  %v9856_v46 = vld [vmem:[#allocation11 + $0x7e4] sm:$0xf0] }
 0x733   :  { %3970 = vmatpush.bf16.msrb.mxu0 %v8252_v11  ;;  %3956 = vmatpush.bf16.msrb.mxu2 %v8196_v41  ;;  %v9821_v11 = vld [vmem:[#allocation11 + $0x6d4] sm:$0xf] }
 0x734   :  { %v8272_v40 = vor.u32 %v9821_v11, %v8269_v24  ;;  %v8405_v24 = vld [vmem:[#allocation11 + $0x7e0] sm:$0xf] }
 0x737   :  { %3971 = vmatpush.bf16.msrb.mxu0 %v8244_v63  ;;  %3957 = vmatpush.bf16.msrb.mxu2 %v8188_v57  ;;  %v8261_v63 = vld [vmem:[#allocation11 + $0x6c8] sm:$0xf0]  ;;  %v8216_v57 = vor.u32 %v9807_v15, %v8213_v50  ;;  %v8389_v50 = vld [vmem:[#allocation11 + $0x7c0] sm:$0xf] }
 0x73b   :  { %3972 = vmatpush.bf16.msrb.mxu0 %v8236_v0  ;;  %3958 = vmatpush.bf16.msrb.mxu2 %v8180_v25  ;;  %v8264_v0 = vor.u32 %v9819_v45, %v8261_v63  ;;  %v8245_v25 = vld [vmem:[#allocation11 + $0x6a8] sm:$0xf0]  ;;  %v8397_v45 = vld [vmem:[#allocation11 + $0x7d0] sm:$0xf]  ;;  %v9854_v63 = vld [vmem:[#allocation11 + $0x7d4] sm:$0xf0] }
 0x73c   :  { %v8248_v42 = vor.u32 %v9815_v3, %v8245_v25  ;;  %v9850_v3 = vld [vmem:[#allocation11 + $0x7b4] sm:$0xf0]  ;;  %v8350_v25 = vor.u32 %v9842_v19, %v8349_v33 }
 0x73f   :  { %3973 = vmatpush.bf16.msrb.mxu0 %v8228_v13  ;;  %3959 = vmatpush.bf16.msrb.mxu2 %v8172_v30  ;;  %v3714_v13 = vld [vmem:[#allocation14 + $0xc] sm:$0x3] }
 0x740   :  { %v8197_v30 = vld [vmem:[#allocation11 + $0x648] sm:$0xf0] }
 0x743   :  { %3960 = vmatpush.bf16.msrb.mxu2 %v8164_v8  ;;  %v8237_v8 = vld [vmem:[#allocation11 + $0x698] sm:$0xf0] }
 0x744   :  { %v8240_v37 = vor.u32 %v9813_v7, %v8237_v8  ;;  %v9848_v8 = vld [vmem:[#allocation11 + $0x7a4] sm:$0xf0] }
 0x77e   :  { %v10838_v26 = vpop.f32.mrf.mxu0  ;;  %v10840_v28 = vpop.f32.mrf.mxu1 }
 0x786   :  { %v3389_v59 = vpop.f32.mrf.mxu0  ;;  %v3415_v29 = vpop.f32.mrf.mxu1 }
 0x787   :  { %v8200_v59 = vor.u32 %v9803_v56, %v8197_v30  ;;  %v9801_v29 = vld [vmem:[#allocation11 + $0x634] sm:$0xf]  ;;  %v8341_v56 = vld [vmem:[#allocation11 + $0x760] sm:$0xf]  ;;  %v9840_v30 = vld [vmem:[#allocation11 + $0x764] sm:$0xf0] }
 0x788   :  { %v10842_v31 = vpop.f32.mrf.mxu2  ;;  %v10844_v34 = vpop.f32.mrf.mxu3  ;;  %v8192_v20 = vor.u32 %v9801_v29, %v8189_v22  ;;  %v8342_v7 = vor.u32 %v9840_v30, %v8341_v56  ;;  %v9838_v29 = vld [vmem:[#allocation11 + $0x754] sm:$0xf0]  ;;  %v9855_v56 = vld [vmem:[#allocation11 + $0x7e4] sm:$0xf] }
 0x78e   :  { %v3461_v35 = vpop.f32.mrf.mxu0 }
 0x78f   :  { %v3465_v39 = vpack.c.bf16 %v3461_v35, %v3461_v35  ;;  %v9811_v35 = vld [vmem:[#allocation11 + $0x684] sm:$0xf] }
 0x790   :  { %v3376_v58 = vpop.f32.mrf.mxu2  ;;  %v3402_v44 = vpop.f32.mrf.mxu3 }
 0x791   :  { %3680 = vmatmul.bf16.vlgmr.msrb.gmra.mxu1 %v3465_v39  ;;  %3706 = vmatmul.bf16.vlgmr.msra.gmra.mxu0 %v3465_v39  ;;  %v8413_v39 = vld [vmem:[#allocation11 + $0x7f0] sm:$0xf]  ;;  %v9799_v58 = vld [vmem:[#allocation11 + $0x624] sm:$0xf]  ;;  %v8181_v44 = vld [vmem:[#allocation11 + $0x628] sm:$0xf0] }
 0x792   :  { %4044 = vmatpush.msra.mxu0 %v10728_v36  ;;  %3992 = vmatpush.bf16.msrb.mxu1 %v8288_v12  ;;  %v8229_v12 = vld [vmem:[#allocation11 + $0x688] sm:$0xf0]  ;;  %v8414_v11 = vor.u32 %v9858_v60, %v8413_v39  ;;  %v8184_v38 = vor.u32 %v9799_v58, %v8181_v44  ;;  %v8325_v60 = vld [vmem:[#allocation11 + $0x740] sm:$0xf] }
 0x793   :  { %v8357_v58 = vld [vmem:[#allocation11 + $0x780] sm:$0xf] }
 0x794   :  { %4045 = vmatpush.msra.mxu0 %v10732_v10 }
 0x796   :  { %4046 = vmatpush.msra.mxu0 %v10738_v61  ;;  %3993 = vmatpush.bf16.msrb.mxu1 %v8280_v18  ;;  %v8232_v18 = vor.u32 %v9811_v35, %v8229_v12  ;;  %v9846_v35 = vld [vmem:[#allocation11 + $0x794] sm:$0xf0] }
 0x798   :  { %4047 = vmatpush.msra.mxu0 %v10744_v4  ;;  %v3441_v1 = vpop.f32.mrf.mxu2 }
 0x799   :  { %v3464_v41 = vpack.c.bf16 %v3441_v1, %v3441_v1  ;;  %v8398_v1 = vor.u32 %v9854_v63, %v8397_v45  ;;  %v9832_v45 = vld [vmem:[#allocation11 + $0x724] sm:$0xf0] }
 0x79a   :  { %3994 = vmatpush.bf16.msrb.mxu1 %v8272_v40  ;;  %v8406_v40 = vor.u32 %v9856_v46, %v8405_v24  ;;  %v8317_v24 = vld [vmem:[#allocation11 + $0x730] sm:$0xf]  ;;  %v9834_v46 = vld [vmem:[#allocation11 + $0x734] sm:$0xf0] }
 0x79b   :  { %3667 = vmatmul.bf16.vlgmr.msrb.gmra.mxu3 %v3464_v41  ;;  %3693 = vmatmul.bf16.vlgmr.msra.gmra.mxu2 %v3464_v41  ;;  %v8173_v41 = vld [vmem:[#allocation11 + $0x618] sm:$0xf0] }
 0x79c   :  { %4024 = vmatpush.msra.mxu2 %v10726_v32  ;;  %3979 = vmatpush.bf16.msrb.mxu3 %v8224_v62  ;;  %v9797_v62 = vld [vmem:[#allocation11 + $0x614] sm:$0xf] }
 0x79d   :  { %v8176_v15 = vor.u32 %v9797_v62, %v8173_v41  ;;  %v9830_v62 = vld [vmem:[#allocation11 + $0x714] sm:$0xf0] }
 0x79e   :  { %4025 = vmatpush.msra.mxu2 %v10730_v53  ;;  %3995 = vmatpush.bf16.msrb.mxu1 %v8264_v0  ;;  %v9852_v0 = vld [vmem:[#allocation11 + $0x7c4] sm:$0xf0] }
 0x79f   :  { %v8390_v14 = vor.u32 %v9852_v0, %v8389_v50  ;;  %v8293_v0 = vld [vmem:[#allocation11 + $0x700] sm:$0xf] }
 0x7a0   :  { %4026 = vmatpush.msra.mxu2 %v10736_v43  ;;  %3980 = vmatpush.bf16.msrb.mxu3 %v8216_v57  ;;  %v8165_v57 = vld [vmem:[#allocation11 + $0x608] sm:$0xf0] }
 0x7a1   :  { %8160 = vmatmul.msk.f32.vlgmr.msra.gmra.mxu1 %vm235_vm2, %v3714_v13 }
 0x7a2   :  { %4027 = vmatpush.msra.mxu2 %v10742_v5  ;;  %3996 = vmatpush.bf16.msrb.mxu1 %v8256_v27  ;;  %v8381_v27 = vld [vmem:[#allocation11 + $0x7b0] sm:$0xf] }
 0x7a4   :  { %3981 = vmatpush.bf16.msrb.mxu3 %v8208_v54  ;;  %v8382_v54 = vor.u32 %v9850_v3, %v8381_v27 }
 0x7a6   :  { %3997 = vmatpush.bf16.msrb.mxu1 %v8248_v42  ;;  %v8373_v42 = vld [vmem:[#allocation11 + $0x7a0] sm:$0xf] }
 0x7a7   :  { %v8374_v22 = vor.u32 %v9848_v8, %v8373_v42  ;;  %v8407_v42 = vld [vmem:[#allocation11 + $0x7e8] sm:$0xf0]  ;;  %v9853_v8 = vld [vmem:[#allocation11 + $0x7d4] sm:$0xf] }
 0x7a8   :  { %3982 = vmatpush.bf16.msrb.mxu3 %v8200_v59  ;;  %v8333_v59 = vld [vmem:[#allocation11 + $0x750] sm:$0xf] }
 0x7a9   :  { %v8334_v12 = vor.u32 %v9838_v29, %v8333_v59  ;;  %v8399_v59 = vld [vmem:[#allocation11 + $0x7d8] sm:$0xf0] }
 0x7aa   :  { %3998 = vmatpush.bf16.msrb.mxu1 %v8240_v37  ;;  %v8365_v37 = vld [vmem:[#allocation11 + $0x790] sm:$0xf] }
 0x7ab   :  { %8159 = vmatmul.msk.f32.vlgmr.msra.gmra.mxu3 %vm235_vm2, %v3714_v13  ;;  %v8168_v13 = vor.u32 %v9795_v51, %v8165_v57  ;;  %v8366_v39 = vor.u32 %v9846_v35, %v8365_v37  ;;  %v9828_v51 = vld [vmem:[#allocation11 + $0x704] sm:$0xf0]  ;;  %v8402_v37 = vor.u32 %v9853_v8, %v8399_v59  ;;  %v9851_v35 = vld [vmem:[#allocation11 + $0x7c4] sm:$0xf]  ;;  %v9833_v59 = vld [vmem:[#allocation11 + $0x734] sm:$0xf] }
 0x7ac   :  { %3983 = vmatpush.bf16.msrb.mxu3 %v8192_v20  ;;  %v9836_v20 = vld [vmem:[#allocation11 + $0x744] sm:$0xf0] }
 0x7ad   :  { %v8326_v44 = vor.u32 %v9836_v20, %v8325_v60  ;;  %v9841_v60 = vld [vmem:[#allocation11 + $0x774] sm:$0xf]  ;;  %v8351_v20 = vld [vmem:[#allocation11 + $0x778] sm:$0xf0] }
 0x7ae   :  { %3999 = vmatpush.bf16.msrb.mxu1 %v8232_v18  ;;  %v9844_v18 = vld [vmem:[#allocation11 + $0x784] sm:$0xf0] }
 0x7b0   :  { %3984 = vmatpush.bf16.msrb.mxu3 %v8184_v38  ;;  %v8318_v38 = vor.u32 %v9834_v46, %v8317_v24  ;;  %v4008_v24 = vld [vmem:[#allocation14 + $0xe] sm:$0x3]  ;;  %v8354_v46 = vor.u32 %v9841_v60, %v8351_v20  ;;  %v9886_v20 = vld [vmem:[#allocation11 + $0x8d4] sm:$0xf0] }
 0x7b1   :  { %v8527_v60 = vld [vmem:[#allocation11 + $0x8d0] sm:$0xf] }
 0x7b2   :  { %4260 = vmatpush.bf16.msra.mxu1 %v8414_v11  ;;  %v8358_v11 = vor.u32 %v9844_v18, %v8357_v58  ;;  %v9849_v58 = vld [vmem:[#allocation11 + $0x7b4] sm:$0xf] }
 0x7b4   :  { %3985 = vmatpush.bf16.msrb.mxu3 %v8176_v15 }
 0x7b6   :  { %4261 = vmatpush.bf16.msra.mxu1 %v8406_v40  ;;  %v8309_v40 = vld [vmem:[#allocation11 + $0x720] sm:$0xf] }
 0x7b7   :  { %v8310_v63 = vor.u32 %v9832_v45, %v8309_v40  ;;  %v9839_v40 = vld [vmem:[#allocation11 + $0x764] sm:$0xf]  ;;  %v8343_v45 = vld [vmem:[#allocation11 + $0x768] sm:$0xf0] }
 0x7b8   :  { %3986 = vmatpush.bf16.msrb.mxu3 %v8168_v13 }
 0x7ba   :  { %4262 = vmatpush.bf16.msra.mxu1 %v8398_v1  ;;  %v8301_v1 = vld [vmem:[#allocation11 + $0x710] sm:$0xf] }
 0x7bb   :  { %v8302_v41 = vor.u32 %v9830_v62, %v8301_v1  ;;  %v8375_v1 = vld [vmem:[#allocation11 + $0x7a8] sm:$0xf0]  ;;  %v8346_v62 = vor.u32 %v9839_v40, %v8343_v45  ;;  %v8511_v40 = vld [vmem:[#allocation11 + $0x8b0] sm:$0xf]  ;;  %v9882_v45 = vld [vmem:[#allocation11 + $0x8b4] sm:$0xf0] }
 0x7bc   :  { %4247 = vmatpush.bf16.msra.mxu3 %v8350_v25  ;;  %v9857_v25 = vld [vmem:[#allocation11 + $0x7f4] sm:$0xf] }
 0x7be   :  { %4263 = vmatpush.bf16.msra.mxu1 %v8390_v14  ;;  %v8294_v14 = vor.u32 %v9828_v51, %v8293_v0  ;;  %v9837_v0 = vld [vmem:[#allocation11 + $0x754] sm:$0xf]  ;;  %v8335_v51 = vld [vmem:[#allocation11 + $0x758] sm:$0xf0] }
 0x7c0   :  { %4248 = vmatpush.bf16.msra.mxu3 %v8342_v7  ;;  %v8410_v7 = vor.u32 %v9855_v56, %v8407_v42  ;;  %v8359_v56 = vld [vmem:[#allocation11 + $0x788] sm:$0xf0]  ;;  %v9890_v42 = vld [vmem:[#allocation11 + $0x8f4] sm:$0xf0] }
 0x7c2   :  { %4264 = vmatpush.bf16.msra.mxu1 %v8382_v54  ;;  %v8415_v54 = vld [vmem:[#allocation11 + $0x7f8] sm:$0xf0] }
 0x7c3   :  { %v8418_v30 = vor.u32 %v9857_v25, %v8415_v54  ;;  %v8327_v25 = vld [vmem:[#allocation11 + $0x748] sm:$0xf0]  ;;  %v9843_v54 = vld [vmem:[#allocation11 + $0x784] sm:$0xf] }
 0x7c4   :  { %4249 = vmatpush.bf16.msra.mxu3 %v8334_v12  ;;  %v8391_v12 = vld [vmem:[#allocation11 + $0x7c8] sm:$0xf0]  ;;  %v8362_v8 = vor.u32 %v9843_v54, %v8359_v56  ;;  %v8495_v56 = vld [vmem:[#allocation11 + $0x890] sm:$0xf] }
 0x7c6   :  { %4265 = vmatpush.bf16.msra.mxu1 %v8374_v22 }
 0x7c8   :  { %4250 = vmatpush.bf16.msra.mxu3 %v8326_v44  ;;  %v8383_v44 = vld [vmem:[#allocation11 + $0x7b8] sm:$0xf0] }
 0x7ca   :  { %4266 = vmatpush.bf16.msra.mxu1 %v8366_v39  ;;  %v8394_v39 = vor.u32 %v9851_v35, %v8391_v12  ;;  %v9888_v35 = vld [vmem:[#allocation11 + $0x8e4] sm:$0xf0] }
 0x7cc   :  { %4251 = vmatpush.bf16.msra.mxu3 %v8318_v38  ;;  %v8386_v38 = vor.u32 %v9849_v58, %v8383_v44  ;;  %v8528_v58 = vor.u32 %v9886_v20, %v8527_v60  ;;  %v8519_v44 = vld [vmem:[#allocation11 + $0x8c0] sm:$0xf]  ;;  %v9868_v20 = vld [vmem:[#allocation11 + $0x844] sm:$0xf0] }
 0x7cd   :  { %v8455_v60 = vld [vmem:[#allocation11 + $0x840] sm:$0xf] }
 0x7ce   :  { %4267 = vmatpush.bf16.msra.mxu1 %v8358_v11 }
 0x7d0   :  { %4252 = vmatpush.bf16.msra.mxu3 %v8310_v63  ;;  %v9847_v63 = vld [vmem:[#allocation11 + $0x7a4] sm:$0xf] }
 0x7d4   :  { %4253 = vmatpush.bf16.msra.mxu3 %v8302_v41  ;;  %v8378_v41 = vor.u32 %v9847_v63, %v8375_v1  ;;  %v9829_v1 = vld [vmem:[#allocation11 + $0x714] sm:$0xf] }
 0x7d8   :  { %4254 = vmatpush.bf16.msra.mxu3 %v8294_v14  ;;  %v9845_v14 = vld [vmem:[#allocation11 + $0x794] sm:$0xf] }
 0x80e   :  { %v10856_v15 = vpop.f32.mrf.mxu1  ;;  %v10858_v50 = vpop.f32.mrf.mxu0 }
 0x816   :  { %v3683_v57 = vpop.f32.mrf.mxu1  ;;  %v3709_v33 = vpop.f32.mrf.mxu0 }
 0x817   :  { %v8367_v57 = vld [vmem:[#allocation11 + $0x798] sm:$0xf0]  ;;  %v8338_v33 = vor.u32 %v9837_v0, %v8335_v51  ;;  %v8503_v0 = vld [vmem:[#allocation11 + $0x8a0] sm:$0xf]  ;;  %v9880_v51 = vld [vmem:[#allocation11 + $0x8a4] sm:$0xf0] }
 0x81e   :  { %v10860_v19 = vpop.f32.mrf.mxu3  ;;  %v10862_v13 = vpop.f32.mrf.mxu2 }
 0x81f   :  { %v3755_v27 = vpop.f32.mrf.mxu1 }
 0x820   :  { %v3759_v3 = vpack.c.bf16 %v3755_v27, %v3755_v27  ;;  %v8370_v27 = vor.u32 %v9845_v14, %v8367_v57  ;;  %v9827_v14 = vld [vmem:[#allocation11 + $0x704] sm:$0xf]  ;;  %v8504_v57 = vor.u32 %v9880_v51, %v8503_v0  ;;  %v9860_v0 = vld [vmem:[#allocation11 + $0x804] sm:$0xf0] }
 0x822   :  { %3974 = vmatmul.bf16.vlgmr.msrb.gmra.mxu0 %v3759_v3  ;;  %4000 = vmatmul.bf16.vlgmr.msrb.gmra.mxu1 %v3759_v3  ;;  %v9835_v3 = vld [vmem:[#allocation11 + $0x744] sm:$0xf] }
 0x823   :  { %4338 = vmatpush.msrb.mxu1 %v10728_v36  ;;  %4286 = vmatpush.bf16.msrb.mxu0 %v8418_v30  ;;  %v8543_v30 = vld [vmem:[#allocation11 + $0x8f0] sm:$0xf] }
 0x825   :  { %4339 = vmatpush.msrb.mxu1 %v10732_v10 }
 0x826   :  { %v3670_v29 = vpop.f32.mrf.mxu3  ;;  %v3696_v22 = vpop.f32.mrf.mxu2 }
 0x827   :  { %4340 = vmatpush.msrb.mxu1 %v10738_v61  ;;  %4287 = vmatpush.bf16.msrb.mxu0 %v8410_v7  ;;  %v8330_v7 = vor.u32 %v9835_v3, %v8327_v25  ;;  %v8319_v29 = vld [vmem:[#allocation11 + $0x738] sm:$0xf0]  ;;  %v8544_v22 = vor.u32 %v9890_v42, %v8543_v30  ;;  %v9874_v3 = vld [vmem:[#allocation11 + $0x874] sm:$0xf0] }
 0x828   :  { %v8322_v12 = vor.u32 %v9833_v59, %v8319_v29  ;;  %v9878_v30 = vld [vmem:[#allocation11 + $0x894] sm:$0xf0]  ;;  %v8487_v29 = vld [vmem:[#allocation11 + $0x880] sm:$0xf] }
 0x829   :  { %4341 = vmatpush.msrb.mxu1 %v10744_v4  ;;  %v8496_v42 = vor.u32 %v9878_v30, %v8495_v56  ;;  %v8545_v56 = vld [vmem:[#allocation11 + $0x8f8] sm:$0xf0]  ;;  %v9887_v30 = vld [vmem:[#allocation11 + $0x8e4] sm:$0xf] }
 0x82b   :  { %4288 = vmatpush.bf16.msrb.mxu0 %v8402_v37  ;;  %v8535_v37 = vld [vmem:[#allocation11 + $0x8e0] sm:$0xf] }
 0x82e   :  { %v3735_v18 = vpop.f32.mrf.mxu3 }
 0x82f   :  { %v3758_v11 = vpack.c.bf16 %v3735_v18, %v3735_v18  ;;  %4289 = vmatpush.bf16.msrb.mxu0 %v8394_v39  ;;  %v8536_v39 = vor.u32 %v9888_v35, %v8535_v37  ;;  %v9884_v18 = vld [vmem:[#allocation11 + $0x8c4] sm:$0xf0]  ;;  %v8463_v35 = vld [vmem:[#allocation11 + $0x850] sm:$0xf] }
 0x831   :  { %3961 = vmatmul.bf16.vlgmr.msrb.gmra.mxu2 %v3758_v11  ;;  %3987 = vmatmul.bf16.vlgmr.msrb.gmra.mxu3 %v3758_v11  ;;  %v9831_v11 = vld [vmem:[#allocation11 + $0x724] sm:$0xf] }
 0x832   :  { %8290 = vmatmul.msk.f32.vlgmr.msra.gmra.mxu0 %vm235_vm2, %v4008_v24  ;;  %4318 = vmatpush.msrb.mxu3 %v10726_v32 }
 0x833   :  { %4273 = vmatpush.bf16.msrb.mxu2 %v8354_v46  ;;  %4290 = vmatpush.bf16.msrb.mxu0 %v8386_v38  ;;  %v8520_v46 = vor.u32 %v9884_v18, %v8519_v44  ;;  %v8311_v38 = vld [vmem:[#allocation11 + $0x728] sm:$0xf0]  ;;  %v8447_v44 = vld [vmem:[#allocation11 + $0x830] sm:$0xf]  ;;  %v9866_v18 = vld [vmem:[#allocation11 + $0x834] sm:$0xf0] }
 0x834   :  { %4319 = vmatpush.msrb.mxu3 %v10730_v53  ;;  %v8314_v63 = vor.u32 %v9831_v11, %v8311_v38  ;;  %v8448_v11 = vor.u32 %v9866_v18, %v8447_v44  ;;  %v9864_v38 = vld [vmem:[#allocation11 + $0x824] sm:$0xf0] }
 0x836   :  { %4320 = vmatpush.msrb.mxu3 %v10736_v43 }
 0x837   :  { %4274 = vmatpush.bf16.msrb.mxu2 %v8346_v62  ;;  %4291 = vmatpush.bf16.msrb.mxu0 %v8378_v41  ;;  %v8303_v62 = vld [vmem:[#allocation11 + $0x718] sm:$0xf0] }
 0x838   :  { %4321 = vmatpush.msrb.mxu3 %v10742_v5  ;;  %v8306_v41 = vor.u32 %v9829_v1, %v8303_v62  ;;  %v8431_v1 = vld [vmem:[#allocation11 + $0x810] sm:$0xf]  ;;  %v9862_v62 = vld [vmem:[#allocation11 + $0x814] sm:$0xf0] }
 0x83b   :  { %4275 = vmatpush.bf16.msrb.mxu2 %v8338_v33  ;;  %4292 = vmatpush.bf16.msrb.mxu0 %v8370_v27  ;;  %v8295_v33 = vld [vmem:[#allocation11 + $0x708] sm:$0xf0]  ;;  %v8479_v27 = vld [vmem:[#allocation11 + $0x870] sm:$0xf] }
 0x83c   :  { %v8298_v25 = vor.u32 %v9827_v14, %v8295_v33  ;;  %v8480_v54 = vor.u32 %v9874_v3, %v8479_v27 }
 0x83f   :  { %4276 = vmatpush.bf16.msrb.mxu2 %v8330_v7  ;;  %4293 = vmatpush.bf16.msrb.mxu0 %v8362_v8  ;;  %v8471_v7 = vld [vmem:[#allocation11 + $0x860] sm:$0xf]  ;;  %v9872_v8 = vld [vmem:[#allocation11 + $0x864] sm:$0xf0] }
 0x840   :  { %v8472_v59 = vor.u32 %v9872_v8, %v8471_v7  ;;  %v8537_v7 = vld [vmem:[#allocation11 + $0x8e8] sm:$0xf0] }
 0x841   :  { %8289 = vmatmul.msk.f32.vlgmr.msra.gmra.mxu2 %vm235_vm2, %v4008_v24  ;;  %v8512_v24 = vor.u32 %v9882_v45, %v8511_v40  ;;  %v8540_v8 = vor.u32 %v9887_v30, %v8537_v7  ;;  %v8489_v7 = vld [vmem:[#allocation11 + $0x888] sm:$0xf0] }
 0x843   :  { %4554 = vmatpush.bf16.msra.mxu0 %v8544_v22  ;;  %4277 = vmatpush.bf16.msrb.mxu2 %v8322_v12  ;;  %v9876_v22 = vld [vmem:[#allocation11 + $0x884] sm:$0xf0]  ;;  %v9870_v12 = vld [vmem:[#allocation11 + $0x854] sm:$0xf0] }
 0x844   :  { %v8488_v37 = vor.u32 %v9876_v22, %v8487_v29  ;;  %v9885_v22 = vld [vmem:[#allocation11 + $0x8d4] sm:$0xf] }
 0x847   :  { %4555 = vmatpush.bf16.msra.mxu0 %v8536_v39  ;;  %4278 = vmatpush.bf16.msrb.mxu2 %v8314_v63  ;;  %v8464_v39 = vor.u32 %v9870_v12, %v8463_v35  ;;  %v4302_v35 = vld [vmem:[#allocation14 + $0x10] sm:$0x3] }
 0x84b   :  { %4556 = vmatpush.bf16.msra.mxu0 %v8528_v58  ;;  %4279 = vmatpush.bf16.msrb.mxu2 %v8306_v41  ;;  %v8456_v58 = vor.u32 %v9868_v20, %v8455_v60  ;;  %v8423_v41 = vld [vmem:[#allocation11 + $0x800] sm:$0xf]  ;;  %v8521_v60 = vld [vmem:[#allocation11 + $0x8c8] sm:$0xf0]  ;;  %v9873_v20 = vld [vmem:[#allocation11 + $0x874] sm:$0xf] }
 0x84c   :  { %v8424_v51 = vor.u32 %v9860_v0, %v8423_v41  ;;  %v9879_v41 = vld [vmem:[#allocation11 + $0x8a4] sm:$0xf]  ;;  %v8505_v0 = vld [vmem:[#allocation11 + $0x8a8] sm:$0xf0] }
 0x84f   :  { %4557 = vmatpush.bf16.msra.mxu0 %v8520_v46  ;;  %4280 = vmatpush.bf16.msrb.mxu2 %v8298_v25  ;;  %v8439_v46 = vld [vmem:[#allocation11 + $0x820] sm:$0xf] }
 0x850   :  { %v8440_v40 = vor.u32 %v9864_v38, %v8439_v46  ;;  %v9881_v46 = vld [vmem:[#allocation11 + $0x8b4] sm:$0xf]  ;;  %v8513_v38 = vld [vmem:[#allocation11 + $0x8b8] sm:$0xf0] }
 0x853   :  { %4558 = vmatpush.bf16.msra.mxu0 %v8512_v24  ;;  %4541 = vmatpush.bf16.msra.mxu2 %v8480_v54  ;;  %v8432_v24 = vor.u32 %v9862_v62, %v8431_v1  ;;  %v9889_v54 = vld [vmem:[#allocation11 + $0x8f4] sm:$0xf]  ;;  %v9871_v1 = vld [vmem:[#allocation11 + $0x864] sm:$0xf]  ;;  %v8473_v62 = vld [vmem:[#allocation11 + $0x868] sm:$0xf0] }
 0x857   :  { %4559 = vmatpush.bf16.msra.mxu0 %v8504_v57  ;;  %4542 = vmatpush.bf16.msra.mxu2 %v8472_v59 }
 0x85b   :  { %4560 = vmatpush.bf16.msra.mxu0 %v8496_v42  ;;  %4543 = vmatpush.bf16.msra.mxu2 %v8464_v39  ;;  %v8548_v42 = vor.u32 %v9889_v54, %v8545_v56  ;;  %v9883_v39 = vld [vmem:[#allocation11 + $0x8c4] sm:$0xf]  ;;  %v8497_v54 = vld [vmem:[#allocation11 + $0x898] sm:$0xf0] }
 0x85c   :  { %v8524_v18 = vor.u32 %v9883_v39, %v8521_v60  ;;  %v8657_v60 = vld [vmem:[#allocation11 + $0x9d0] sm:$0xf] }
 0x85f   :  { %4561 = vmatpush.bf16.msra.mxu0 %v8488_v37  ;;  %4544 = vmatpush.bf16.msra.mxu2 %v8456_v58  ;;  %v8529_v37 = vld [vmem:[#allocation11 + $0x8d8] sm:$0xf0] }
 0x860   :  { %v8532_v12 = vor.u32 %v9885_v22, %v8529_v37  ;;  %v8481_v58 = vld [vmem:[#allocation11 + $0x878] sm:$0xf0]  ;;  %v8665_v37 = vld [vmem:[#allocation11 + $0x9e0] sm:$0xf] }
 0x863   :  { %4545 = vmatpush.bf16.msra.mxu2 %v8448_v11 }
 0x867   :  { %4546 = vmatpush.bf16.msra.mxu2 %v8440_v40  ;;  %v8484_v40 = vor.u32 %v9873_v20, %v8481_v58  ;;  %v9918_v20 = vld [vmem:[#allocation11 + $0x9d4] sm:$0xf0] }
 0x868   :  { %v8658_v58 = vor.u32 %v9918_v20, %v8657_v60  ;;  %v8617_v60 = vld [vmem:[#allocation11 + $0x980] sm:$0xf] }
 0x86b   :  { %4547 = vmatpush.bf16.msra.mxu2 %v8432_v24  ;;  %v8516_v24 = vor.u32 %v9881_v46, %v8513_v38  ;;  %v8649_v46 = vld [vmem:[#allocation11 + $0x9c0] sm:$0xf]  ;;  %v9916_v38 = vld [vmem:[#allocation11 + $0x9c4] sm:$0xf0] }
 0x86f   :  { %4548 = vmatpush.bf16.msra.mxu2 %v8424_v51  ;;  %v8476_v51 = vor.u32 %v9871_v1, %v8473_v62  ;;  %v8650_v1 = vor.u32 %v9916_v38, %v8649_v46  ;;  %v8449_v62 = vld [vmem:[#allocation11 + $0x838] sm:$0xf0]  ;;  %v8593_v38 = vld [vmem:[#allocation11 + $0x950] sm:$0xf] }
 0x89f   :  { %v10874_v45 = vpop.f32.mrf.mxu0  ;;  %v10876_v63 = vpop.f32.mrf.mxu1 }
 0x8a7   :  { %v3977_v14 = vpop.f32.mrf.mxu0  ;;  %v4003_v57 = vpop.f32.mrf.mxu1 }
 0x8a8   :  { %v9869_v14 = vld [vmem:[#allocation11 + $0x854] sm:$0xf]  ;;  %v8465_v57 = vld [vmem:[#allocation11 + $0x858] sm:$0xf0] }
 0x8a9   :  { %v8468_v56 = vor.u32 %v9869_v14, %v8465_v57  ;;  %v8441_v14 = vld [vmem:[#allocation11 + $0x828] sm:$0xf0] }
 0x8af   :  { %v4049_v33 = vpop.f32.mrf.mxu0 }
 0x8b0   :  { %v4053_v27 = vpack.c.bf16 %v4049_v33, %v4049_v33  ;;  %v8508_v33 = vor.u32 %v9879_v41, %v8505_v0  ;;  %v9914_v41 = vld [vmem:[#allocation11 + $0x9b4] sm:$0xf0] }
 0x8b2   :  { %4268 = vmatmul.bf16.vlgmr.msra.gmra.mxu1 %v4053_v27  ;;  %4294 = vmatmul.bf16.vlgmr.msrb.gmra.mxu0 %v4053_v27  ;;  %v9877_v27 = vld [vmem:[#allocation11 + $0x894] sm:$0xf] }
 0x8b3   :  { %4632 = vmatpush.msrb.mxu0 %v10728_v36  ;;  %4580 = vmatpush.bf16.msra.mxu1 %v8548_v42  ;;  %v8500_v30 = vor.u32 %v9877_v27, %v8497_v54  ;;  %v9875_v42 = vld [vmem:[#allocation11 + $0x884] sm:$0xf]  ;;  %v9912_v27 = vld [vmem:[#allocation11 + $0x9a4] sm:$0xf0]  ;;  %v9861_v54 = vld [vmem:[#allocation11 + $0x814] sm:$0xf] }
 0x8b4   :  { %v10879_v3 = vpop.f32.mrf.mxu2  ;;  %v10881_v25 = vpop.f32.mrf.mxu3 }
 0x8b5   :  { %4633 = vmatpush.msrb.mxu0 %v10732_v10 }
 0x8b7   :  { %4634 = vmatpush.msrb.mxu0 %v10738_v61  ;;  %4581 = vmatpush.bf16.msra.mxu1 %v8540_v8  ;;  %v8673_v8 = vld [vmem:[#allocation11 + $0x9f0] sm:$0xf] }
 0x8b9   :  { %4635 = vmatpush.msrb.mxu0 %v10744_v4 }
 0x8bb   :  { %4582 = vmatpush.bf16.msra.mxu1 %v8532_v12  ;;  %v9920_v12 = vld [vmem:[#allocation11 + $0x9e4] sm:$0xf0] }
 0x8bc   :  { %v3964_v59 = vpop.f32.mrf.mxu2  ;;  %v3990_v29 = vpop.f32.mrf.mxu3  ;;  %v8666_v39 = vor.u32 %v9920_v12, %v8665_v37  ;;  %v8609_v12 = vld [vmem:[#allocation11 + $0x970] sm:$0xf] }
 0x8bd   :  { %v9922_v59 = vld [vmem:[#allocation11 + $0x9f4] sm:$0xf0]  ;;  %v8492_v29 = vor.u32 %v9875_v42, %v8489_v7  ;;  %v8625_v42 = vld [vmem:[#allocation11 + $0x990] sm:$0xf] }
 0x8be   :  { %v8674_v22 = vor.u32 %v9922_v59, %v8673_v8  ;;  %v9910_v7 = vld [vmem:[#allocation11 + $0x994] sm:$0xf0] }
 0x8bf   :  { %4583 = vmatpush.bf16.msra.mxu1 %v8524_v18  ;;  %v8457_v18 = vld [vmem:[#allocation11 + $0x848] sm:$0xf0]  ;;  %v8626_v59 = vor.u32 %v9910_v7, %v8625_v42 }
 0x8c2   :  { %8420 = vmatmul.msk.f32.vlgmr.msrb.gmra.mxu1 %vm235_vm2, %v4302_v35 }
 0x8c3   :  { %4584 = vmatpush.bf16.msra.mxu1 %v8516_v24  ;;  %v8641_v24 = vld [vmem:[#allocation11 + $0x9b0] sm:$0xf] }
 0x8c4   :  { %v4029_v44 = vpop.f32.mrf.mxu2  ;;  %v8642_v0 = vor.u32 %v9914_v41, %v8641_v24  ;;  %v9900_v24 = vld [vmem:[#allocation11 + $0x944] sm:$0xf0] }
 0x8c5   :  { %v4052_v11 = vpack.c.bf16 %v4029_v44, %v4029_v44  ;;  %v9867_v44 = vld [vmem:[#allocation11 + $0x844] sm:$0xf] }
 0x8c7   :  { %4255 = vmatmul.bf16.vlgmr.msra.gmra.mxu3 %v4052_v11  ;;  %4281 = vmatmul.bf16.vlgmr.msrb.gmra.mxu2 %v4052_v11  ;;  %v8460_v11 = vor.u32 %v9867_v44, %v8457_v18  ;;  %v8601_v18 = vld [vmem:[#allocation11 + $0x960] sm:$0xf] }
 0x8c8   :  { %4612 = vmatpush.msrb.mxu2 %v10726_v32  ;;  %4567 = vmatpush.bf16.msra.mxu3 %v8484_v40  ;;  %v9865_v40 = vld [vmem:[#allocation11 + $0x834] sm:$0xf] }
 0x8c9   :  { %4585 = vmatpush.bf16.msra.mxu1 %v8508_v33  ;;  %v8633_v33 = vld [vmem:[#allocation11 + $0x9a0] sm:$0xf] }
 0x8ca   :  { %4613 = vmatpush.msrb.mxu2 %v10730_v53 }
 0x8cc   :  { %4614 = vmatpush.msrb.mxu2 %v10736_v43  ;;  %4568 = vmatpush.bf16.msra.mxu3 %v8476_v51  ;;  %v9863_v51 = vld [vmem:[#allocation11 + $0x824] sm:$0xf] }
 0x8cd   :  { %4586 = vmatpush.bf16.msra.mxu1 %v8500_v30  ;;  %v8444_v57 = vor.u32 %v9863_v51, %v8441_v14  ;;  %v8433_v30 = vld [vmem:[#allocation11 + $0x818] sm:$0xf0] }
 0x8ce   :  { %4615 = vmatpush.msrb.mxu2 %v10742_v5  ;;  %v8436_v8 = vor.u32 %v9861_v54, %v8433_v30  ;;  %v9894_v30 = vld [vmem:[#allocation11 + $0x914] sm:$0xf0] }
 0x8d0   :  { %4569 = vmatpush.bf16.msra.mxu3 %v8468_v56  ;;  %v8634_v56 = vor.u32 %v9912_v27, %v8633_v33  ;;  %v8569_v33 = vld [vmem:[#allocation11 + $0x920] sm:$0xf]  ;;  %v9896_v27 = vld [vmem:[#allocation11 + $0x924] sm:$0xf0] }
 0x8d1   :  { %4587 = vmatpush.bf16.msra.mxu1 %v8492_v29  ;;  %v9859_v29 = vld [vmem:[#allocation11 + $0x804] sm:$0xf]  ;;  %v8570_v54 = vor.u32 %v9896_v27, %v8569_v33  ;;  %v8611_v33 = vld [vmem:[#allocation11 + $0x978] sm:$0xf0] }
 0x8d4   :  { %4570 = vmatpush.bf16.msra.mxu3 %v8460_v11  ;;  %v9904_v11 = vld [vmem:[#allocation11 + $0x964] sm:$0xf0] }
 0x8d5   :  { %4848 = vmatpush.bf16.msrb.mxu1 %v8674_v22  ;;  %v8425_v22 = vld [vmem:[#allocation11 + $0x808] sm:$0xf0]  ;;  %v8602_v46 = vor.u32 %v9904_v11, %v8601_v18  ;;  %v3120_v18 = vadd.f32 %v10822_v9, %v10826_v55  ;;  %v4002_v55 = vadd.f32 %v10876_v63, %v10881_v25 }
 0x8d6   :  { %v8428_v37 = vor.u32 %v9859_v29, %v8425_v22  ;;  %v9892_v29 = vld [vmem:[#allocation11 + $0x904] sm:$0xf0]  ;;  %v8667_v25 = vld [vmem:[#allocation11 + $0x9e8] sm:$0xf0] }
 0x8d7   :  { %8419 = vmatmul.msk.f32.vlgmr.msrb.gmra.mxu3 %vm235_vm2, %v4302_v35  ;;  %v8452_v35 = vor.u32 %v9865_v40, %v8449_v62  ;;  %v9902_v40 = vld [vmem:[#allocation11 + $0x954] sm:$0xf0]  ;;  %v8585_v62 = vld [vmem:[#allocation11 + $0x940] sm:$0xf] }
 0x8d8   :  { %v8586_v41 = vor.u32 %v9900_v24, %v8585_v62  ;;  %v9917_v62 = vld [vmem:[#allocation11 + $0x9d4] sm:$0xf]  ;;  %v8659_v24 = vld [vmem:[#allocation11 + $0x9d8] sm:$0xf0] }
 0x8d9   :  { %4849 = vmatpush.bf16.msrb.mxu1 %v8666_v39  ;;  %4571 = vmatpush.bf16.msra.mxu3 %v8452_v35  ;;  %v9906_v39 = vld [vmem:[#allocation11 + $0x974] sm:$0xf0]  ;;  %v8577_v35 = vld [vmem:[#allocation11 + $0x930] sm:$0xf] }
 0x8da   :  { %v8610_v20 = vor.u32 %v9906_v39, %v8609_v12  ;;  %v2800_v12 = vadd.f32 %v10806_v48, %v10802_v17  ;;  %v2826_v39 = vadd.f32 %v10808_v47, %v10804_v49  ;;  %v3388_v17 = vadd.f32 %v10838_v26, %v10842_v31 }
 0x8db   :  { %v3414_v49 = vadd.f32 %v10840_v28, %v10844_v34  ;;  %v3682_v47 = vadd.f32 %v10856_v15, %v10860_v19 }
 0x8dd   :  { %4850 = vmatpush.bf16.msrb.mxu1 %v8658_v58  ;;  %4572 = vmatpush.bf16.msra.mxu3 %v8444_v57  ;;  %v9908_v58 = vld [vmem:[#allocation11 + $0x984] sm:$0xf0] }
 0x8de   :  { %v8618_v44 = vor.u32 %v9908_v58, %v8617_v60 }
 0x8e1   :  { %4851 = vmatpush.bf16.msrb.mxu1 %v8650_v1  ;;  %4573 = vmatpush.bf16.msra.mxu3 %v8436_v8  ;;  %v8594_v1 = vor.u32 %v9902_v40, %v8593_v38  ;;  %v9919_v38 = vld [vmem:[#allocation11 + $0x9e4] sm:$0xf]  ;;  %v4596_v40 = vld [vmem:[#allocation14 + $0x12] sm:$0x3] }
 0x8e5   :  { %4852 = vmatpush.bf16.msrb.mxu1 %v8642_v0  ;;  %4574 = vmatpush.bf16.msra.mxu3 %v8428_v37  ;;  %v9898_v0 = vld [vmem:[#allocation11 + $0x934] sm:$0xf0]  ;;  %v2521_v37 = vadd.f32 %v10788_v21, %v10784_v2  ;;  %v2829_v2 = vadd.f32 %v2800_v12, %v10790_v16 }
 0x8e6   :  { %v8578_v51 = vor.u32 %v9898_v0, %v8577_v35  ;;  %v8662_v0 = vor.u32 %v9917_v62, %v8659_v24  ;;  %v8755_v62 = vld [vmem:[#allocation11 + $0xa90] sm:$0xf]  ;;  %v9942_v24 = vld [vmem:[#allocation11 + $0xa94] sm:$0xf0] }
 0x8e7   :  { %v2534_v58 = vadd.f32 %v10786_v6, %v2521_v37  ;;  %v8635_v37 = vld [vmem:[#allocation11 + $0x9a8] sm:$0xf0] }
 0x8e9   :  { %4853 = vmatpush.bf16.msrb.mxu1 %v8634_v56  ;;  %4835 = vmatpush.bf16.msrb.mxu3 %v8610_v20  ;;  %v8561_v56 = vld [vmem:[#allocation11 + $0x910] sm:$0xf]  ;;  %v2830_v21 = vadd.f32 %v2826_v39, %v2534_v58 }
 0x8ea   :  { %v8562_v42 = vor.u32 %v9894_v30, %v8561_v56  ;;  %v8643_v56 = vld [vmem:[#allocation11 + $0x9b8] sm:$0xf0] }
 0x8eb   :  { %v3124_v48 = vadd.f32 %v3120_v18, %v2830_v21  ;;  %v8619_v18 = vld [vmem:[#allocation11 + $0x988] sm:$0xf0]  ;;  %v9954_v21 = vld [vmem:[#allocation11 + $0xaf4] sm:$0xf0] }
 0x8ed   :  { %4854 = vmatpush.bf16.msrb.mxu1 %v8626_v59  ;;  %4836 = vmatpush.bf16.msrb.mxu3 %v8602_v46  ;;  %v8553_v59 = vld [vmem:[#allocation11 + $0x900] sm:$0xf]  ;;  %v3418_v9 = vadd.f32 %v3414_v49, %v3124_v48  ;;  %v9952_v48 = vld [vmem:[#allocation11 + $0xae4] sm:$0xf0] }
 0x8ee   :  { %v8554_v22 = vor.u32 %v9892_v29, %v8553_v59  ;;  %v8603_v59 = vld [vmem:[#allocation11 + $0x968] sm:$0xf0] }
 0x8f1   :  { %4855 = vmatpush.bf16.msrb.mxu1 %v8618_v44  ;;  %4837 = vmatpush.bf16.msrb.mxu3 %v8594_v1  ;;  %v3094_v44 = vadd.f32 %v10820_v52, %v10824_v23  ;;  %v3708_v52 = vadd.f32 %v10858_v50, %v10862_v13  ;;  %v3976_v23 = vadd.f32 %v10874_v45, %v10879_v3  ;;  %v9921_v45 = vld [vmem:[#allocation11 + $0x9f4] sm:$0xf]  ;;  %v8675_v3 = vld [vmem:[#allocation11 + $0x9f8] sm:$0xf0] }
 0x8f2   :  { %v8678_v63 = vor.u32 %v9921_v45, %v8675_v3  ;;  %v8670_v1 = vor.u32 %v9919_v38, %v8667_v25  ;;  %v8763_v38 = vld [vmem:[#allocation11 + $0xaa0] sm:$0xf]  ;;  %v9897_v25 = vld [vmem:[#allocation11 + $0x934] sm:$0xf] }
 0x8f3   :  { %v3123_v6 = vadd.f32 %v3094_v44, %v2829_v2  ;;  %v3712_v28 = vadd.f32 %v3708_v52, %v3418_v9  ;;  %v9907_v44 = vld [vmem:[#allocation11 + $0x984] sm:$0xf]  ;;  %v8803_v2 = vld [vmem:[#allocation11 + $0xaf0] sm:$0xf] }
 0x8f4   :  { %v8804_v49 = vor.u32 %v9954_v21, %v8803_v2  ;;  %v8787_v52 = vld [vmem:[#allocation11 + $0xad0] sm:$0xf]  ;;  %v9932_v2 = vld [vmem:[#allocation11 + $0xa44] sm:$0xf0] }
 0x8f5   :  { %4838 = vmatpush.bf16.msrb.mxu3 %v8586_v41  ;;  %v3417_v16 = vadd.f32 %v3388_v17, %v3123_v6  ;;  %v4006_v50 = vadd.f32 %v4002_v55, %v3712_v28  ;;  %v8622_v17 = vor.u32 %v9907_v44, %v8619_v18  ;;  %v8795_v6 = vld [vmem:[#allocation11 + $0xae0] sm:$0xf]  ;;  %v9948_v55 = vld [vmem:[#allocation11 + $0xac4] sm:$0xf0] }
 0x8f6   :  { %v8715_v18 = vld [vmem:[#allocation11 + $0xa40] sm:$0xf] }
 0x8f7   :  { %v3711_v26 = vadd.f32 %v3682_v47, %v3417_v16  ;;  %v8796_v47 = vor.u32 %v9952_v48, %v8795_v6  ;;  %v9950_v16 = vld [vmem:[#allocation11 + $0xad4] sm:$0xf0] }
 0x8f8   :  { %v8788_v9 = vor.u32 %v9950_v16, %v8787_v52  ;;  %v9930_v6 = vld [vmem:[#allocation11 + $0xa34] sm:$0xf0]  ;;  %v8699_v52 = vld [vmem:[#allocation11 + $0xa20] sm:$0xf]  ;;  %v9928_v16 = vld [vmem:[#allocation11 + $0xa24] sm:$0xf0] }
 0x8f9   :  { %4839 = vmatpush.bf16.msrb.mxu3 %v8578_v51  ;;  %v4005_v15 = vadd.f32 %v3976_v23, %v3711_v26  ;;  %v9915_v51 = vld [vmem:[#allocation11 + $0x9c4] sm:$0xf]  ;;  %v8779_v23 = vld [vmem:[#allocation11 + $0xac0] sm:$0xf]  ;;  %v9901_v26 = vld [vmem:[#allocation11 + $0x954] sm:$0xf] }
 0x8fa   :  { %v8780_v28 = vor.u32 %v9948_v55, %v8779_v23  ;;  %v8691_v23 = vld [vmem:[#allocation11 + $0xa10] sm:$0xf]  ;;  %v9926_v55 = vld [vmem:[#allocation11 + $0xa14] sm:$0xf0] }
 0x8fd   :  { %4840 = vmatpush.bf16.msrb.mxu3 %v8570_v54  ;;  %v9913_v54 = vld [vmem:[#allocation11 + $0x9b4] sm:$0xf] }
 0x8fe   :  { %v8646_v29 = vor.u32 %v9913_v54, %v8643_v56  ;;  %v9893_v54 = vld [vmem:[#allocation11 + $0x914] sm:$0xf]  ;;  %v8563_v56 = vld [vmem:[#allocation11 + $0x918] sm:$0xf0] }
 0x901   :  { %4841 = vmatpush.bf16.msrb.mxu3 %v8562_v42 }
 0x905   :  { %4842 = vmatpush.bf16.msrb.mxu3 %v8554_v22  ;;  %v9911_v22 = vld [vmem:[#allocation11 + $0x9a4] sm:$0xf] }
 0x906   :  { %v8638_v39 = vor.u32 %v9911_v22, %v8635_v37  ;;  %v8731_v37 = vld [vmem:[#allocation11 + $0xa60] sm:$0xf] }
 0x92f   :  { %v4269_v14 = vpop.f32.mrf.mxu1  ;;  %v4295_v57 = vpop.f32.mrf.mxu0 }
 0x937   :  { %v4271_v7 = vpop.f32.mrf.mxu1  ;;  %v4297_v8 = vpop.f32.mrf.mxu0 }
 0x938   :  { %v9903_v8 = vld [vmem:[#allocation11 + $0x964] sm:$0xf] }
 0x939   :  { %v8606_v12 = vor.u32 %v9903_v8, %v8603_v59  ;;  %v8739_v59 = vld [vmem:[#allocation11 + $0xa70] sm:$0xf] }
 0x93f   :  { %v4343_v60 = vpop.f32.mrf.mxu1 }
 0x940   :  { %v4347_v20 = vpack.c.bf16 %v4343_v60, %v4343_v60  ;;  %v9909_v60 = vld [vmem:[#allocation11 + $0x994] sm:$0xf] }
 0x942   :  { %4562 = vmatmul.bf16.vlgmr.msra.gmra.mxu0 %v4347_v20  ;;  %4588 = vmatmul.bf16.vlgmr.msra.gmra.mxu1 %v4347_v20  ;;  %v8627_v20 = vld [vmem:[#allocation11 + $0x998] sm:$0xf0] }
 0x943   :  { %4926 = vmatpush.msra.mxu1 %v10728_v36  ;;  %4874 = vmatpush.bf16.msra.mxu0 %v8678_v63  ;;  %v8630_v58 = vor.u32 %v9909_v60, %v8627_v20  ;;  %v9944_v63 = vld [vmem:[#allocation11 + $0xaa4] sm:$0xf0]  ;;  %v9934_v20 = vld [vmem:[#allocation11 + $0xa54] sm:$0xf0] }
 0x945   :  { %4927 = vmatpush.msra.mxu1 %v10732_v10 }
 0x947   :  { %4928 = vmatpush.msra.mxu1 %v10738_v61  ;;  %4875 = vmatpush.bf16.msra.mxu0 %v8670_v1  ;;  %v8579_v1 = vld [vmem:[#allocation11 + $0x938] sm:$0xf0] }
 0x949   :  { %4929 = vmatpush.msra.mxu1 %v10744_v4 }
 0x94a   :  { %v4256_v31 = vpop.f32.mrf.mxu3  ;;  %v4282_v34 = vpop.f32.mrf.mxu2 }
 0x94b   :  { %v4270_v19 = vadd.f32 %v4269_v14, %v4256_v31  ;;  %v4296_v13 = vadd.f32 %v4295_v57, %v4282_v34  ;;  %v8651_v14 = vld [vmem:[#allocation11 + $0x9c8] sm:$0xf0]  ;;  %v9905_v57 = vld [vmem:[#allocation11 + $0x974] sm:$0xf]  ;;  %4876 = vmatpush.bf16.msra.mxu0 %v8662_v0  ;;  %v8595_v31 = vld [vmem:[#allocation11 + $0x958] sm:$0xf0] }
 0x94c   :  { %v8654_v27 = vor.u32 %v9915_v51, %v8651_v14  ;;  %v8614_v42 = vor.u32 %v9905_v57, %v8611_v33  ;;  %v8771_v34 = vld [vmem:[#allocation11 + $0xab0] sm:$0xf]  ;;  %v8571_v0 = vld [vmem:[#allocation11 + $0x928] sm:$0xf0]  ;;  %v8756_v51 = vor.u32 %v9942_v24, %v8755_v62  ;;  %v8747_v57 = vld [vmem:[#allocation11 + $0xa80] sm:$0xf] }
 0x94d   :  { %v10920_v11 = vadd.f32 %v4270_v19, %v4005_v15  ;;  %v10922_v46 = vadd.f32 %v4296_v13, %v4006_v50  ;;  %v9946_v15 = vld [vmem:[#allocation11 + $0xab4] sm:$0xf0]  ;;  %v8598_v50 = vor.u32 %v9901_v26, %v8595_v31  ;;  %v9899_v19 = vld [vmem:[#allocation11 + $0x944] sm:$0xf]  ;;  %v8587_v13 = vld [vmem:[#allocation11 + $0x948] sm:$0xf0] }
 0x94e   :  { %v8772_v45 = vor.u32 %v9946_v15, %v8771_v34  ;;  %v8590_v3 = vor.u32 %v9899_v19, %v8587_v13  ;;  %v9940_v33 = vld [vmem:[#allocation11 + $0xa84] sm:$0xf0]  ;;  %v8683_v15 = vld [vmem:[#allocation11 + $0xa00] sm:$0xf]  ;;  %v4890_v13 = vld [vmem:[#allocation14 + $0x14] sm:$0x3] }
 0x94f   :  { %4877 = vmatpush.bf16.msra.mxu0 %v8654_v27  ;;  %v8748_v27 = vor.u32 %v9940_v33, %v8747_v57  ;;  %v8805_v62 = vld [vmem:[#allocation11 + $0xaf8] sm:$0xf0]  ;;  %v9951_v24 = vld [vmem:[#allocation11 + $0xae4] sm:$0xf] }
 0x952   :  { %8550 = vmatmul.msk.f32.vlgmr.msrb.gmra.mxu0 %vm235_vm2, %v4596_v40  ;;  %v4258_v41 = vpop.f32.mrf.mxu3  ;;  %v4284_v35 = vpop.f32.mrf.mxu2 }
 0x953   :  { %4878 = vmatpush.bf16.msra.mxu0 %v8646_v29  ;;  %v8582_v41 = vor.u32 %v9897_v25, %v8579_v1  ;;  %v9895_v35 = vld [vmem:[#allocation11 + $0x924] sm:$0xf]  ;;  %v9938_v29 = vld [vmem:[#allocation11 + $0xa74] sm:$0xf0]  ;;  %v9953_v1 = vld [vmem:[#allocation11 + $0xaf4] sm:$0xf] }
 0x954   :  { %v8574_v14 = vor.u32 %v9895_v35, %v8571_v0  ;;  %v8740_v22 = vor.u32 %v9938_v29, %v8739_v59  ;;  %v8797_v35 = vld [vmem:[#allocation11 + $0xae8] sm:$0xf0]  ;;  %v9943_v59 = vld [vmem:[#allocation11 + $0xaa4] sm:$0xf] }
 0x955   :  { %v8800_v0 = vor.u32 %v9951_v24, %v8797_v35  ;;  %v8765_v29 = vld [vmem:[#allocation11 + $0xaa8] sm:$0xf0]  ;;  %v9974_v35 = vld [vmem:[#allocation11 + $0xb94] sm:$0xf0] }
 0x956   :  { %v8717_v24 = vld [vmem:[#allocation11 + $0xa48] sm:$0xf0] }
 0x957   :  { %4879 = vmatpush.bf16.msra.mxu0 %v8638_v39  ;;  %v8723_v39 = vld [vmem:[#allocation11 + $0xa50] sm:$0xf] }
 0x95a   :  { %v4323_v30 = vpop.f32.mrf.mxu3 }
 0x95b   :  { %v4346_v7 = vpack.c.bf16 %v4323_v30, %v4323_v30  ;;  %4880 = vmatpush.bf16.msra.mxu0 %v8630_v58  ;;  %v8566_v30 = vor.u32 %v9893_v54, %v8563_v56  ;;  %v8724_v58 = vor.u32 %v9934_v20, %v8723_v39  ;;  %v9947_v54 = vld [vmem:[#allocation11 + $0xac4] sm:$0xf]  ;;  %v8781_v56 = vld [vmem:[#allocation11 + $0xac8] sm:$0xf0] }
 0x95c   :  { %v8749_v20 = vld [vmem:[#allocation11 + $0xa88] sm:$0xf0] }
 0x95d   :  { %4549 = vmatmul.bf16.vlgmr.msra.gmra.mxu2 %v4346_v7  ;;  %4575 = vmatmul.bf16.vlgmr.msra.gmra.mxu3 %v4346_v7  ;;  %v8555_v7 = vld [vmem:[#allocation11 + $0x908] sm:$0xf0] }
 0x95e   :  { %4906 = vmatpush.msra.mxu3 %v10726_v32  ;;  %4861 = vmatpush.bf16.msra.mxu2 %v8614_v42  ;;  %v9891_v42 = vld [vmem:[#allocation11 + $0x904] sm:$0xf] }
 0x95f   :  { %4881 = vmatpush.bf16.msra.mxu0 %v8622_v17  ;;  %v8558_v8 = vor.u32 %v9891_v42, %v8555_v7  ;;  %v8716_v17 = vor.u32 %v9932_v2, %v8715_v18 }
 0x960   :  { %4907 = vmatpush.msra.mxu3 %v10730_v53 }
 0x962   :  { %4908 = vmatpush.msra.mxu3 %v10736_v43  ;;  %4862 = vmatpush.bf16.msra.mxu2 %v8606_v12  ;;  %v9936_v12 = vld [vmem:[#allocation11 + $0xa64] sm:$0xf0] }
 0x963   :  { %5142 = vmatpush.bf16.msrb.mxu0 %v8804_v49  ;;  %v8732_v60 = vor.u32 %v9936_v12, %v8731_v37  ;;  %v8707_v49 = vld [vmem:[#allocation11 + $0xa30] sm:$0xf]  ;;  %v9941_v37 = vld [vmem:[#allocation11 + $0xa94] sm:$0xf]  ;;  %v8757_v12 = vld [vmem:[#allocation11 + $0xa98] sm:$0xf0] }
 0x964   :  { %4909 = vmatpush.msra.mxu3 %v10742_v5  ;;  %v8708_v48 = vor.u32 %v9930_v6, %v8707_v49  ;;  %v8760_v39 = vor.u32 %v9941_v37, %v8757_v12  ;;  %v8917_v6 = vld [vmem:[#allocation11 + $0xbd0] sm:$0xf]  ;;  %v9970_v12 = vld [vmem:[#allocation11 + $0xb74] sm:$0xf0] }
 0x966   :  { %4863 = vmatpush.bf16.msra.mxu2 %v8598_v50  ;;  %v9924_v50 = vld [vmem:[#allocation11 + $0xa04] sm:$0xf0] }
 0x967   :  { %5143 = vmatpush.bf16.msrb.mxu0 %v8796_v47  ;;  %v8684_v19 = vor.u32 %v9924_v50, %v8683_v15  ;;  %v9978_v15 = vld [vmem:[#allocation11 + $0xbb4] sm:$0xf0] }
 0x96a   :  { %4864 = vmatpush.bf16.msra.mxu2 %v8590_v3 }
 0x96b   :  { %5144 = vmatpush.bf16.msrb.mxu0 %v8788_v9  ;;  %v8700_v9 = vor.u32 %v9928_v16, %v8699_v52  ;;  %v9937_v52 = vld [vmem:[#allocation11 + $0xa74] sm:$0xf]  ;;  %v8741_v16 = vld [vmem:[#allocation11 + $0xa78] sm:$0xf0] }
 0x96d   :  { %8549 = vmatmul.msk.f32.vlgmr.msrb.gmra.mxu2 %vm235_vm2, %v4596_v40  ;;  %v8764_v40 = vor.u32 %v9944_v63, %v8763_v38 }
 0x96e   :  { %4865 = vmatpush.bf16.msra.mxu2 %v8582_v41  ;;  %v8808_v41 = vor.u32 %v9953_v1, %v8805_v62  ;;  %v9931_v1 = vld [vmem:[#allocation11 + $0xa44] sm:$0xf] }
 0x96f   :  { %5145 = vmatpush.bf16.msrb.mxu0 %v8780_v28  ;;  %v8692_v28 = vor.u32 %v9926_v55, %v8691_v23  ;;  %v8909_v23 = vld [vmem:[#allocation11 + $0xbc0] sm:$0xf]  ;;  %v9980_v55 = vld [vmem:[#allocation11 + $0xbc4] sm:$0xf0] }
 0x972   :  { %4866 = vmatpush.bf16.msra.mxu2 %v8574_v14  ;;  %v8789_v14 = vld [vmem:[#allocation11 + $0xad8] sm:$0xf0] }
 0x973   :  { %5146 = vmatpush.bf16.msrb.mxu0 %v8772_v45 }
 0x976   :  { %4867 = vmatpush.bf16.msra.mxu2 %v8566_v30  ;;  %v9945_v30 = vld [vmem:[#allocation11 + $0xab4] sm:$0xf] }
 0x977   :  { %5147 = vmatpush.bf16.msrb.mxu0 %v8764_v40 }
 0x97a   :  { %4868 = vmatpush.bf16.msra.mxu2 %v8558_v8 }
 0x97b   :  { %5148 = vmatpush.bf16.msrb.mxu0 %v8756_v51  ;;  %v9949_v51 = vld [vmem:[#allocation11 + $0xad4] sm:$0xf] }
 0x97e   :  { %5129 = vmatpush.bf16.msrb.mxu2 %v8740_v22  ;;  %v8768_v22 = vor.u32 %v9943_v59, %v8765_v29  ;;  %v9923_v59 = vld [vmem:[#allocation11 + $0xa04] sm:$0xf]  ;;  %v8685_v29 = vld [vmem:[#allocation11 + $0xa08] sm:$0xf0] }
 0x97f   :  { %5149 = vmatpush.bf16.msrb.mxu0 %v8748_v27  ;;  %v8792_v27 = vor.u32 %v9949_v51, %v8789_v14  ;;  %v9929_v14 = vld [vmem:[#allocation11 + $0xa34] sm:$0xf]  ;;  %v8688_v37 = vor.u32 %v9923_v59, %v8685_v29 }
 0x982   :  { %5130 = vmatpush.bf16.msrb.mxu2 %v8732_v60  ;;  %v9939_v60 = vld [vmem:[#allocation11 + $0xa84] sm:$0xf] }
 0x983   :  { %v8752_v18 = vor.u32 %v9939_v60, %v8749_v20  ;;  %v8861_v60 = vld [vmem:[#allocation11 + $0xb60] sm:$0xf]  ;;  %v9968_v20 = vld [vmem:[#allocation11 + $0xb64] sm:$0xf0] }
 0x986   :  { %5131 = vmatpush.bf16.msrb.mxu2 %v8724_v58  ;;  %v8933_v58 = vld [vmem:[#allocation11 + $0xbf0] sm:$0xf] }
 0x98a   :  { %5132 = vmatpush.bf16.msrb.mxu2 %v8716_v17  ;;  %v9984_v17 = vld [vmem:[#allocation11 + $0xbe4] sm:$0xf0] }
 0x98e   :  { %5133 = vmatpush.bf16.msrb.mxu2 %v8708_v48  ;;  %v9982_v48 = vld [vmem:[#allocation11 + $0xbd4] sm:$0xf0] }
 0x992   :  { %5134 = vmatpush.bf16.msrb.mxu2 %v8700_v9  ;;  %v8744_v9 = vor.u32 %v9937_v52, %v8741_v16  ;;  %v8837_v52 = vld [vmem:[#allocation11 + $0xb30] sm:$0xf]  ;;  %v9962_v16 = vld [vmem:[#allocation11 + $0xb34] sm:$0xf0] }
 0x996   :  { %5135 = vmatpush.bf16.msrb.mxu2 %v8692_v28  ;;  %v8910_v28 = vor.u32 %v9980_v55, %v8909_v23  ;;  %v8829_v23 = vld [vmem:[#allocation11 + $0xb20] sm:$0xf]  ;;  %v9960_v55 = vld [vmem:[#allocation11 + $0xb24] sm:$0xf0] }
 0x99a   :  { %5136 = vmatpush.bf16.msrb.mxu2 %v8684_v19 }
 0x9bf   :  { %v4563_v44 = vpop.f32.mrf.mxu0  ;;  %v4589_v21 = vpop.f32.mrf.mxu1 }
 0x9c7   :  { %v4565_v47 = vpop.f32.mrf.mxu0  ;;  %v4591_v26 = vpop.f32.mrf.mxu1 }
 0x9c8   :  { %v8918_v47 = vor.u32 %v9982_v48, %v8917_v6  ;;  %v9935_v26 = vld [vmem:[#allocation11 + $0xa64] sm:$0xf]  ;;  %v9964_v6 = vld [vmem:[#allocation11 + $0xb44] sm:$0xf0] }
 0x9cf   :  { %v4637_v31 = vpop.f32.mrf.mxu0 }
 0x9d0   :  { %v4641_v34 = vpack.c.bf16 %v4637_v31, %v4637_v31  ;;  %v8733_v31 = vld [vmem:[#allocation11 + $0xa68] sm:$0xf0] }
 0x9d1   :  { %v8736_v50 = vor.u32 %v9935_v26, %v8733_v31 }
 0x9d2   :  { %4856 = vmatmul.bf16.vlgmr.msrb.gmra.mxu1 %v4641_v34  ;;  %4882 = vmatmul.bf16.vlgmr.msra.gmra.mxu0 %v4641_v34  ;;  %v8901_v34 = vld [vmem:[#allocation11 + $0xbb0] sm:$0xf] }
 0x9d3   :  { %5220 = vmatpush.msra.mxu0 %v10728_v36  ;;  %5168 = vmatpush.bf16.msrb.mxu1 %v8808_v41  ;;  %v8902_v19 = vor.u32 %v9978_v15, %v8901_v34  ;;  %v8885_v41 = vld [vmem:[#allocation11 + $0xb90] sm:$0xf]  ;;  %v9958_v15 = vld [vmem:[#allocation11 + $0xb14] sm:$0xf0] }
 0x9d4   :  { %v8886_v51 = vor.u32 %v9974_v35, %v8885_v41  ;;  %v8821_v34 = vld [vmem:[#allocation11 + $0xb10] sm:$0xf] }
 0x9d5   :  { %5221 = vmatpush.msra.mxu0 %v10732_v10 }
 0x9d7   :  { %5222 = vmatpush.msra.mxu0 %v10738_v61  ;;  %5169 = vmatpush.bf16.msrb.mxu1 %v8800_v0  ;;  %v8720_v0 = vor.u32 %v9931_v1, %v8717_v24 }
 0x9d9   :  { %5223 = vmatpush.msra.mxu0 %v10744_v4 }
 0x9db   :  { %5170 = vmatpush.bf16.msrb.mxu1 %v8792_v27  ;;  %v8877_v27 = vld [vmem:[#allocation11 + $0xb80] sm:$0xf] }
 0x9e0   :  { %v4550_v45 = vpop.f32.mrf.mxu2  ;;  %v4576_v3 = vpop.f32.mrf.mxu3 }
 0x9e1   :  { %v4564_v38 = vadd.f32 %v4563_v44, %v4550_v45  ;;  %v4590_v63 = vadd.f32 %v4589_v21, %v4576_v3  ;;  %v9986_v44 = vld [vmem:[#allocation11 + $0xbf4] sm:$0xf0]  ;;  %v8925_v21 = vld [vmem:[#allocation11 + $0xbe0] sm:$0xf]  ;;  %v8725_v45 = vld [vmem:[#allocation11 + $0xa58] sm:$0xf0] }
 0x9e2   :  { %8680 = vmatmul.msk.f32.vlgmr.msra.gmra.mxu1 %vm235_vm2, %v4890_v13  ;;  %v8934_v2 = vor.u32 %v9986_v44, %v8933_v58  ;;  %v8926_v49 = vor.u32 %v9984_v17, %v8925_v21  ;;  %v8862_v58 = vor.u32 %v9968_v20, %v8861_v60  ;;  %v9973_v60 = vld [vmem:[#allocation11 + $0xb94] sm:$0xf]  ;;  %v8887_v20 = vld [vmem:[#allocation11 + $0xb98] sm:$0xf0] }
 0x9e3   :  { %v10936_v25 = vadd.f32 %v4564_v38, %v10920_v11  ;;  %v10939_v40 = vadd.f32 %v4590_v63, %v10922_v46  ;;  %v8784_v11 = vor.u32 %v9947_v54, %v8781_v56  ;;  %v8773_v46 = vld [vmem:[#allocation11 + $0xab8] sm:$0xf0]  ;;  %v8893_v38 = vld [vmem:[#allocation11 + $0xba0] sm:$0xf]  ;;  %v9976_v63 = vld [vmem:[#allocation11 + $0xba4] sm:$0xf0] }
 0x9e4   :  { %v8776_v8 = vor.u32 %v9945_v30, %v8773_v46  ;;  %v8894_v62 = vor.u32 %v9976_v63, %v8893_v38  ;;  %v9972_v54 = vld [vmem:[#allocation11 + $0xb84] sm:$0xf0]  ;;  %v8701_v30 = vld [vmem:[#allocation11 + $0xa28] sm:$0xf0]  ;;  %v5184_v38 = vld [vmem:[#allocation14 + $0x16] sm:$0x3] }
 0x9e5   :  { %5171 = vmatpush.bf16.msrb.mxu1 %v8784_v11  ;;  %v8878_v56 = vor.u32 %v9972_v54, %v8877_v27  ;;  %v9927_v11 = vld [vmem:[#allocation11 + $0xa24] sm:$0xf]  ;;  %v9981_v54 = vld [vmem:[#allocation11 + $0xbd4] sm:$0xf] }
 0x9e6   :  { %v8704_v46 = vor.u32 %v9927_v11, %v8701_v30 }
 0x9e8   :  { %v4552_v57 = vpop.f32.mrf.mxu2  ;;  %v4578_v33 = vpop.f32.mrf.mxu3 }
 0x9e9   :  { %5172 = vmatpush.bf16.msrb.mxu1 %v8776_v8  ;;  %v8709_v57 = vld [vmem:[#allocation11 + $0xa38] sm:$0xf0] }
 0x9ea   :  { %v8712_v33 = vor.u32 %v9929_v14, %v8709_v57  ;;  %v9983_v14 = vld [vmem:[#allocation11 + $0xbe4] sm:$0xf] }
 0x9ed   :  { %5173 = vmatpush.bf16.msrb.mxu1 %v8768_v22  ;;  %v8869_v22 = vld [vmem:[#allocation11 + $0xb70] sm:$0xf] }
 0x9f0   :  { %v4617_v42 = vpop.f32.mrf.mxu2 }
 0x9f1   :  { %v4640_v7 = vpack.c.bf16 %v4617_v42, %v4617_v42  ;;  %5174 = vmatpush.bf16.msrb.mxu1 %v8760_v39  ;;  %v9925_v42 = vld [vmem:[#allocation11 + $0xa14] sm:$0xf]  ;;  %v8870_v39 = vor.u32 %v9970_v12, %v8869_v22  ;;  %v8895_v12 = vld [vmem:[#allocation11 + $0xba8] sm:$0xf0] }
 0x9f3   :  { %4843 = vmatmul.bf16.vlgmr.msrb.gmra.mxu3 %v4640_v7  ;;  %4869 = vmatmul.bf16.vlgmr.msra.gmra.mxu2 %v4640_v7  ;;  %v8693_v7 = vld [vmem:[#allocation11 + $0xa18] sm:$0xf0] }
 0x9f4   :  { %5200 = vmatpush.msra.mxu2 %v10726_v32  ;;  %5155 = vmatpush.bf16.msrb.mxu3 %v8744_v9  ;;  %v8696_v8 = vor.u32 %v9925_v42, %v8693_v7  ;;  %v8838_v9 = vor.u32 %v9962_v16, %v8837_v52  ;;  %v9979_v42 = vld [vmem:[#allocation11 + $0xbc4] sm:$0xf]  ;;  %v8911_v7 = vld [vmem:[#allocation11 + $0xbc8] sm:$0xf0]  ;;  %v9047_v52 = vld [vmem:[#allocation11 + $0xcd0] sm:$0xf] }
 0x9f5   :  { %5175 = vmatpush.bf16.msrb.mxu1 %v8752_v18  ;;  %v8853_v18 = vld [vmem:[#allocation11 + $0xb50] sm:$0xf]  ;;  %v10014_v16 = vld [vmem:[#allocation11 + $0xcd4] sm:$0xf0] }
 0x9f6   :  { %5201 = vmatpush.msra.mxu2 %v10730_v53 }
 0x9f8   :  { %5202 = vmatpush.msra.mxu2 %v10736_v43  ;;  %5156 = vmatpush.bf16.msrb.mxu3 %v8736_v50 }
 0x9f9   :  { %5436 = vmatpush.bf16.msra.mxu1 %v8934_v2  ;;  %v9966_v2 = vld [vmem:[#allocation11 + $0xb54] sm:$0xf0] }
 0x9fa   :  { %5203 = vmatpush.msra.mxu2 %v10742_v5  ;;  %v8854_v21 = vor.u32 %v9966_v2, %v8853_v18  ;;  %v8879_v18 = vld [vmem:[#allocation11 + $0xb88] sm:$0xf0]  ;;  %v9063_v2 = vld [vmem:[#allocation11 + $0xcf0] sm:$0xf] }
 0x9fd   :  { %5437 = vmatpush.bf16.msra.mxu1 %v8926_v49  ;;  %v8845_v49 = vld [vmem:[#allocation11 + $0xb40] sm:$0xf] }
 0xa01   :  { %5438 = vmatpush.bf16.msra.mxu1 %v8918_v47  ;;  %v8846_v47 = vor.u32 %v9964_v6, %v8845_v49  ;;  %v9055_v6 = vld [vmem:[#allocation11 + $0xce0] sm:$0xf] }
 0xa03   :  { %8679 = vmatmul.msk.f32.vlgmr.msra.gmra.mxu3 %vm235_vm2, %v4890_v13  ;;  %v9933_v13 = vld [vmem:[#allocation11 + $0xa54] sm:$0xf] }
 0xa04   :  { %v8728_v3 = vor.u32 %v9933_v13, %v8725_v45  ;;  %v8813_v13 = vld [vmem:[#allocation11 + $0xb00] sm:$0xf]  ;;  %v9956_v45 = vld [vmem:[#allocation11 + $0xb04] sm:$0xf0] }
 0xa05   :  { %5439 = vmatpush.bf16.msra.mxu1 %v8910_v28  ;;  %v8830_v28 = vor.u32 %v9960_v55, %v8829_v23  ;;  %v9039_v23 = vld [vmem:[#allocation11 + $0xcc0] sm:$0xf]  ;;  %v10012_v55 = vld [vmem:[#allocation11 + $0xcc4] sm:$0xf0] }
 0xa06   :  { %5157 = vmatpush.bf16.msrb.mxu3 %v8728_v3  ;;  %v8814_v3 = vor.u32 %v9956_v45, %v8813_v13  ;;  %v9023_v13 = vld [vmem:[#allocation11 + $0xca0] sm:$0xf]  ;;  %v10008_v45 = vld [vmem:[#allocation11 + $0xca4] sm:$0xf0] }
 0xa09   :  { %5440 = vmatpush.bf16.msra.mxu1 %v8902_v19  ;;  %v8822_v19 = vor.u32 %v9958_v15, %v8821_v34  ;;  %v9969_v34 = vld [vmem:[#allocation11 + $0xb74] sm:$0xf]  ;;  %v8871_v15 = vld [vmem:[#allocation11 + $0xb78] sm:$0xf0] }
 0xa0a   :  { %5158 = vmatpush.bf16.msrb.mxu3 %v8720_v0  ;;  %v9985_v0 = vld [vmem:[#allocation11 + $0xbf4] sm:$0xf] }
 0xa0d   :  { %5441 = vmatpush.bf16.msra.mxu1 %v8894_v62 }
 0xa0e   :  { %5159 = vmatpush.bf16.msrb.mxu3 %v8712_v33  ;;  %v8927_v33 = vld [vmem:[#allocation11 + $0xbe8] sm:$0xf0] }
 0xa0f   :  { %v8930_v27 = vor.u32 %v9983_v14, %v8927_v33  ;;  %v9007_v33 = vld [vmem:[#allocation11 + $0xc80] sm:$0xf] }
 0xa11   :  { %5442 = vmatpush.bf16.msra.mxu1 %v8886_v51  ;;  %v8935_v51 = vld [vmem:[#allocation11 + $0xbf8] sm:$0xf0] }
 0xa12   :  { %5160 = vmatpush.bf16.msrb.mxu3 %v8704_v46  ;;  %v8938_v57 = vor.u32 %v9985_v0, %v8935_v51  ;;  %v9965_v0 = vld [vmem:[#allocation11 + $0xb54] sm:$0xf]  ;;  %v8855_v51 = vld [vmem:[#allocation11 + $0xb58] sm:$0xf0] }
 0xa15   :  { %5443 = vmatpush.bf16.msra.mxu1 %v8878_v56  ;;  %v8919_v56 = vld [vmem:[#allocation11 + $0xbd8] sm:$0xf0] }
 0xa16   :  { %5161 = vmatpush.bf16.msrb.mxu3 %v8696_v8  ;;  %v8922_v46 = vor.u32 %v9981_v54, %v8919_v56  ;;  %v9977_v8 = vld [vmem:[#allocation11 + $0xbb4] sm:$0xf]  ;;  %v9963_v56 = vld [vmem:[#allocation11 + $0xb44] sm:$0xf] }
 0xa1a   :  { %5162 = vmatpush.bf16.msrb.mxu3 %v8688_v37  ;;  %v9975_v37 = vld [vmem:[#allocation11 + $0xba4] sm:$0xf] }
 0xa1e   :  { %5423 = vmatpush.bf16.msra.mxu3 %v8870_v39  ;;  %v8898_v39 = vor.u32 %v9975_v37, %v8895_v12  ;;  %v9955_v37 = vld [vmem:[#allocation11 + $0xb04] sm:$0xf]  ;;  %v8815_v12 = vld [vmem:[#allocation11 + $0xb08] sm:$0xf0] }
 0xa22   :  { %5424 = vmatpush.bf16.msra.mxu3 %v8862_v58  ;;  %v8890_v58 = vor.u32 %v9973_v60, %v8887_v20  ;;  %v8818_v60 = vor.u32 %v9955_v37, %v8815_v12  ;;  %v8999_v20 = vld [vmem:[#allocation11 + $0xc70] sm:$0xf] }
 0xa26   :  { %5425 = vmatpush.bf16.msra.mxu3 %v8854_v21  ;;  %v10018_v21 = vld [vmem:[#allocation11 + $0xcf4] sm:$0xf0] }
 0xa27   :  { %v9064_v49 = vor.u32 %v10018_v21, %v9063_v2  ;;  %v10000_v2 = vld [vmem:[#allocation11 + $0xc64] sm:$0xf0] }
 0xa2a   :  { %5426 = vmatpush.bf16.msra.mxu3 %v8846_v47 }
 0xa2e   :  { %5427 = vmatpush.bf16.msra.mxu3 %v8838_v9  ;;  %v9048_v9 = vor.u32 %v10014_v16, %v9047_v52  ;;  %v9996_v52 = vld [vmem:[#allocation11 + $0xc44] sm:$0xf0] }
 0xa32   :  { %5428 = vmatpush.bf16.msra.mxu3 %v8830_v28  ;;  %v9040_v28 = vor.u32 %v10012_v55, %v9039_v23  ;;  %v8967_v55 = vld [vmem:[#allocation11 + $0xc30] sm:$0xf] }
 0xa36   :  { %5429 = vmatpush.bf16.msra.mxu3 %v8822_v19 }
 0xa3a   :  { %5430 = vmatpush.bf16.msra.mxu3 %v8814_v3  ;;  %v9967_v3 = vld [vmem:[#allocation11 + $0xb64] sm:$0xf] }
 0xa4f   :  { %v4857_v44 = vpop.f32.mrf.mxu1  ;;  %v4883_v48 = vpop.f32.mrf.mxu0 }
 0xa57   :  { %v4859_v17 = vpop.f32.mrf.mxu1  ;;  %v4885_v50 = vpop.f32.mrf.mxu0 }
 0xa58   :  { %v8874_v50 = vor.u32 %v9969_v34, %v8871_v15  ;;  %v8959_v34 = vld [vmem:[#allocation11 + $0xc20] sm:$0xf]  ;;  %v9992_v15 = vld [vmem:[#allocation11 + $0xc24] sm:$0xf0] }
 0xa5f   :  { %v4931_v26 = vpop.f32.mrf.mxu1 }
 0xa60   :  { %v4935_v31 = vpack.c.bf16 %v4931_v26, %v4931_v26  ;;  %v9031_v26 = vld [vmem:[#allocation11 + $0xcb0] sm:$0xf] }
 0xa62   :  { %5150 = vmatmul.bf16.vlgmr.msrb.gmra.mxu0 %v4935_v31  ;;  %5176 = vmatmul.bf16.vlgmr.msrb.gmra.mxu1 %v4935_v31  ;;  %v10010_v31 = vld [vmem:[#allocation11 + $0xcb4] sm:$0xf0] }
 0xa63   :  { %5514 = vmatpush.msrb.mxu1 %v10728_v36  ;;  %5462 = vmatpush.bf16.msrb.mxu0 %v8938_v57  ;;  %v9032_v19 = vor.u32 %v10010_v31, %v9031_v26  ;;  %v8858_v57 = vor.u32 %v9965_v0, %v8855_v51  ;;  %v9994_v26 = vld [vmem:[#allocation11 + $0xc34] sm:$0xf0] }
 0xa64   :  { %v8968_v31 = vor.u32 %v9994_v26, %v8967_v55  ;;  %v10046_v55 = vld [vmem:[#allocation11 + $0xdd4] sm:$0xf0] }
 0xa65   :  { %5515 = vmatpush.msrb.mxu1 %v10732_v10 }
 0xa67   :  { %5516 = vmatpush.msrb.mxu1 %v10738_v61  ;;  %5463 = vmatpush.bf16.msrb.mxu0 %v8930_v27  ;;  %v10004_v27 = vld [vmem:[#allocation11 + $0xc84] sm:$0xf0] }
 0xa68   :  { %v9008_v54 = vor.u32 %v10004_v27, %v9007_v33  ;;  %v10017_v27 = vld [vmem:[#allocation11 + $0xcf4] sm:$0xf] }
 0xa69   :  { %5517 = vmatpush.msrb.mxu1 %v10744_v4 }
 0xa6b   :  { %5464 = vmatpush.bf16.msrb.mxu0 %v8922_v46  ;;  %v9961_v46 = vld [vmem:[#allocation11 + $0xb34] sm:$0xf] }
 0xa72   :  { %8810 = vmatmul.msk.f32.vlgmr.msra.gmra.mxu0 %vm235_vm2, %v5184_v38 }
 0xa76   :  { %v4844_v63 = vpop.f32.mrf.mxu3  ;;  %v4870_v1 = vpop.f32.mrf.mxu2 }
 0xa77   :  { %v4858_v62 = vadd.f32 %v4857_v44, %v4844_v63  ;;  %v4884_v24 = vadd.f32 %v4883_v48, %v4870_v1  ;;  %v9971_v44 = vld [vmem:[#allocation11 + $0xb84] sm:$0xf]  ;;  %v10016_v48 = vld [vmem:[#allocation11 + $0xce4] sm:$0xf0]  ;;  %v8863_v63 = vld [vmem:[#allocation11 + $0xb68] sm:$0xf0] }
 0xa78   :  { %v8882_v17 = vor.u32 %v9971_v44, %v8879_v18  ;;  %v9056_v47 = vor.u32 %v10016_v48, %v9055_v6  ;;  %v9015_v1 = vld [vmem:[#allocation11 + $0xc90] sm:$0xf]  ;;  %v8991_v18 = vld [vmem:[#allocation11 + $0xc60] sm:$0xf] }
 0xa79   :  { %v10952_v41 = vadd.f32 %v4858_v62, %v10936_v25  ;;  %v10955_v35 = vadd.f32 %v4884_v24, %v10939_v40  ;;  %v8914_v25 = vor.u32 %v9979_v42, %v8911_v7  ;;  %v8903_v40 = vld [vmem:[#allocation11 + $0xbb8] sm:$0xf0]  ;;  %v10006_v62 = vld [vmem:[#allocation11 + $0xc94] sm:$0xf0]  ;;  %v8866_v24 = vor.u32 %v9967_v3, %v8863_v63  ;;  %v9988_v63 = vld [vmem:[#allocation11 + $0xc04] sm:$0xf0] }
 0xa7a   :  { %v8906_v22 = vor.u32 %v9977_v8, %v8903_v40  ;;  %v9016_v14 = vor.u32 %v10006_v62, %v9015_v1  ;;  %v8839_v42 = vld [vmem:[#allocation11 + $0xb38] sm:$0xf0]  ;;  %v8831_v8 = vld [vmem:[#allocation11 + $0xb28] sm:$0xf0]  ;;  %v8992_v21 = vor.u32 %v10000_v2, %v8991_v18  ;;  %v5478_v62 = vld [vmem:[#allocation14 + $0x18] sm:$0x3] }
 0xa7b   :  { %5465 = vmatpush.bf16.msrb.mxu0 %v8914_v25  ;;  %v8842_v7 = vor.u32 %v9961_v46, %v8839_v42  ;;  %v9959_v25 = vld [vmem:[#allocation11 + $0xb24] sm:$0xf]  ;;  %v10013_v42 = vld [vmem:[#allocation11 + $0xcd4] sm:$0xf]  ;;  %v9017_v18 = vld [vmem:[#allocation11 + $0xc98] sm:$0xf0] }
 0xa7c   :  { %v8834_v40 = vor.u32 %v9959_v25, %v8831_v8 }
 0xa7e   :  { %v4846_v11 = vpop.f32.mrf.mxu3  ;;  %v4872_v30 = vpop.f32.mrf.mxu2 }
 0xa7f   :  { %5466 = vmatpush.bf16.msrb.mxu0 %v8906_v22  ;;  %v8847_v11 = vld [vmem:[#allocation11 + $0xb48] sm:$0xf0] }
 0xa80   :  { %v8850_v30 = vor.u32 %v9963_v56, %v8847_v11  ;;  %v10015_v56 = vld [vmem:[#allocation11 + $0xce4] sm:$0xf] }
 0xa83   :  { %5467 = vmatpush.bf16.msrb.mxu0 %v8898_v39 }
 0xa86   :  { %v4911_v59 = vpop.f32.mrf.mxu3 }
 0xa87   :  { %v4934_v29 = vpack.c.bf16 %v4911_v59, %v4911_v59  ;;  %5468 = vmatpush.bf16.msrb.mxu0 %v8890_v58  ;;  %v9957_v59 = vld [vmem:[#allocation11 + $0xb14] sm:$0xf]  ;;  %v10002_v58 = vld [vmem:[#allocation11 + $0xc74] sm:$0xf0] }
 0xa88   :  { %v9000_v44 = vor.u32 %v10002_v58, %v8999_v20  ;;  %v9025_v20 = vld [vmem:[#allocation11 + $0xca8] sm:$0xf0] }
 0xa89   :  { %5137 = vmatmul.bf16.vlgmr.msrb.gmra.mxu2 %v4934_v29  ;;  %5163 = vmatmul.bf16.vlgmr.msrb.gmra.mxu3 %v4934_v29  ;;  %v8823_v29 = vld [vmem:[#allocation11 + $0xb18] sm:$0xf0] }
 0xa8a   :  { %5494 = vmatpush.msrb.mxu3 %v10726_v32  ;;  %5449 = vmatpush.bf16.msrb.mxu2 %v8874_v50  ;;  %v8826_v22 = vor.u32 %v9957_v59, %v8823_v29  ;;  %v8960_v50 = vor.u32 %v9992_v15, %v8959_v34  ;;  %v10011_v59 = vld [vmem:[#allocation11 + $0xcc4] sm:$0xf]  ;;  %v9041_v29 = vld [vmem:[#allocation11 + $0xcc8] sm:$0xf0]  ;;  %v9161_v34 = vld [vmem:[#allocation11 + $0xdb0] sm:$0xf] }
 0xa8b   :  { %5469 = vmatpush.bf16.msrb.mxu0 %v8882_v17  ;;  %v8983_v17 = vld [vmem:[#allocation11 + $0xc50] sm:$0xf] }
 0xa8c   :  { %5495 = vmatpush.msrb.mxu3 %v10730_v53 }
 0xa8e   :  { %5496 = vmatpush.msrb.mxu3 %v10736_v43  ;;  %5450 = vmatpush.bf16.msrb.mxu2 %v8866_v24 }
 0xa8f   :  { %5730 = vmatpush.bf16.msra.mxu0 %v9064_v49  ;;  %v9998_v49 = vld [vmem:[#allocation11 + $0xc54] sm:$0xf0] }
 0xa90   :  { %5497 = vmatpush.msrb.mxu3 %v10742_v5  ;;  %v8984_v48 = vor.u32 %v9998_v49, %v8983_v17  ;;  %v9009_v17 = vld [vmem:[#allocation11 + $0xc88] sm:$0xf0]  ;;  %v9193_v49 = vld [vmem:[#allocation11 + $0xdf0] sm:$0xf] }
 0xa92   :  { %5451 = vmatpush.bf16.msrb.mxu2 %v8858_v57 }
 0xa93   :  { %5731 = vmatpush.bf16.msra.mxu0 %v9056_v47  ;;  %v8975_v47 = vld [vmem:[#allocation11 + $0xc40] sm:$0xf] }
 0xa96   :  { %5452 = vmatpush.bf16.msrb.mxu2 %v8850_v30  ;;  %v9057_v30 = vld [vmem:[#allocation11 + $0xce8] sm:$0xf0] }
 0xa97   :  { %5732 = vmatpush.bf16.msra.mxu0 %v9048_v9  ;;  %v8976_v9 = vor.u32 %v9996_v52, %v8975_v47  ;;  %v9060_v46 = vor.u32 %v10015_v56, %v9057_v30  ;;  %v9185_v52 = vld [vmem:[#allocation11 + $0xde0] sm:$0xf]  ;;  %v10036_v56 = vld [vmem:[#allocation11 + $0xd84] sm:$0xf0]  ;;  %v9997_v30 = vld [vmem:[#allocation11 + $0xc54] sm:$0xf] }
 0xa99   :  { %8809 = vmatmul.msk.f32.vlgmr.msra.gmra.mxu2 %vm235_vm2, %v5184_v38  ;;  %v9024_v38 = vor.u32 %v10008_v45, %v9023_v13  ;;  %v9990_v13 = vld [vmem:[#allocation11 + $0xc14] sm:$0xf0] }
 0xa9a   :  { %5453 = vmatpush.bf16.msrb.mxu2 %v8842_v7  ;;  %v9049_v7 = vld [vmem:[#allocation11 + $0xcd8] sm:$0xf0] }
 0xa9b   :  { %5733 = vmatpush.bf16.msra.mxu0 %v9040_v28 }
 0xa9e   :  { %5454 = vmatpush.bf16.msrb.mxu2 %v8834_v40  ;;  %v9052_v40 = vor.u32 %v10013_v42, %v9049_v7  ;;  %v9995_v7 = vld [vmem:[#allocation11 + $0xc44] sm:$0xf] }
 0xa9f   :  { %5734 = vmatpush.bf16.msra.mxu0 %v9032_v19  ;;  %v8951_v19 = vld [vmem:[#allocation11 + $0xc10] sm:$0xf] }
 0xaa0   :  { %v8952_v3 = vor.u32 %v9990_v13, %v8951_v19  ;;  %v9153_v13 = vld [vmem:[#allocation11 + $0xda0] sm:$0xf] }
 0xaa2   :  { %5455 = vmatpush.bf16.msrb.mxu2 %v8826_v22  ;;  %v10009_v22 = vld [vmem:[#allocation11 + $0xcb4] sm:$0xf] }
 0xaa3   :  { %5735 = vmatpush.bf16.msra.mxu0 %v9024_v38  ;;  %v8943_v38 = vld [vmem:[#allocation11 + $0xc00] sm:$0xf] }
 0xaa4   :  { %v8944_v1 = vor.u32 %v9988_v63, %v8943_v38  ;;  %v9001_v63 = vld [vmem:[#allocation11 + $0xc78] sm:$0xf0] }
 0xaa6   :  { %5456 = vmatpush.bf16.msrb.mxu2 %v8818_v60  ;;  %v10007_v60 = vld [vmem:[#allocation11 + $0xca4] sm:$0xf] }
 0xaa7   :  { %5736 = vmatpush.bf16.msra.mxu0 %v9016_v14  ;;  %v9028_v58 = vor.u32 %v10007_v60, %v9025_v20  ;;  %v9987_v60 = vld [vmem:[#allocation11 + $0xc04] sm:$0xf] }
 0xaaa   :  { %5717 = vmatpush.bf16.msra.mxu2 %v9000_v44  ;;  %v10005_v44 = vld [vmem:[#allocation11 + $0xc94] sm:$0xf] }
 0xaab   :  { %5737 = vmatpush.bf16.msra.mxu0 %v9008_v54  ;;  %v9065_v54 = vld [vmem:[#allocation11 + $0xcf8] sm:$0xf0]  ;;  %v9020_v2 = vor.u32 %v10005_v44, %v9017_v18  ;;  %v9129_v44 = vld [vmem:[#allocation11 + $0xd70] sm:$0xf]  ;;  %v10034_v18 = vld [vmem:[#allocation11 + $0xd74] sm:$0xf0] }
 0xaac   :  { %v9068_v11 = vor.u32 %v10017_v27, %v9065_v54  ;;  %v9137_v54 = vld [vmem:[#allocation11 + $0xd80] sm:$0xf] }
 0xaae   :  { %5718 = vmatpush.bf16.msra.mxu2 %v8992_v21  ;;  %v10003_v21 = vld [vmem:[#allocation11 + $0xc84] sm:$0xf] }
 0xab2   :  { %5719 = vmatpush.bf16.msra.mxu2 %v8984_v48  ;;  %v9012_v48 = vor.u32 %v10003_v21, %v9009_v17  ;;  %v9130_v21 = vor.u32 %v10034_v18, %v9129_v44  ;;  %v10039_v44 = vld [vmem:[#allocation11 + $0xda4] sm:$0xf]  ;;  %v9155_v18 = vld [vmem:[#allocation11 + $0xda8] sm:$0xf0] }
 0xab6   :  { %5720 = vmatpush.bf16.msra.mxu2 %v8976_v9 }
 0xaba   :  { %5721 = vmatpush.bf16.msra.mxu2 %v8968_v31  ;;  %v10044_v31 = vld [vmem:[#allocation11 + $0xdc4] sm:$0xf0] }
 0xabe   :  { %5722 = vmatpush.bf16.msra.mxu2 %v8960_v50  ;;  %v10042_v50 = vld [vmem:[#allocation11 + $0xdb4] sm:$0xf0] }
 0xabf   :  { %v9162_v19 = vor.u32 %v10042_v50, %v9161_v34  ;;  %v9097_v34 = vld [vmem:[#allocation11 + $0xd30] sm:$0xf] }
 0xac2   :  { %5723 = vmatpush.bf16.msra.mxu2 %v8952_v3  ;;  %v10001_v3 = vld [vmem:[#allocation11 + $0xc74] sm:$0xf] }
 0xac6   :  { %5724 = vmatpush.bf16.msra.mxu2 %v8944_v1  ;;  %v9145_v1 = vld [vmem:[#allocation11 + $0xd90] sm:$0xf] }
 0xadf   :  { %v5151_v39 = vpop.f32.mrf.mxu0  ;;  %v5177_v16 = vpop.f32.mrf.mxu1 }
 0xae7   :  { %v5153_v6 = vpop.f32.mrf.mxu0  ;;  %v5179_v45 = vpop.f32.mrf.mxu1 }
 0xae8   :  { %v10050_v6 = vld [vmem:[#allocation11 + $0xdf4] sm:$0xf0]  ;;  %v10040_v45 = vld [vmem:[#allocation11 + $0xda4] sm:$0xf0] }
 0xae9   :  { %v9194_v47 = vor.u32 %v10050_v6, %v9193_v49  ;;  %v9154_v38 = vor.u32 %v10040_v45, %v9153_v13  ;;  %v9121_v49 = vld [vmem:[#allocation11 + $0xd60] sm:$0xf]  ;;  %v10032_v6 = vld [vmem:[#allocation11 + $0xd64] sm:$0xf0] }
 0xaea   :  { %v10024_v13 = vld [vmem:[#allocation11 + $0xd24] sm:$0xf0] }
 0xaef   :  { %v5225_v23 = vpop.f32.mrf.mxu0 }
 0xaf0   :  { %v5229_v28 = vpack.c.bf16 %v5225_v23, %v5225_v23  ;;  %v9177_v23 = vld [vmem:[#allocation11 + $0xdd0] sm:$0xf] }
 0xaf1   :  { %v9178_v26 = vor.u32 %v10046_v55, %v9177_v23  ;;  %v9105_v55 = vld [vmem:[#allocation11 + $0xd40] sm:$0xf] }
 0xaf2   :  { %5444 = vmatmul.bf16.vlgmr.msra.gmra.mxu1 %v5229_v28  ;;  %5470 = vmatmul.bf16.vlgmr.msrb.gmra.mxu0 %v5229_v28  ;;  %v9169_v28 = vld [vmem:[#allocation11 + $0xdc0] sm:$0xf] }
 0xaf3   :  { %5808 = vmatpush.msrb.mxu0 %v10728_v36  ;;  %5756 = vmatpush.bf16.msra.mxu1 %v9068_v11  ;;  %v9170_v15 = vor.u32 %v10044_v31, %v9169_v28  ;;  %v9138_v11 = vor.u32 %v10036_v56, %v9137_v54 }
 0xaf5   :  { %5809 = vmatpush.msrb.mxu0 %v10732_v10 }
 0xaf7   :  { %5810 = vmatpush.msrb.mxu0 %v10738_v61  ;;  %5757 = vmatpush.bf16.msra.mxu1 %v9060_v46  ;;  %v8985_v46 = vld [vmem:[#allocation11 + $0xc58] sm:$0xf0] }
 0xaf8   :  { %v8988_v42 = vor.u32 %v9997_v30, %v8985_v46  ;;  %v10049_v46 = vld [vmem:[#allocation11 + $0xdf4] sm:$0xf] }
 0xaf9   :  { %5811 = vmatpush.msrb.mxu0 %v10744_v4 }
 0xafb   :  { %5758 = vmatpush.bf16.msra.mxu1 %v9052_v40  ;;  %v9993_v40 = vld [vmem:[#allocation11 + $0xc34] sm:$0xf] }
 0xb02   :  { %8940 = vmatmul.msk.f32.vlgmr.msrb.gmra.mxu1 %vm235_vm2, %v5478_v62 }
 0xb0c   :  { %v5138_v24 = vpop.f32.mrf.mxu2  ;;  %v5164_v0 = vpop.f32.mrf.mxu3 }
 0xb0d   :  { %v5152_v51 = vadd.f32 %v5151_v39, %v5138_v24  ;;  %v5178_v14 = vadd.f32 %v5177_v16, %v5164_v0  ;;  %v10048_v16 = vld [vmem:[#allocation11 + $0xde4] sm:$0xf0]  ;;  %v9004_v24 = vor.u32 %v10001_v3, %v9001_v63  ;;  %v9081_v3 = vld [vmem:[#allocation11 + $0xd10] sm:$0xf] }
 0xb0e   :  { %v9186_v9 = vor.u32 %v10048_v16, %v9185_v52  ;;  %v10030_v52 = vld [vmem:[#allocation11 + $0xd54] sm:$0xf0] }
 0xb0f   :  { %v10968_v57 = vadd.f32 %v5152_v51, %v10952_v41  ;;  %v10971_v33 = vadd.f32 %v5178_v14, %v10955_v35  ;;  %v9044_v41 = vor.u32 %v10011_v59, %v9041_v29  ;;  %v9033_v35 = vld [vmem:[#allocation11 + $0xcb8] sm:$0xf0]  ;;  %v9999_v51 = vld [vmem:[#allocation11 + $0xc64] sm:$0xf]  ;;  %v8993_v14 = vld [vmem:[#allocation11 + $0xc68] sm:$0xf0] }
 0xb10   :  { %v9036_v39 = vor.u32 %v10009_v22, %v9033_v35  ;;  %v8996_v27 = vor.u32 %v9999_v51, %v8993_v14  ;;  %v8969_v59 = vld [vmem:[#allocation11 + $0xc38] sm:$0xf0]  ;;  %v8961_v22 = vld [vmem:[#allocation11 + $0xc28] sm:$0xf0] }
 0xb11   :  { %5759 = vmatpush.bf16.msra.mxu1 %v9044_v41  ;;  %v8972_v29 = vor.u32 %v9993_v40, %v8969_v59  ;;  %v9991_v41 = vld [vmem:[#allocation11 + $0xc24] sm:$0xf]  ;;  %v10045_v59 = vld [vmem:[#allocation11 + $0xdd4] sm:$0xf] }
 0xb12   :  { %v8964_v35 = vor.u32 %v9991_v41, %v8961_v22 }
 0xb14   :  { %v5140_v25 = vpop.f32.mrf.mxu2  ;;  %v5166_v8 = vpop.f32.mrf.mxu3 }
 0xb15   :  { %5760 = vmatpush.bf16.msra.mxu1 %v9036_v39  ;;  %v8977_v25 = vld [vmem:[#allocation11 + $0xc48] sm:$0xf0]  ;;  %v8953_v39 = vld [vmem:[#allocation11 + $0xc18] sm:$0xf0] }
 0xb16   :  { %v8980_v8 = vor.u32 %v9995_v7, %v8977_v25  ;;  %v10047_v7 = vld [vmem:[#allocation11 + $0xde4] sm:$0xf] }
 0xb19   :  { %5761 = vmatpush.bf16.msra.mxu1 %v9028_v58  ;;  %v8945_v58 = vld [vmem:[#allocation11 + $0xc08] sm:$0xf0] }
 0xb1c   :  { %v5205_v37 = vpop.f32.mrf.mxu2 }
 0xb1d   :  { %v5228_v12 = vpack.c.bf16 %v5205_v37, %v5205_v37  ;;  %5762 = vmatpush.bf16.msra.mxu1 %v9020_v2  ;;  %v8948_v2 = vor.u32 %v9987_v60, %v8945_v58 }
 0xb1f   :  { %5431 = vmatmul.bf16.vlgmr.msra.gmra.mxu3 %v5228_v12  ;;  %5457 = vmatmul.bf16.vlgmr.msrb.gmra.mxu2 %v5228_v12  ;;  %v9989_v12 = vld [vmem:[#allocation11 + $0xc14] sm:$0xf] }
 0xb20   :  { %5788 = vmatpush.msrb.mxu2 %v10726_v32  ;;  %5743 = vmatpush.bf16.msra.mxu3 %v9004_v24  ;;  %v8956_v20 = vor.u32 %v9989_v12, %v8953_v39  ;;  %v9073_v24 = vld [vmem:[#allocation11 + $0xd00] sm:$0xf]  ;;  %v9171_v12 = vld [vmem:[#allocation11 + $0xdc8] sm:$0xf0]  ;;  %v10041_v39 = vld [vmem:[#allocation11 + $0xdb4] sm:$0xf] }
 0xb21   :  { %5763 = vmatpush.bf16.msra.mxu1 %v9012_v48  ;;  %v9122_v48 = vor.u32 %v10032_v6, %v9121_v49  ;;  %v10035_v6 = vld [vmem:[#allocation11 + $0xd84] sm:$0xf] }
 0xb22   :  { %5789 = vmatpush.msrb.mxu2 %v10730_v53 }
 0xb24   :  { %5790 = vmatpush.msrb.mxu2 %v10736_v43  ;;  %5744 = vmatpush.bf16.msra.mxu3 %v8996_v27 }
 0xb25   :  { %6024 = vmatpush.bf16.msrb.mxu1 %v9194_v47  ;;  %v9113_v47 = vld [vmem:[#allocation11 + $0xd50] sm:$0xf] }
 0xb26   :  { %5791 = vmatpush.msrb.mxu2 %v10742_v5 }
 0xb28   :  { %5745 = vmatpush.bf16.msra.mxu3 %v8988_v42  ;;  %v9195_v42 = vld [vmem:[#allocation11 + $0xdf8] sm:$0xf0] }
 0xb29   :  { %6025 = vmatpush.bf16.msrb.mxu1 %v9186_v9  ;;  %v9114_v9 = vor.u32 %v10030_v52, %v9113_v47  ;;  %v9198_v25 = vor.u32 %v10049_v46, %v9195_v42  ;;  %v9323_v47 = vld [vmem:[#allocation11 + $0xef0] sm:$0xf]  ;;  %v10082_v52 = vld [vmem:[#allocation11 + $0xef4] sm:$0xf0]  ;;  %v10031_v42 = vld [vmem:[#allocation11 + $0xd64] sm:$0xf] }
 0xb2c   :  { %5746 = vmatpush.bf16.msra.mxu3 %v8980_v8  ;;  %v9187_v8 = vld [vmem:[#allocation11 + $0xde8] sm:$0xf0] }
 0xb2d   :  { %6026 = vmatpush.bf16.msrb.mxu1 %v9178_v26  ;;  %v10028_v26 = vld [vmem:[#allocation11 + $0xd44] sm:$0xf0]  ;;  %v9190_v40 = vor.u32 %v10047_v7, %v9187_v8  ;;  %v9123_v7 = vld [vmem:[#allocation11 + $0xd68] sm:$0xf0]  ;;  %v10029_v8 = vld [vmem:[#allocation11 + $0xd54] sm:$0xf] }
 0xb2e   :  { %v9106_v31 = vor.u32 %v10028_v26, %v9105_v55  ;;  %v10080_v55 = vld [vmem:[#allocation11 + $0xee4] sm:$0xf0] }
 0xb2f   :  { %8939 = vmatmul.msk.f32.vlgmr.msrb.gmra.mxu3 %vm235_vm2, %v5478_v62  ;;  %v10038_v62 = vld [vmem:[#allocation11 + $0xd94] sm:$0xf0] }
 0xb30   :  { %v9146_v0 = vor.u32 %v10038_v62, %v9145_v1  ;;  %5747 = vmatpush.bf16.msra.mxu3 %v8972_v29  ;;  %v5772_v1 = vld [vmem:[#allocation14 + $0x1a] sm:$0x3] }
 0xb31   :  { %6027 = vmatpush.bf16.msrb.mxu1 %v9170_v15  ;;  %v10026_v15 = vld [vmem:[#allocation11 + $0xd34] sm:$0xf0]  ;;  %v9179_v29 = vld [vmem:[#allocation11 + $0xdd8] sm:$0xf0] }
 0xb32   :  { %v9098_v50 = vor.u32 %v10026_v15, %v9097_v34  ;;  %v9299_v15 = vld [vmem:[#allocation11 + $0xec0] sm:$0xf] }
 0xb34   :  { %5748 = vmatpush.bf16.msra.mxu3 %v8964_v35  ;;  %v9182_v35 = vor.u32 %v10045_v59, %v9179_v29  ;;  %v10027_v29 = vld [vmem:[#allocation11 + $0xd44] sm:$0xf] }
 0xb35   :  { %6028 = vmatpush.bf16.msrb.mxu1 %v9162_v19  ;;  %v9089_v19 = vld [vmem:[#allocation11 + $0xd20] sm:$0xf] }
 0xb36   :  { %v9090_v45 = vor.u32 %v10024_v13, %v9089_v19  ;;  %v9291_v19 = vld [vmem:[#allocation11 + $0xeb0] sm:$0xf] }
 0xb38   :  { %5749 = vmatpush.bf16.msra.mxu3 %v8956_v20 }
 0xb39   :  { %6029 = vmatpush.bf16.msrb.mxu1 %v9154_v38  ;;  %v10022_v38 = vld [vmem:[#allocation11 + $0xd14] sm:$0xf0] }
 0xb3a   :  { %v9082_v62 = vor.u32 %v10022_v38, %v9081_v3  ;;  %v9283_v38 = vld [vmem:[#allocation11 + $0xea0] sm:$0xf] }
 0xb3c   :  { %5750 = vmatpush.bf16.msra.mxu3 %v8948_v2  ;;  %v9158_v2 = vor.u32 %v10039_v44, %v9155_v18 }
 0xb3d   :  { %6030 = vmatpush.bf16.msrb.mxu1 %v9146_v0  ;;  %v10020_v0 = vld [vmem:[#allocation11 + $0xd04] sm:$0xf0] }
 0xb3e   :  { %v9074_v51 = vor.u32 %v10020_v0, %v9073_v24 }
 0xb40   :  { %6011 = vmatpush.bf16.msrb.mxu3 %v9130_v21  ;;  %v10037_v21 = vld [vmem:[#allocation11 + $0xd94] sm:$0xf] }
 0xb41   :  { %6031 = vmatpush.bf16.msrb.mxu1 %v9138_v11 }
 0xb44   :  { %6012 = vmatpush.bf16.msrb.mxu3 %v9122_v48  ;;  %v9139_v48 = vld [vmem:[#allocation11 + $0xd88] sm:$0xf0] }
 0xb48   :  { %6013 = vmatpush.bf16.msrb.mxu3 %v9114_v9  ;;  %v9324_v9 = vor.u32 %v10082_v52, %v9323_v47  ;;  %v9251_v47 = vld [vmem:[#allocation11 + $0xe60] sm:$0xf]  ;;  %v10064_v52 = vld [vmem:[#allocation11 + $0xe64] sm:$0xf0] }
 0xb4c   :  { %6014 = vmatpush.bf16.msrb.mxu3 %v9106_v31  ;;  %v10078_v31 = vld [vmem:[#allocation11 + $0xed4] sm:$0xf0] }
 0xb50   :  { %6015 = vmatpush.bf16.msrb.mxu3 %v9098_v50  ;;  %v10076_v50 = vld [vmem:[#allocation11 + $0xec4] sm:$0xf0] }
 0xb51   :  { %v9300_v13 = vor.u32 %v10076_v50, %v9299_v15 }
 0xb54   :  { %6016 = vmatpush.bf16.msrb.mxu3 %v9090_v45  ;;  %v10074_v45 = vld [vmem:[#allocation11 + $0xeb4] sm:$0xf0] }
 0xb55   :  { %v9292_v3 = vor.u32 %v10074_v45, %v9291_v19  ;;  %v9227_v19 = vld [vmem:[#allocation11 + $0xe30] sm:$0xf] }
 0xb58   :  { %6017 = vmatpush.bf16.msrb.mxu3 %v9082_v62  ;;  %v9275_v62 = vld [vmem:[#allocation11 + $0xe90] sm:$0xf] }
 0xb5c   :  { %6018 = vmatpush.bf16.msrb.mxu3 %v9074_v51  ;;  %v9267_v51 = vld [vmem:[#allocation11 + $0xe80] sm:$0xf] }
 0xb6f   :  { %v5445_v37 = vpop.f32.mrf.mxu1  ;;  %v5471_v28 = vpop.f32.mrf.mxu0 }
 0xb77   :  { %v5447_v17 = vpop.f32.mrf.mxu1  ;;  %v5473_v63 = vpop.f32.mrf.mxu0 }
 0xb78   :  { %v9147_v17 = vld [vmem:[#allocation11 + $0xd98] sm:$0xf0]  ;;  %v10072_v63 = vld [vmem:[#allocation11 + $0xea4] sm:$0xf0] }
 0xb79   :  { %v9150_v49 = vor.u32 %v10037_v21, %v9147_v17  ;;  %v9284_v24 = vor.u32 %v10072_v63, %v9283_v38  ;;  %v9075_v21 = vld [vmem:[#allocation11 + $0xd08] sm:$0xf0]  ;;  %v9259_v17 = vld [vmem:[#allocation11 + $0xe70] sm:$0xf] }
 0xb7a   :  { %v9211_v63 = vld [vmem:[#allocation11 + $0xe10] sm:$0xf] }
 0xb7f   :  { %v5519_v16 = vpop.f32.mrf.mxu1 }
 0xb80   :  { %v5523_v23 = vpack.c.bf16 %v5519_v16, %v5519_v16  ;;  %v9142_v16 = vor.u32 %v10035_v6, %v9139_v48 }
 0xb82   :  { %5738 = vmatmul.bf16.vlgmr.msra.gmra.mxu0 %v5523_v23  ;;  %5764 = vmatmul.bf16.vlgmr.msra.gmra.mxu1 %v5523_v23  ;;  %v9315_v23 = vld [vmem:[#allocation11 + $0xee0] sm:$0xf] }
 0xb83   :  { %6102 = vmatpush.msra.mxu1 %v10728_v36  ;;  %6050 = vmatpush.bf16.msra.mxu0 %v9198_v25  ;;  %v9316_v26 = vor.u32 %v10080_v55, %v9315_v23  ;;  %v9126_v25 = vor.u32 %v10031_v42, %v9123_v7  ;;  %v9252_v23 = vor.u32 %v10064_v52, %v9251_v47  ;;  %v9243_v55 = vld [vmem:[#allocation11 + $0xe50] sm:$0xf]  ;;  %v10081_v42 = vld [vmem:[#allocation11 + $0xef4] sm:$0xf]  ;;  %v9325_v7 = vld [vmem:[#allocation11 + $0xef8] sm:$0xf0] }
 0xb84   :  { %v9301_v47 = vld [vmem:[#allocation11 + $0xec8] sm:$0xf0] }
 0xb85   :  { %6103 = vmatpush.msra.mxu1 %v10732_v10 }
 0xb87   :  { %6104 = vmatpush.msra.mxu1 %v10738_v61  ;;  %6051 = vmatpush.bf16.msra.mxu0 %v9190_v40  ;;  %v9115_v40 = vld [vmem:[#allocation11 + $0xd58] sm:$0xf0] }
 0xb88   :  { %v9118_v59 = vor.u32 %v10029_v8, %v9115_v40  ;;  %v10079_v8 = vld [vmem:[#allocation11 + $0xee4] sm:$0xf]  ;;  %v9317_v40 = vld [vmem:[#allocation11 + $0xee8] sm:$0xf0] }
 0xb89   :  { %6105 = vmatpush.msra.mxu1 %v10744_v4 }
 0xb8b   :  { %6052 = vmatpush.bf16.msra.mxu0 %v9182_v35  ;;  %v10025_v35 = vld [vmem:[#allocation11 + $0xd34] sm:$0xf] }
 0xb92   :  { %9070 = vmatmul.msk.f32.vlgmr.msrb.gmra.mxu0 %vm235_vm2, %v5772_v1 }
 0xba2   :  { %v5432_v14 = vpop.f32.mrf.mxu3  ;;  %v5458_v27 = vpop.f32.mrf.mxu2 }
 0xba3   :  { %v5446_v54 = vadd.f32 %v5445_v37, %v5432_v14  ;;  %v5472_v56 = vadd.f32 %v5471_v28, %v5458_v27  ;;  %v10043_v37 = vld [vmem:[#allocation11 + $0xdc4] sm:$0xf]  ;;  %v9307_v28 = vld [vmem:[#allocation11 + $0xed0] sm:$0xf]  ;;  %v10068_v14 = vld [vmem:[#allocation11 + $0xe84] sm:$0xf0] }
 0xba4   :  { %v9308_v34 = vor.u32 %v10078_v31, %v9307_v28  ;;  %v9268_v27 = vor.u32 %v10068_v14, %v9267_v51  ;;  %v9235_v31 = vld [vmem:[#allocation11 + $0xe40] sm:$0xf] }
 0xba5   :  { %v10984_v11 = vadd.f32 %v5446_v54, %v10968_v57  ;;  %v10987_v30 = vadd.f32 %v5472_v56, %v10971_v33  ;;  %v9174_v57 = vor.u32 %v10043_v37, %v9171_v12  ;;  %v9163_v33 = vld [vmem:[#allocation11 + $0xdb8] sm:$0xf0]  ;;  %v10033_v54 = vld [vmem:[#allocation11 + $0xd74] sm:$0xf] }
 0xba6   :  { %v9166_v58 = vor.u32 %v10041_v39, %v9163_v33  ;;  %v9131_v56 = vld [vmem:[#allocation11 + $0xd78] sm:$0xf0]  ;;  %v10023_v39 = vld [vmem:[#allocation11 + $0xd24] sm:$0xf]  ;;  %v9091_v33 = vld [vmem:[#allocation11 + $0xd28] sm:$0xf0] }
 0xba7   :  { %6053 = vmatpush.bf16.msra.mxu0 %v9174_v57  ;;  %v9134_v46 = vor.u32 %v10033_v54, %v9131_v56  ;;  %v9099_v37 = vld [vmem:[#allocation11 + $0xd38] sm:$0xf0] }
 0xba8   :  { %v9102_v57 = vor.u32 %v10025_v35, %v9099_v37  ;;  %v9261_v35 = vld [vmem:[#allocation11 + $0xe78] sm:$0xf0] }
 0xbaa   :  { %v5434_v41 = vpop.f32.mrf.mxu3  ;;  %v5460_v22 = vpop.f32.mrf.mxu2 }
 0xbab   :  { %6054 = vmatpush.bf16.msra.mxu0 %v9166_v58  ;;  %v9107_v41 = vld [vmem:[#allocation11 + $0xd48] sm:$0xf0]  ;;  %v9083_v58 = vld [vmem:[#allocation11 + $0xd18] sm:$0xf0] }
 0xbac   :  { %v9110_v22 = vor.u32 %v10027_v29, %v9107_v41 }
 0xbaf   :  { %6055 = vmatpush.bf16.msra.mxu0 %v9158_v2  ;;  %v10019_v2 = vld [vmem:[#allocation11 + $0xd04] sm:$0xf] }
 0xbb0   :  { %v9078_v6 = vor.u32 %v10019_v2, %v9075_v21  ;;  %v9309_v21 = vld [vmem:[#allocation11 + $0xed8] sm:$0xf0] }
 0xbb2   :  { %v5499_v60 = vpop.f32.mrf.mxu3 }
 0xbb3   :  { %v5522_v20 = vpack.c.bf16 %v5499_v60, %v5499_v60  ;;  %6056 = vmatpush.bf16.msra.mxu0 %v9150_v49  ;;  %v9094_v60 = vor.u32 %v10023_v39, %v9091_v33  ;;  %v10066_v49 = vld [vmem:[#allocation11 + $0xe74] sm:$0xf0]  ;;  %v9253_v39 = vld [vmem:[#allocation11 + $0xe68] sm:$0xf0]  ;;  %v10061_v33 = vld [vmem:[#allocation11 + $0xe54] sm:$0xf] }
 0xbb4   :  { %v9260_v48 = vor.u32 %v10066_v49, %v9259_v17 }
 0xbb5   :  { %5725 = vmatmul.bf16.vlgmr.msra.gmra.mxu2 %v5522_v20  ;;  %5751 = vmatmul.bf16.vlgmr.msra.gmra.mxu3 %v5522_v20  ;;  %v10021_v20 = vld [vmem:[#allocation11 + $0xd14] sm:$0xf] }
 0xbb6   :  { %6082 = vmatpush.msra.mxu3 %v10726_v32  ;;  %6037 = vmatpush.bf16.msra.mxu2 %v9134_v46  ;;  %v9086_v18 = vor.u32 %v10021_v20, %v9083_v58  ;;  %v10059_v58 = vld [vmem:[#allocation11 + $0xe44] sm:$0xf] }
 0xbb7   :  { %6057 = vmatpush.bf16.msra.mxu0 %v9142_v16 }
 0xbb8   :  { %6083 = vmatpush.msra.mxu3 %v10730_v53 }
 0xbba   :  { %6084 = vmatpush.msra.mxu3 %v10736_v43  ;;  %6038 = vmatpush.bf16.msra.mxu2 %v9126_v25  ;;  %v9328_v25 = vor.u32 %v10081_v42, %v9325_v7 }
 0xbbb   :  { %6318 = vmatpush.bf16.msrb.mxu0 %v9324_v9 }
 0xbbc   :  { %6085 = vmatpush.msra.mxu3 %v10742_v5 }
 0xbbe   :  { %6039 = vmatpush.bf16.msra.mxu2 %v9118_v59  ;;  %v9320_v59 = vor.u32 %v10079_v8, %v9317_v40  ;;  %v10098_v8 = vld [vmem:[#allocation11 + $0xf74] sm:$0xf0] }
 0xbbf   :  { %6319 = vmatpush.bf16.msrb.mxu0 %v9316_v26  ;;  %v10062_v26 = vld [vmem:[#allocation11 + $0xe54] sm:$0xf0] }
 0xbc0   :  { %v9244_v28 = vor.u32 %v10062_v26, %v9243_v55  ;;  %v9293_v55 = vld [vmem:[#allocation11 + $0xeb8] sm:$0xf0]  ;;  %v10053_v26 = vld [vmem:[#allocation11 + $0xe14] sm:$0xf] }
 0xbc2   :  { %6040 = vmatpush.bf16.msra.mxu2 %v9110_v22  ;;  %v10065_v22 = vld [vmem:[#allocation11 + $0xe74] sm:$0xf] }
 0xbc3   :  { %6320 = vmatpush.bf16.msrb.mxu0 %v9308_v34  ;;  %v10060_v34 = vld [vmem:[#allocation11 + $0xe44] sm:$0xf0] }
 0xbc4   :  { %v9236_v50 = vor.u32 %v10060_v34, %v9235_v31 }
 0xbc5   :  { %9069 = vmatmul.msk.f32.vlgmr.msrb.gmra.mxu2 %vm235_vm2, %v5772_v1  ;;  %v10070_v1 = vld [vmem:[#allocation11 + $0xe94] sm:$0xf0] }
 0xbc6   :  { %v9276_v0 = vor.u32 %v10070_v1, %v9275_v62  ;;  %6041 = vmatpush.bf16.msra.mxu2 %v9102_v57  ;;  %v10054_v62 = vld [vmem:[#allocation11 + $0xe14] sm:$0xf0] }
 0xbc7   :  { %6321 = vmatpush.bf16.msrb.mxu0 %v9300_v13  ;;  %v10058_v13 = vld [vmem:[#allocation11 + $0xe34] sm:$0xf0] }
 0xbc8   :  { %v9228_v45 = vor.u32 %v10058_v13, %v9227_v19 }
 0xbca   :  { %6042 = vmatpush.bf16.msra.mxu2 %v9094_v60  ;;  %v9245_v60 = vld [vmem:[#allocation11 + $0xe58] sm:$0xf0] }
 0xbcb   :  { %6322 = vmatpush.bf16.msrb.mxu0 %v9292_v3  ;;  %v9219_v3 = vld [vmem:[#allocation11 + $0xe20] sm:$0xf]  ;;  %v9248_v20 = vor.u32 %v10061_v33, %v9245_v60 }
 0xbcc   :  { %v9445_v60 = vld [vmem:[#allocation11 + $0xfe0] sm:$0xf] }
 0xbce   :  { %6043 = vmatpush.bf16.msra.mxu2 %v9086_v18  ;;  %v10077_v18 = vld [vmem:[#allocation11 + $0xed4] sm:$0xf] }
 0xbcf   :  { %6323 = vmatpush.bf16.msrb.mxu0 %v9284_v24  ;;  %v9203_v24 = vld [vmem:[#allocation11 + $0xe00] sm:$0xf]  ;;  %v9312_v17 = vor.u32 %v10077_v18, %v9309_v21  ;;  %v9447_v18 = vld [vmem:[#allocation11 + $0xfe8] sm:$0xf0]  ;;  %v10097_v21 = vld [vmem:[#allocation11 + $0xf74] sm:$0xf] }
 0xbd2   :  { %6044 = vmatpush.bf16.msra.mxu2 %v9078_v6  ;;  %v9229_v6 = vld [vmem:[#allocation11 + $0xe38] sm:$0xf0] }
 0xbd3   :  { %6324 = vmatpush.bf16.msrb.mxu0 %v9276_v0  ;;  %v6066_v0 = vld [vmem:[#allocation14 + $0x1c] sm:$0x3] }
 0xbd6   :  { %6305 = vmatpush.bf16.msrb.mxu2 %v9260_v48 }
 0xbd7   :  { %6325 = vmatpush.bf16.msrb.mxu0 %v9268_v27 }
 0xbda   :  { %6306 = vmatpush.bf16.msrb.mxu2 %v9252_v23 }
 0xbde   :  { %6307 = vmatpush.bf16.msrb.mxu2 %v9244_v28  ;;  %v9213_v28 = vld [vmem:[#allocation11 + $0xe18] sm:$0xf0] }
 0xbdf   :  { %v9216_v19 = vor.u32 %v10053_v26, %v9213_v28  ;;  %v9439_v28 = vld [vmem:[#allocation11 + $0xfd8] sm:$0xf0] }
 0xbe2   :  { %6308 = vmatpush.bf16.msrb.mxu2 %v9236_v50  ;;  %v9285_v50 = vld [vmem:[#allocation11 + $0xea8] sm:$0xf0] }
 0xbe6   :  { %6309 = vmatpush.bf16.msrb.mxu2 %v9228_v45 }
 0xbff   :  { %v10994_v12 = vpop.f32.mrf.mxu0  ;;  %v5765_v15 = vpop.f32.mrf.mxu1 }
 0xc07   :  { %v5741_v44 = vpop.f32.mrf.mxu0 }
 0xc08   :  { %v9237_v44 = vld [vmem:[#allocation11 + $0xe48] sm:$0xf0] }
 0xc0f   :  { %v5813_v16 = vpop.f32.mrf.mxu0 }
 0xc10   :  { %v5817_v9 = vpack.c.bf16 %v5813_v16, %v5813_v16  ;;  %v9221_v16 = vld [vmem:[#allocation11 + $0xe28] sm:$0xf0] }
 0xc12   :  { %6058 = vmatmul.bf16.vlgmr.msra.gmra.mxu0 %v5817_v9  ;;  %6032 = vmatmul.bf16.vlgmr.msrb.gmra.mxu1 %v5817_v9  ;;  %v10073_v9 = vld [vmem:[#allocation11 + $0xeb4] sm:$0xf] }
 0xc13   :  { %6396 = vmatpush.msra.mxu0 %v10728_v36  ;;  %v10056_v36 = vld [vmem:[#allocation11 + $0xe24] sm:$0xf0]  ;;  %6344 = vmatpush.bf16.msrb.mxu1 %v9328_v25  ;;  %v9296_v34 = vor.u32 %v10073_v9, %v9293_v55  ;;  %v9389_v25 = vld [vmem:[#allocation11 + $0xf70] sm:$0xf]  ;;  %v10109_v55 = vld [vmem:[#allocation11 + $0xfd4] sm:$0xf] }
 0xc14   :  { %v9220_v38 = vor.u32 %v10056_v36, %v9219_v3  ;;  %v10051_v3 = vld [vmem:[#allocation11 + $0xe04] sm:$0xf]  ;;  %v9205_v36 = vld [vmem:[#allocation11 + $0xe08] sm:$0xf0]  ;;  %v9390_v40 = vor.u32 %v10098_v8, %v9389_v25  ;;  %v9437_v9 = vld [vmem:[#allocation11 + $0xfd0] sm:$0xf] }
 0xc15   :  { %6397 = vmatpush.msra.mxu0 %v10732_v10  ;;  %v5767_v10 = vpop.f32.mrf.mxu1  ;;  %v10089_v25 = vld [vmem:[#allocation11 + $0xf34] sm:$0xf] }
 0xc16   :  { %6310 = vmatpush.bf16.msrb.mxu2 %v9220_v38  ;;  %v10069_v38 = vld [vmem:[#allocation11 + $0xe94] sm:$0xf] }
 0xc17   :  { %6398 = vmatpush.msra.mxu0 %v10738_v61  ;;  %v9212_v61 = vor.u32 %v10054_v62, %v9211_v63  ;;  %6345 = vmatpush.bf16.msrb.mxu1 %v9320_v59  ;;  %v9208_v63 = vor.u32 %v10051_v3, %v9205_v36  ;;  %v9277_v62 = vld [vmem:[#allocation11 + $0xe98] sm:$0xf0]  ;;  %v9381_v59 = vld [vmem:[#allocation11 + $0xf60] sm:$0xf]  ;;  %v10092_v3 = vld [vmem:[#allocation11 + $0xf44] sm:$0xf0] }
 0xc18   :  { %v9280_v10 = vor.u32 %v10069_v38, %v9277_v62  ;;  %v10091_v36 = vld [vmem:[#allocation11 + $0xf44] sm:$0xf] }
 0xc19   :  { %6399 = vmatpush.msra.mxu0 %v10744_v4  ;;  %v10052_v4 = vld [vmem:[#allocation11 + $0xe04] sm:$0xf0] }
 0xc1a   :  { %6311 = vmatpush.bf16.msrb.mxu2 %v9212_v61  ;;  %v9204_v1 = vor.u32 %v10052_v4, %v9203_v24  ;;  %v10067_v24 = vld [vmem:[#allocation11 + $0xe84] sm:$0xf]  ;;  %v9269_v4 = vld [vmem:[#allocation11 + $0xe88] sm:$0xf0] }
 0xc1b   :  { %6346 = vmatpush.bf16.msrb.mxu1 %v9312_v17  ;;  %v9391_v17 = vld [vmem:[#allocation11 + $0xf78] sm:$0xf0] }
 0xc1e   :  { %6312 = vmatpush.bf16.msrb.mxu2 %v9204_v1 }
 0xc22   :  { %9200 = vmatmul.msk.f32.vlgmr.msra.gmra.mxu1 %vm235_vm2, %v6066_v0 }
 0xc38   :  { %v5726_v51 = vpop.f32.mrf.mxu2  ;;  %v5752_v14 = vpop.f32.mrf.mxu3 }
 0xc39   :  { %v5740_v27 = vadd.f32 %v10994_v12, %v5726_v51  ;;  %v5766_v54 = vadd.f32 %v5765_v15, %v5752_v14  ;;  %v9264_v12 = vor.u32 %v10065_v22, %v9261_v35  ;;  %v10071_v15 = vld [vmem:[#allocation11 + $0xea4] sm:$0xf]  ;;  %v9453_v22 = vld [vmem:[#allocation11 + $0xff0] sm:$0xf] }
 0xc3a   :  { %v9288_v45 = vor.u32 %v10071_v15, %v9285_v50  ;;  %v10108_v15 = vld [vmem:[#allocation11 + $0xfc4] sm:$0xf0]  ;;  %v10107_v50 = vld [vmem:[#allocation11 + $0xfc4] sm:$0xf] }
 0xc3b   :  { %v11003_v56 = vadd.f32 %v5740_v27, %v10984_v11  ;;  %v11006_v46 = vadd.f32 %v5766_v54, %v10987_v30  ;;  %v10063_v11 = vld [vmem:[#allocation11 + $0xe64] sm:$0xf] }
 0xc3c   :  { %v9256_v30 = vor.u32 %v10063_v11, %v9253_v39  ;;  %v9373_v39 = vld [vmem:[#allocation11 + $0xf50] sm:$0xf] }
 0xc40   :  { %v5728_v29 = vpop.f32.mrf.mxu2  ;;  %v5754_v41 = vpop.f32.mrf.mxu3 }
 0xc41   :  { %v10096_v29 = vld [vmem:[#allocation11 + $0xf64] sm:$0xf0]  ;;  %v6360_v41 = vld [vmem:[#allocation14 + $0x1e] sm:$0x3] }
 0xc42   :  { %v9382_v35 = vor.u32 %v10096_v29, %v9381_v59  ;;  %v9359_v59 = vld [vmem:[#allocation11 + $0xf38] sm:$0xf0] }
 0xc43   :  { %v9362_v29 = vor.u32 %v10089_v25, %v9359_v59 }
 0xc48   :  { %v5793_v37 = vpop.f32.mrf.mxu2 }
 0xc49   :  { %v5816_v57 = vpack.c.bf16 %v5793_v37, %v5793_v37  ;;  %v10114_v37 = vld [vmem:[#allocation11 + $0xff4] sm:$0xf0] }
 0xc4a   :  { %v9454_v11 = vor.u32 %v10114_v37, %v9453_v22  ;;  %v10104_v22 = vld [vmem:[#allocation11 + $0xfa4] sm:$0xf0] }
 0xc4b   :  { %6019 = vmatmul.bf16.vlgmr.msrb.gmra.mxu3 %v5816_v57  ;;  %6045 = vmatmul.bf16.vlgmr.msra.gmra.mxu2 %v5816_v57  ;;  %v9455_v57 = vld [vmem:[#allocation11 + $0xff8] sm:$0xf0] }
 0xc4c   :  { %6376 = vmatpush.msra.mxu2 %v10726_v32  ;;  %6331 = vmatpush.bf16.msrb.mxu3 %v9264_v12  ;;  %v9240_v32 = vor.u32 %v10059_v58, %v9237_v44  ;;  %v10113_v12 = vld [vmem:[#allocation11 + $0xff4] sm:$0xf]  ;;  %v10111_v44 = vld [vmem:[#allocation11 + $0xfe4] sm:$0xf] }
 0xc4e   :  { %6377 = vmatpush.msra.mxu2 %v10730_v53  ;;  %v10057_v53 = vld [vmem:[#allocation11 + $0xe34] sm:$0xf] }
 0xc4f   :  { %v9232_v48 = vor.u32 %v10057_v53, %v9229_v6  ;;  %v9394_v53 = vor.u32 %v10097_v21, %v9391_v17  ;;  %v10102_v17 = vld [vmem:[#allocation11 + $0xf94] sm:$0xf0] }
 0xc50   :  { %6378 = vmatpush.msra.mxu2 %v10736_v43  ;;  %6332 = vmatpush.bf16.msrb.mxu3 %v9256_v30  ;;  %v10075_v43 = vld [vmem:[#allocation11 + $0xec4] sm:$0xf]  ;;  %v10094_v30 = vld [vmem:[#allocation11 + $0xf54] sm:$0xf0] }
 0xc51   :  { %v9304_v52 = vor.u32 %v10075_v43, %v9301_v47  ;;  %v10095_v43 = vld [vmem:[#allocation11 + $0xf64] sm:$0xf] }
 0xc52   :  { %6379 = vmatpush.msra.mxu2 %v10742_v5  ;;  %v10055_v5 = vld [vmem:[#allocation11 + $0xe24] sm:$0xf] }
 0xc53   :  { %6347 = vmatpush.bf16.msrb.mxu1 %v9304_v52  ;;  %v9224_v23 = vor.u32 %v10055_v5, %v9221_v16  ;;  %v10093_v52 = vld [vmem:[#allocation11 + $0xf54] sm:$0xf]  ;;  %v9375_v5 = vld [vmem:[#allocation11 + $0xf58] sm:$0xf0] }
 0xc54   :  { %6333 = vmatpush.bf16.msrb.mxu3 %v9248_v20  ;;  %v10112_v20 = vld [vmem:[#allocation11 + $0xfe4] sm:$0xf0]  ;;  %v9378_v16 = vor.u32 %v10093_v52, %v9375_v5  ;;  %v10099_v5 = vld [vmem:[#allocation11 + $0xf84] sm:$0xf] }
 0xc55   :  { %v9446_v58 = vor.u32 %v10112_v20, %v9445_v60  ;;  %v10086_v60 = vld [vmem:[#allocation11 + $0xf14] sm:$0xf0]  ;;  %v10100_v52 = vld [vmem:[#allocation11 + $0xf84] sm:$0xf0] }
 0xc57   :  { %6348 = vmatpush.bf16.msrb.mxu1 %v9296_v34  ;;  %v9429_v34 = vld [vmem:[#allocation11 + $0xfc0] sm:$0xf] }
 0xc58   :  { %6334 = vmatpush.bf16.msrb.mxu3 %v9240_v32  ;;  %v9450_v32 = vor.u32 %v10111_v44, %v9447_v18  ;;  %v10085_v44 = vld [vmem:[#allocation11 + $0xf14] sm:$0xf]  ;;  %v9343_v18 = vld [vmem:[#allocation11 + $0xf18] sm:$0xf0] }
 0xc5b   :  { %9199 = vmatmul.msk.f32.vlgmr.msra.gmra.mxu3 %vm235_vm2, %v6066_v0  ;;  %6349 = vmatpush.bf16.msrb.mxu1 %v9288_v45  ;;  %v9272_v0 = vor.u32 %v10067_v24, %v9269_v4  ;;  %v9365_v45 = vld [vmem:[#allocation11 + $0xf40] sm:$0xf]  ;;  %v9421_v4 = vld [vmem:[#allocation11 + $0xfb0] sm:$0xf] }
 0xc5c   :  { %6335 = vmatpush.bf16.msrb.mxu3 %v9232_v48  ;;  %v9383_v48 = vld [vmem:[#allocation11 + $0xf68] sm:$0xf0]  ;;  %v9366_v62 = vor.u32 %v10092_v3, %v9365_v45  ;;  %v6694_v45 = vld [vmem:[%s11137_s9 + $0xf8] sm:$0xff]  ;;  %v6677_v3 = vld [vmem:[%s11137_s9 + $0x70] sm:$0xff] }
 0xc5d   :  { %v9386_v47 = vor.u32 %v10095_v43, %v9383_v48 }
 0xc5f   :  { %6350 = vmatpush.bf16.msrb.mxu1 %v9280_v10  ;;  %v9367_v10 = vld [vmem:[#allocation11 + $0xf48] sm:$0xf0] }
 0xc60   :  { %6336 = vmatpush.bf16.msrb.mxu3 %v9224_v23  ;;  %v10110_v23 = vld [vmem:[#allocation11 + $0xfd4] sm:$0xf0]  ;;  %v9370_v24 = vor.u32 %v10091_v36, %v9367_v10  ;;  %v6693_v36 = vld [vmem:[%s11137_s9 + $0xf0] sm:$0xff]  ;;  %v6675_v10 = vld [vmem:[%s11137_s9 + $0x60] sm:$0xff] }
 0xc61   :  { %v9438_v26 = vor.u32 %v10110_v23, %v9437_v9  ;;  %v9399_v9 = vld [vmem:[#allocation11 + $0xf88] sm:$0xf0]  ;;  %v9333_v23 = vld [vmem:[#allocation11 + $0xf00] sm:$0xf] }
 0xc63   :  { %6351 = vmatpush.bf16.msrb.mxu1 %v9272_v0  ;;  %v10105_v0 = vld [vmem:[#allocation11 + $0xfb4] sm:$0xf] }
 0xc64   :  { %6337 = vmatpush.bf16.msrb.mxu3 %v9216_v19  ;;  %v9430_v19 = vor.u32 %v10108_v15, %v9429_v34  ;;  %v9335_v34 = vld [vmem:[#allocation11 + $0xf08] sm:$0xf0] }
 0xc67   :  { %6612 = vmatpush.bf16.msra.mxu1 %v9454_v11  ;;  %v10088_v11 = vld [vmem:[#allocation11 + $0xf24] sm:$0xf0] }
 0xc68   :  { %6338 = vmatpush.bf16.msrb.mxu3 %v9208_v63 }
 0xc6b   :  { %6613 = vmatpush.bf16.msra.mxu1 %v9446_v58 }
 0xc6c   :  { %6599 = vmatpush.bf16.msra.mxu3 %v9390_v40 }
 0xc6f   :  { %6614 = vmatpush.bf16.msra.mxu1 %v9438_v26  ;;  %v10083_v26 = vld [vmem:[#allocation11 + $0xf04] sm:$0xf] }
 0xc70   :  { %6600 = vmatpush.bf16.msra.mxu3 %v9382_v35  ;;  %v10103_v35 = vld [vmem:[#allocation11 + $0xfa4] sm:$0xf] }
 0xc73   :  { %6615 = vmatpush.bf16.msra.mxu1 %v9430_v19 }
 0xc8f   :  { %v6033_v2 = vpop.f32.mrf.mxu1  ;;  %v6059_v49 = vpop.f32.mrf.mxu0 }
 0xc97   :  { %v6035_v31 = vpop.f32.mrf.mxu1  ;;  %v6061_v13 = vpop.f32.mrf.mxu0 }
 0xc98   :  { %v9442_v31 = vor.u32 %v10109_v55, %v9439_v28  ;;  %v9431_v13 = vld [vmem:[#allocation11 + $0xfc8] sm:$0xf0]  ;;  %v10084_v55 = vld [vmem:[#allocation11 + $0xf04] sm:$0xf0]  ;;  %v9402_v28 = vor.u32 %v10099_v5, %v9399_v9 }
 0xc99   :  { %v9434_v38 = vor.u32 %v10107_v50, %v9431_v13  ;;  %v9338_v50 = vor.u32 %v10083_v26, %v9335_v34  ;;  %v6678_v13 = vld [vmem:[%s11137_s9 + $0x78] sm:$0xff] }
 0xc9f   :  { %v6107_v61 = vpop.f32.mrf.mxu1 }
 0xca0   :  { %v6111_v1 = vpack.c.bf16 %v6107_v61, %v6107_v61 }
 0xca2   :  { %6326 = vmatmul.bf16.vlgmr.msrb.gmra.mxu0 %v6111_v1  ;;  %6352 = vmatmul.bf16.vlgmr.msrb.gmra.mxu1 %v6111_v1  ;;  %v10106_v1 = vld [vmem:[#allocation11 + $0xfb4] sm:$0xf0] }
 0xcb2   :  { %9330 = vmatmul.msk.f32.vlgmr.msra.gmra.mxu0 %vm235_vm2, %v6360_v41 }
 0xcce   :  { %v6020_v51 = vpop.f32.mrf.mxu3  ;;  %v6046_v14 = vpop.f32.mrf.mxu2 }
 0xccf   :  { %v6034_v27 = vadd.f32 %v6033_v2, %v6020_v51  ;;  %v6060_v54 = vadd.f32 %v6059_v49, %v6046_v14  ;;  %v9374_v2 = vor.u32 %v10094_v30, %v9373_v39  ;;  %v9422_v51 = vor.u32 %v10106_v1, %v9421_v4  ;;  %v9423_v14 = vld [vmem:[#allocation11 + $0xfb8] sm:$0xf0]  ;;  %v6674_v4 = vld [vmem:[%s11137_s9 + $0x58] sm:$0xff] }
 0xcd0   :  { %v9426_v8 = vor.u32 %v10105_v0, %v9423_v14  ;;  %v6690_v1 = vld [vmem:[%s11137_s9 + $0xd8] sm:$0xff]  ;;  %v6673_v0 = vld [vmem:[%s11137_s9 + $0x50] sm:$0xff]  ;;  %v6672_v14 = vld [vmem:[%s11137_s9 + $0x48] sm:$0xff] }
 0xcd1   :  { %v11014_v42 = vadd.f32 %v6034_v27, %v11003_v56  ;;  %v11017_v7 = vadd.f32 %v6060_v54, %v11006_v46  ;;  %v9458_v56 = vor.u32 %v10113_v12, %v9455_v57  ;;  %6601 = vmatpush.bf16.msra.mxu3 %v9374_v2  ;;  %v9357_v27 = vld [vmem:[#allocation11 + $0xf30] sm:$0xf]  ;;  %v10090_v54 = vld [vmem:[#allocation11 + $0xf34] sm:$0xf0]  ;;  %6616 = vmatpush.bf16.msra.mxu1 %v9422_v51  ;;  %v9415_v12 = vld [vmem:[#allocation11 + $0xfa8] sm:$0xf0] }
 0xcd2   :  { %v9358_v40 = vor.u32 %v10090_v54, %v9357_v27  ;;  %v9349_v57 = vld [vmem:[#allocation11 + $0xf20] sm:$0xf]  ;;  %v9418_v39 = vor.u32 %v10103_v35, %v9415_v12  ;;  %v9405_v2 = vld [vmem:[#allocation11 + $0xf90] sm:$0xf]  ;;  %v6688_v27 = vld [vmem:[%s11137_s9 + $0xc8] sm:$0xff] }
 0xcd3   :  { %6638 = vmatpush.bf16.msrb.mxu0 %v9458_v56  ;;  %v10087_v56 = vld [vmem:[#allocation11 + $0xf24] sm:$0xf]  ;;  %v9350_v30 = vor.u32 %v10088_v11, %v9349_v57  ;;  %v9406_v43 = vor.u32 %v10102_v17, %v9405_v2  ;;  %v6689_v51 = vld [vmem:[%s11137_s9 + $0xd0] sm:$0xff]  ;;  %v6668_v12 = vld [vmem:[%s11137_s9 + $0x28] sm:$0xff] }
 0xcd4   :  { %v6681_v2 = vld [vmem:[%s11137_s9 + $0x90] sm:$0xff]  ;;  %v6663_v17 = vld [vmem:[%s11137_s9] sm:$0xff] }
 0xcd5   :  { %6602 = vmatpush.bf16.msra.mxu3 %v9366_v62  ;;  %v6692_v62 = vld [vmem:[%s11137_s9 + $0xe8] sm:$0xff] }
 0xcd6   :  { %v6022_v46 = vpop.f32.mrf.mxu3  ;;  %v6048_v33 = vpop.f32.mrf.mxu2 }
 0xcd7   :  { %6639 = vmatpush.bf16.msrb.mxu0 %v9450_v32  ;;  %v9351_v46 = vld [vmem:[#allocation11 + $0xf28] sm:$0xf0]  ;;  %v9341_v33 = vld [vmem:[#allocation11 + $0xf10] sm:$0xf] }
 0xcd8   :  { %v9354_v58 = vor.u32 %v10087_v56, %v9351_v46  ;;  %v9342_v21 = vor.u32 %v10086_v60, %v9341_v33  ;;  %v6667_v46 = vld [vmem:[%s11137_s9 + $0x20] sm:$0xff]  ;;  %v6666_v60 = vld [vmem:[%s11137_s9 + $0x18] sm:$0xff] }
 0xcd9   :  { %6603 = vmatpush.bf16.msra.mxu3 %v9358_v40  ;;  %v6687_v40 = vld [vmem:[%s11137_s9 + $0xc0] sm:$0xff] }
 0xcda   :  { %v6683_v33 = vld [vmem:[%s11137_s9 + $0xa0] sm:$0xff] }
 0xcdb   :  { %6640 = vmatpush.bf16.msrb.mxu0 %v9442_v31  ;;  %v9334_v31 = vor.u32 %v10084_v55, %v9333_v23 }
 0xcdd   :  { %6604 = vmatpush.bf16.msra.mxu3 %v9350_v30 }
 0xcde   :  { %v6087_v49 = vpop.f32.mrf.mxu3 }
 0xcdf   :  { %v6110_v6 = vpack.c.bf16 %v6087_v49, %v6087_v49  ;;  %6641 = vmatpush.bf16.msrb.mxu0 %v9434_v38  ;;  %v10101_v49 = vld [vmem:[#allocation11 + $0xf94] sm:$0xf] }
 0xce0   :  { %v6676_v38 = vld [vmem:[%s11137_s9 + $0x68] sm:$0xff] }
 0xce1   :  { %6313 = vmatmul.bf16.vlgmr.msrb.gmra.mxu2 %v6110_v6  ;;  %6339 = vmatmul.bf16.vlgmr.msrb.gmra.mxu3 %v6110_v6  ;;  %v9346_v6 = vor.u32 %v10085_v44, %v9343_v18  ;;  %v6665_v18 = vld [vmem:[%s11137_s9 + $0x10] sm:$0xff] }
 0xce2   :  { %6625 = vmatpush.bf16.msrb.mxu2 %v9394_v53  ;;  %v9407_v53 = vld [vmem:[#allocation11 + $0xf98] sm:$0xf0]  ;;  %6605 = vmatpush.bf16.msra.mxu3 %v9342_v21  ;;  %v6680_v21 = vld [vmem:[%s11137_s9 + $0x88] sm:$0xff] }
 0xce3   :  { %6642 = vmatpush.bf16.msrb.mxu0 %v9426_v8  ;;  %v9410_v48 = vor.u32 %v10101_v49, %v9407_v53  ;;  %v6671_v8 = vld [vmem:[%s11137_s9 + $0x40] sm:$0xff]  ;;  %v6653_v53 = vld [vmem:[#allocation13] sm:$0x3] }
 0xce4   :  { %v6679_v49 = vld [vmem:[%s11137_s9 + $0x80] sm:$0xff]  ;;  %v6656_v5 = vperm.slane %v6653_v53, 1 }
 0xce6   :  { %6626 = vmatpush.bf16.msrb.mxu2 %v9386_v47  ;;  %v9397_v47 = vld [vmem:[#allocation11 + $0xf80] sm:$0xf]  ;;  %6606 = vmatpush.bf16.msra.mxu3 %v9334_v31 }
 0xce7   :  { %6643 = vmatpush.bf16.msrb.mxu0 %v9418_v39 }
 0xcea   :  { %6627 = vmatpush.bf16.msrb.mxu2 %v9378_v16  ;;  %v9398_v16 = vor.u32 %v10100_v52, %v9397_v47  ;;  %6699 = vmatpush.msrb.mxu3 %v6678_v13  ;;  %v6655_v47 = vperm.slane %v6653_v53, 0 }
 0xceb   :  { %6644 = vmatpush.bf16.msrb.mxu0 %v9410_v48 }
 0xcec   :  { %6700 = vmatpush.msrb.mxu3 %v6677_v3 }
 0xcee   :  { %6628 = vmatpush.bf16.msrb.mxu2 %v9370_v24  ;;  %v6691_v24 = vld [vmem:[%s11137_s9 + $0xe0] sm:$0xff]  ;;  %6701 = vmatpush.msrb.mxu3 %v6676_v38 }
 0xcef   :  { %6645 = vmatpush.bf16.msrb.mxu0 %v9402_v28 }
 0xcf0   :  { %6702 = vmatpush.msrb.mxu3 %v6675_v10 }
 0xcf1   :  { %9329 = vmatmul.msk.f32.vlgmr.msra.gmra.mxu2 %vm235_vm2, %v6360_v41  ;;  %v9413_v41 = vld [vmem:[#allocation11 + $0xfa0] sm:$0xf] }
 0xcf2   :  { %v9414_v37 = vor.u32 %v10104_v22, %v9413_v41  ;;  %6629 = vmatpush.bf16.msrb.mxu2 %v9362_v29  ;;  %6703 = vmatpush.msrb.mxu3 %v6674_v4  ;;  %v6670_v41 = vld [vmem:[%s11137_s9 + $0x38] sm:$0xff] }
 0xcf3   :  { %v6686_v22 = vld [vmem:[%s11137_s9 + $0xb8] sm:$0xff] }
 0xcf4   :  { %6617 = vmatpush.bf16.msra.mxu1 %v9414_v37  ;;  %6704 = vmatpush.msrb.mxu3 %v6673_v0 }
 0xcf6   :  { %6630 = vmatpush.bf16.msrb.mxu2 %v9354_v58  ;;  %6705 = vmatpush.msrb.mxu3 %v6672_v14 }
 0xcf8   :  { %6618 = vmatpush.bf16.msra.mxu1 %v9406_v43  ;;  %6706 = vmatpush.msrb.mxu3 %v6671_v8 }
 0xcfa   :  { %6631 = vmatpush.bf16.msrb.mxu2 %v9346_v6  ;;  %6707 = vmatpush.msrb.mxu3 %v6670_v41 }
 0xcfc   :  { %6619 = vmatpush.bf16.msra.mxu1 %v9398_v16 }
 0xcfe   :  { %6632 = vmatpush.bf16.msrb.mxu2 %v9338_v50 }
 0xd00   :  { %6719 = vmatpush.msrb.mxu1 %v6694_v45 }
 0xd02   :  { %6720 = vmatpush.msrb.mxu1 %v6693_v36 }
 0xd04   :  { %6721 = vmatpush.msrb.mxu1 %v6692_v62 }
 0xd06   :  { %6722 = vmatpush.msrb.mxu1 %v6691_v24 }
 0xd08   :  { %6723 = vmatpush.msrb.mxu1 %v6690_v1 }
 0xd0a   :  { %6724 = vmatpush.msrb.mxu1 %v6689_v51 }
 0xd0c   :  { %6725 = vmatpush.msrb.mxu1 %v6688_v27 }
 0xd0e   :  { %6726 = vmatpush.msrb.mxu1 %v6687_v40 }
 0xd10   :  { %6727 = vmatpush.msrb.mxu1 %v6686_v22 }
 0xd1f   :  { %v11021_v63 = vpop.f32.mrf.mxu0  ;;  %v11023_v61 = vpop.f32.mrf.mxu1 }
 0xd27   :  { %v6329_v20 = vpop.f32.mrf.mxu0  ;;  %v6355_v32 = vpop.f32.mrf.mxu1 }
 0xd28   :  { %v6682_v20 = vld [vmem:[%s11137_s9 + $0x98] sm:$0xff]  ;;  %v6664_v32 = vld [vmem:[%s11137_s9 + $0x8] sm:$0xff] }
 0xd2f   :  { %v6401_v15 = vpop.f32.mrf.mxu0 }
 0xd30   :  { %v6405_v19 = vpack.c.bf16 %v6401_v15, %v6401_v15  ;;  %v10130_v15 = vld [vmem:[#allocation16] ss:$0 sm:$0xff] }
 0xd32   :  { %6620 = vmatmul.bf16.vlgmr.msra.gmra.mxu1 %v6405_v19  ;;  %6646 = vmatmul.bf16.vlgmr.msrb.gmra.mxu0 %v6405_v19 }
 0xd64   :  { %v6314_v54 = vpop.f32.mrf.mxu2  ;;  %v6340_v25 = vpop.f32.mrf.mxu3 }
 0xd65   :  { %v6328_v59 = vadd.f32 %v11021_v63, %v6314_v54  ;;  %v6354_v29 = vadd.f32 %v11023_v61, %v6340_v25  ;;  %v6669_v63 = vld [vmem:[%s11137_s9 + $0x30] sm:$0xff] }
 0xd66   :  { %v6685_v61 = vld [vmem:[%s11137_s9 + $0xb0] sm:$0xff]  ;;  %6708 = vmatpush.msrb.mxu3 %v6669_v63 }
 0xd67   :  { %v6357_v35 = vadd.f32 %v6328_v59, %v11014_v42  ;;  %v6358_v37 = vadd.f32 %v6354_v29, %v11017_v7  ;;  %v6684_v42 = vld [vmem:[%s11137_s9 + $0xa8] sm:$0xff]  ;;  %6728 = vmatpush.msrb.mxu1 %v6685_v61  ;;  %s10396_s9 = smov [#allocation17]  }
 0xd68   :  { %6709 = vmatpush.msrb.mxu3 %v6668_v12  ;;  %s6746_s30 = sshll.u32 %s10396_s9, 4  ;;  %s6747_s30 = int_to_ptr.vmem [resolvable:$true] %s6746_s30 }
 0xd69   :  { %6729 = vmatpush.msrb.mxu1 %v6684_v42 }
 0xd6a   :  { %6710 = vmatpush.msrb.mxu3 %v6667_v46 }
 0xd6b   :  { %6730 = vmatpush.msrb.mxu1 %v6683_v33 }
 0xd6c   :  { %v6316_v7 = vpop.f32.mrf.mxu2  ;;  %v6342_v57 = vpop.f32.mrf.mxu3  ;;  %6711 = vmatpush.msrb.mxu3 %v6666_v60 }
 0xd6d   :  { %6731 = vmatpush.msrb.mxu1 %v6682_v20 }
 0xd6e   :  { %6712 = vmatpush.msrb.mxu3 %v6665_v18 }
 0xd6f   :  { %6732 = vmatpush.msrb.mxu1 %v6681_v2 }
 0xd70   :  { %6713 = vmatpush.msrb.mxu3 %v6664_v32 }
 0xd71   :  { %6733 = vmatpush.msrb.mxu1 %v6680_v21 }
 0xd72   :  { %6714 = vmatpush.msrb.mxu3 %v6663_v17 }
 0xd73   :  { %6734 = vmatpush.msrb.mxu1 %v6679_v49 }
 0xd74   :  { %v6381_v11 = vpop.f32.mrf.mxu2 }
 0xd75   :  { %v6404_v56 = vpack.c.bf16 %v6381_v11, %v6381_v11 }
 0xd77   :  { %6607 = vmatmul.bf16.vlgmr.msra.gmra.mxu3 %v6404_v56  ;;  %6633 = vmatmul.bf16.vlgmr.msrb.gmra.mxu2 %v6404_v56 }
 0xdaf   :  { %v6621_v39 = vpop.f32.mrf.mxu1  ;;  %v6647_v30 = vpop.f32.mrf.mxu0 }
 0xdb7   :  { %v6623_v58 = vpop.f32.mrf.mxu1  ;;  %v6649_v44 = vpop.f32.mrf.mxu0 }
 0xdfa   :  { %v6608_v6 = vpop.f32.mrf.mxu3  ;;  %v6634_v43 = vpop.f32.mrf.mxu2 }
 0xdfb   :  { %v6622_v48 = vadd.f32 %v6621_v39, %v6608_v6  ;;  %v6648_v52 = vadd.f32 %v6647_v30, %v6634_v43 }
 0xdfd   :  { %v6651_v16 = vadd.f32 %v6622_v48, %v6357_v35  ;;  %v6652_v9 = vadd.f32 %v6648_v52, %v6358_v37 }
 0xdff   :  { %v6659_v23 = vadd.f32 %v6655_v47, %v6651_v16  ;;  %v6660_v55 = vadd.f32 %v6656_v5, %v6652_v9 }
 0xe01   :  { %v6661_v26 = vmax.f32 %v6659_v23, 0.0  ;;  %v6662_v28 = vmax.f32 %v6660_v55, 0.0 }
 0xe02   :  { %v6610_v31 = vpop.f32.mrf.mxu3  ;;  %v6636_v34 = vpop.f32.mrf.mxu2 }
 0xe03   :  { %6715 = vmatmul.f32.vlgmr.msrb.gmra.mxu3 %v6661_v26  ;;  %6735 = vmatmul.f32.vlgmr.msrb.gmra.mxu1 %v6662_v28 }
 0xe80   :  { %v6736_v13 = vpop.f32.mrf.mxu1 }
 0xe86   :  { %v6716_v50 = vpop.f32.mrf.mxu3 }
 0xe87   :  { %v6717_v19 = vadd.f32 %v10130_v15, %v6716_v50 }
 0xe89   :  { %v6737_v45 = vadd.f32 %v6736_v13, %v6717_v19 }
 0xe8b   :  { %6740 = vst.msk [vmem:[#allocation17] sm:$0x3] %vm6739_vm3, %v6737_v45 }
 0xe8c   :  { %6751 = dma.vmem_to_hbm [thread:$0]  %s6747_s30, 32, %s6749_s1, [#allocation4]  }
 0xe8d   :  { %10381 = dma.done.wait [#allocation4], 32  }
 0xe8e   :  { %10382 = vsyncadd [#allocation4], 4294967264 }
 0xe8f   :  { %6756 = vsyncpa [#allocation3], 1 }
 0xe90   :  { %6757 = vsyncpa [#allocation6], 1 }
 0xe91   :  { %6758 = vsyncpa [#allocation9], 1 }
 0xe92   :  { %6759 = vsyncpa [#allocation12], 1 }
 0xe93   :  { %6760 = vsyncpa [#allocation15], 1 }
 0xe94   :  { %6761 = vsyncpa [#allocation4], 1 }

</bundles_post_ra>
